<compile_context>
chip_gen: v6e
topology: v6e:2x2x1
jax: 0.10.0
libtpu: 0.0.40
codegen_flags: <defaults>
</compile_context>

<pallas_src>
import functools

import jax
import jax.numpy as jnp
import numpy as np
from jax.experimental import pallas as pl
from jax.experimental.pallas import tpu as pltpu


# ---------------------------------------------------------------------------
# Fused Pallas kernel: expand 1x1 -> depthwise 3x3 -> project 1x1 (+ residual)
# ---------------------------------------------------------------------------

def _fused_ir_kernel(*refs, stride, tile_h, out_w, has_expand, use_res):
    if has_expand:
        (xt_ref, mask_ref, w1_ref, b1_ref,
         wdw_ref, bdw_ref, w2_ref, b2_ref, o_ref) = refs
    else:
        xt_ref, wdw_ref, bdw_ref, w2_ref, b2_ref, o_ref = refs

    th, wo = tile_h, out_w
    xt = xt_ref[0, 0]                                # (win, wp, Cin), halo'd tile
    win, wp, cin = xt.shape

    if has_expand:
        hidden = w1_ref.shape[1]
        # Expand 1x1 conv (+ folded-BN bias + ReLU6) over every pixel of the
        # tile.  Inputs stay in their native dtype (bf16 fast path); f32 accum.
        h = jnp.dot(xt.reshape(win * wp, cin), w1_ref[...],
                    preferred_element_type=jnp.float32)
        h = jnp.clip(h + b1_ref[...], 0.0, 6.0)
        # Zero positions that are conv padding / outside the image: PyTorch
        # zero-pads the depthwise-conv *input*, and the BN bias would otherwise
        # make padded pixels nonzero.
        h = h.reshape(win, wp, hidden) * mask_ref[0]
    else:
        hidden = cin
        h = xt.astype(jnp.float32)                   # zero padding already correct

    # Depthwise 3x3 (+ folded-BN bias + ReLU6): 9 VPU multiply-accumulate taps.
    wdw = wdw_ref[...].astype(jnp.float32)           # (3, 3, hidden)
    acc = jnp.zeros((th, wo, hidden), jnp.float32)
    for kh in range(3):
        if stride == 1:
            rows = h[kh:kh + th]                     # (th, wp, hidden)
            taps = (rows[:, 0:wo, :], rows[:, 1:wo + 1, :], rows[:, 2:wo + 2, :])
        else:  # stride == 2: parity reshapes, no strided sublane slices
            hr = h.reshape(th + 1, 2, wp, hidden)
            if kh == 0:
                rows = hr[:th, 0]
            elif kh == 1:
                rows = hr[:th, 1]
            else:
                rows = hr[1:th + 1, 0]
            rc = rows.reshape(th, wo + 1, 2, hidden)
            taps = (rc[:, :wo, 0, :], rc[:, :wo, 1, :], rc[:, 1:wo + 1, 0, :])
        for kw in range(3):
            acc = acc + taps[kw] * wdw[kh, kw]
    y = jnp.clip(acc + bdw_ref[...], 0.0, 6.0)

    # Projection 1x1 conv (+ folded-BN bias) and optional residual add.
    yq = y.reshape(th * wo, hidden).astype(w2_ref.dtype)
    out = jnp.dot(yq, w2_ref[...], preferred_element_type=jnp.float32)
    out = out + b2_ref[...]
    if use_res:
        res = xt[1:th + 1, 1:wo + 1, :]              # stride == 1 here, wo == W
        out = out + res.reshape(th * wo, cin).astype(jnp.float32)
    o_ref[0, 0] = out.reshape(th, wo, -1).astype(o_ref.dtype)


# ---------------------------------------------------------------------------
# Wrapper
# ---------------------------------------------------------------------------

def fold_bn(gamma, beta, mean, var, eps=1e-5):
    scale = gamma / jnp.sqrt(var + eps)
    return scale, beta - mean * scale


def _pick_tile_h(out_h, wp, hidden, stride, hidden_tile_bytes):
    per_out_row = stride * wp * hidden * 4           # f32 hidden bytes / output row
    return int(max(1, min(out_h, hidden_tile_bytes // max(per_out_row, 1))))


def inverted_residual_forward(x_nchw, params, *, inp, oup, stride, expand_ratio,
                              tile_h=None, hidden_tile_bytes=2 * 1024 * 1024):
    assert stride in (1, 2)
    hidden = int(round(inp * expand_ratio))
    has_expand = expand_ratio != 1
    use_res = (stride == 1) and (inp == oup)
    # TODO(synk): BatchNorm is folded in inference mode (running stats); training-
    # mode batch statistics are not reproduced.

    b, c, h, w = x_nchw.shape
    assert c == inp
    out_h = (h + 2 - 3) // stride + 1
    out_w = (w + 2 - 3) // stride + 1
    wp = stride * out_w + 2                          # padded tile width

    if tile_h is None:
        tile_h = _pick_tile_h(out_h, wp, hidden, stride, hidden_tile_bytes)
    th = int(min(tile_h, out_h))
    n_tiles = (out_h + th - 1) // th
    win = stride * th + 2                            # input rows per tile (halo)
    hp = stride * n_tiles * th + 2                   # padded input height

    dt = x_nchw.dtype
    x = jnp.transpose(x_nchw, (0, 2, 3, 1))          # NCHW -> NHWC (C on lanes)
    xp = jnp.pad(x, ((0, 0), (1, hp - (h + 1)), (1, wp - (w + 1)), (0, 0)))
    # Overlapping row tiles (with 3x3 halo) of the SMALL input tensor only; the
    # expand_ratio-times-larger hidden activation never leaves VMEM.
    x_tiles = jnp.stack(
        [xp[:, t * stride * th: t * stride * th + win] for t in range(n_tiles)],
        axis=1)                                      # (B, n_tiles, win, wp, Cin)

    args = [x_tiles]
    in_specs = [pl.BlockSpec((1, 1, win, wp, inp), lambda i, j: (i, j, 0, 0, 0))]

    if has_expand:
        # Validity mask: 1 inside the image, 0 on conv padding / halo overrun.
        rr = jnp.arange(hp)[:, None]
        cc = jnp.arange(wp)[None, :]
        valid = ((rr >= 1) & (rr <= h) & (cc >= 1) & (cc <= w)).astype(jnp.float32)
        mask_tiles = jnp.stack(
            [valid[t * stride * th: t * stride * th + win] for t in range(n_tiles)],
            axis=0)[..., None]                       # (n_tiles, win, wp, 1)
        # Fold BN scale into the weights host-side; only bias stays in-kernel.
        w1 = (params["w_expand"] * params["s_expand"][None, :]).astype(dt)
        b1 = params["b_expand"].reshape(1, hidden).astype(jnp.float32)
        args += [mask_tiles, w1, b1]
        in_specs += [pl.BlockSpec((1, win, wp, 1), lambda i, j: (j, 0, 0, 0)),
                     pl.BlockSpec((inp, hidden), lambda i, j: (0, 0)),
                     pl.BlockSpec((1, hidden), lambda i, j: (0, 0))]

    wdw = (params["w_dw"] * params["s_dw"][None, None, :]).astype(jnp.float32)
    bdw = params["b_dw"].reshape(1, hidden).astype(jnp.float32)
    w2 = (params["w_proj"] * params["s_proj"][None, :]).astype(dt)
    b2 = params["b_proj"].reshape(1, oup).astype(jnp.float32)
    args += [wdw, bdw, w2, b2]
    in_specs += [pl.BlockSpec((3, 3, hidden), lambda i, j: (0, 0, 0)),
                 pl.BlockSpec((1, hidden), lambda i, j: (0, 0)),
                 pl.BlockSpec((hidden, oup), lambda i, j: (0, 0)),
                 pl.BlockSpec((1, oup), lambda i, j: (0, 0))]

    kernel = functools.partial(
        _fused_ir_kernel, stride=stride, tile_h=th, out_w=out_w,
        has_expand=has_expand, use_res=use_res)

    out = pl.pallas_call(
        kernel,
        out_shape=jax.ShapeDtypeStruct((b, n_tiles, th, out_w, oup), dt),
        grid=(b, n_tiles),
        in_specs=in_specs,
        out_specs=pl.BlockSpec((1, 1, th, out_w, oup), lambda i, j: (i, j, 0, 0, 0)),
        compiler_params=pltpu.CompilerParams(
            dimension_semantics=("parallel", "parallel"),
            vmem_limit_bytes=32 * 1024 * 1024),
    )(*args)

    out = out.reshape(b, n_tiles * th, out_w, oup)[:, :out_h]
    # TODO(synk): for realistic Cout < 128 the output channels could be padded to
    # a lane multiple in-kernel (lane-dense stores) and sliced here; in a full
    # NHWC network this final transpose would be elided entirely.
    return jnp.transpose(out, (0, 3, 1, 2))          # NHWC -> NCHW


# ---------------------------------------------------------------------------
# Parameters (inference-mode BN folded to scale/bias)
# ---------------------------------------------------------------------------

def make_params(key, inp, oup, expand_ratio):
    hidden = int(round(inp * expand_ratio))
    ks = jax.random.split(key, 16)

    params = {}
    if expand_ratio != 1:
        params["w_expand"] = 0.2 * jax.random.normal(ks[0], (inp, hidden), jnp.float32)
        g = jax.random.uniform(ks[1], (hidden,), minval=0.5, maxval=1.5)
        bb = 0.1 * jax.random.normal(ks[2], (hidden,))
        m = 0.1 * jax.random.normal(ks[3], (hidden,))
        v = jax.random.uniform(ks[4], (hidden,), minval=0.5, maxval=1.5)
        params["s_expand"], params["b_expand"] = fold_bn(g, bb, m, v)

    params["w_dw"] = 0.2 * jax.random.normal(ks[5], (3, 3, hidden), jnp.float32)
    g = jax.random.uniform(ks[6], (hidden,), minval=0.5, maxval=1.5)
    bb = 0.1 * jax.random.normal(ks[7], (hidden,))
    m = 0.1 * jax.random.normal(ks[8], (hidden,))
    v = jax.random.uniform(ks[9], (hidden,), minval=0.5, maxval=1.5)
    params["s_dw"], params["b_dw"] = fold_bn(g, bb, m, v)

    params["w_proj"] = 0.2 * jax.random.normal(ks[10], (hidden, oup), jnp.float32)
    g = jax.random.uniform(ks[11], (oup,), minval=0.5, maxval=1.5)
    bb = 0.1 * jax.random.normal(ks[12], (oup,))
    m = 0.1 * jax.random.normal(ks[13], (oup,))
    v = jax.random.uniform(ks[14], (oup,), minval=0.5, maxval=1.5)
    params["s_proj"], params["b_proj"] = fold_bn(g, bb, m, v)
    return params


# ---------------------------------------------------------------------------
# Pure-JAX reference (same folded-BN inference semantics) for self-check
# ---------------------------------------------------------------------------

def reference_forward(x_nchw, params, *, inp, oup, stride, expand_ratio):
    hidden = int(round(inp * expand_ratio))
    use_res = (stride == 1) and (inp == oup)
    x = jnp.transpose(x_nchw, (0, 2, 3, 1)).astype(jnp.float32)
    a = x
    if expand_ratio != 1:
        a = jnp.einsum("bhwc,cd->bhwd", a, params["w_expand"])
        a = a * params["s_expand"] + params["b_expand"]
        a = jnp.clip(a, 0.0, 6.0)
    dw_w = params["w_dw"].reshape(3, 3, 1, hidden)
    a = jax.lax.conv_general_dilated(
        a, dw_w, window_strides=(stride, stride), padding=((1, 1), (1, 1)),
        dimension_numbers=("NHWC", "HWIO", "NHWC"), feature_group_count=hidden)
    a = jnp.clip(a * params["s_dw"] + params["b_dw"], 0.0, 6.0)
    a = jnp.einsum("bhwc,cd->bhwd", a, params["w_proj"])
    a = a * params["s_proj"] + params["b_proj"]
    if use_res:
        a = a + x
    return jnp.transpose(a, (0, 3, 1, 2))


# ---------------------------------------------------------------------------

if __name__ == "__main__":
    configs = [
        # residual path, single row tile
        dict(B=2, inp=4, oup=4, H=16, W=16, stride=1, expand=4, tile_h=None),
        # residual path, multiple row tiles + remainder tile
        dict(B=2, inp=4, oup=4, H=16, W=16, stride=1, expand=4, tile_h=5),
        # stride 2, odd spatial size, no residual
        dict(B=2, inp=4, oup=8, H=15, W=15, stride=2, expand=6, tile_h=3),
        # expand_ratio == 1 variant (dw + project only), residual path
        dict(B=2, inp=8, oup=8, H=16, W=16, stride=1, expand=1, tile_h=None),
    ]
    key = jax.random.PRNGKey(0)
    for cfg in configs:
        key, kx, kp = jax.random.split(key, 3)
        x = jax.random.normal(kx, (cfg["B"], cfg["inp"], cfg["H"], cfg["W"]),
                              jnp.float32)
        params = make_params(kp, cfg["inp"], cfg["oup"], cfg["expand"])
        out = inverted_residual_forward(
            x, params, inp=cfg["inp"], oup=cfg["oup"], stride=cfg["stride"],
            expand_ratio=cfg["expand"], tile_h=cfg["tile_h"])
        out = jax.block_until_ready(out)
        ref = reference_forward(x, params, inp=cfg["inp"], oup=cfg["oup"],
                                stride=cfg["stride"], expand_ratio=cfg["expand"])
        np.testing.assert_allclose(np.asarray(out), np.asarray(ref),
                                   rtol=1e-4, atol=1e-4)
    print("KERNEL_OK")
</pallas_src>

<mosaic_0001>
module attributes {stable_mosaic.version = 11 : i64} {
  func.func @_fused_ir_kernel(%arg0: i32, %arg1: i32, %arg2: memref<1x1x18x18x4xf32, #tpu.memory_space<vmem>>, %arg3: memref<1x18x18x1xf32, #tpu.memory_space<vmem>>, %arg4: memref<4x16xf32, #tpu.memory_space<vmem>>, %arg5: memref<1x16xf32, #tpu.memory_space<vmem>>, %arg6: memref<3x3x16xf32, #tpu.memory_space<vmem>>, %arg7: memref<1x16xf32, #tpu.memory_space<vmem>>, %arg8: memref<16x4xf32, #tpu.memory_space<vmem>>, %arg9: memref<1x4xf32, #tpu.memory_space<vmem>>, %arg10: memref<1x1x16x16x4xf32, #tpu.memory_space<vmem>>) attributes {dimension_semantics = [#tpu.dimension_semantics<parallel>, #tpu.dimension_semantics<parallel>], iteration_bounds = array<i64: 2, 1>, scalar_prefetch = 0 : i64, scratch_operands = 0 : i64, tpu.core_type = #tpu.core_type<tc>, window_params = [{transform_indices = @transform_0, window_bounds = array<i64: 1, 1, 18, 18, 4>}, {transform_indices = @transform_1, window_bounds = array<i64: 1, 18, 18, 1>}, {pipeline_mode = #tpu.pipeline_mode<synchronous>, transform_indices = @transform_2, window_bounds = array<i64: 4, 16>}, {pipeline_mode = #tpu.pipeline_mode<synchronous>, transform_indices = @transform_3, window_bounds = array<i64: 1, 16>}, {pipeline_mode = #tpu.pipeline_mode<synchronous>, transform_indices = @transform_4, window_bounds = array<i64: 3, 3, 16>}, {pipeline_mode = #tpu.pipeline_mode<synchronous>, transform_indices = @transform_5, window_bounds = array<i64: 1, 16>}, {pipeline_mode = #tpu.pipeline_mode<synchronous>, transform_indices = @transform_6, window_bounds = array<i64: 16, 4>}, {pipeline_mode = #tpu.pipeline_mode<synchronous>, transform_indices = @transform_7, window_bounds = array<i64: 1, 4>}, {transform_indices = @transform_8, window_bounds = array<i64: 1, 1, 16, 16, 4>}]} {
    %c0 = arith.constant 0 : index
    %c0_0 = arith.constant 0 : index
    %c0_1 = arith.constant 0 : index
    %c0_2 = arith.constant 0 : index
    %c0_3 = arith.constant 0 : index
    %0 = vector.load %arg2[%c0, %c0_0, %c0_1, %c0_2, %c0_3] : memref<1x1x18x18x4xf32, #tpu.memory_space<vmem>>, vector<1x1x18x18x4xf32>
    %1 = vector.shape_cast %0 : vector<1x1x18x18x4xf32> to vector<18x18x4xf32>
    %2 = vector.shape_cast %1 : vector<18x18x4xf32> to vector<324x4xf32>
    %c0_4 = arith.constant 0 : index
    %c0_5 = arith.constant 0 : index
    %3 = vector.load %arg4[%c0_4, %c0_5] : memref<4x16xf32, #tpu.memory_space<vmem>>, vector<4x16xf32>
    %cst = arith.constant dense<0.000000e+00> : vector<324x16xf32>
    %4 = tpu.matmul %2, %3, %cst {dimension_numbers = #tpu.dot_dimension_numbers<[1], [0], [0], [1], [0, 0, 1, 1], [], []>} : vector<324x4xf32>, vector<4x16xf32>, vector<324x16xf32> -> vector<324x16xf32>
    %c0_6 = arith.constant 0 : index
    %c0_7 = arith.constant 0 : index
    %5 = vector.load %arg5[%c0_6, %c0_7] : memref<1x16xf32, #tpu.memory_space<vmem>>, vector<1x16xf32>
    %6 = vector.broadcast %5 : vector<1x16xf32> to vector<324x16xf32>
    %7 = arith.addf %4, %6 : vector<324x16xf32>
    %cst_8 = arith.constant 0.000000e+00 : f32
    %cst_9 = arith.constant 6.000000e+00 : f32
    %8 = vector.broadcast %cst_8 : f32 to vector<324x16xf32>
    %9 = arith.maximumf %8, %7 : vector<324x16xf32>
    %10 = vector.broadcast %cst_9 : f32 to vector<324x16xf32>
    %11 = arith.minimumf %10, %9 : vector<324x16xf32>
    %12 = vector.shape_cast %11 : vector<324x16xf32> to vector<18x18x16xf32>
    %c0_10 = arith.constant 0 : index
    %c0_11 = arith.constant 0 : index
    %c0_12 = arith.constant 0 : index
    %c0_13 = arith.constant 0 : index
    %13 = vector.load %arg3[%c0_10, %c0_11, %c0_12, %c0_13] : memref<1x18x18x1xf32, #tpu.memory_space<vmem>>, vector<1x18x18x1xf32>
    %14 = vector.shape_cast %13 : vector<1x18x18x1xf32> to vector<18x18x1xf32>
    %15 = vector.broadcast %14 : vector<18x18x1xf32> to vector<18x18x16xf32>
    %16 = arith.mulf %12, %15 : vector<18x18x16xf32>
    %c0_14 = arith.constant 0 : index
    %c0_15 = arith.constant 0 : index
    %c0_16 = arith.constant 0 : index
    %17 = vector.load %arg6[%c0_14, %c0_15, %c0_16] : memref<3x3x16xf32, #tpu.memory_space<vmem>>, vector<3x3x16xf32>
    %cst_17 = arith.constant 0.000000e+00 : f32
    %18 = vector.broadcast %cst_17 : f32 to vector<16x16x16xf32>
    %19 = vector.extract_strided_slice %16 {offsets = [0, 0, 0], sizes = [16, 18, 16], strides = [1, 1, 1]} : vector<18x18x16xf32> to vector<16x18x16xf32>
    %20 = vector.extract_strided_slice %19 {offsets = [0, 0, 0], sizes = [16, 16, 16], strides = [1, 1, 1]} : vector<16x18x16xf32> to vector<16x16x16xf32>
    %21 = vector.extract_strided_slice %19 {offsets = [0, 1, 0], sizes = [16, 16, 16], strides = [1, 1, 1]} : vector<16x18x16xf32> to vector<16x16x16xf32>
    %22 = vector.extract_strided_slice %19 {offsets = [0, 2, 0], sizes = [16, 16, 16], strides = [1, 1, 1]} : vector<16x18x16xf32> to vector<16x16x16xf32>
    %23 = vector.extract_strided_slice %17 {offsets = [0, 0, 0], sizes = [1, 1, 16], strides = [1, 1, 1]} : vector<3x3x16xf32> to vector<1x1x16xf32>
    %24 = vector.shape_cast %23 : vector<1x1x16xf32> to vector<16xf32>
    %25 = vector.shape_cast %24 : vector<16xf32> to vector<1x1x16xf32>
    %26 = vector.broadcast %25 : vector<1x1x16xf32> to vector<16x16x16xf32>
    %27 = arith.mulf %20, %26 : vector<16x16x16xf32>
    %28 = arith.addf %18, %27 : vector<16x16x16xf32>
    %29 = vector.extract_strided_slice %17 {offsets = [0, 1, 0], sizes = [1, 1, 16], strides = [1, 1, 1]} : vector<3x3x16xf32> to vector<1x1x16xf32>
    %30 = vector.shape_cast %29 : vector<1x1x16xf32> to vector<16xf32>
    %31 = vector.shape_cast %30 : vector<16xf32> to vector<1x1x16xf32>
    %32 = vector.broadcast %31 : vector<1x1x16xf32> to vector<16x16x16xf32>
    %33 = arith.mulf %21, %32 : vector<16x16x16xf32>
    %34 = arith.addf %28, %33 : vector<16x16x16xf32>
    %35 = vector.extract_strided_slice %17 {offsets = [0, 2, 0], sizes = [1, 1, 16], strides = [1, 1, 1]} : vector<3x3x16xf32> to vector<1x1x16xf32>
    %36 = vector.shape_cast %35 : vector<1x1x16xf32> to vector<16xf32>
    %37 = vector.shape_cast %36 : vector<16xf32> to vector<1x1x16xf32>
    %38 = vector.broadcast %37 : vector<1x1x16xf32> to vector<16x16x16xf32>
    %39 = arith.mulf %22, %38 : vector<16x16x16xf32>
    %40 = arith.addf %34, %39 : vector<16x16x16xf32>
    %41 = vector.extract_strided_slice %16 {offsets = [1, 0, 0], sizes = [16, 18, 16], strides = [1, 1, 1]} : vector<18x18x16xf32> to vector<16x18x16xf32>
    %42 = vector.extract_strided_slice %41 {offsets = [0, 0, 0], sizes = [16, 16, 16], strides = [1, 1, 1]} : vector<16x18x16xf32> to vector<16x16x16xf32>
    %43 = vector.extract_strided_slice %41 {offsets = [0, 1, 0], sizes = [16, 16, 16], strides = [1, 1, 1]} : vector<16x18x16xf32> to vector<16x16x16xf32>
    %44 = vector.extract_strided_slice %41 {offsets = [0, 2, 0], sizes = [16, 16, 16], strides = [1, 1, 1]} : vector<16x18x16xf32> to vector<16x16x16xf32>
    %45 = vector.extract_strided_slice %17 {offsets = [1, 0, 0], sizes = [1, 1, 16], strides = [1, 1, 1]} : vector<3x3x16xf32> to vector<1x1x16xf32>
    %46 = vector.shape_cast %45 : vector<1x1x16xf32> to vector<16xf32>
    %47 = vector.shape_cast %46 : vector<16xf32> to vector<1x1x16xf32>
    %48 = vector.broadcast %47 : vector<1x1x16xf32> to vector<16x16x16xf32>
    %49 = arith.mulf %42, %48 : vector<16x16x16xf32>
    %50 = arith.addf %40, %49 : vector<16x16x16xf32>
    %51 = vector.extract_strided_slice %17 {offsets = [1, 1, 0], sizes = [1, 1, 16], strides = [1, 1, 1]} : vector<3x3x16xf32> to vector<1x1x16xf32>
    %52 = vector.shape_cast %51 : vector<1x1x16xf32> to vector<16xf32>
    %53 = vector.shape_cast %52 : vector<16xf32> to vector<1x1x16xf32>
    %54 = vector.broadcast %53 : vector<1x1x16xf32> to vector<16x16x16xf32>
    %55 = arith.mulf %43, %54 : vector<16x16x16xf32>
    %56 = arith.addf %50, %55 : vector<16x16x16xf32>
    %57 = vector.extract_strided_slice %17 {offsets = [1, 2, 0], sizes = [1, 1, 16], strides = [1, 1, 1]} : vector<3x3x16xf32> to vector<1x1x16xf32>
    %58 = vector.shape_cast %57 : vector<1x1x16xf32> to vector<16xf32>
    %59 = vector.shape_cast %58 : vector<16xf32> to vector<1x1x16xf32>
    %60 = vector.broadcast %59 : vector<1x1x16xf32> to vector<16x16x16xf32>
    %61 = arith.mulf %44, %60 : vector<16x16x16xf32>
    %62 = arith.addf %56, %61 : vector<16x16x16xf32>
    %63 = vector.extract_strided_slice %16 {offsets = [2, 0, 0], sizes = [16, 18, 16], strides = [1, 1, 1]} : vector<18x18x16xf32> to vector<16x18x16xf32>
    %64 = vector.extract_strided_slice %63 {offsets = [0, 0, 0], sizes = [16, 16, 16], strides = [1, 1, 1]} : vector<16x18x16xf32> to vector<16x16x16xf32>
    %65 = vector.extract_strided_slice %63 {offsets = [0, 1, 0], sizes = [16, 16, 16], strides = [1, 1, 1]} : vector<16x18x16xf32> to vector<16x16x16xf32>
    %66 = vector.extract_strided_slice %63 {offsets = [0, 2, 0], sizes = [16, 16, 16], strides = [1, 1, 1]} : vector<16x18x16xf32> to vector<16x16x16xf32>
    %67 = vector.extract_strided_slice %17 {offsets = [2, 0, 0], sizes = [1, 1, 16], strides = [1, 1, 1]} : vector<3x3x16xf32> to vector<1x1x16xf32>
    %68 = vector.shape_cast %67 : vector<1x1x16xf32> to vector<16xf32>
    %69 = vector.shape_cast %68 : vector<16xf32> to vector<1x1x16xf32>
    %70 = vector.broadcast %69 : vector<1x1x16xf32> to vector<16x16x16xf32>
    %71 = arith.mulf %64, %70 : vector<16x16x16xf32>
    %72 = arith.addf %62, %71 : vector<16x16x16xf32>
    %73 = vector.extract_strided_slice %17 {offsets = [2, 1, 0], sizes = [1, 1, 16], strides = [1, 1, 1]} : vector<3x3x16xf32> to vector<1x1x16xf32>
    %74 = vector.shape_cast %73 : vector<1x1x16xf32> to vector<16xf32>
    %75 = vector.shape_cast %74 : vector<16xf32> to vector<1x1x16xf32>
    %76 = vector.broadcast %75 : vector<1x1x16xf32> to vector<16x16x16xf32>
    %77 = arith.mulf %65, %76 : vector<16x16x16xf32>
    %78 = arith.addf %72, %77 : vector<16x16x16xf32>
    %79 = vector.extract_strided_slice %17 {offsets = [2, 2, 0], sizes = [1, 1, 16], strides = [1, 1, 1]} : vector<3x3x16xf32> to vector<1x1x16xf32>
    %80 = vector.shape_cast %79 : vector<1x1x16xf32> to vector<16xf32>
    %81 = vector.shape_cast %80 : vector<16xf32> to vector<1x1x16xf32>
    %82 = vector.broadcast %81 : vector<1x1x16xf32> to vector<16x16x16xf32>
    %83 = arith.mulf %66, %82 : vector<16x16x16xf32>
    %84 = arith.addf %78, %83 : vector<16x16x16xf32>
    %c0_18 = arith.constant 0 : index
    %c0_19 = arith.constant 0 : index
    %85 = vector.load %arg7[%c0_18, %c0_19] : memref<1x16xf32, #tpu.memory_space<vmem>>, vector<1x16xf32>
    %86 = vector.shape_cast %85 : vector<1x16xf32> to vector<1x1x16xf32>
    %87 = vector.broadcast %86 : vector<1x1x16xf32> to vector<16x16x16xf32>
    %88 = arith.addf %84, %87 : vector<16x16x16xf32>
    %cst_20 = arith.constant 0.000000e+00 : f32
    %cst_21 = arith.constant 6.000000e+00 : f32
    %89 = vector.broadcast %cst_20 : f32 to vector<16x16x16xf32>
    %90 = arith.maximumf %89, %88 : vector<16x16x16xf32>
    %91 = vector.broadcast %cst_21 : f32 to vector<16x16x16xf32>
    %92 = arith.minimumf %91, %90 : vector<16x16x16xf32>
    %93 = vector.shape_cast %92 : vector<16x16x16xf32> to vector<256x16xf32>
    %c0_22 = arith.constant 0 : index
    %c0_23 = arith.constant 0 : index
    %94 = vector.load %arg8[%c0_22, %c0_23] : memref<16x4xf32, #tpu.memory_space<vmem>>, vector<16x4xf32>
    %cst_24 = arith.constant dense<0.000000e+00> : vector<256x4xf32>
    %95 = tpu.matmul %93, %94, %cst_24 {dimension_numbers = #tpu.dot_dimension_numbers<[1], [0], [0], [1], [0, 0, 1, 1], [], []>} : vector<256x16xf32>, vector<16x4xf32>, vector<256x4xf32> -> vector<256x4xf32>
    %c0_25 = arith.constant 0 : index
    %c0_26 = arith.constant 0 : index
    %96 = vector.load %arg9[%c0_25, %c0_26] : memref<1x4xf32, #tpu.memory_space<vmem>>, vector<1x4xf32>
    %97 = vector.broadcast %96 : vector<1x4xf32> to vector<256x4xf32>
    %98 = arith.addf %95, %97 : vector<256x4xf32>
    %99 = vector.extract_strided_slice %1 {offsets = [1, 1, 0], sizes = [16, 16, 4], strides = [1, 1, 1]} : vector<18x18x4xf32> to vector<16x16x4xf32>
    %100 = vector.shape_cast %99 : vector<16x16x4xf32> to vector<256x4xf32>
    %101 = arith.addf %98, %100 : vector<256x4xf32>
    %102 = vector.shape_cast %101 : vector<256x4xf32> to vector<16x16x4xf32>
    %c0_27 = arith.constant 0 : index
    %c0_28 = arith.constant 0 : index
    %c0_29 = arith.constant 0 : index
    %c0_30 = arith.constant 0 : index
    %c0_31 = arith.constant 0 : index
    %103 = vector.load %arg10[%c0_27, %c0_28, %c0_29, %c0_30, %c0_31] : memref<1x1x16x16x4xf32, #tpu.memory_space<vmem>>, vector<1x1x16x16x4xf32>
    %104 = vector.shape_cast %103 : vector<1x1x16x16x4xf32> to vector<16x16x4xf32>
    %105 = vector.shape_cast %102 : vector<16x16x4xf32> to vector<1x1x16x16x4xf32>
    tpu.vector_store %arg10[%c0_27, %c0_28, %c0_29, %c0_30, %c0_31], %105 {strides = array<i32>} : memref<1x1x16x16x4xf32, #tpu.memory_space<vmem>>, vector<1x1x16x16x4xf32>,
    return
  }
  func.func @transform_0(%arg0: i32, %arg1: i32) -> (i32, i32, i32, i32, i32) {
    %c0_i32 = arith.constant 0 : i32
    %c0_i32_0 = arith.constant 0 : i32
    %c0_i32_1 = arith.constant 0 : i32
    %c0_i32_2 = arith.constant 0 : i32
    return %arg0, %arg1, %c0_i32, %c0_i32_0, %c0_i32_1 : i32, i32, i32, i32, i32
  }
  func.func @transform_1(%arg0: i32, %arg1: i32) -> (i32, i32, i32, i32) {
    %c0_i32 = arith.constant 0 : i32
    %c0_i32_0 = arith.constant 0 : i32
    %c0_i32_1 = arith.constant 0 : i32
    %c0_i32_2 = arith.constant 0 : i32
    return %arg1, %c0_i32, %c0_i32_0, %c0_i32_1 : i32, i32, i32, i32
  }
  func.func @transform_2(%arg0: i32, %arg1: i32) -> (i32, i32) {
    %c0_i32 = arith.constant 0 : i32
    %c0_i32_0 = arith.constant 0 : i32
    %c0_i32_1 = arith.constant 0 : i32
    return %c0_i32, %c0_i32_0 : i32, i32
  }
  func.func @transform_3(%arg0: i32, %arg1: i32) -> (i32, i32) {
    %c0_i32 = arith.constant 0 : i32
    %c0_i32_0 = arith.constant 0 : i32
    %c0_i32_1 = arith.constant 0 : i32
    return %c0_i32, %c0_i32_0 : i32, i32
  }
  func.func @transform_4(%arg0: i32, %arg1: i32) -> (i32, i32, i32) {
    %c0_i32 = arith.constant 0 : i32
    %c0_i32_0 = arith.constant 0 : i32
    %c0_i32_1 = arith.constant 0 : i32
    %c0_i32_2 = arith.constant 0 : i32
    return %c0_i32, %c0_i32_0, %c0_i32_1 : i32, i32, i32
  }
  func.func @transform_5(%arg0: i32, %arg1: i32) -> (i32, i32) {
    %c0_i32 = arith.constant 0 : i32
    %c0_i32_0 = arith.constant 0 : i32
    %c0_i32_1 = arith.constant 0 : i32
    return %c0_i32, %c0_i32_0 : i32, i32
  }
  func.func @transform_6(%arg0: i32, %arg1: i32) -> (i32, i32) {
    %c0_i32 = arith.constant 0 : i32
    %c0_i32_0 = arith.constant 0 : i32
    %c0_i32_1 = arith.constant 0 : i32
    return %c0_i32, %c0_i32_0 : i32, i32
  }
  func.func @transform_7(%arg0: i32, %arg1: i32) -> (i32, i32) {
    %c0_i32 = arith.constant 0 : i32
    %c0_i32_0 = arith.constant 0 : i32
    %c0_i32_1 = arith.constant 0 : i32
    return %c0_i32, %c0_i32_0 : i32, i32
  }
  func.func @transform_8(%arg0: i32, %arg1: i32) -> (i32, i32, i32, i32, i32) {
    %c0_i32 = arith.constant 0 : i32
    %c0_i32_0 = arith.constant 0 : i32
    %c0_i32_1 = arith.constant 0 : i32
    %c0_i32_2 = arith.constant 0 : i32
    return %arg0, %arg1, %c0_i32, %c0_i32_0, %c0_i32_1 : i32, i32, i32, i32, i32
  }
}

</mosaic_0001>

<bundles_post_ra>
// kernel: tpu_custom_call.1
= control target key start
LH: loop header
LB: loop body
LE: loop exit
PB: predicated region body
PF: predicated region fallthrough
CT: control target
= control target key end

     0   :  { %s11893_s27 = smov 0   ;;  %s11895_s28 = smov 0   ;;  %s18716_s0 = inlined_call_operand.vmem [shape: f32[2,1,18,18,4], index: 0, kind: input, shape index: {}]   ;;  %s18717_s1 = inlined_call_operand.vmem [shape: f32[1,18,18,1], index: 1, kind: input, shape index: {}]   ;;  %s18718_s2 = inlined_call_operand.vmem [shape: f32[4,16], index: 2, kind: input, shape index: {}]   ;;  %s18719_s3 = inlined_call_operand.vmem [shape: f32[1,16], index: 3, kind: input, shape index: {}]   ;;  %s18720_s4 = inlined_call_operand.vmem [shape: f32[3,3,16], index: 4, kind: input, shape index: {}]   ;;  %s18721_s5 = inlined_call_operand.vmem [shape: f32[1,16], index: 5, kind: input, shape index: {}]   ;;  %s18722_s6 = inlined_call_operand.vmem [shape: f32[16,4], index: 6, kind: input, shape index: {}]   ;;  %s18723_s7 = inlined_call_operand.vmem [shape: f32[1,4], index: 7, kind: input, shape index: {}]   ;;  %s18724_s8 = inlined_call_operand.vmem [shape: f32[2,1,16,16,4], index: 8, kind: output, shape index: {}]  }
   0x1   :  { %s11897_s29 = smov 0  }
   0x2 LB: > { %s30_s30 = sadd.s32 1, %s11834_s28  ;;  %p11288_p0 = scmp.ge.s32.totalorder %s11838_s29, 1  ;;  %s11838_s29 = sphi %s11897_s29, %s18_s29   ;;  %s11834_s28 = sphi %s11895_s28, %s21093_s28   ;;  %s11830_s27 = sphi %s11893_s27, %s21092_s27  }
   0x3   : > { %p32_p1 = scmp.ge.s32.totalorder %s30_s30, 2  ;;  %p292_p2 = scmp.lt.s32.totalorder %s11838_s29, 3 }
   0x5   : > { %s21095_s30 = smov (%p32_p1, %s30_s30), 0  ;;  %p293_p3 = pnand %p11288_p0, %p292_p2 }
   0x7   : > { %296 = sbr.rel (%p293_p3) target bundleno = 1618 (0x652), region = 52 }
   0xc   : > { %v1208_v0 = vld [vmem:[%s18718_s2] sm:$0xf]  ;;  %vm1987_vm0 = vcmask 1043456   ;;  %p339_p4 = scmp.lt.s32.totalorder %s11830_s27, 1  ;;  %v474_v1 = vlaneseq  ;;  %v11840_v2 = vmov 0.0   ;;  %vm11841_vm1 = vmmov 0  }
   0xd   : > { %11675 = vmatprep.subr.mxu1 %v11840_v2  ;;  %11587 = vmatprep.mubr.msk.f32.mxu1 %vm11841_vm1, %v11840_v2  ;;  %v11842_v3 = vmov 1983009808   ;;  %v3234_v6 = vld [vmem:[%s18717_s1] sm:$0xff]  ;;  %v3236_v7 = vld [vmem:[%s18717_s1 + $0x10] sm:$0x3]  ;;  %v11843_v9 = vmov 0  }
   0xe   : > { %11676 = vmatpush3.msk.msra.mxu1 %vm1987_vm0, %v1208_v0  ;;  %11498 = vmatprep.subr.mxu0 %v11840_v2  ;;  %s21097_s27 = smov (!%p339_p4, %s11830_s27), 1  ;;  %v472_v4 = vunpack.c.l.s4 %v11842_v3  ;;  %v11920_v5 = vshrl.u32 %v474_v1, 7  ;;  %v3235_v11 = vld [vmem:[%s18717_s1 + $0x8] sm:$0xff]  ;;  %v3237_v12 = vld [vmem:[%s18717_s1 + $0x18] sm:$0xff]  ;;  %vm1904_vm2 = vcmask 31744   ;;  %v3238_v29 = vld [vmem:[%s18717_s1 + $0x20] sm:$0xff] }
   0xf   : > { %11499 = vmatpush3.msk.msra.mxu0 %vm1987_vm0, %v1208_v0  ;;  %11500 = vmatprep.mubr.msk.f32.mxu0 %vm11841_vm1, %v11840_v2  ;;  %s11677_s15 = smul.u32 432, %s21097_s27  ;;  %v3239_v34 = vld [vmem:[%s18717_s1 + $0x28] sm:$0x3]  ;;  %v3240_v50 = vld [vmem:[%s18717_s1 + $0x30] sm:$0xff]  ;;  %vm5269_vm3 = vcmask 1040384   ;;  %vm5270_vm4 = vcmask 1042434  }
  0x10   : > { %v473_v8 = vunpack.c.0.s8 %v472_v4  ;;  %11710 = vset.pattern.permute.xlu0 %v11843_v9  ;;  %11711 = vset.pattern.permute.xlu1 %v11843_v9  ;;  %vm5271_vm5 = vmor %vm5269_vm3, %vm5270_vm4  ;;  %vm5272_vm6 = vcmask 1044484   ;;  %vm5274_vm8 = vcmask 1046534   ;;  %vm10708_vm10 = vcmask 130048   ;;  %s11421_s10 = sshll.u32 %s21097_s27, 8 }
  0x11   : > { %3290 = vperm.xlu0 %11710, %v3234_v6   ;;  %3298 = vperm.xlu1 %11711, %v3236_v7   ;;  %s11934_s18 = scalar_lea.vmem %s18716_s0, %s11677_s15  ;;  %vm5273_vm7 = vmor %vm5271_vm5, %vm5272_vm6  ;;  %vm10998_vm11 = vcmask 1046528   ;;  %s18507_s12 = scalar_lea.vmem %s18724_s8, %s11421_s10 }
  0x12   : > { %v11937_v10 = vsub.s32 %v473_v8, %v11920_v5  ;;  %v11800_v13 = vld.sshfl [vmem:[%s11934_s18 + $0x130] sm:$0x3 pattern:$0x76325410]  ;;  %v401_v14 = vld [vmem:[%s11934_s18 + $0x138] sm:$0xff]  ;;  %v362_v15 = vld [vmem:[%s11934_s18] sm:$0xff] }
  0x13   : > { %v1003_v16 = vcombine.high %v401_v14, %v401_v14  ;;  %v470_v18 = vcombine.high %v362_v15, %v362_v15  ;;  %v402_v19 = vld [vmem:[%s11934_s18 + $0x140] sm:$0xff]  ;;  %v363_v20 = vld [vmem:[%s11934_s18 + $0x8] sm:$0xff]  ;;  %v404_v47 = vld [vmem:[%s11934_s18 + $0x150] sm:$0xff] }
  0x14   : > { %19436 = vst [vmem:[#allocation2_spill] sm:$0xff] %v11937_v10  ;;  %v1010_v17 = vrot.slane %v401_v14, %v11937_v10  ;;  %v477_v21 = vrot.slane %v362_v15, %v11937_v10  ;;  %v1020_v22 = vcombine.high %v402_v19, %v402_v19  ;;  %v1027_v23 = vrot.slane %v402_v19, %v11937_v10  ;;  %v11801_v43 = vld.sshfl [vmem:[%s11934_s18 + $0x148] sm:$0x3 pattern:$0x76325410]  ;;  %v365_v49 = vld [vmem:[%s11934_s18 + $0x18] sm:$0xff]  ;;  %vm12500_vm9 = vmor %vm5273_vm7, %vm5274_vm8 }
  0x15   : > { %v487_v24 = vcombine.high %v363_v20, %v363_v20  ;;  %3294 = vperm.xlu0 %11710, %v3235_v11   ;;  %v1017_v25 = vrot.slane %v1003_v16, %v11937_v10  ;;  %v484_v28 = vrot.slane %v470_v18, %v11937_v10  ;;  %3302 = vperm.xlu1 %11711, %v3237_v12   ;;  %v11292_v61 = vld.sshfl [vmem:[%s11934_s18 + $0x10] sm:$0x3 pattern:$0x76325410]  ;;  %v405_v63 = vld [vmem:[%s11934_s18 + $0x158] sm:$0xff]  ;;  %v366_v11 = vld [vmem:[%s11934_s18 + $0x20] sm:$0xff] }
  0x16   : > { %v1018_v26 = vcombine.high %v1010_v17, %v1010_v17  ;;  %v1709_v27 = vcombine.low %v11800_v13, %v1010_v17  ;;  %v485_v30 = vcombine.high %v477_v21, %v477_v21  ;;  %v1034_v31 = vrot.slane %v1020_v22, %v11937_v10 }
  0x17   : > { %v1035_v32 = vcombine.high %v1027_v23, %v1027_v23  ;;  %v494_v33 = vrot.slane %v363_v20, %v11937_v10  ;;  %v486_v37 = vcombine.high %v484_v28, %v484_v28  ;;  %v1019_v38 = vcombine.high %v1017_v25, %v1017_v25  ;;  %v11802_v20 = vld.sshfl [vmem:[%s11934_s18 + $0x160] sm:$0x3 pattern:$0x76325410] }
  0x18   : > { %v1710_v35 = vcombine.low %v1018_v26, %v1017_v25  ;;  %v1717_v36 = vrot.slane %v1709_v27, %v11937_v10  ;;  %v1216_v39 = vcombine.low %v477_v21, %v485_v30  ;;  %v501_v41 = vrot.slane %v487_v24, %v11937_v10  ;;  %v3241_v30 = vld [vmem:[%s18717_s1 + $0x38] sm:$0xff] }
  0x19   : > { %v1727_v40 = vcombine.low %v1035_v32, %v1034_v31  ;;  %v502_v42 = vcombine.high %v494_v33, %v494_v33  ;;  %3306 = vperm.xlu0 %11710, %v3238_v29   ;;  %v1217_v45 = vcombine.low %v484_v28, %v486_v37  ;;  %v1726_v46 = vcombine.low %v1019_v38, %v1027_v23  ;;  %v407_v28 = vld [vmem:[%s11934_s18 + $0x168] sm:$0xff] }
  0x1a   : > { %v1724_v44 = vrot.slane %v1710_v35, %v11937_v10  ;;  %v1036_v48 = vcombine.high %v1034_v31, %v1034_v31  ;;  %3310 = vperm.xlu1 %11711, %v3239_v34   ;;  %v1224_v51 = vrot.slane %v1216_v39, %v11937_v10  ;;  %v503_v53 = vcombine.high %v501_v41, %v501_v41  ;;  %v11803_v38 = vld.sshfl [vmem:[%s11934_s18 + $0x28] sm:$0x3 pattern:$0x76325410] }
  0x1b   : > { %v1741_v52 = vrot.slane %v1727_v40, %v11937_v10  ;;  %v1233_v54 = vcombine.low %v494_v33, %v502_v42  ;;  %v1231_v56 = vrot.slane %v1217_v45, %v11937_v10  ;;  %v1734_v57 = vrot.slane %v1726_v46, %v11937_v10 }
  0x1c   : > { %v1725_v55 = vcombine.low %v1717_v36, %v1724_v44  ;;  %v1234_v58 = vcombine.low %v501_v41, %v503_v53  ;;  %v1051_v60 = vrot.slane %v404_v47, %v11937_v10  ;;  %v511_v62 = vcombine.high %v365_v49, %v365_v49 }
  0x1d   : > { %v1241_v59 = vrot.slane %v1233_v54, %v11937_v10  ;;  %3314 = vperm.xlu0 %11710, %v3240_v50   ;;  %v1232_v0 = vcombine.low %v1224_v51, %v1231_v56  ;;  %v1742_v1 = vcombine.low %v1734_v57, %v1741_v52  ;;  %v1743_v3 = vcombine.low %v1036_v48, %v11801_v43  ;;  %v368_v43 = vld [vmem:[%s11934_s18 + $0x30] sm:$0xff]  ;;  %v3242_v48 = vld [vmem:[%s18717_s1 + $0x40] sm:$0x3]  ;;  %v369_v56 = vld [vmem:[%s11934_s18 + $0x38] sm:$0xff] }
  0x1e   : > { %11588 = vmatmul.mubr.msk.f32.vlgmr.msra.gmra.mxu1 %vm1904_vm2, %v1725_v55  ;;  %v518_v4 = vrot.slane %v365_v49, %v11937_v10  ;;  %v1248_v6 = vrot.slane %v1234_v58, %v11937_v10  ;;  %v1059_v7 = vcombine.high %v1051_v60, %v1051_v60  ;;  %v525_v8 = vrot.slane %v511_v62, %v11937_v10  ;;  %v408_v51 = vld [vmem:[%s11934_s18 + $0x170] sm:$0xff] }
  0x1f   : > { %11590 = vmatprep.mubr.msk.f32.mxu1 %vm11841_vm1, %v11840_v2  ;;  %v1044_v9 = vcombine.high %v404_v47, %v404_v47  ;;  %11501 = vmatmul.mubr.msk.f32.vlgmr.msra.gmra.mxu0 %vm1904_vm2, %v1232_v0  ;;  %v1751_v12 = vrot.slane %v1743_v3, %v11937_v10  ;;  %v1068_v15 = vrot.slane %v405_v63, %v11937_v10 }
  0x20   : > { %v526_v13 = vcombine.high %v518_v4, %v518_v4  ;;  %v1250_v14 = vcombine.low %v11292_v61, %v518_v4  ;;  %11503 = vmatprep.mubr.msk.f32.mxu0 %vm11841_vm1, %v11840_v2  ;;  %v1249_v16 = vcombine.low %v1241_v59, %v1248_v6  ;;  %v1744_v17 = vcombine.low %v1051_v60, %v1059_v7  ;;  %v3243_v7 = vld [vmem:[%s18717_s1 + $0x48] sm:$0xff] }
  0x21   : > { %v1058_v18 = vrot.slane %v1044_v9, %v11937_v10  ;;  %v527_v19 = vcombine.high %v525_v8, %v525_v8  ;;  %v1076_v23 = vcombine.high %v1068_v15, %v1068_v15  ;;  %v528_v24 = vcombine.high %v366_v11, %v366_v11  ;;  %3318 = vperm.xlu1 %11711, %v3241_v30  }
  0x22   : > { %11591 = vmatmul.mubr.msk.f32.gmra.mxu1 %vm1904_vm2, %v1742_v1  ;;  %v1251_v21 = vcombine.low %v526_v13, %v525_v8  ;;  %v1258_v22 = vrot.slane %v1250_v14, %v11937_v10  ;;  %v1758_v25 = vrot.slane %v1744_v17, %v11937_v10  ;;  %v535_v27 = vrot.slane %v366_v11, %v11937_v10 }
  0x23   : > { %11593 = vmatprep.mubr.msk.f32.mxu1 %vm11841_vm1, %v11840_v2  ;;  %v1060_v26 = vcombine.high %v1058_v18, %v1058_v18  ;;  %v1061_v29 = vcombine.high %v405_v63, %v405_v63  ;;  %11504 = vmatmul.mubr.msk.f32.gmra.mxu0 %vm1904_vm2, %v1249_v16  ;;  %v1761_v32 = vcombine.low %v1068_v15, %v1076_v23  ;;  %v3244_v23 = vld [vmem:[%s18717_s1 + $0x50] sm:$0xff] }
  0x24   : > { %v1265_v31 = vrot.slane %v1251_v21, %v11937_v10  ;;  %v542_v33 = vrot.slane %v528_v24, %v11937_v10  ;;  %v1759_v34 = vcombine.low %v1751_v12, %v1758_v25  ;;  %11506 = vmatprep.mubr.msk.f32.mxu0 %vm11841_vm1, %v11840_v2  ;;  %v543_v36 = vcombine.high %v535_v27, %v535_v27  ;;  %v11804_v12 = vld.sshfl [vmem:[%s11934_s18 + $0x178] sm:$0x3 pattern:$0x76325410] }
  0x25   : > { %v1760_v35 = vcombine.low %v1058_v18, %v1060_v26  ;;  %v1267_v37 = vcombine.low %v527_v19, %v535_v27  ;;  %v1775_v40 = vrot.slane %v1761_v32, %v11937_v10  ;;  %v1075_v41 = vrot.slane %v1061_v29, %v11937_v10  ;;  %3322 = vperm.xlu0 %11710, %v3242_v48   ;;  %v371_v26 = vld [vmem:[%s11934_s18 + $0x48] sm:$0xff]  ;;  %v410_v32 = vld [vmem:[%s11934_s18 + $0x180] sm:$0xff] }
  0x26   : > { %v1266_v39 = vcombine.low %v1258_v22, %v1265_v31  ;;  %v1092_v42 = vrot.slane %v407_v28, %v11937_v10  ;;  %11594 = vmatmul.mubr.msk.f32.gmra.mxu1 %vm1904_vm2, %v1759_v34  ;;  %v1268_v45 = vcombine.low %v543_v36, %v542_v33  ;;  %v544_v47 = vcombine.high %v542_v33, %v542_v33  ;;  %v11805_v22 = vld.sshfl [vmem:[%s11934_s18 + $0x40] sm:$0x3 pattern:$0x76325410] }
  0x27   : > { %v1768_v44 = vrot.slane %v1760_v35, %v11937_v10  ;;  %v1275_v46 = vrot.slane %v1267_v37, %v11937_v10  ;;  %11596 = vmatprep.mubr.msk.f32.mxu1 %vm11841_vm1, %v11840_v2  ;;  %v1077_v49 = vcombine.high %v1075_v41, %v1075_v41  ;;  %v559_v54 = vrot.slane %v368_v43, %v11937_v10 }
  0x28   : > { %11507 = vmatmul.mubr.msk.f32.gmra.mxu0 %vm1904_vm2, %v1266_v39  ;;  %v1778_v50 = vcombine.low %v11802_v20, %v1092_v42  ;;  %v1282_v53 = vrot.slane %v1268_v45, %v11937_v10  ;;  %v1085_v55 = vcombine.high %v407_v28, %v407_v28  ;;  %v1284_v59 = vcombine.low %v544_v47, %v11803_v38  ;;  %v3245_v45 = vld [vmem:[%s18717_s1 + $0x58] sm:$0x3] }
  0x29   : > { %v1776_v52 = vcombine.low %v1768_v44, %v1775_v40  ;;  %11509 = vmatprep.mubr.msk.f32.mxu0 %vm11841_vm1, %v11840_v2  ;;  %v1777_v57 = vcombine.low %v1075_v41, %v1077_v49  ;;  %v1100_v60 = vcombine.high %v1092_v42, %v1092_v42  ;;  %v567_v62 = vcombine.high %v559_v54, %v559_v54  ;;  %v372_v44 = vld [vmem:[%s11934_s18 + $0x50] sm:$0xff] }
  0x2a   : > { %v1792_v58 = vrot.slane %v1778_v50, %v11937_v10  ;;  %v1283_v61 = vcombine.low %v1275_v46, %v1282_v53  ;;  %v1099_v63 = vrot.slane %v1085_v55, %v11937_v10  ;;  %v1109_v0 = vrot.slane %v408_v51, %v11937_v10  ;;  %3326 = vperm.xlu1 %11711, %v3243_v7   ;;  %v411_v50 = vld [vmem:[%s11934_s18 + $0x188] sm:$0xff] }
  0x2b   : > { %11597 = vmatmul.mubr.msk.f32.gmra.mxu1 %vm1904_vm2, %v1776_v52  ;;  %v1785_v1 = vrot.slane %v1777_v57, %v11937_v10  ;;  %v1292_v3 = vrot.slane %v1284_v59, %v11937_v10  ;;  %v552_v4 = vcombine.high %v368_v43, %v368_v43  ;;  %v576_v6 = vrot.slane %v369_v56, %v11937_v10 }
  0x2c   : > { %11599 = vmatprep.mubr.msk.f32.mxu1 %vm11841_vm1, %v11840_v2  ;;  %11510 = vmatmul.mubr.msk.f32.gmra.mxu0 %vm1904_vm2, %v1283_v61  ;;  %v1285_v8 = vcombine.low %v559_v54, %v567_v62  ;;  %v1101_v9 = vcombine.high %v1099_v63, %v1099_v63  ;;  %v1794_v11 = vcombine.low %v1100_v60, %v1099_v63  ;;  %v3246_v63 = vld [vmem:[%s18717_s1 + $0x60] sm:$0xff] }
  0x2d   : > { %v1102_v13 = vcombine.high %v408_v51, %v408_v51  ;;  %v1793_v14 = vcombine.low %v1785_v1, %v1792_v58  ;;  %11512 = vmatprep.mubr.msk.f32.mxu0 %vm11841_vm1, %v11840_v2  ;;  %v566_v15 = vrot.slane %v552_v4, %v11937_v10  ;;  %v584_v16 = vcombine.high %v576_v6, %v576_v6  ;;  %v11806_v4 = vld.sshfl [vmem:[%s11934_s18 + $0x58] sm:$0x3 pattern:$0x76325410] }
  0x2e   : > { %v1117_v17 = vcombine.high %v1109_v0, %v1109_v0  ;;  %v1299_v18 = vrot.slane %v1285_v8, %v11937_v10  ;;  %v1795_v19 = vcombine.low %v1101_v9, %v1109_v0  ;;  %v1802_v20 = vrot.slane %v1794_v11, %v11937_v10  ;;  %3330 = vperm.xlu0 %11710, %v3244_v23   ;;  %v3247_v11 = vld [vmem:[%s18717_s1 + $0x68] sm:$0xff] }
  0x2f   : > { %v1116_v21 = vrot.slane %v1102_v13, %v11937_v10  ;;  %11600 = vmatmul.mubr.msk.f32.gmra.mxu1 %vm1904_vm2, %v1793_v14  ;;  %v568_v24 = vcombine.high %v566_v15, %v566_v15  ;;  %v1302_v25 = vcombine.low %v576_v6, %v584_v16  ;;  %v569_v27 = vcombine.high %v369_v56, %v369_v56  ;;  %v11807_v16 = vld.sshfl [vmem:[%s11934_s18 + $0x190] sm:$0x3 pattern:$0x76325410] }
  0x30   : > { %v1300_v28 = vcombine.low %v1292_v3, %v1299_v18  ;;  %11602 = vmatprep.mubr.msk.f32.mxu1 %vm11841_vm1, %v11840_v2  ;;  %v1809_v29 = vrot.slane %v1795_v19, %v11937_v10  ;;  %v600_v39 = vrot.slane %v371_v26, %v11937_v10  ;;  %v1126_v42 = vcombine.high %v410_v32, %v410_v32 }
  0x31   : > { %v1118_v30 = vcombine.high %v1116_v21, %v1116_v21  ;;  %v1811_v31 = vcombine.low %v1117_v17, %v1116_v21  ;;  %v1301_v33 = vcombine.low %v566_v15, %v568_v24  ;;  %v1316_v34 = vrot.slane %v1302_v25, %v11937_v10  ;;  %3334 = vperm.xlu1 %11711, %v3245_v45   ;;  %v413_v17 = vld [vmem:[%s11934_s18 + $0x198] sm:$0xff]  ;;  %v3248_v21 = vld [vmem:[%s18717_s1 + $0x70] sm:$0x3]  ;;  %v374_v25 = vld [vmem:[%s11934_s18 + $0x60] sm:$0xff] }
  0x32   : > { %v583_v35 = vrot.slane %v569_v27, %v11937_v10  ;;  %11513 = vmatmul.mubr.msk.f32.gmra.mxu0 %vm1904_vm2, %v1300_v28  ;;  %v1810_v36 = vcombine.low %v1802_v20, %v1809_v29  ;;  %v1133_v43 = vrot.slane %v410_v32, %v11937_v10  ;;  %v1319_v47 = vcombine.low %v11805_v22, %v600_v39 }
  0x33   : > { %v1812_v37 = vcombine.low %v1118_v30, %v11804_v12  ;;  %v1819_v38 = vrot.slane %v1811_v31, %v11937_v10  ;;  %11515 = vmatprep.mubr.msk.f32.mxu0 %vm11841_vm1, %v11840_v2  ;;  %v1309_v40 = vrot.slane %v1301_v33, %v11937_v10  ;;  %v593_v48 = vcombine.high %v371_v26, %v371_v26 }
  0x34   : > { %v585_v41 = vcombine.high %v583_v35, %v583_v35  ;;  %11603 = vmatmul.mubr.msk.f32.gmra.mxu1 %vm1904_vm2, %v1810_v36  ;;  %v608_v49 = vcombine.high %v600_v39, %v600_v39  ;;  %v1140_v53 = vrot.slane %v1126_v42, %v11937_v10  ;;  %v1141_v54 = vcombine.high %v1133_v43, %v1133_v43 }
  0x35   : > { %v1826_v46 = vrot.slane %v1812_v37, %v11937_v10  ;;  %v1317_v51 = vcombine.low %v1309_v40, %v1316_v34  ;;  %11605 = vmatprep.mubr.msk.f32.mxu1 %vm11841_vm1, %v11840_v2  ;;  %v1333_v56 = vrot.slane %v1319_v47, %v11937_v10  ;;  %v607_v57 = vrot.slane %v593_v48, %v11937_v10  ;;  %v3249_v37 = vld [vmem:[%s18717_s1 + $0x78] sm:$0xff] }
  0x36   : > { %v1318_v52 = vcombine.low %v583_v35, %v585_v41  ;;  %v617_v58 = vrot.slane %v372_v44, %v11937_v10  ;;  %v1142_v60 = vcombine.high %v1140_v53, %v1140_v53  ;;  %v1828_v61 = vcombine.low %v1133_v43, %v1141_v54  ;;  %3338 = vperm.xlu0 %11710, %v3246_v63  }
  0x37   : > { %v1827_v55 = vcombine.low %v1819_v38, %v1826_v46  ;;  %11516 = vmatmul.mubr.msk.f32.gmra.mxu0 %vm1904_vm2, %v1317_v51  ;;  %v1143_v62 = vcombine.high %v411_v50, %v411_v50  ;;  %v609_v0 = vcombine.high %v607_v57, %v607_v57  ;;  %v1335_v1 = vcombine.low %v608_v49, %v607_v57  ;;  %v414_v38 = vld [vmem:[%s11934_s18 + $0x1a0] sm:$0xff] }
  0x38   : > { %v1326_v59 = vrot.slane %v1318_v52, %v11937_v10  ;;  %11518 = vmatprep.mubr.msk.f32.mxu0 %vm11841_vm1, %v11840_v2  ;;  %v1150_v3 = vrot.slane %v411_v50, %v11937_v10  ;;  %v1829_v7 = vcombine.low %v1140_v53, %v1142_v60  ;;  %v1836_v8 = vrot.slane %v1828_v61, %v11937_v10  ;;  %v3250_v46 = vld [vmem:[%s18717_s1 + $0x80] sm:$0xff] }
  0x39   : > { %11606 = vmatmul.mubr.msk.f32.gmra.mxu1 %vm1904_vm2, %v1827_v55  ;;  %v1157_v9 = vrot.slane %v1143_v62, %v11937_v10  ;;  %v1336_v12 = vcombine.low %v609_v0, %v617_v58  ;;  %v1343_v13 = vrot.slane %v1335_v1, %v11937_v10  ;;  %v610_v15 = vcombine.high %v372_v44, %v372_v44  ;;  %v375_v55 = vld [vmem:[%s11934_s18 + $0x68] sm:$0xff]  ;;  %v3252_v0 = vld [vmem:[%s18717_s1 + $0x90] sm:$0xff] }
  0x3a   : > { %v1334_v6 = vcombine.low %v1326_v59, %v1333_v56  ;;  %11608 = vmatprep.mubr.msk.f32.mxu1 %vm11841_vm1, %v11840_v2  ;;  %v1158_v14 = vcombine.high %v1150_v3, %v1150_v3  ;;  %v1843_v18 = vrot.slane %v1829_v7, %v11937_v10  ;;  %v625_v20 = vcombine.high %v617_v58, %v617_v58  ;;  %v3251_v56 = vld [vmem:[%s18717_s1 + $0x88] sm:$0x3]  ;;  %v11808_v1 = vld.sshfl [vmem:[%s11934_s18 + $0x70] sm:$0x3 pattern:$0x76325410] }
  0x3b   : > { %v1159_v19 = vcombine.high %v1157_v9, %v1157_v9  ;;  %v1350_v22 = vrot.slane %v1336_v12, %v11937_v10  ;;  %v624_v24 = vrot.slane %v610_v15, %v11937_v10  ;;  %3342 = vperm.xlu1 %11711, %v3247_v11   ;;  %v1167_v28 = vcombine.high %v413_v17, %v413_v17  ;;  %v377_v7 = vld [vmem:[%s11934_s18 + $0x78] sm:$0xff] }
  0x3c   : > { %11519 = vmatmul.mubr.msk.f32.gmra.mxu0 %vm1904_vm2, %v1334_v6  ;;  %v1845_v23 = vcombine.low %v1150_v3, %v1158_v14  ;;  %v1844_v26 = vcombine.low %v1836_v8, %v1843_v18  ;;  %3346 = vperm.xlu0 %11710, %v3248_v21   ;;  %v1174_v34 = vrot.slane %v413_v17, %v11937_v10  ;;  %v3253_v14 = vld [vmem:[%s18717_s1 + $0x98] sm:$0xff] }
  0x3d   : > { %11521 = vmatprep.mubr.msk.f32.mxu0 %vm11841_vm1, %v11840_v2  ;;  %v1846_v27 = vcombine.low %v1157_v9, %v1159_v19  ;;  %v1351_v29 = vcombine.low %v1343_v13, %v1350_v22  ;;  %v626_v31 = vcombine.high %v624_v24, %v624_v24  ;;  %v1352_v32 = vcombine.low %v625_v20, %v624_v24  ;;  %v11293_v13 = vld.sshfl [vmem:[%s11934_s18 + $0x1a8] sm:$0x3 pattern:$0x76325410]  ;;  %v3254_v22 = vld [vmem:[%s18717_s1 + $0xa0] sm:$0x3] }
  0x3e   : > { %v1853_v30 = vrot.slane %v1845_v23, %v11937_v10  ;;  %11609 = vmatmul.mubr.msk.f32.gmra.mxu1 %vm1904_vm2, %v1844_v26  ;;  %v1181_v35 = vrot.slane %v1167_v28, %v11937_v10  ;;  %v634_v36 = vcombine.high %v374_v25, %v374_v25  ;;  %v641_v41 = vrot.slane %v374_v25, %v11937_v10  ;;  %v378_v26 = vld [vmem:[%s11934_s18 + $0x80] sm:$0xff] }
  0x3f   : > { %v1860_v33 = vrot.slane %v1846_v27, %v11937_v10  ;;  %11611 = vmatprep.mubr.msk.f32.mxu1 %vm11841_vm1, %v11840_v2  ;;  %v1353_v39 = vcombine.low %v626_v31, %v11806_v4  ;;  %v1360_v40 = vrot.slane %v1352_v32, %v11937_v10  ;;  %v1182_v43 = vcombine.high %v1174_v34, %v1174_v34  ;;  %v3255_v31 = vld [vmem:[%s18717_s1 + $0xa8] sm:$0xff] }
  0x40   : > { %11522 = vmatmul.mubr.msk.f32.gmra.mxu0 %vm1904_vm2, %v1351_v29  ;;  %v1862_v44 = vcombine.low %v11807_v16, %v1174_v34  ;;  %v648_v45 = vrot.slane %v634_v36, %v11937_v10  ;;  %v649_v48 = vcombine.high %v641_v41, %v641_v41  ;;  %3350 = vperm.xlu1 %11711, %v3249_v37   ;;  %v11809_v32 = vld.sshfl [vmem:[%s11934_s18 + $0x88] sm:$0x3 pattern:$0x76325410]  ;;  %v380_v36 = vld [vmem:[%s11934_s18 + $0x90] sm:$0xff] }
  0x41   : > { %v1861_v42 = vcombine.low %v1853_v30, %v1860_v33  ;;  %11524 = vmatprep.mubr.msk.f32.mxu0 %vm11841_vm1, %v11840_v2  ;;  %v1367_v47 = vrot.slane %v1353_v39, %v11937_v10  ;;  %v1183_v49 = vcombine.high %v1181_v35, %v1181_v35  ;;  %v1184_v50 = vcombine.high %v414_v38, %v414_v38 }
  0x42   : > { %v1863_v51 = vcombine.low %v1182_v43, %v1181_v35  ;;  %v1870_v52 = vrot.slane %v1862_v44, %v11937_v10  ;;  %v650_v53 = vcombine.high %v648_v45, %v648_v45  ;;  %v1191_v54 = vrot.slane %v414_v38, %v11937_v10  ;;  %3354 = vperm.xlu0 %11710, %v3250_v46  }
  0x43   : > { %11612 = vmatmul.mubr.msk.f32.gmra.mxu1 %vm1904_vm2, %v1861_v42  ;;  %v1368_v57 = vcombine.low %v1360_v40, %v1367_v47  ;;  %v1369_v58 = vcombine.low %v641_v41, %v649_v48  ;;  %v1198_v59 = vrot.slane %v1184_v50, %v11937_v10  ;;  %v651_v4 = vcombine.high %v375_v55, %v375_v55  ;;  %v3256_v41 = vld [vmem:[%s18717_s1 + $0xb0] sm:$0xff]  ;;  %v381_v42 = vld [vmem:[%s11934_s18 + $0x98] sm:$0xff] }
  0x44   : > { %11614 = vmatprep.mubr.msk.f32.mxu1 %vm11841_vm1, %v11840_v2  ;;  %v1877_v60 = vrot.slane %v1863_v51, %v11937_v10  ;;  %v1370_v61 = vcombine.low %v648_v45, %v650_v53  ;;  %v1199_v62 = vcombine.high %v1191_v54, %v1191_v54  ;;  %v1879_v63 = vcombine.low %v1183_v49, %v1191_v54  ;;  %v3257_v48 = vld [vmem:[%s18717_s1 + $0xb8] sm:$0x3] }
  0x45   : > { %11525 = vmatmul.mubr.msk.f32.gmra.mxu0 %vm1904_vm2, %v1368_v57  ;;  %v1377_v3 = vrot.slane %v1369_v58, %v11937_v10  ;;  %v658_v6 = vrot.slane %v375_v55, %v11937_v10  ;;  %3358 = vperm.xlu1 %11711, %v3251_v56   ;;  %v665_v15 = vrot.slane %v651_v4, %v11937_v10  ;;  %v3258_v57 = vld [vmem:[%s18717_s1 + $0xc0] sm:$0xff]  ;;  %v3259_v4 = vld [vmem:[%s18717_s1 + $0xc8] sm:$0xff] }
  0x46   : > { %v1878_v8 = vcombine.low %v1870_v52, %v1877_v60  ;;  %11527 = vmatprep.mubr.msk.f32.mxu0 %vm11841_vm1, %v11840_v2  ;;  %v1384_v9 = vrot.slane %v1370_v61, %v11937_v10  ;;  %v1880_v11 = vcombine.low %v1199_v62, %v1198_v59  ;;  %v1887_v12 = vrot.slane %v1879_v63, %v11937_v10  ;;  %v383_v60 = vld [vmem:[%s11934_s18 + $0xa8] sm:$0xff] }
  0x47   : > { %v666_v16 = vcombine.high %v658_v6, %v658_v6  ;;  %v1200_v17 = vcombine.high %v1198_v59, %v1198_v59  ;;  %3362 = vperm.xlu0 %11710, %v3252_v0   ;;  %v675_v20 = vcombine.high %v377_v7, %v377_v7  ;;  %v682_v21 = vrot.slane %v377_v7, %v11937_v10  ;;  %v11810_v59 = vld.sshfl [vmem:[%s11934_s18 + $0xa0] sm:$0x3 pattern:$0x76325410] }
  0x48   : > { %11615 = vmatmul.mubr.msk.f32.gmra.mxu1 %vm1904_vm2, %v1878_v8  ;;  %v1385_v18 = vcombine.low %v1377_v3, %v1384_v9  ;;  %v1894_v19 = vrot.slane %v1880_v11, %v11937_v10  ;;  %v667_v23 = vcombine.high %v665_v15, %v665_v15  ;;  %v692_v40 = vcombine.high %v378_v26, %v378_v26 }
  0x49   : > { %11617 = vmatprep.mubr.msk.f32.mxu1 %vm11841_vm1, %v11840_v2  ;;  %v1386_v24 = vcombine.low %v658_v6, %v666_v16  ;;  %v1896_v25 = vcombine.low %v1200_v17, %v11293_v13  ;;  %3366 = vperm.xlu1 %11711, %v3253_v14   ;;  %v689_v28 = vrot.slane %v675_v20, %v11937_v10  ;;  %v3260_v14 = vld [vmem:[%s18717_s1 + $0xd0] sm:$0x3] }
  0x4a   : > { %11528 = vmatmul.mubr.msk.f32.gmra.mxu0 %vm1904_vm2, %v1385_v18  ;;  %v1895_v27 = vcombine.low %v1887_v12, %v1894_v19  ;;  %v690_v29 = vcombine.high %v682_v21, %v682_v21  ;;  %v1403_v30 = vcombine.low %v11808_v1, %v682_v21  ;;  %v1387_v33 = vcombine.low %v665_v15, %v667_v23  ;;  %v384_v16 = vld [vmem:[%s11934_s18 + $0xb0] sm:$0xff]  ;;  %v3261_v19 = vld [vmem:[%s18717_s1 + $0xd8] sm:$0xff]  ;;  %v386_v21 = vld [vmem:[%s11934_s18 + $0xc0] sm:$0xff] }
  0x4b   : > { %11530 = vmatprep.mubr.msk.f32.mxu0 %vm11841_vm1, %v11840_v2  ;;  %v1394_v34 = vrot.slane %v1386_v24, %v11937_v10  ;;  %v1903_v35 = vrot.slane %v1896_v25, %v11937_v10  ;;  %3370 = vperm.xlu0 %11710, %v3254_v22   ;;  %v691_v39 = vcombine.high %v689_v28, %v689_v28 }
  0x4c   : > { %11618 = vmatmul.mubr.msk.f32.gmra.mxu1 %vm1904_vm2, %v1895_v27  ;;  %v1404_v37 = vcombine.low %v690_v29, %v689_v28  ;;  %v1411_v38 = vrot.slane %v1403_v30, %v11937_v10  ;;  %v1401_v43 = vrot.slane %v1387_v33, %v11937_v10  ;;  %v699_v44 = vrot.slane %v378_v26, %v11937_v10  ;;  %v3262_v27 = vld [vmem:[%s18717_s1 + $0xe0] sm:$0xff] }
  0x4d   : > { %11620 = vmatprep.mubr.msk.f32.mxu1 %vm11841_vm1, %v11840_v2  ;;  %3374 = vperm.xlu1 %11711, %v3255_v31   ;;  %v706_v46 = vrot.slane %v692_v40, %v11937_v10  ;;  %v723_v47 = vrot.slane %v380_v36, %v11937_v10  ;;  %v716_v49 = vcombine.high %v380_v36, %v380_v36  ;;  %v11811_v31 = vld.sshfl [vmem:[%s11934_s18 + $0xb8] sm:$0x3 pattern:$0x76325410] }
  0x4e   : > { %v1418_v45 = vrot.slane %v1404_v37, %v11937_v10  ;;  %v1402_v50 = vcombine.low %v1394_v34, %v1401_v43  ;;  %v707_v51 = vcombine.high %v699_v44, %v699_v44  ;;  %v1420_v52 = vcombine.low %v691_v39, %v699_v44  ;;  %v3263_v37 = vld [vmem:[%s18717_s1 + $0xe8] sm:$0x3] }
  0x4f   : > { %3378 = vperm.xlu0 %11710, %v3256_v41   ;;  %v740_v53 = vrot.slane %v381_v42, %v11937_v10  ;;  %v708_v55 = vcombine.high %v706_v46, %v706_v46  ;;  %v731_v56 = vcombine.high %v723_v47, %v723_v47  ;;  %v730_v58 = vrot.slane %v716_v49, %v11937_v10  ;;  %v3264_v41 = vld [vmem:[%s18717_s1 + $0xf0] sm:$0xff]  ;;  %v3265_v49 = vld [vmem:[%s18717_s1 + $0xf8] sm:$0xff] }
  0x50   : > { %11621 = vmatmul.mubr.msk.f32.gmra.mxu1 %vm1904_vm2, %v1903_v35  ;;  %v1419_v54 = vcombine.low %v1411_v38, %v1418_v45  ;;  %11531 = vmatmul.mubr.msk.f32.gmra.mxu0 %vm1904_vm2, %v1402_v50  ;;  %v1421_v61 = vcombine.low %v707_v51, %v706_v46  ;;  %v1428_v62 = vrot.slane %v1420_v52, %v11937_v10 }
  0x51   : > { %3382 = vperm.xlu1 %11711, %v3257_v48   ;;  %v748_v63 = vcombine.high %v740_v53, %v740_v53  ;;  %11533 = vmatprep.mubr.msk.f32.mxu0 %vm11841_vm1, %v11840_v2  ;;  %v1437_v0 = vcombine.low %v708_v55, %v11809_v32  ;;  %v1438_v1 = vcombine.low %v723_v47, %v731_v56  ;;  %v387_v32 = vld [vmem:[%s11934_s18 + $0xc8] sm:$0xff] }
  0x52   : > { %v732_v3 = vcombine.high %v730_v58, %v730_v58  ;;  %v733_v6 = vcombine.high %v381_v42, %v381_v42  ;;  %v1435_v7 = vrot.slane %v1421_v61, %v11937_v10  ;;  %v764_v9 = vrot.slane %v383_v60, %v11937_v10  ;;  %v389_v61 = vld [vmem:[%s11934_s18 + $0xd8] sm:$0xff] }
  0x53   : > { %3386 = vperm.xlu0 %11710, %v3258_v57   ;;  %v1455_v8 = vcombine.low %v740_v53, %v748_v63  ;;  %v1445_v11 = vrot.slane %v1437_v0, %v11937_v10  ;;  %v1452_v12 = vrot.slane %v1438_v1, %v11937_v10  ;;  %v757_v20 = vcombine.high %v383_v60, %v383_v60  ;;  %v3267_v60 = vld [vmem:[%s18717_s1 + $0x108] sm:$0xff] }
  0x54   : > { %v1454_v13 = vcombine.low %v730_v58, %v732_v3  ;;  %v747_v15 = vrot.slane %v733_v6, %v11937_v10  ;;  %11534 = vmatmul.mubr.msk.f32.gmra.mxu0 %vm1904_vm2, %v1419_v54  ;;  %v1436_v17 = vcombine.low %v1428_v62, %v1435_v7  ;;  %v1472_v24 = vcombine.low %v11810_v59, %v764_v9  ;;  %v3266_v54 = vld [vmem:[%s18717_s1 + $0x100] sm:$0x3]  ;;  %v3268_v6 = vld [vmem:[%s18717_s1 + $0x110] sm:$0xff] }
  0x55   : > { %3390 = vperm.xlu1 %11711, %v3259_v4   ;;  %11536 = vmatprep.mubr.msk.f32.mxu0 %vm11841_vm1, %v11840_v2  ;;  %v1469_v23 = vrot.slane %v1455_v8, %v11937_v10  ;;  %v774_v25 = vcombine.high %v384_v16, %v384_v16  ;;  %v1453_v26 = vcombine.low %v1445_v11, %v1452_v12  ;;  %v11812_v7 = vld.sshfl [vmem:[%s11934_s18 + $0xd0] sm:$0x3 pattern:$0x76325410]  ;;  %v390_v12 = vld [vmem:[%s11934_s18 + $0xe0] sm:$0xff] }
  0x56   : > { %v749_v18 = vcombine.high %v747_v15, %v747_v15  ;;  %v1462_v22 = vrot.slane %v1454_v13, %v11937_v10  ;;  %v771_v28 = vrot.slane %v757_v20, %v11937_v10  ;;  %v772_v29 = vcombine.high %v764_v9, %v764_v9  ;;  %v3269_v13 = vld [vmem:[%s18717_s1 + $0x118] sm:$0x3] }
  0x57   : > { %3394 = vperm.xlu0 %11710, %v3260_v14   ;;  %v781_v30 = vrot.slane %v384_v16, %v11937_v10  ;;  %v788_v34 = vrot.slane %v774_v25, %v11937_v10  ;;  %v798_v35 = vcombine.high %v386_v21, %v386_v21  ;;  %v1486_v39 = vrot.slane %v1472_v24, %v11937_v10  ;;  %v3271_v24 = vld [vmem:[%s18717_s1 + $0x128] sm:$0xff]  ;;  %v392_v25 = vld [vmem:[%s11934_s18 + $0xf0] sm:$0xff] }
  0x58   : > { %11537 = vmatmul.mubr.msk.f32.gmra.mxu0 %vm1904_vm2, %v1436_v17  ;;  %v1471_v33 = vcombine.low %v747_v15, %v749_v18  ;;  %v773_v36 = vcombine.high %v771_v28, %v771_v28  ;;  %v1470_v38 = vcombine.low %v1462_v22, %v1469_v23  ;;  %v815_v40 = vcombine.high %v387_v32, %v387_v32 }
  0x59   : > { %3398 = vperm.xlu1 %11711, %v3261_v19   ;;  %11539 = vmatprep.mubr.msk.f32.mxu0 %vm11841_vm1, %v11840_v2  ;;  %v789_v42 = vcombine.high %v781_v30, %v781_v30  ;;  %v790_v43 = vcombine.high %v788_v34, %v788_v34  ;;  %v805_v44 = vrot.slane %v386_v21, %v11937_v10  ;;  %v3270_v19 = vld [vmem:[%s18717_s1 + $0x120] sm:$0xff] }
  0x5a   : > { %v812_v45 = vrot.slane %v798_v35, %v11937_v10  ;;  %v1479_v46 = vrot.slane %v1471_v33, %v11937_v10  ;;  %v1488_v47 = vcombine.low %v772_v29, %v771_v28  ;;  %v1489_v48 = vcombine.low %v773_v36, %v781_v30  ;;  %v3272_v30 = vld [vmem:[%s18717_s1 + $0x130] sm:$0x3]  ;;  %v393_v33 = vld [vmem:[%s11934_s18 + $0xf8] sm:$0xff] }
  0x5b   : > { %3402 = vperm.xlu0 %11710, %v3262_v27   ;;  %v822_v50 = vrot.slane %v387_v32, %v11937_v10  ;;  %v829_v51 = vrot.slane %v815_v40, %v11937_v10  ;;  %v1505_v52 = vcombine.low %v789_v42, %v788_v34  ;;  %v1506_v53 = vcombine.low %v790_v43, %v11811_v31 }
  0x5c   : > { %11540 = vmatmul.mubr.msk.f32.gmra.mxu0 %vm1904_vm2, %v1453_v26  ;;  %v813_v55 = vcombine.high %v805_v44, %v805_v44  ;;  %v814_v56 = vcombine.high %v812_v45, %v812_v45  ;;  %v1487_v57 = vcombine.low %v1479_v46, %v1486_v39  ;;  %v1496_v58 = vrot.slane %v1488_v47, %v11937_v10  ;;  %v3273_v39 = vld [vmem:[%s18717_s1 + $0x138] sm:$0xff] }
  0x5d   : > { %3406 = vperm.xlu1 %11711, %v3263_v37   ;;  %11542 = vmatprep.mubr.msk.f32.mxu0 %vm11841_vm1, %v11840_v2  ;;  %v1503_v59 = vrot.slane %v1489_v48, %v11937_v10  ;;  %v830_v62 = vcombine.high %v822_v50, %v822_v50  ;;  %v831_v63 = vcombine.high %v829_v51, %v829_v51  ;;  %v11813_v37 = vld.sshfl [vmem:[%s11934_s18 + $0xe8] sm:$0x3 pattern:$0x76325410] }
  0x5e   : > { %v1513_v0 = vrot.slane %v1505_v52, %v11937_v10  ;;  %v1520_v1 = vrot.slane %v1506_v53, %v11937_v10  ;;  %v1522_v3 = vcombine.low %v805_v44, %v813_v55  ;;  %v1523_v4 = vcombine.low %v812_v45, %v814_v56  ;;  %v3274_v45 = vld [vmem:[%s18717_s1 + $0x140] sm:$0xff]  ;;  %v3275_v52 = vld [vmem:[%s18717_s1 + $0x148] sm:$0x3] }
  0x5f   : > { %3410 = vperm.xlu0 %11710, %v3264_v41   ;;  %v1504_v8 = vcombine.low %v1496_v58, %v1503_v59  ;;  %v839_v9 = vcombine.high %v389_v61, %v389_v61  ;;  %v846_v11 = vrot.slane %v389_v61, %v11937_v10  ;;  %v1539_v14 = vcombine.low %v822_v50, %v830_v62  ;;  %v11814_v59 = vld.sshfl [vmem:[%s11934_s18 + $0x100] sm:$0x3 pattern:$0x76325410] }
  0x60   : > { %11543 = vmatmul.mubr.msk.f32.gmra.mxu0 %vm1904_vm2, %v1470_v38  ;;  %v1540_v15 = vcombine.low %v829_v51, %v831_v63  ;;  %v1521_v16 = vcombine.low %v1513_v0, %v1520_v1  ;;  %v1530_v17 = vrot.slane %v1522_v3, %v11937_v10  ;;  %v1537_v18 = vrot.slane %v1523_v4, %v11937_v10  ;;  %v395_v51 = vld [vmem:[%s11934_s18 + $0x108] sm:$0xff]  ;;  %v396_v0 = vld [vmem:[%s11934_s18 + $0x110] sm:$0xff]  ;;  %v3277_v1 = vld [vmem:[%s18717_s1 + $0x158] sm:$0xff] }
  0x61   : > { %3414 = vperm.xlu1 %11711, %v3265_v49   ;;  %11545 = vmatprep.mubr.msk.f32.mxu0 %vm11841_vm1, %v11840_v2  ;;  %v856_v20 = vcombine.high %v390_v12, %v390_v12  ;;  %v853_v21 = vrot.slane %v839_v9, %v11937_v10  ;;  %v854_v22 = vcombine.high %v846_v11, %v846_v11 }
  0x62   : > { %v863_v23 = vrot.slane %v390_v12, %v11937_v10  ;;  %v1547_v26 = vrot.slane %v1539_v14, %v11937_v10  ;;  %v1554_v27 = vrot.slane %v1540_v15, %v11937_v10  ;;  %v1556_v28 = vcombine.low %v11812_v7, %v846_v11  ;;  %v3279_v15 = vld [vmem:[%s18717_s1 + $0x168] sm:$0xff] }
  0x63   : > { %3418 = vperm.xlu0 %11710, %v3266_v54   ;;  %v1538_v29 = vcombine.low %v1530_v17, %v1537_v18  ;;  %v855_v31 = vcombine.high %v853_v21, %v853_v21  ;;  %v870_v32 = vrot.slane %v856_v20, %v11937_v10  ;;  %v880_v34 = vcombine.high %v392_v25, %v392_v25 }
  0x64   : > { %11546 = vmatmul.mubr.msk.f32.gmra.mxu0 %vm1904_vm2, %v1487_v57  ;;  %v1557_v35 = vcombine.low %v854_v22, %v853_v21  ;;  %v871_v36 = vcombine.high %v863_v23, %v863_v23  ;;  %v887_v38 = vrot.slane %v392_v25, %v11937_v10  ;;  %v1555_v40 = vcombine.low %v1547_v26, %v1554_v27  ;;  %v3276_v57 = vld [vmem:[%s18717_s1 + $0x150] sm:$0xff]  ;;  %v11815_v27 = vld.sshfl [vmem:[%s11934_s18 + $0x118] sm:$0x3 pattern:$0x76325410] }
  0x65   : > { %3422 = vperm.xlu1 %11711, %v3267_v60   ;;  %11548 = vmatprep.mubr.msk.f32.mxu0 %vm11841_vm1, %v11840_v2  ;;  %v1564_v41 = vrot.slane %v1556_v28, %v11937_v10  ;;  %v904_v42 = vrot.slane %v393_v33, %v11937_v10  ;;  %v897_v43 = vcombine.high %v393_v33, %v393_v33  ;;  %v3280_v22 = vld [vmem:[%s18717_s1 + $0x170] sm:$0xff] }
  0x66   : > { %v1573_v44 = vcombine.low %v855_v31, %v863_v23  ;;  %v872_v46 = vcombine.high %v870_v32, %v870_v32  ;;  %v894_v47 = vrot.slane %v880_v34, %v11937_v10  ;;  %v1571_v48 = vrot.slane %v1557_v35, %v11937_v10 }
  0x67   : > { %3426 = vperm.xlu0 %11710, %v3268_v6   ;;  %v1574_v49 = vcombine.low %v871_v36, %v870_v32  ;;  %v895_v50 = vcombine.high %v887_v38, %v887_v38  ;;  %v912_v53 = vcombine.high %v904_v42, %v904_v42  ;;  %v911_v54 = vrot.slane %v897_v43, %v11937_v10 }
  0x68   : > { %11549 = vmatmul.mubr.msk.f32.gmra.mxu0 %vm1904_vm2, %v1504_v8  ;;  %v1581_v55 = vrot.slane %v1573_v44, %v11937_v10  ;;  %v1590_v56 = vcombine.low %v872_v46, %v11813_v37  ;;  %v896_v58 = vcombine.high %v894_v47, %v894_v47  ;;  %v921_v60 = vcombine.high %v395_v51, %v395_v51  ;;  %v3278_v8 = vld [vmem:[%s18717_s1 + $0x160] sm:$0x3] }
  0x69   : > { %3430 = vperm.xlu1 %11711, %v3269_v13   ;;  %11551 = vmatprep.mubr.msk.f32.mxu0 %vm11841_vm1, %v11840_v2  ;;  %v1572_v61 = vcombine.low %v1564_v41, %v1571_v48  ;;  %v1588_v62 = vrot.slane %v1574_v49, %v11937_v10  ;;  %v1591_v63 = vcombine.low %v887_v38, %v895_v50  ;;  %v3282_v37 = vld [vmem:[%s18717_s1 + $0x180] sm:$0xff]  ;;  %v3284_v48 = vld [vmem:[%s18717_s1 + $0x190] sm:$0x3] }
  0x6a   : > { %v1608_v3 = vcombine.low %v904_v42, %v912_v53  ;;  %v913_v4 = vcombine.high %v911_v54, %v911_v54  ;;  %v928_v6 = vrot.slane %v395_v51, %v11937_v10  ;;  %v1607_v7 = vcombine.low %v894_v47, %v896_v58  ;;  %v3283_v42 = vld [vmem:[%s18717_s1 + $0x188] sm:$0xff]  ;;  %v3285_v53 = vld [vmem:[%s18717_s1 + $0x198] sm:$0xff] }
  0x6b   : > { %3434 = vperm.xlu0 %11710, %v3270_v19   ;;  %v935_v9 = vrot.slane %v921_v60, %v11937_v10  ;;  %v938_v11 = vcombine.high %v396_v0, %v396_v0  ;;  %v1589_v12 = vcombine.low %v1581_v55, %v1588_v62  ;;  %v1598_v13 = vrot.slane %v1590_v56, %v11937_v10  ;;  %v3287_v62 = vld [vmem:[%s18717_s1 + $0x1a8] sm:$0x3] }
  0x6c   : > { %11552 = vmatmul.mubr.msk.f32.gmra.mxu0 %vm1904_vm2, %v1521_v16  ;;  %v1605_v14 = vrot.slane %v1591_v63, %v11937_v10  ;;  %v398_v16 = vld [vmem:[%s11934_s18 + $0x120] sm:$0xff]  ;;  %v1622_v17 = vrot.slane %v1608_v3, %v11937_v10  ;;  %v1624_v18 = vcombine.low %v911_v54, %v913_v4  ;;  %v1625_v19 = vcombine.low %v11814_v59, %v928_v6 }
  0x6d   : > { %3438 = vperm.xlu1 %11711, %v3271_v24   ;;  %11554 = vmatprep.mubr.msk.f32.mxu0 %vm11841_vm1, %v11840_v2  ;;  %v936_v20 = vcombine.high %v928_v6, %v928_v6  ;;  %v1615_v21 = vrot.slane %v1607_v7, %v11937_v10  ;;  %v937_v23 = vcombine.high %v935_v9, %v935_v9 }
  0x6e   : > { %v945_v24 = vrot.slane %v396_v0, %v11937_v10  ;;  %v952_v25 = vrot.slane %v938_v11, %v11937_v10  ;;  %v1606_v26 = vcombine.low %v1598_v13, %v1605_v14  ;;  %v962_v28 = vcombine.high %v398_v16, %v398_v16 }
  0x6f   : > { %3442 = vperm.xlu0 %11710, %v3272_v30   ;;  %v399_v30 = vld [vmem:[%s11934_s18 + $0x128] sm:$0xff]  ;;  %v1632_v31 = vrot.slane %v1624_v18, %v11937_v10  ;;  %v1639_v32 = vrot.slane %v1625_v19, %v11937_v10  ;;  %v1641_v33 = vcombine.low %v936_v20, %v935_v9  ;;  %v1623_v35 = vcombine.low %v1615_v21, %v1622_v17  ;;  %v4962_v19 = vld [vmem:[%s18720_s4] sm:$0x7] }
  0x70   : > { %11555 = vmatmul.mubr.msk.f32.gmra.mxu0 %vm1904_vm2, %v1538_v29  ;;  %v3281_v29 = vld [vmem:[%s18717_s1 + $0x178] sm:$0x3]  ;;  %v953_v34 = vcombine.high %v945_v24, %v945_v24  ;;  %v1642_v36 = vcombine.low %v937_v23, %v945_v24  ;;  %v954_v38 = vcombine.high %v952_v25, %v952_v25  ;;  %v979_v41 = vcombine.high %v399_v30, %v399_v30  ;;  %v4963_v24 = vld [vmem:[%s18720_s4 + $0x4] sm:$0x7] }
  0x71   : > { %3446 = vperm.xlu1 %11711, %v3273_v39   ;;  %11557 = vmatprep.mubr.msk.f32.mxu0 %vm11841_vm1, %v11840_v2  ;;  %v969_v39 = vrot.slane %v398_v16, %v11937_v10  ;;  %v1640_v43 = vcombine.low %v1632_v31, %v1639_v32  ;;  %v1649_v44 = vrot.slane %v1641_v33, %v11937_v10  ;;  %v12436_v18 = vsub.s32 1, %v11920_v5 }
  0x72   : > { %v1658_v46 = vcombine.low %v953_v34, %v952_v25  ;;  %v1659_v47 = vcombine.low %v954_v38, %v11815_v27  ;;  %v986_v49 = vrot.slane %v399_v30, %v11937_v10  ;;  %v12452_v25 = vsub.s32 0, %v11920_v5 }
  0x73   : > { %3450 = vperm.xlu0 %11710, %v3274_v45   ;;  %v1656_v45 = vrot.slane %v1642_v36, %v11937_v10  ;;  %v977_v50 = vcombine.high %v969_v39, %v969_v39  ;;  %v5250_v20 = vrot.slane %v4962_v19, %v12436_v18  ;;  %v12456_v27 = vsub.s32 2, %v11920_v5 }
  0x74   : > { %11558 = vmatmul.mubr.msk.f32.gmra.mxu0 %vm1904_vm2, %v1555_v40  ;;  %v976_v40 = vrot.slane %v962_v28, %v11937_v10  ;;  %v1666_v55 = vrot.slane %v1658_v46, %v11937_v10  ;;  %v1673_v56 = vrot.slane %v1659_v47, %v11937_v10  ;;  %v994_v58 = vcombine.high %v986_v49, %v986_v49 }
  0x75   : > { %3454 = vperm.xlu1 %11711, %v3275_v52   ;;  %11560 = vmatprep.mubr.msk.f32.mxu0 %vm11841_vm1, %v11840_v2  ;;  %v993_v52 = vrot.slane %v979_v41, %v11937_v10  ;;  %v1657_v54 = vcombine.low %v1649_v44, %v1656_v45  ;;  %v1675_v59 = vcombine.low %v969_v39, %v977_v50  ;;  %v11844_v28 = vmov 269488144  }
  0x76   : > { %v978_v51 = vcombine.high %v976_v40, %v976_v40  ;;  %v1674_v63 = vcombine.low %v1666_v55, %v1673_v56  ;;  %v1692_v0 = vcombine.low %v986_v49, %v994_v58  ;;  %v5252_v23 = vcombine.high %v5250_v20, %v5250_v20 }
  0x77   : > { %3458 = vperm.xlu0 %11710, %v3276_v57   ;;  %v3286_v57 = vld [vmem:[%s18717_s1 + $0x1a0] sm:$0xff]  ;;  %v11845_v30 = vmov 842150450   ;;  %v6805_v32 = vrot.slane %v4963_v24, %v12436_v18  ;;  %v11846_v33 = vmov 1414812756  }
  0x78   : > { %11561 = vmatmul.mubr.msk.f32.gmra.mxu0 %vm1904_vm2, %v1572_v61  ;;  %v1676_v60 = vcombine.low %v976_v40, %v978_v51  ;;  %v995_v61 = vcombine.high %v993_v52, %v993_v52  ;;  %v3512_v31 = vunpack.c.l.s4 %v11845_v30  ;;  %v3519_v34 = vunpack.c.l.s4 %v11846_v33 }
  0x79   : > { %3462 = vperm.xlu1 %11711, %v3277_v1   ;;  %11563 = vmatprep.mubr.msk.f32.mxu0 %vm11841_vm1, %v11840_v2  ;;  %v1683_v1 = vrot.slane %v1675_v59, %v11937_v10  ;;  %v5266_v36 = vrot.slane %v5252_v23, %v11937_v10  ;;  %v11847_v38 = vmov 1987475062   ;;  %v6814_v45 = vrot.slane %v6805_v32, %v11937_v10 }
  0x7a   : > { %v1690_v3 = vrot.slane %v1676_v60, %v11937_v10  ;;  %v1693_v4 = vcombine.low %v993_v52, %v995_v61  ;;  %v3526_v39 = vunpack.c.l.s4 %v11847_v38  ;;  %v3513_v44 = vunpack.c.0.s8 %v3512_v31 }
  0x7b   : > { %3466 = vperm.xlu0 %11710, %v3278_v8   ;;  %v1700_v8 = vrot.slane %v1692_v0, %v11937_v10  ;;  %v3520_v46 = vunpack.c.0.s8 %v3519_v34  ;;  %v5268_v47 = vcombine.high %v5266_v36, %v5266_v36  ;;  %v6523_v61 = vrot.slane %v4963_v24, %v12452_v25 }
  0x7c   : > { %11564 = vmatmul.mubr.msk.f32.gmra.mxu0 %vm1904_vm2, %v1589_v12  ;;  %v1691_v7 = vcombine.low %v1683_v1, %v1690_v3  ;;  %v1707_v9 = vrot.slane %v1693_v4, %v11937_v10  ;;  %v3527_v50 = vunpack.c.0.s8 %v3526_v39  ;;  %v12475_v56 = vsub.s32 %v3513_v44, %v11920_v5 }
  0x7d   : > { %3470 = vperm.xlu1 %11711, %v3279_v15   ;;  %11566 = vmatprep.mubr.msk.f32.mxu0 %vm11841_vm1, %v11840_v2  ;;  %v12478_v58 = vsub.s32 %v3520_v46, %v11920_v5  ;;  %v5284_v60 = vrot.slane %v5268_v47, 7  ;;  %v6525_v31 = vcombine.high %v6523_v61, %v6523_v61 }
  0x7e   : > { %v1708_v12 = vcombine.low %v1700_v8, %v1707_v9  ;;  %19447 = vst [vmem:[#allocation13_spill] sm:$0xff] %v12475_v56  ;;  %v12510_v23 = vsub.s32 %v3527_v50, %v11920_v5 }
  0x7f   : > { %3474 = vperm.xlu0 %11710, %v3280_v22   ;;  %19448 = vst [vmem:[#allocation14_spill] sm:$0xff] %v12478_v58  ;;  %v12515_v30 = vrot.slane %v5284_v60, 2 }
  0x80   : > { %11567 = vmatmul.mubr.msk.f32.gmra.mxu0 %vm1904_vm2, %v1606_v26  ;;  %v5259_v26 = vrot.slane %v5250_v20, %v11937_v10  ;;  %v12507_v20 = vrot.slane %v6814_v45, 7  ;;  %19458 = vst [vmem:[#allocation22_spill] sm:$0xff] %v12510_v23 }
  0x81   : > { %3478 = vperm.xlu1 %11711, %v3281_v29   ;;  %11569 = vmatprep.mubr.msk.f32.mxu0 %vm11841_vm1, %v11840_v2  ;;  %v3505_v29 = vunpack.c.l.s4 %v11844_v28  ;;  %v7789_v28 = vrot.slane %v4963_v24, %v12456_v27  ;;  %19459 = vst [vmem:[#allocation23_spill] sm:$0xff] %v12515_v30 }
  0x82   : > { %v5267_v41 = vcombine.high %v5259_v26, %v5259_v26  ;;  %v12467_v49 = vrot.slane %v5259_v26, 7  ;;  %19457 = vst [vmem:[#allocation21_spill] sm:$0xff] %v12507_v20 }
  0x83   : > { %3482 = vperm.xlu0 %11710, %v3282_v37   ;;  %v4968_v37 = vrot.slane %v4962_v19, %v12452_v25 }
  0x84   : > { %11570 = vmatmul.mubr.msk.f32.gmra.mxu0 %vm1904_vm2, %v1623_v35  ;;  %19444 = vst [vmem:[#allocation10_spill] sm:$0xff] %v12467_v49  ;;  %v5278_v52 = vrot.slane %v5267_v41, 7  ;;  %v5277_v3 = vrot.slane %v12467_v49, 2  ;;  %v6825_v41 = vrot.slane %v12507_v20, 2  ;;  %v12559_v47 = vsel %vm12500_vm9, %v12515_v30, %v12467_v49 }
  0x85   : > { %3486 = vperm.xlu1 %11711, %v3283_v42   ;;  %11572 = vmatprep.mubr.msk.f32.mxu0 %vm11841_vm1, %v11840_v2  ;;  %v6241_v42 = vrot.slane %v4962_v19, %v12456_v27  ;;  %v12489_v0 = vrot.slane %v4968_v37, %v11937_v10  ;;  %19470 = vst [vmem:[#allocation34_spill] sm:$0xff] %v12559_v47 }
  0x86   : > { %v5280_v9 = vrot.slane %v5278_v52, 2  ;;  %v12531_v24 = vsel %vm12500_vm9, %v5277_v3, %v5278_v52 }
  0x87   : > { %3490 = vperm.xlu0 %11710, %v3284_v48   ;;  %v4970_v48 = vcombine.high %v4968_v37, %v4968_v37  ;;  %19450 = vst [vmem:[#allocation16_spill] sm:$0xff] %v12489_v0  ;;  %v12496_v4 = vrot.slane %v6241_v42, %v11937_v10  ;;  %v12523_v34 = vcombine.high %v12489_v0, %v12489_v0  ;;  %19463 = vst [vmem:[#allocation27_spill] sm:$0xff] %v12531_v24 }
  0x88   : > { %11573 = vmatmul.mubr.msk.f32.gmra.mxu0 %vm1904_vm2, %v1640_v43  ;;  %v3506_v43 = vunpack.c.0.s8 %v3505_v29 }
  0x89   : > { %3494 = vperm.xlu1 %11711, %v3285_v53   ;;  %11575 = vmatprep.mubr.msk.f32.mxu0 %vm11841_vm1, %v11840_v2  ;;  %v5281_v53 = vrot.slane %v5266_v36, 7  ;;  %v12492_v1 = vrot.slane %v4970_v48, %v11937_v10  ;;  %19452 = vst [vmem:[#allocation18_spill] sm:$0xff] %v12496_v4  ;;  %19461 = vst [vmem:[#allocation25_spill] sm:$0xff] %v12523_v34  ;;  %v12562_v48 = vrot.slane %v6525_v31, %v11937_v10 }
  0x8a   : > { %v12472_v55 = vsub.s32 %v3506_v43, %v11920_v5  ;;  %v7791_v43 = vcombine.high %v7789_v28, %v7789_v28 }
  0x8b   : > { %3498 = vperm.xlu0 %11710, %v3286_v57   ;;  %v6822_v57 = vcombine.high %v6814_v45, %v6814_v45  ;;  %19451 = vst [vmem:[#allocation17_spill] sm:$0xff] %v12492_v1  ;;  %v12527_v5 = vcombine.high %v12492_v1, %v12492_v1  ;;  %v12541_v37 = vsel %vm12500_vm9, %v5280_v9, %v5281_v53  ;;  %19471 = vst [vmem:[#allocation35_spill] sm:$0xff] %v12562_v48 }
  0x8c   : > { %11576 = vmatmul.mubr.msk.f32.gmra.mxu0 %vm1904_vm2, %v1657_v54  ;;  %v12412_v6 = vpop.permute.xlu0 %3290  ;;  %v12419_v11 = vpop.permute.xlu1 %3298  ;;  %v6243_v54 = vcombine.high %v6241_v42, %v6241_v42  ;;  %19446 = vst [vmem:[#allocation12_spill] sm:$0xff] %v12472_v55  ;;  %19466 = vst [vmem:[#allocation30_spill] sm:$0xff] %v12541_v37 }
  0x8d   : > { %3502 = vperm.xlu1 %11711, %v3287_v62   ;;  %11578 = vmatprep.mubr.msk.f32.mxu0 %vm11841_vm1, %v11840_v2  ;;  %v6807_v62 = vcombine.high %v6805_v32, %v6805_v32  ;;  %v6826_v26 = vrot.slane %v6822_v57, 7  ;;  %v12518_v32 = vrot.slane %v6523_v61, %v11937_v10  ;;  %19462 = vst [vmem:[#allocation26_spill] sm:$0xff] %v12527_v5 }
  0x8e   : > { %v12505_v19 = vrot.slane %v6243_v54, %v11937_v10 }
  0x8f   : > { %19460 = vst [vmem:[#allocation24_spill] sm:$0xff] %v12518_v32  ;;  %v6821_v33 = vrot.slane %v6807_v62, %v11937_v10  ;;  %v6828_v42 = vrot.slane %v6826_v26, 2  ;;  %v12566_v50 = vcombine.high %v12518_v32, %v12518_v32 }
  0x90   : > { %11579 = vmatmul.mubr.msk.f32.gmra.mxu0 %vm1904_vm2, %v1674_v63  ;;  %v12424_v13 = vpop.permute.xlu0 %3294  ;;  %v12426_v14 = vpop.permute.xlu1 %3302  ;;  %v12486_v63 = vld [vmem:[%s18720_s4 + $0x8] sm:$0x7]  ;;  %19456 = vst [vmem:[#allocation20_spill] sm:$0xff] %v12505_v19  ;;  %v12549_v39 = vcombine.high %v12505_v19, %v12505_v19 }
  0x91   : > { %11581 = vmatprep.mubr.msk.f32.mxu0 %vm11841_vm1, %v11840_v2  ;;  %v8353_v29 = vrot.slane %v12486_v63, %v12436_v18  ;;  %v12535_v18 = vcombine.high %v12496_v4, %v12496_v4  ;;  %19472 = vst [vmem:[#allocation36_spill] sm:$0xff] %v12566_v50  ;;  %v6823_v52 = vcombine.high %v6821_v33, %v6821_v33  ;;  %v6829_v57 = vrot.slane %v6821_v33, 7 }
  0x92   : > { %19468 = vst [vmem:[#allocation32_spill] sm:$0xff] %v12549_v39 }
  0x93   : > { %19464 = vst [vmem:[#allocation28_spill] sm:$0xff] %v12535_v18  ;;  %v8355_v44 = vcombine.high %v8353_v29, %v8353_v29  ;;  %v8362_v45 = vrot.slane %v8353_v29, %v11937_v10  ;;  %v12589_v29 = vsel %vm12500_vm9, %v6828_v42, %v6829_v57  ;;  %v6832_v61 = vrot.slane %v6823_v52, 7 }
  0x94   : > { %11582 = vmatmul.mubr.msk.f32.gmra.mxu0 %vm1904_vm2, %v1691_v7  ;;  %v12429_v15 = vpop.permute.xlu0 %3306  ;;  %19476 = vst [vmem:[#allocation40_spill] sm:$0xff] %v12589_v29  ;;  %v12619_v52 = vcombine.high %v12562_v48, %v12562_v48  ;;  %v6831_v42 = vrot.slane %v6829_v57, 2  ;;  %v9337_v48 = vrot.slane %v12486_v63, %v12456_v27 }
  0x95   : > { %11584 = vmatprep.mubr.msk.f32.mxu0 %vm11841_vm1, %v11840_v2  ;;  %v12431_v16 = vpop.permute.xlu1 %3310  ;;  %v8369_v31 = vrot.slane %v8355_v44, %v11937_v10  ;;  %v8370_v33 = vcombine.high %v8362_v45, %v8362_v45 }
  0x96   : > { %19437 = vst [vmem:[#allocation3_spill] sm:$0xff] %v12431_v16  ;;  %19480 = vst [vmem:[#allocation44_spill] sm:$0xff] %v12619_v52 }
  0x97   : > { %v8371_v44 = vcombine.high %v8369_v31, %v8369_v31  ;;  %v8374_v62 = vrot.slane %v8370_v33, 7 }
  0x98   : > { %11585 = vmatmul.mubr.msk.f32.gmra.mxu0 %vm1904_vm2, %v1708_v12  ;;  %v12433_v17 = vpop.permute.xlu0 %3314  ;;  %v5283_v12 = vrot.slane %v5281_v53, 2  ;;  %v12623_v53 = vrot.slane %v8362_v45, 7 }
  0x99   : > { %19438 = vst [vmem:[#allocation4_spill] sm:$0xff] %v12433_v17  ;;  %v8376_v3 = vrot.slane %v8374_v62, 2  ;;  %v8380_v57 = vrot.slane %v8371_v44, 7  ;;  %v9339_v17 = vcombine.high %v9337_v48, %v9337_v48 }
  0x9a   : > { %v12545_v38 = vsel %vm12500_vm9, %v5283_v12, %v5284_v60  ;;  %v12573_v60 = vrot.slane %v7789_v28, %v11937_v10  ;;  %v12585_v12 = vsel %vm12500_vm9, %v6825_v41, %v6826_v26  ;;  %v12592_v28 = vrot.slane %v7791_v43, %v11937_v10  ;;  %19481 = vst [vmem:[#allocation45_spill] sm:$0xff] %v12623_v53 }
  0x9b   : > { %19467 = vst [vmem:[#allocation31_spill] sm:$0xff] %v12545_v38  ;;  %19475 = vst [vmem:[#allocation39_spill] sm:$0xff] %v12585_v12  ;;  %v8071_v43 = vrot.slane %v12486_v63, %v12452_v25  ;;  %v12629_v26 = vrot.slane %v6832_v61, 2  ;;  %v8377_v12 = vrot.slane %v8369_v31, 7  ;;  %v12651_v25 = vsel %vm12500_vm9, %v6831_v42, %v6832_v61 }
  0x9c   : > { %v12441_v2 = vpop.permute.xlu1 %3318  ;;  %19473 = vst [vmem:[#allocation37_spill] sm:$0xff] %v12573_v60  ;;  %19477 = vst [vmem:[#allocation41_spill] sm:$0xff] %v12592_v28  ;;  %v8373_v45 = vrot.slane %v12623_v53, 2  ;;  %v12664_v27 = vcombine.high %v12573_v60, %v12573_v60  ;;  %v12674_v53 = vcombine.high %v12592_v28, %v12592_v28 }
  0x9d   : > { %19439 = vst [vmem:[#allocation5_spill] sm:$0xff] %v12441_v2  ;;  %19483 = vst [vmem:[#allocation47_spill] sm:$0xff] %v12629_v26  ;;  %v8073_v52 = vcombine.high %v8071_v43, %v8071_v43  ;;  %v12660_v31 = vsel %vm12500_vm9, %v12629_v26, %v12507_v20  ;;  %v8379_v33 = vrot.slane %v8377_v12, 2  ;;  %v12683_v61 = vrot.slane %v8071_v43, %v11937_v10 }
  0x9e   : > { %19485 = vst [vmem:[#allocation49_spill] sm:$0xff] %v12651_v25  ;;  %19487 = vst [vmem:[#allocation51_spill] sm:$0xff] %v12660_v31  ;;  %v12690_v44 = vsel %vm12500_vm9, %v8373_v45, %v8374_v62  ;;  %v12694_v28 = vsel %vm12500_vm9, %v8376_v3, %v8377_v12  ;;  %v12696_v31 = vrot.slane %v8380_v57, 2  ;;  %v12712_v3 = vrot.slane %v9339_v17, %v11937_v10 }
  0x9f   : > { %19488 = vst [vmem:[#allocation52_spill] sm:$0xff] %v12664_v27  ;;  %19489 = vst [vmem:[#allocation53_spill] sm:$0xff] %v12674_v53  ;;  %v12686_v42 = vrot.slane %v8073_v52, %v11937_v10  ;;  %v12699_v27 = vrot.slane %v9337_v48, %v11937_v10  ;;  %v12709_v62 = vsel %vm12500_vm9, %v8379_v33, %v8380_v57 }
  0xa0   : > { %v12444_v21 = vpop.permute.xlu0 %3322  ;;  %19491 = vst [vmem:[#allocation55_spill] sm:$0xff] %v12683_v61  ;;  %19493 = vst [vmem:[#allocation57_spill] sm:$0xff] %v12690_v44  ;;  %v12812_v17 = vcombine.high %v12712_v3, %v12712_v3 }
  0xa1   : > { %19440 = vst [vmem:[#allocation6_spill] sm:$0xff] %v12444_v21  ;;  %19492 = vst [vmem:[#allocation56_spill] sm:$0xff] %v12686_v42 }
  0xa2   : > { %19494 = vst [vmem:[#allocation58_spill] sm:$0xff] %v12694_v28  ;;  %19495 = vst [vmem:[#allocation59_spill] sm:$0xff] %v12696_v31 }
  0xa3   : > { %19496 = vst [vmem:[#allocation60_spill] sm:$0xff] %v12699_v27  ;;  %19498 = vst [vmem:[#allocation62_spill] sm:$0xff] %v12709_v62 }
  0xa4   : > { %19499 = vst [vmem:[#allocation63_spill] sm:$0xff] %v12712_v3  ;;  %19505 = vst [vmem:[#allocation69_spill] sm:$0xff] %v12812_v17 }
  0xa5   : > { %v12446_v22 = vpop.permute.xlu1 %3326 }
  0xa6   : > { %19441 = vst [vmem:[#allocation7_spill] sm:$0xff] %v12446_v22 }
  0xa9   : > { %v12459_v35 = vpop.permute.xlu0 %3330 }
  0xaa   : > { %19442 = vst [vmem:[#allocation8_spill] sm:$0xff] %v12459_v35 }
  0xac   : > { %v12463_v40 = vpop.permute.xlu1 %3334 }
  0xad   : > { %19443 = vst [vmem:[#allocation9_spill] sm:$0xff] %v12463_v40 }
  0xb1   : > { %v12469_v51 = vpop.permute.xlu0 %3338 }
  0xb2   : > { %19445 = vst [vmem:[#allocation11_spill] sm:$0xff] %v12469_v51 }
  0xb6   : > { %v12480_v59 = vpop.permute.xlu1 %3342 }
  0xb7   : > { %19449 = vst [vmem:[#allocation15_spill] sm:$0xff] %v12480_v59  ;;  %v12498_v7 = vpop.permute.xlu0 %3346 }
  0xb8   : > { %19453 = vst [vmem:[#allocation19_spill] sm:$0xff] %v12498_v7 }
  0xbb   : > { %v12537_v36 = vpop.permute.xlu1 %3350 }
  0xbc   : > { %19465 = vst [vmem:[#allocation29_spill] sm:$0xff] %v12537_v36 }
  0xbd   : > { %v12553_v46 = vpop.permute.xlu0 %3354 }
  0xbe   : > { %19469 = vst [vmem:[#allocation33_spill] sm:$0xff] %v12553_v46 }
  0xc0   : > { %v12581_v9 = vpop.permute.xlu1 %3358 }
  0xc1   : > { %19474 = vst [vmem:[#allocation38_spill] sm:$0xff] %v12581_v9 }
  0xc2   : > { %v12601_v41 = vpop.permute.xlu0 %3362 }
  0xc3   : > { %19478 = vst [vmem:[#allocation42_spill] sm:$0xff] %v12601_v41 }
  0xc4   : > { %v12615_v54 = vpop.permute.xlu1 %3366 }
  0xc5   : > { %19479 = vst [vmem:[#allocation43_spill] sm:$0xff] %v12615_v54 }
  0xc6   : > { %v12627_v29 = vpop.permute.xlu0 %3370 }
  0xc7   : > { %19482 = vst [vmem:[#allocation46_spill] sm:$0xff] %v12627_v29 }
  0xc8   : > { %v12647_v63 = vpop.permute.xlu1 %3374 }
  0xc9   : > { %19484 = vst [vmem:[#allocation48_spill] sm:$0xff] %v12647_v63 }
  0xca   : > { %v12654_v16 = vpop.permute.xlu0 %3378 }
  0xcb   : > { %19486 = vst [vmem:[#allocation50_spill] sm:$0xff] %v12654_v16 }
  0xcc   : > { %v12680_v25 = vpop.permute.xlu1 %3382 }
  0xcd   : > { %19490 = vst [vmem:[#allocation54_spill] sm:$0xff] %v12680_v25  ;;  %v12843_v25 = vld [vmem:[%s18719_s3] ss:$0 sm:$0xff] }
  0xce   : > { %v12705_v42 = vpop.permute.xlu0 %3386  ;;  %19507 = vst [vmem:[#allocation71_spill] sm:$0xff] %v12843_v25 }
  0xcf   : > { %19497 = vst [vmem:[#allocation61_spill] sm:$0xff] %v12705_v42 }
  0xd0   : > { %v12730_v12 = vpop.permute.xlu1 %3390 }
  0xd1   : > { %19500 = vst [vmem:[#allocation64_spill] sm:$0xff] %v12730_v12 }
  0xd2   : > { %v12748_v27 = vpop.permute.xlu0 %3394 }
  0xd3   : > { %19501 = vst [vmem:[#allocation65_spill] sm:$0xff] %v12748_v27 }
  0xd4   : > { %v12766_v7 = vpop.permute.xlu1 %3398 }
  0xd5   : > { %19502 = vst [vmem:[#allocation66_spill] sm:$0xff] %v12766_v7 }
  0xd6   : > { %v12784_v9 = vpop.permute.xlu0 %3402 }
  0xd7   : > { %19503 = vst [vmem:[#allocation67_spill] sm:$0xff] %v12784_v9 }
  0xd8   : > { %v12802_v54 = vpop.permute.xlu1 %3406 }
  0xd9   : > { %19504 = vst [vmem:[#allocation68_spill] sm:$0xff] %v12802_v54 }
  0xda   : > { %v12822_v43 = vpop.permute.xlu0 %3410 }
  0xdb   : > { %19506 = vst [vmem:[#allocation70_spill] sm:$0xff] %v12822_v43 }
  0xdc   : > { %v12845_v16 = vpop.permute.xlu1 %3414 }
  0xdd   : > { %19508 = vst [vmem:[#allocation72_spill] sm:$0xff] %v12845_v16 }
  0xde   : > { %v2202_v45 = vpop.f32.mrf.mxu1  ;;  %v12867_v29 = vpop.permute.xlu0 %3418 }
  0xdf   : > { %v2203_v48 = vadd.f32 %v12843_v25, %v2202_v45  ;;  %v2057_v7 = vpop.f32.mrf.mxu0  ;;  %19509 = vst [vmem:[#allocation73_spill] sm:$0xff] %v12867_v29 }
  0xe0   : > { %v11589_v63 = vpop.f32.mrf.mxu1  ;;  %v2058_v57 = vadd.f32 %v12843_v25, %v2057_v7  ;;  %v12880_v41 = vpop.permute.xlu1 %3422 }
  0xe1   : > { %v2290_v42 = vmax.f32 %v2203_v48, 0.0  ;;  %v11502_v33 = vpop.f32.mrf.mxu0  ;;  %19510 = vst [vmem:[#allocation74_spill] sm:$0xff] %v12880_v41 }
  0xe2   : > { %v2207_v54 = vpop.f32.mrf.mxu1  ;;  %v2261_v48 = vmax.f32 %v2058_v57, 0.0  ;;  %v12893_v43 = vpop.permute.xlu0 %3426 }
  0xe3   : > { %v2331_v45 = vmin.f32 %v2290_v42, 6.0  ;;  %v2208_v9 = vadd.f32 %v12843_v25, %v2207_v54  ;;  %v2062_v33 = vpop.f32.mrf.mxu0  ;;  %19511 = vst [vmem:[#allocation75_spill] sm:$0xff] %v12893_v43  ;;  %v19513_v42 = vrot.slane %v12412_v6, %v12472_v55 }
  0xe4   : > { %v11592_v27 = vpop.f32.mrf.mxu1  ;;  %v2302_v54 = vmin.f32 %v2261_v48, 6.0  ;;  %v2063_v63 = vadd.f32 %v12843_v25, %v2062_v33 }
  0xe5   : > { %v2877_v7 = vcombine.high %v2331_v45, %v2331_v45  ;;  %v12891_v57 = vrot.slane %v2331_v45, %v11937_v10  ;;  %v2291_v16 = vmax.f32 %v2208_v9, 0.0  ;;  %v11505_v27 = vpop.f32.mrf.mxu0 }
  0xe6   : > { %v2384_v45 = vcombine.high %v2302_v54, %v2302_v54  ;;  %v2391_v9 = vrot.slane %v2302_v54, %v11937_v10  ;;  %v2212_v46 = vpop.f32.mrf.mxu1  ;;  %v2262_v41 = vmax.f32 %v2063_v63, 0.0 }
  0xe7   : > { %v12903_v29 = vrot.slane %v2877_v7, %v11937_v10  ;;  %v2332_v12 = vmin.f32 %v2291_v16, 6.0  ;;  %v2213_v52 = vadd.f32 %v12843_v25, %v2212_v46 }
  0xe8   : > { %v12911_v36 = vpop.f32.mrf.mxu0  ;;  %v2398_v27 = vrot.slane %v2384_v45, %v11937_v10  ;;  %v2399_v7 = vcombine.high %v2391_v9, %v2391_v9  ;;  %v4800_v54 = vmul.f32 %v19513_v42, %v2391_v9  ;;  %v11595_v59 = vpop.f32.mrf.mxu1  ;;  %v2303_v46 = vmin.f32 %v2262_v41, 6.0 }
  0xe9   : > { %19512 = vst [vmem:[#allocation76_spill] sm:$0xff] %v12903_v29  ;;  %v2894_v16 = vcombine.high %v2332_v12, %v2332_v12  ;;  %v12922_v63 = vrot.slane %v2332_v12, %v11937_v10  ;;  %v19515_v45 = vrot.slane %v12412_v6, %v12475_v56  ;;  %v19516_v42 = vrot.slane %v12412_v6, %v12478_v58 }
  0xea   : > { %v11508_v3 = vpop.f32.mrf.mxu0  ;;  %v2400_v28 = vcombine.high %v2398_v27, %v2398_v27  ;;  %v2292_v48 = vmax.f32 %v2213_v52, 0.0  ;;  %v4991_v33 = vmul.f32 %v12489_v0, %v4800_v54  ;;  %v5294_v43 = vmul.f32 %v12467_v49, %v4800_v54 }
  0xeb   : > { %19514 = vst [vmem:[#allocation77_spill] sm:$0xff] %v12922_v63  ;;  %v4801_v44 = vmul.f32 %v19515_v45, %v2399_v7  ;;  %v4802_v9 = vmul.f32 %v19516_v42, %v2398_v27  ;;  %v12930_v59 = vpop.f32.mrf.mxu1  ;;  %v12935_v12 = vrot.slane %v2894_v16, %v11937_v10  ;;  %v2401_v41 = vcombine.high %v2303_v46, %v2303_v46 }
  0xec   : > { %v19518_v3 = vrot.slane %v12412_v6, %v12510_v23  ;;  %v12944_v27 = vpop.f32.mrf.mxu0  ;;  %v11337_v51 = vrot.slane %v5294_v43, 9 }
  0xed   : > { %19517 = vst [vmem:[#allocation78_spill] sm:$0xff] %v12935_v12  ;;  %v4992_v7 = vmul.f32 %v12523_v34, %v4801_v44  ;;  %v5295_v45 = vmul.f32 %v12531_v24, %v4801_v44  ;;  %v11598_v42 = vpop.f32.mrf.mxu1  ;;  %v4993_v54 = vmul.f32 %v12492_v1, %v4802_v9  ;;  %v5296_v16 = vmul.f32 %v12541_v37, %v4802_v9 }
  0xee   : > { %v4803_v62 = vmul.f32 %v19518_v3, %v2400_v28  ;;  %v6264_v61 = vmul.f32 %v12496_v4, %v4801_v44  ;;  %v6265_v40 = vmul.f32 %v12535_v18, %v4802_v9  ;;  %v11511_v35 = vpop.f32.mrf.mxu0  ;;  %v2408_v42 = vrot.slane %v2303_v46, %v11937_v10 }
  0xef   : > { %v5584_v3 = vrot.slane %v5295_v45, 7  ;;  %v5587_v17 = vrot.slane %v5296_v16, 7  ;;  %v2415_v22 = vrot.slane %v2401_v41, %v11937_v10  ;;  %v12955_v21 = vpop.f32.mrf.mxu1  ;;  %v19519_v46 = vrot.slane %v12424_v13, %v12472_v55 }
  0xf0   : > { %v4994_v6 = vmul.f32 %v12527_v5, %v4803_v62  ;;  %v5297_v28 = vmul.f32 %v12545_v38, %v4803_v62  ;;  %v6266_v52 = vmul.f32 %v12505_v19, %v4803_v62  ;;  %v2416_v35 = vcombine.high %v2408_v42, %v2408_v42 }
  0xf1   : > { %v5585_v44 = vsel %vm12500_vm9, %v11337_v51, %v5584_v3  ;;  %v5586_v43 = vrot.slane %v5584_v3, 2  ;;  %v5589_v63 = vrot.slane %v5587_v17, 2  ;;  %v2417_v16 = vcombine.high %v2415_v22, %v2415_v22  ;;  %v11601_v29 = vpop.f32.mrf.mxu1 }
  0xf2   : > { %v5590_v2 = vrot.slane %v5297_v28, 7  ;;  %v6110_v9 = vadd.f32 %v5585_v44, %v4991_v33  ;;  %v4804_v41 = vmul.f32 %v19519_v46, %v2408_v42  ;;  %v19520_v51 = vrot.slane %v12424_v13, %v12478_v58  ;;  %v12969_v31 = vpop.f32.mrf.mxu0 }
  0xf3   : > { %v5588_v62 = vsel %vm12500_vm9, %v5586_v43, %v5587_v17  ;;  %v2333_v28 = vmin.f32 %v2292_v48, 6.0  ;;  %19521 = vst [vmem:[#allocation79_spill] sm:$0xff] %v12969_v31  ;;  %v19522_v29 = vrot.slane %v12424_v13, %v12475_v56  ;;  %v19523_v42 = vrot.slane %v12424_v13, %v12510_v23 }
  0xf4   : > { %v4806_v3 = vmul.f32 %v19520_v51, %v2415_v22  ;;  %v5591_v33 = vsel %vm12500_vm9, %v5589_v63, %v5590_v2  ;;  %v5592_v44 = vrot.slane %v5590_v2, 2  ;;  %v6111_v45 = vadd.f32 %v5588_v62, %v4992_v7  ;;  %v11514_v48 = vpop.f32.mrf.mxu0  ;;  %v12982_v51 = vpop.f32.mrf.mxu1 }
  0xf5   : > { %v4805_v17 = vmul.f32 %v19522_v29, %v2416_v35  ;;  %v6112_v43 = vadd.f32 %v5591_v33, %v4993_v54  ;;  %v12976_v12 = vadd.f32 %v6264_v61, %v6110_v9  ;;  %v4807_v46 = vmul.f32 %v19523_v42, %v2417_v16  ;;  %19524 = vst [vmem:[#allocation80_spill] sm:$0xff] %v12982_v51  ;;  %v12996_v33 = vpop.permute.xlu1 %3430 }
  0xf6   : > { %v4995_v22 = vmul.f32 %v12489_v0, %v4804_v41  ;;  %v12984_v31 = vadd.f32 %v6265_v40, %v6111_v45  ;;  %v4997_v2 = vmul.f32 %v12492_v1, %v4806_v3  ;;  %v5298_v63 = vmul.f32 %v12559_v47, %v4804_v41  ;;  %v11604_v35 = vpop.f32.mrf.mxu1  ;;  %19527 = vst [vmem:[#allocation83_spill] sm:$0xff] %v12996_v33 }
  0xf7   : > { %v5299_v7 = vmul.f32 %v12531_v24, %v4805_v17  ;;  %v12989_v54 = vadd.f32 %v6266_v52, %v6112_v43  ;;  %v4996_v61 = vmul.f32 %v12523_v34, %v4805_v17  ;;  %v5300_v13 = vmul.f32 %v12541_v37, %v4806_v3  ;;  %v12998_v29 = vpop.f32.mrf.mxu0 }
  0xf8   : > { %19525 = vst [vmem:[#allocation81_spill] sm:$0xff] %v12984_v31  ;;  %v5301_v9 = vmul.f32 %v12545_v38, %v4807_v46  ;;  %v5593_v16 = vrot.slane %v5298_v63, 7  ;;  %v6267_v40 = vmul.f32 %v12549_v39, %v4804_v41  ;;  %v6268_v45 = vmul.f32 %v12496_v4, %v4805_v17  ;;  %19528 = vst [vmem:[#allocation84_spill] sm:$0xff] %v12998_v29 }
  0xf9   : > { %19526 = vst [vmem:[#allocation82_spill] sm:$0xff] %v12989_v54  ;;  %v5596_v62 = vrot.slane %v5299_v7, 7  ;;  %v5599_v42 = vrot.slane %v5300_v13, 7  ;;  %v6269_v43 = vmul.f32 %v12535_v18, %v4806_v3  ;;  %v2911_v48 = vcombine.high %v2333_v28, %v2333_v28  ;;  %v13001_v54 = vpop.f32.mrf.mxu1  ;;  %v11517_v31 = vpop.f32.mrf.mxu0 }
  0xfa   : > { %v5602_v52 = vrot.slane %v5301_v9, 7  ;;  %19529 = vst [vmem:[#allocation85_spill] sm:$0xff] %v13001_v54  ;;  %v5594_v35 = vsel %vm12500_vm9, %v5592_v44, %v5593_v16  ;;  %v5595_v63 = vrot.slane %v5593_v16, 2  ;;  %v6270_v41 = vmul.f32 %v12505_v19, %v4807_v46  ;;  %v13020_v54 = vpop.permute.xlu0 %3434 }
  0xfb   : > { %v5598_v7 = vrot.slane %v5596_v62, 2  ;;  %v5601_v17 = vrot.slane %v5599_v42, 2  ;;  %v6113_v51 = vadd.f32 %v5594_v35, %v4994_v6  ;;  %v13007_v47 = vrot.slane %v2333_v28, %v11937_v10  ;;  %v11607_v3 = vpop.f32.mrf.mxu1  ;;  %19532 = vst [vmem:[#allocation88_spill] sm:$0xff] %v13020_v54 }
  0xfc   : > { %v13010_v13 = vrot.slane %v2911_v48, %v11937_v10  ;;  %v5597_v9 = vsel %vm12500_vm9, %v5595_v63, %v5596_v62  ;;  %v13016_v16 = vrot.slane %v5602_v52, 2  ;;  %v2068_v31 = vadd.f32 %v12843_v25, %v12911_v36  ;;  %v13022_v6 = vpop.f32.mrf.mxu0  ;;  %v13032_v36 = vpop.permute.xlu1 %3438 }
  0xfd   : > { %19530 = vst [vmem:[#allocation86_spill] sm:$0xff] %v13007_v47  ;;  %v5600_v44 = vsel %vm12500_vm9, %v5598_v7, %v5599_v42  ;;  %19533 = vst [vmem:[#allocation89_spill] sm:$0xff] %v13022_v6  ;;  %v5603_v28 = vsel %vm12500_vm9, %v5601_v17, %v5602_v52  ;;  %v6114_v48 = vadd.f32 %v5597_v9, %v4995_v22 }
  0xfe   : > { %19531 = vst [vmem:[#allocation87_spill] sm:$0xff] %v13010_v13  ;;  %v6115_v35 = vadd.f32 %v5600_v44, %v4996_v61  ;;  %v13026_v3 = vadd.f32 %v6267_v40, %v6113_v51  ;;  %v6116_v62 = vadd.f32 %v5603_v28, %v4997_v2  ;;  %v2263_v7 = vmax.f32 %v2068_v31, 0.0  ;;  %19534 = vst [vmem:[#allocation90_spill] sm:$0xff] %v13032_v36  ;;  %v11520_v29 = vpop.f32.mrf.mxu0  ;;  %v13047_v17 = vpop.f32.mrf.mxu1 }
  0xff   : > { %v13034_v47 = vadd.f32 %v6268_v45, %v6114_v48  ;;  %v4998_v22 = vmul.f32 %v12527_v5, %v4807_v46  ;;  %19536 = vst [vmem:[#allocation92_spill] sm:$0xff] %v13047_v17  ;;  %v2218_v46 = vadd.f32 %v12843_v25, %v12930_v59  ;;  %v2073_v28 = vadd.f32 %v12843_v25, %v12944_v27  ;;  %v3443_v48 = vpop.permute.xlu0 %3442 }
 0x100   : > { %v13036_v6 = vadd.f32 %v6269_v43, %v6115_v35  ;;  %v13041_v2 = vadd.f32 %v6270_v41, %v6116_v62  ;;  %v2304_v61 = vmin.f32 %v2263_v7, 6.0  ;;  %v13057_v41 = vpop.f32.mrf.mxu0  ;;  %v11610_v35 = vpop.f32.mrf.mxu1  ;;  %v4322_v7 = vrot.slane %v3443_v48, %v12472_v55 }
 0x101   : > { %19537 = vst [vmem:[#allocation93_spill] sm:$0xff] %v13057_v41  ;;  %v2293_v59 = vmax.f32 %v2218_v46, 0.0  ;;  %v13069_v43 = vadd.f32 %v12843_v25, %v12955_v21  ;;  %v19538_v31 = vrot.slane %v12419_v11, %v12472_v55  ;;  %v2264_v52 = vmax.f32 %v2073_v28, 0.0  ;;  %v13075_v35 = vpop.permute.xlu1 %3446 }
 0x102   : > { %19535 = vst [vmem:[#allocation91_spill] sm:$0xff] %v13041_v2  ;;  %v2418_v9 = vcombine.high %v2304_v61, %v2304_v61  ;;  %v2425_v44 = vrot.slane %v2304_v61, %v11937_v10  ;;  %v11523_v29 = vpop.f32.mrf.mxu0  ;;  %v13080_v48 = vmul.f32 %v4322_v7, %v12891_v57  ;;  %v19541_v40 = vrot.slane %v12426_v14, %v12472_v55 }
 0x103   : > { %v13077_v46 = vpop.f32.mrf.mxu1  ;;  %v2334_v62 = vmin.f32 %v2293_v59, 6.0 }
 0x104   : > { %v2432_v61 = vrot.slane %v2418_v9, %v11937_v10  ;;  %v2433_v45 = vcombine.high %v2425_v44, %v2425_v44  ;;  %v4808_v27 = vmul.f32 %v19538_v31, %v2425_v44  ;;  %19539 = vst [vmem:[#allocation94_spill] sm:$0xff] %v13077_v46  ;;  %19540 = vst [vmem:[#allocation95_spill] sm:$0xff] %v13080_v48 }
 0x105   : > { %v19542_v44 = vrot.slane %v12426_v14, %v12475_v56  ;;  %v11613_v59 = vpop.f32.mrf.mxu1  ;;  %v2928_v51 = vcombine.high %v2334_v62, %v2334_v62  ;;  %v13094_v63 = vrot.slane %v2334_v62, %v11937_v10  ;;  %v13098_v29 = vpop.f32.mrf.mxu0 }
 0x106   : > { %v2434_v9 = vcombine.high %v2432_v61, %v2432_v61  ;;  %v4809_v11 = vmul.f32 %v19541_v40, %v2433_v45  ;;  %v5302_v28 = vmul.f32 %v12515_v30, %v4808_v27  ;;  %v6271_v7 = vmul.f32 %v12549_v39, %v4808_v27  ;;  %19544 = vst [vmem:[#allocation97_spill] sm:$0xff] %v13098_v29 }
 0x107   : > { %v4810_v31 = vmul.f32 %v19542_v44, %v2432_v61  ;;  %19543 = vst [vmem:[#allocation96_spill] sm:$0xff] %v13094_v63  ;;  %v19545_v40 = vrot.slane %v12426_v14, %v12478_v58  ;;  %v2305_v59 = vmin.f32 %v2264_v52, 6.0  ;;  %v11526_v42 = vpop.f32.mrf.mxu0 }
 0x108   : > { %v4999_v61 = vmul.f32 %v12489_v0, %v4809_v11  ;;  %v5303_v44 = vmul.f32 %v12467_v49, %v4809_v11  ;;  %v5605_v21 = vrot.slane %v5302_v28, 7  ;;  %v6546_v36 = vmul.f32 %v12518_v32, %v4809_v11  ;;  %v13117_v29 = vpop.f32.mrf.mxu1 }
 0x109   : > { %v13103_v45 = vmul.f32 %v19545_v40, %v2434_v9  ;;  %v5000_v27 = vmul.f32 %v12523_v34, %v4810_v31  ;;  %v5304_v62 = vmul.f32 %v12531_v24, %v4810_v31  ;;  %v6272_v33 = vmul.f32 %v12496_v4, %v4810_v31  ;;  %19547 = vst [vmem:[#allocation99_spill] sm:$0xff] %v13117_v29 }
 0x10a   : > { %v11338_v40 = vrot.slane %v5303_v44, 9  ;;  %v5606_v52 = vsel %vm12500_vm9, %v13016_v16, %v5605_v21  ;;  %v13127_v46 = vmul.f32 %v12566_v50, %v4810_v31  ;;  %v6674_v44 = vadd.f32 %v6546_v36, %v12976_v12  ;;  %v13131_v2 = vpop.f32.mrf.mxu0  ;;  %v11616_v29 = vpop.f32.mrf.mxu1  ;;  %v19554_v12 = vld [vmem:[#allocation35_spill] sm:$0xff] }
 0x10b   : > { %19546 = vst [vmem:[#allocation98_spill] sm:$0xff] %v13103_v45  ;;  %v13112_v54 = vmul.f32 %v12492_v1, %v13103_v45  ;;  %v5305_v9 = vmul.f32 %v12541_v37, %v13103_v45  ;;  %v5609_v28 = vrot.slane %v5304_v62, 7  ;;  %v13124_v42 = vmul.f32 %v12535_v18, %v13103_v45  ;;  %19550 = vst [vmem:[#allocation102_spill] sm:$0xff] %v13131_v2  ;;  %v19551_v62 = vld [vmem:[#allocation39_spill] sm:$0xff] }
 0x10c   : > { %19549 = vst [vmem:[#allocation101_spill] sm:$0xff] %v13127_v46  ;;  %v6117_v17 = vadd.f32 %v5606_v52, %v4998_v22  ;;  %v6842_v13 = vmul.f32 %v12507_v20, %v4809_v11  ;;  %v6843_v25 = vmul.f32 %v19551_v62, %v4810_v31  ;;  %v13144_v36 = vmul.f32 %v19554_v12, %v13103_v45  ;;  %v11529_v11 = vpop.f32.mrf.mxu0  ;;  %v13146_v29 = vpop.f32.mrf.mxu1 }
 0x10d   : > { %19548 = vst [vmem:[#allocation100_spill] sm:$0xff] %v13124_v42  ;;  %v5612_v41 = vrot.slane %v5305_v9, 7  ;;  %v5610_v16 = vsel %vm12500_vm9, %v11338_v40, %v5609_v28  ;;  %v5611_v21 = vrot.slane %v5609_v28, 2  ;;  %v19552_v42 = vld [vmem:[#allocation40_spill] sm:$0xff]  ;;  %19556 = vst [vmem:[#allocation105_spill] sm:$0xff] %v13146_v29 }
 0x10e   : > { %v13138_v49 = vmul.f32 %v19552_v42, %v13103_v45  ;;  %v6118_v46 = vadd.f32 %v5610_v16, %v4999_v61  ;;  %v13140_v9 = vadd.f32 %v6271_v7, %v6117_v17  ;;  %19555 = vst [vmem:[#allocation104_spill] sm:$0xff] %v13144_v36  ;;  %v11353_v22 = vrot.slane %v6842_v13, 9  ;;  %v11619_v13 = vpop.f32.mrf.mxu1 }
 0x10f   : > { %v5613_v40 = vsel %vm12500_vm9, %v5611_v21, %v5612_v41  ;;  %v5614_v52 = vrot.slane %v5612_v41, 2  ;;  %v7132_v28 = vrot.slane %v6843_v25, 7  ;;  %v7812_v17 = vmul.f32 %v12573_v60, %v4810_v31 }
 0x110   : > { %19553 = vst [vmem:[#allocation103_spill] sm:$0xff] %v13138_v49  ;;  %v13151_v20 = vadd.f32 %v5613_v40, %v5000_v27  ;;  %v13153_v61 = vadd.f32 %v6272_v33, %v6118_v46  ;;  %v13157_v7 = vrot.slane %v2928_v51, %v11937_v10  ;;  %v2435_v41 = vcombine.high %v2305_v59, %v2305_v59 }
 0x111   : > { %v7133_v16 = vsel %vm12500_vm9, %v11353_v22, %v7132_v28  ;;  %v2442_v25 = vrot.slane %v2305_v59, %v11937_v10  ;;  %v13164_v11 = vrot.slane %v7132_v28, 2  ;;  %v13170_v51 = vmul.f32 %v12515_v30, %v13080_v48 }
 0x112   : > { %19557 = vst [vmem:[#allocation106_spill] sm:$0xff] %v13151_v20  ;;  %19558 = vst [vmem:[#allocation107_spill] sm:$0xff] %v13153_v61  ;;  %v7658_v27 = vadd.f32 %v7133_v16, %v6674_v44  ;;  %v2449_v46 = vrot.slane %v2435_v41, %v11937_v10  ;;  %v19562_v22 = vrot.slane %v12426_v14, %v12510_v23 }
 0x113   : > { %19559 = vst [vmem:[#allocation108_spill] sm:$0xff] %v13157_v7  ;;  %19560 = vst [vmem:[#allocation109_spill] sm:$0xff] %v13164_v11  ;;  %v2450_v31 = vcombine.high %v2442_v25, %v2442_v25  ;;  %v13178_v59 = vmul.f32 %v12549_v39, %v13080_v48  ;;  %v13185_v13 = vmul.f32 %v12629_v26, %v13080_v48 }
 0x114   : > { %19561 = vst [vmem:[#allocation110_spill] sm:$0xff] %v13170_v51  ;;  %v4812_v40 = vmul.f32 %v19562_v22, %v2442_v25  ;;  %v13180_v28 = vadd.f32 %v7812_v17, %v7658_v27  ;;  %v13189_v16 = vmul.f32 %v12674_v53, %v13080_v48  ;;  %v2451_v41 = vcombine.high %v2449_v46, %v2449_v46  ;;  %v19570_v22 = vld [vmem:[#allocation59_spill] sm:$0xff] }
 0x115   : > { %19563 = vst [vmem:[#allocation111_spill] sm:$0xff] %v13178_v59  ;;  %19565 = vst [vmem:[#allocation113_spill] sm:$0xff] %v13185_v13  ;;  %v19567_v14 = vrot.slane %v12429_v15, %v12472_v55  ;;  %v19569_v17 = vrot.slane %v12429_v15, %v12475_v56  ;;  %v13201_v44 = vmul.f32 %v19570_v22, %v13080_v48  ;;  %v19572_v59 = vld [vmem:[#allocation44_spill] sm:$0xff]  ;;  %v19575_v48 = vld [vmem:[#allocation49_spill] sm:$0xff] }
 0x116   : > { %19564 = vst [vmem:[#allocation112_spill] sm:$0xff] %v13180_v28  ;;  %19566 = vst [vmem:[#allocation114_spill] sm:$0xff] %v13189_v16  ;;  %v5002_v2 = vmul.f32 %v12527_v5, %v4812_v40  ;;  %v5306_v33 = vmul.f32 %v12545_v38, %v4812_v40  ;;  %v6274_v21 = vmul.f32 %v12505_v19, %v4812_v40 }
 0x117   : > { %v13194_v25 = vmul.f32 %v19567_v14, %v2450_v31  ;;  %v4814_v27 = vmul.f32 %v19569_v17, %v2449_v46  ;;  %19571 = vst [vmem:[#allocation116_spill] sm:$0xff] %v13201_v44  ;;  %v6549_v51 = vmul.f32 %v19572_v59, %v4812_v40  ;;  %v19573_v31 = vrot.slane %v12429_v15, %v12478_v58  ;;  %v19574_v46 = vld [vmem:[#allocation34_spill] sm:$0xff] }
 0x118   : > { %v13215_v61 = vmul.f32 %v19575_v48, %v4812_v40  ;;  %v5615_v45 = vrot.slane %v5306_v33, 7 }
 0x119   : > { %19568 = vst [vmem:[#allocation115_spill] sm:$0xff] %v13194_v25  ;;  %v4815_v14 = vmul.f32 %v19573_v31, %v2451_v41  ;;  %v5003_v16 = vmul.f32 %v12489_v0, %v13194_v25  ;;  %v5307_v17 = vmul.f32 %v19574_v46, %v13194_v25  ;;  %v5004_v20 = vmul.f32 %v12523_v34, %v4814_v27 }
 0x11a   : > { %19576 = vst [vmem:[#allocation117_spill] sm:$0xff] %v13215_v61  ;;  %v5308_v28 = vmul.f32 %v12531_v24, %v4814_v27  ;;  %v6275_v11 = vmul.f32 %v12549_v39, %v13194_v25  ;;  %v6276_v36 = vmul.f32 %v12496_v4, %v4814_v27  ;;  %v5616_v46 = vsel %vm12500_vm9, %v5614_v52, %v5615_v45 }
 0x11b   : > { %v13222_v49 = vmul.f32 %v12492_v1, %v4815_v14  ;;  %v5309_v41 = vmul.f32 %v12541_v37, %v4815_v14  ;;  %v5618_v31 = vrot.slane %v5307_v17, 7  ;;  %v5617_v29 = vrot.slane %v5615_v45, 2 }
 0x11c   : > { %v5621_v7 = vrot.slane %v5308_v28, 7  ;;  %v6550_v34 = vmul.f32 %v12518_v32, %v13194_v25  ;;  %v6120_v22 = vadd.f32 %v5616_v46, %v13112_v54  ;;  %v6551_v1 = vmul.f32 %v12566_v50, %v4814_v27 }
 0x11d   : > { %v5620_v33 = vrot.slane %v5618_v31, 2  ;;  %v5624_v63 = vrot.slane %v5309_v41, 7  ;;  %v5619_v37 = vsel %vm12500_vm9, %v5617_v29, %v5618_v31  ;;  %v13235_v4 = vmul.f32 %v12535_v18, %v4815_v14 }
 0x11e   : > { %v5623_v17 = vrot.slane %v5621_v7, 2  ;;  %v13238_v52 = vadd.f32 %v6549_v51, %v13026_v3  ;;  %v6121_v28 = vadd.f32 %v5619_v37, %v5002_v2  ;;  %v13242_v53 = vadd.f32 %v6274_v21, %v6120_v22  ;;  %v19581_v51 = vld [vmem:[#allocation51_spill] sm:$0xff] }
 0x11f   : > { %19577 = vst [vmem:[#allocation118_spill] sm:$0xff] %v13235_v4  ;;  %v5622_v45 = vsel %vm12500_vm9, %v5620_v33, %v5621_v7  ;;  %v6552_v54 = vmul.f32 %v19554_v12, %v4815_v14  ;;  %v13247_v41 = vrot.slane %v5624_v63, 2  ;;  %v6679_v31 = vadd.f32 %v6551_v1, %v13036_v6  ;;  %v19585_v6 = vld [vmem:[#allocation41_spill] sm:$0xff]  ;;  %v19588_v33 = vld [vmem:[#allocation52_spill] sm:$0xff] }
 0x120   : > { %19578 = vst [vmem:[#allocation119_spill] sm:$0xff] %v13238_v52  ;;  %19579 = vst [vmem:[#allocation120_spill] sm:$0xff] %v13242_v53  ;;  %v5625_v46 = vsel %vm12500_vm9, %v5623_v17, %v5624_v63  ;;  %v6122_v29 = vadd.f32 %v5622_v45, %v5003_v16  ;;  %v6678_v3 = vadd.f32 %v6550_v34, %v13034_v47  ;;  %v18839_v16 = vrot.slane %v13215_v61, 7 }
 0x121   : > { %v13250_v4 = vadd.f32 %v5625_v46, %v5004_v20  ;;  %v13255_v7 = vmul.f32 %v19581_v51, %v13194_v25  ;;  %v6847_v37 = vmul.f32 %v19551_v62, %v4814_v27  ;;  %v13258_v2 = vadd.f32 %v6275_v11, %v6121_v28  ;;  %v19616_v25 = vld [vmem:[#allocation86_spill] sm:$0xff] }
 0x122   : > { %v13260_v21 = vadd.f32 %v6276_v36, %v6122_v29  ;;  %v6848_v63 = vmul.f32 %v19552_v42, %v4815_v14  ;;  %v13266_v22 = vmul.f32 %v19585_v6, %v4812_v40  ;;  %v7816_v34 = vmul.f32 %v12573_v60, %v4814_v27  ;;  %v13283_v27 = vpop.f32.mrf.mxu0 }
 0x123   : > { %19580 = vst [vmem:[#allocation121_spill] sm:$0xff] %v13250_v4  ;;  %19582 = vst [vmem:[#allocation122_spill] sm:$0xff] %v13255_v7  ;;  %v18838_v1 = vrot.slane %v13255_v7, 7  ;;  %v7144_v20 = vrot.slane %v6847_v37, 7  ;;  %v13271_v47 = vrot.slane %v18839_v16, 2  ;;  %v7817_v36 = vmul.f32 %v19588_v33, %v4815_v14 }
 0x124   : > { %19583 = vst [vmem:[#allocation123_spill] sm:$0xff] %v13258_v2  ;;  %19584 = vst [vmem:[#allocation124_spill] sm:$0xff] %v13260_v21  ;;  %v7147_v11 = vrot.slane %v6848_v63, 7  ;;  %v19589_v46 = vmax.f32 %v13069_v43, 0.0  ;;  %v4343_v40 = vrot.slane %v13075_v35, %v12478_v58  ;;  %v4350_v14 = vrot.slane %v13075_v35, %v12510_v23  ;;  %v19594_v43 = vld [vmem:[#allocation76_spill] sm:$0xff]  ;;  %v19601_v2 = vld [vmem:[#allocation10_spill] sm:$0xff] }
 0x125   : > { %19586 = vst [vmem:[#allocation125_spill] sm:$0xff] %v13266_v22  ;;  %19587 = vst [vmem:[#allocation126_spill] sm:$0xff] %v13271_v47  ;;  %v7143_v45 = vrot.slane %v18838_v1, 2  ;;  %v7146_v28 = vrot.slane %v7144_v20, 2  ;;  %v19591_v63 = vcombine.high %v12891_v57, %v12891_v57  ;;  %v19592_v17 = vrot.slane %v13075_v35, %v12472_v55 }
 0x126   : > { %v13279_v29 = vmin.f32 %v19589_v46, 6.0  ;;  %19590 = vst [vmem:[#allocation127_spill] sm:$0xff] %v13283_v27  ;;  %v19595_v46 = vrot.slane %v13075_v35, %v12475_v56  ;;  %v13306_v44 = vrot.slane %v7147_v11, 2  ;;  %v19606_v35 = vld [vmem:[#allocation79_spill] sm:$0xff] }
 0x127   : > { %v13294_v1 = vmul.f32 %v19592_v17, %v19591_v63  ;;  %v7145_v37 = vsel %vm12500_vm9, %v7143_v45, %v7144_v20  ;;  %v7148_v13 = vsel %vm12500_vm9, %v7146_v28, %v7147_v11  ;;  %v11532_v17 = vpop.f32.mrf.mxu0  ;;  %v3451_v20 = vpop.permute.xlu0 %3450  ;;  %v19599_v45 = vld [vmem:[#allocation77_spill] sm:$0xff]  ;;  %v19607_v11 = vld [vmem:[#allocation71_spill] sm:$0xff] }
 0x128   : > { %v13300_v16 = vmul.f32 %v19595_v46, %v19594_v43  ;;  %v13310_v57 = vrot.slane %v13279_v29, %v11937_v10  ;;  %v7662_v63 = vadd.f32 %v7145_v37, %v6678_v3  ;;  %v7663_v21 = vadd.f32 %v7148_v13, %v6679_v31  ;;  %v19604_v37 = vld [vmem:[#allocation21_spill] sm:$0xff] }
 0x129   : > { %19593 = vst [vmem:[#allocation128_spill] sm:$0xff] %v13294_v1  ;;  %v19597_v46 = vcombine.high %v19594_v43, %v19594_v43  ;;  %v13322_v28 = vmul.f32 %v4350_v14, %v19599_v45  ;;  %v5411_v17 = vmul.f32 %v19601_v2, %v13294_v1  ;;  %v13336_v43 = vmul.f32 %v19604_v37, %v13294_v1 }
 0x12a   : > { %19596 = vst [vmem:[#allocation76_spill] sm:$0xff] %v13300_v16  ;;  %v5412_v13 = vmul.f32 %v12531_v24, %v13300_v16  ;;  %v13328_v31 = vadd.f32 %v7816_v34, %v7662_v63  ;;  %v13330_v3 = vadd.f32 %v7817_v36, %v7663_v21  ;;  %v13345_v34 = vmul.f32 %v12518_v32, %v13294_v1 }
 0x12b   : > { %v13317_v4 = vmul.f32 %v4343_v40, %v19597_v46  ;;  %19600 = vst [vmem:[#allocation77_spill] sm:$0xff] %v13322_v28  ;;  %v5095_v40 = vmul.f32 %v12489_v0, %v13294_v1  ;;  %19605 = vst [vmem:[#allocation132_spill] sm:$0xff] %v13336_v43  ;;  %v11350_v46 = vrot.slane %v5411_v17, 9  ;;  %v2078_v28 = vadd.f32 %v19607_v11, %v19606_v35  ;;  %v13366_v22 = vpop.permute.xlu0 %3458 }
 0x12c   : > { %19602 = vst [vmem:[#allocation130_spill] sm:$0xff] %v13328_v31  ;;  %19603 = vst [vmem:[#allocation131_spill] sm:$0xff] %v13330_v3  ;;  %v5909_v14 = vrot.slane %v5412_v13, 7  ;;  %v4357_v21 = vrot.slane %v3451_v20, %v12472_v55  ;;  %v4364_v36 = vrot.slane %v3451_v20, %v12475_v56  ;;  %v4371_v63 = vrot.slane %v3451_v20, %v12478_v58  ;;  %v19614_v3 = vld [vmem:[#allocation78_spill] sm:$0xff] }
 0x12d   : > { %19598 = vst [vmem:[#allocation129_spill] sm:$0xff] %v13317_v4  ;;  %v19608_v4 = vld [vmem:[#allocation91_spill] sm:$0xff]  ;;  %19609 = vst [vmem:[#allocation79_spill] sm:$0xff] %v13345_v34  ;;  %v2265_v16 = vmax.f32 %v2078_v28, 0.0  ;;  %v4378_v35 = vrot.slane %v3451_v20, %v12510_v23  ;;  %v19612_v34 = vcombine.high %v19599_v45, %v19599_v45  ;;  %v19618_v28 = vld [vmem:[#allocation80_spill] sm:$0xff]  ;;  %v19619_v45 = vcombine.high %v19614_v3, %v19614_v3 }
 0x12e   : > { %v13341_v53 = vadd.f32 %v6552_v54, %v19608_v4  ;;  %v5910_v17 = vsel %vm12500_vm9, %v11350_v46, %v5909_v14  ;;  %v13354_v4 = vrot.slane %v5909_v14, 2  ;;  %v13364_v31 = vmul.f32 %v4364_v36, %v19614_v3  ;;  %v3455_v14 = vpop.permute.xlu1 %3454  ;;  %v19621_v36 = vld [vmem:[#allocation84_spill] sm:$0xff] }
 0x12f   : > { %v13356_v54 = vadd.f32 %v5910_v17, %v5095_v40  ;;  %v13361_v1 = vmul.f32 %v4357_v21, %v19612_v34  ;;  %v2306_v46 = vmin.f32 %v2265_v16, 6.0  ;;  %v13369_v13 = vmul.f32 %v4378_v35, %v19616_v25 }
 0x130   : > { %19610 = vst [vmem:[#allocation71_spill] sm:$0xff] %v13354_v4  ;;  %19615 = vst [vmem:[#allocation78_spill] sm:$0xff] %v13364_v31  ;;  %v2228_v20 = vadd.f32 %v19607_v11, %v19618_v28  ;;  %v2926_v40 = vcombine.high %v19616_v25, %v19616_v25  ;;  %v13378_v34 = vmul.f32 %v4371_v63, %v19619_v45 }
 0x131   : > { %19611 = vst [vmem:[#allocation91_spill] sm:$0xff] %v13356_v54  ;;  %19613 = vst [vmem:[#allocation133_spill] sm:$0xff] %v13361_v1  ;;  %v4385_v21 = vrot.slane %v3455_v14, %v12472_v55  ;;  %v13383_v16 = vadd.f32 %v19607_v11, %v19621_v36  ;;  %v2452_v35 = vcombine.high %v2306_v46, %v2306_v46 }
 0x132   : > { %19617 = vst [vmem:[#allocation86_spill] sm:$0xff] %v13369_v13  ;;  %19620 = vst [vmem:[#allocation80_spill] sm:$0xff] %v13378_v34  ;;  %v2459_v28 = vrot.slane %v2306_v46, %v11937_v10  ;;  %v2295_v54 = vmax.f32 %v2228_v20, 0.0  ;;  %v13394_v3 = vmul.f32 %v12527_v5, %v13369_v13  ;;  %v13398_v63 = vmul.f32 %v12545_v38, %v13369_v13 }
 0x133   : > { %v13390_v4 = vmul.f32 %v4385_v21, %v2926_v40  ;;  %v2466_v45 = vrot.slane %v2452_v35, %v11937_v10  ;;  %v19624_v46 = vrot.slane %v12429_v15, %v12510_v23  ;;  %v19625_v35 = vld [vmem:[#allocation3_spill] sm:$0xff]  ;;  %v19627_v15 = vld [vmem:[#allocation4_spill] sm:$0xff] }
 0x134   : > { %19623 = vst [vmem:[#allocation134_spill] sm:$0xff] %v13398_v63  ;;  %v2467_v36 = vcombine.high %v2459_v28, %v2459_v28  ;;  %v2336_v21 = vmin.f32 %v2295_v54, 6.0  ;;  %v19626_v13 = vrot.slane %v19625_v35, %v12472_v55 }
 0x135   : > { %19622 = vst [vmem:[#allocation84_spill] sm:$0xff] %v13390_v4  ;;  %v4816_v20 = vmul.f32 %v19624_v46, %v2459_v28  ;;  %v5419_v25 = vmul.f32 %v12515_v30, %v13390_v4  ;;  %v13412_v43 = vmul.f32 %v12549_v39, %v13390_v4  ;;  %v2468_v14 = vcombine.high %v2466_v45, %v2466_v45 }
 0x136   : > { %v4817_v34 = vmul.f32 %v19626_v13, %v2467_v36  ;;  %v19628_v28 = vrot.slane %v19627_v15, %v12472_v55  ;;  %v13424_v54 = vmul.f32 %v12629_v26, %v13390_v4  ;;  %v19631_v13 = vrot.slane %v19627_v15, %v12475_v56 }
 0x137   : > { %v5006_v40 = vmul.f32 %v12527_v5, %v4816_v20  ;;  %v5310_v17 = vmul.f32 %v12545_v38, %v4816_v20  ;;  %v6553_v31 = vmul.f32 %v19572_v59, %v4816_v20  ;;  %v6849_v1 = vmul.f32 %v19575_v48, %v4816_v20 }
 0x138   : > { %v13420_v46 = vmul.f32 %v19628_v28, %v2466_v45  ;;  %19630 = vst [vmem:[#allocation4_spill] sm:$0xff] %v13424_v54  ;;  %v13433_v36 = vmul.f32 %v19631_v13, %v2468_v14  ;;  %v5311_v45 = vmul.f32 %v12515_v30, %v4817_v34  ;;  %v6278_v28 = vmul.f32 %v12505_v19, %v4816_v20 }
 0x139   : > { %v5627_v47 = vrot.slane %v5310_v17, 7  ;;  %v6279_v7 = vmul.f32 %v12549_v39, %v4817_v34  ;;  %v6681_v61 = vadd.f32 %v6553_v31, %v13140_v9  ;;  %v6850_v33 = vmul.f32 %v12629_v26, %v4817_v34 }
 0x13a   : > { %19629 = vst [vmem:[#allocation3_spill] sm:$0xff] %v13420_v46  ;;  %19632 = vst [vmem:[#allocation135_spill] sm:$0xff] %v13433_v36  ;;  %v5312_v35 = vmul.f32 %v19601_v2, %v13420_v46  ;;  %v5007_v52 = vmul.f32 %v12489_v0, %v13420_v46  ;;  %v5313_v27 = vmul.f32 %v12531_v24, %v13433_v36  ;;  %v5630_v14 = vrot.slane %v5311_v45, 7 }
 0x13b   : > { %v13447_v13 = vmul.f32 %v12518_v32, %v13420_v46  ;;  %v5628_v51 = vsel %vm12500_vm9, %v13247_v41, %v5627_v47  ;;  %v5629_v42 = vrot.slane %v5627_v47, 2  ;;  %v13455_v17 = vmul.f32 %v19604_v37, %v13420_v46 }
 0x13c   : > { %v7150_v9 = vrot.slane %v6849_v1, 7  ;;  %v11339_v31 = vrot.slane %v5312_v35, 9  ;;  %v5634_v12 = vrot.slane %v5313_v27, 7  ;;  %v6124_v45 = vadd.f32 %v5628_v51, %v13222_v49  ;;  %v19638_v35 = vld [vmem:[#allocation53_spill] sm:$0xff] }
 0x13d   : > { %19633 = vst [vmem:[#allocation136_spill] sm:$0xff] %v13447_v13  ;;  %19634 = vst [vmem:[#allocation137_spill] sm:$0xff] %v13455_v17  ;;  %v7153_v36 = vrot.slane %v6850_v33, 7  ;;  %v5631_v13 = vsel %vm12500_vm9, %v5629_v42, %v5630_v14  ;;  %v7818_v41 = vmul.f32 %v19585_v6, %v4816_v20  ;;  %v7819_v20 = vmul.f32 %v19638_v35, %v4817_v34  ;;  %v19656_v34 = vld [vmem:[#allocation96_spill] sm:$0xff] }
 0x13e   : > { %v7151_v50 = vsel %vm12500_vm9, %v13306_v44, %v7150_v9  ;;  %v7152_v19 = vrot.slane %v7150_v9, 2  ;;  %v5635_v47 = vsel %vm12500_vm9, %v11339_v31, %v5634_v12  ;;  %v6125_v46 = vadd.f32 %v5631_v13, %v5006_v40  ;;  %v13480_v40 = vpop.f32.mrf.mxu1 }
 0x13f   : > { %v13466_v1 = vadd.f32 %v6278_v28, %v6124_v45  ;;  %v13469_v49 = vrot.slane %v5634_v12, 2  ;;  %v13471_v51 = vadd.f32 %v5635_v47, %v5007_v52  ;;  %v7664_v44 = vadd.f32 %v7151_v50, %v13341_v53  ;;  %19639 = vst [vmem:[#allocation141_spill] sm:$0xff] %v13480_v40 }
 0x140   : > { %v7154_v42 = vsel %vm12500_vm9, %v7152_v19, %v7153_v36  ;;  %v2962_v14 = vcombine.high %v2336_v21, %v2336_v21  ;;  %v13478_v9 = vrot.slane %v2336_v21, %v11937_v10  ;;  %v13482_v28 = vadd.f32 %v6279_v7, %v6125_v46  ;;  %v13488_v19 = vpop.f32.mrf.mxu0  ;;  %v11622_v7 = vpop.f32.mrf.mxu1  ;;  %v19645_v46 = vld [vmem:[#allocation59_spill] sm:$0xff] }
 0x141   : > { %19635 = vst [vmem:[#allocation138_spill] sm:$0xff] %v13466_v1  ;;  %19636 = vst [vmem:[#allocation139_spill] sm:$0xff] %v13469_v49  ;;  %v7665_v33 = vadd.f32 %v7154_v42, %v6681_v61  ;;  %v13484_v12 = vadd.f32 %v7818_v41, %v7664_v44  ;;  %v19642_v52 = vrot.slane %v13398_v63, 7  ;;  %v5930_v31 = vrot.slane %v5419_v25, 7  ;;  %v19668_v63 = vld [vmem:[#allocation5_spill] sm:$0xff] }
 0x142   : > { %19637 = vst [vmem:[#allocation140_spill] sm:$0xff] %v13471_v51  ;;  %19640 = vst [vmem:[#allocation142_spill] sm:$0xff] %v13482_v28  ;;  %v13493_v53 = vrot.slane %v2962_v14, %v11937_v10  ;;  %v13502_v36 = vmul.f32 %v19645_v46, %v13390_v4  ;;  %v19647_v25 = vmax.f32 %v13383_v16, 0.0  ;;  %v4413_v41 = vrot.slane %v13366_v22, %v12510_v23  ;;  %v11535_v47 = vpop.f32.mrf.mxu0 }
 0x143   : > { %19641 = vst [vmem:[#allocation143_spill] sm:$0xff] %v13484_v12  ;;  %v5929_v13 = vrot.slane %v19642_v52, 2  ;;  %19643 = vst [vmem:[#allocation144_spill] sm:$0xff] %v13488_v19  ;;  %v13490_v50 = vadd.f32 %v7819_v20, %v7665_v33  ;;  %v13513_v33 = vmul.f32 %v19638_v35, %v13390_v4  ;;  %v19649_v20 = vld [vmem:[#allocation87_spill] sm:$0xff]  ;;  %v19650_v14 = vrot.slane %v13366_v22, %v12472_v55 }
 0x144   : > { %19646 = vst [vmem:[#allocation146_spill] sm:$0xff] %v13502_v36  ;;  %v2307_v45 = vmin.f32 %v19647_v25, 6.0  ;;  %v19652_v7 = vcombine.high %v19649_v20, %v19649_v20  ;;  %v3463_v25 = vpop.permute.xlu1 %3462  ;;  %v19690_v1 = vrot.slane %v19668_v63, %v12478_v58 }
 0x145   : > { %19644 = vst [vmem:[#allocation145_spill] sm:$0xff] %v13490_v50  ;;  %v5931_v21 = vsel %vm12500_vm9, %v5929_v13, %v5930_v31  ;;  %19648 = vst [vmem:[#allocation147_spill] sm:$0xff] %v13513_v33  ;;  %v13519_v52 = vmul.f32 %v19650_v14, %v19649_v20  ;;  %v19657_v14 = vrot.slane %v13366_v22, %v12478_v58 }
 0x146   : > { %v6221_v44 = vadd.f32 %v5931_v21, %v13394_v3  ;;  %v2469_v13 = vcombine.high %v2307_v45, %v2307_v45  ;;  %v2476_v31 = vrot.slane %v2307_v45, %v11937_v10  ;;  %v19653_v3 = vrot.slane %v13366_v22, %v12475_v56 }
 0x147   : > { %19651 = vst [vmem:[#allocation87_spill] sm:$0xff] %v13519_v52  ;;  %v13538_v16 = vmul.f32 %v19657_v14, %v19656_v34  ;;  %v19659_v45 = vcombine.high %v19656_v34, %v19656_v34  ;;  %v13547_v20 = vmul.f32 %v19601_v2, %v13519_v52  ;;  %v13557_v22 = vmul.f32 %v12489_v0, %v13519_v52  ;;  %v19665_v14 = vld [vmem:[#allocation85_spill] sm:$0xff] }
 0x148   : > { %v13529_v21 = vmul.f32 %v19653_v3, %v19652_v7  ;;  %v13532_v47 = vadd.f32 %v13412_v43, %v6221_v44  ;;  %v2483_v7 = vrot.slane %v2469_v13, %v11937_v10  ;;  %v2484_v3 = vcombine.high %v2476_v31, %v2476_v31 }
 0x149   : > { %19658 = vst [vmem:[#allocation96_spill] sm:$0xff] %v13538_v16  ;;  %v13543_v27 = vmul.f32 %v4413_v41, %v19659_v45  ;;  %v19661_v43 = vrot.slane %v19627_v15, %v12478_v58  ;;  %v13561_v34 = vmul.f32 %v12518_v32, %v13519_v52  ;;  %v13565_v41 = vmul.f32 %v19604_v37, %v13519_v52  ;;  %v19675_v52 = vld [vmem:[#allocation89_spill] sm:$0xff] }
 0x14a   : > { %19654 = vst [vmem:[#allocation148_spill] sm:$0xff] %v13529_v21  ;;  %19655 = vst [vmem:[#allocation149_spill] sm:$0xff] %v13532_v47  ;;  %v2233_v13 = vadd.f32 %v19607_v11, %v19665_v14  ;;  %v4420_v45 = vrot.slane %v3463_v25, %v12472_v55  ;;  %v2485_v42 = vcombine.high %v2483_v7, %v2483_v7 }
 0x14b   : > { %19660 = vst [vmem:[#allocation150_spill] sm:$0xff] %v13543_v27  ;;  %v13553_v44 = vmul.f32 %v19661_v43, %v2476_v31  ;;  %19663 = vst [vmem:[#allocation152_spill] sm:$0xff] %v13561_v34  ;;  %v19666_v31 = vrot.slane %v19627_v15, %v12510_v23  ;;  %v4427_v47 = vrot.slane %v3463_v25, %v12475_v56 }
 0x14c   : > { %19664 = vst [vmem:[#allocation153_spill] sm:$0xff] %v13565_v41  ;;  %v19669_v34 = vrot.slane %v19668_v63, %v12472_v55  ;;  %v2296_v54 = vmax.f32 %v2233_v13, 0.0  ;;  %v4434_v14 = vrot.slane %v3463_v25, %v12478_v58  ;;  %v4441_v27 = vrot.slane %v3463_v25, %v12510_v23 }
 0x14d   : > { %19662 = vst [vmem:[#allocation151_spill] sm:$0xff] %v13553_v44  ;;  %v13573_v43 = vmul.f32 %v19666_v31, %v2484_v3  ;;  %v19671_v16 = vrot.slane %v19668_v63, %v12475_v56  ;;  %v19673_v31 = vld [vmem:[#allocation108_spill] sm:$0xff]  ;;  %v2088_v4 = vadd.f32 %v19607_v11, %v19675_v52  ;;  %v3467_v3 = vpop.permute.xlu0 %3466 }
 0x14e   : > { %v13580_v33 = vmul.f32 %v19669_v34, %v2483_v7  ;;  %v13591_v61 = vmul.f32 %v4420_v45, %v19673_v31  ;;  %v13595_v7 = vpop.f32.mrf.mxu0  ;;  %v2337_v34 = vmin.f32 %v2296_v54, 6.0  ;;  %v19677_v13 = vcombine.high %v19673_v31, %v19673_v31  ;;  %v19683_v31 = vld [vmem:[#allocation92_spill] sm:$0xff] }
 0x14f   : > { %19667 = vst [vmem:[#allocation85_spill] sm:$0xff] %v13573_v43  ;;  %v13587_v15 = vmul.f32 %v19671_v16, %v2485_v42  ;;  %19676 = vst [vmem:[#allocation89_spill] sm:$0xff] %v13595_v7  ;;  %v19679_v42 = vcombine.high %v13310_v57, %v13310_v57  ;;  %v19681_v45 = vcombine.high %v13279_v29, %v13279_v29  ;;  %v2267_v54 = vmax.f32 %v2088_v4, 0.0 }
 0x150   : > { %19670 = vst [vmem:[#allocation5_spill] sm:$0xff] %v13580_v33  ;;  %19674 = vst [vmem:[#allocation108_spill] sm:$0xff] %v13591_v61  ;;  %v13600_v25 = vmul.f32 %v4427_v47, %v19677_v13  ;;  %v13612_v52 = vmul.f32 %v4434_v14, %v13310_v57  ;;  %v4448_v61 = vrot.slane %v3467_v3, %v12472_v55  ;;  %v13617_v13 = vpop.permute.xlu1 %3470 }
 0x151   : > { %19672 = vst [vmem:[#allocation154_spill] sm:$0xff] %v13587_v15  ;;  %v13605_v16 = vmul.f32 %v4441_v27, %v19679_v42  ;;  %v2959_v41 = vrot.slane %v19681_v45, %v11937_v10  ;;  %v2238_v47 = vadd.f32 %v19607_v11, %v19683_v31  ;;  %v2979_v27 = vcombine.high %v2337_v34, %v2337_v34  ;;  %v3475_v44 = vpop.permute.xlu0 %3474 }
 0x152   : > { %19678 = vst [vmem:[#allocation155_spill] sm:$0xff] %v13600_v25  ;;  %19682 = vst [vmem:[#allocation157_spill] sm:$0xff] %v13612_v52  ;;  %v11538_v25 = vpop.f32.mrf.mxu0  ;;  %v13620_v42 = vrot.slane %v2337_v34, %v11937_v10  ;;  %v4455_v29 = vrot.slane %v13617_v13, %v12472_v55  ;;  %v2308_v45 = vmin.f32 %v2267_v54, 6.0 }
 0x153   : > { %19680 = vst [vmem:[#allocation156_spill] sm:$0xff] %v13605_v16  ;;  %v2961_v36 = vcombine.high %v2959_v41, %v2959_v41  ;;  %v13624_v57 = vmul.f32 %v4448_v61, %v2959_v41  ;;  %v5110_v4 = vmul.f32 %v12527_v5, %v13605_v16  ;;  %v13630_v11 = vmul.f32 %v12545_v38, %v13605_v16 }
 0x154   : > { %v13632_v14 = vpop.f32.mrf.mxu0  ;;  %v13635_v3 = vrot.slane %v2979_v27, %v11937_v10  ;;  %v2297_v25 = vmax.f32 %v2238_v47, 0.0  ;;  %v4462_v61 = vrot.slane %v13617_v13, %v12475_v56  ;;  %v2486_v41 = vcombine.high %v2308_v45, %v2308_v45 }
 0x155   : > { %19684 = vst [vmem:[#allocation92_spill] sm:$0xff] %v13624_v57  ;;  %19685 = vst [vmem:[#allocation158_spill] sm:$0xff] %v13630_v11  ;;  %v2493_v54 = vrot.slane %v2308_v45, %v11937_v10  ;;  %v5428_v31 = vmul.f32 %v12515_v30, %v13624_v57  ;;  %v18884_v16 = vrot.slane %v13630_v11, 7  ;;  %v6383_v27 = vmul.f32 %v12549_v39, %v13624_v57 }
 0x156   : > { %19686 = vst [vmem:[#allocation159_spill] sm:$0xff] %v13632_v14  ;;  %v11541_v52 = vpop.f32.mrf.mxu0  ;;  %v13649_v51 = vmul.f32 %v12629_v26, %v13624_v57  ;;  %v13653_v47 = vmul.f32 %v19645_v46, %v13624_v57  ;;  %v4469_v45 = vrot.slane %v13617_v13, %v12478_v58  ;;  %v2500_v34 = vrot.slane %v2486_v41, %v11937_v10  ;;  %v10028_v41 = vld [vmem:[%s18722_s6 + $0x8] sm:$0xff] }
 0x157   : > { %v2501_v49 = vcombine.high %v2493_v54, %v2493_v54  ;;  %v5954_v52 = vrot.slane %v18884_v16, 2  ;;  %v13662_v28 = vmul.f32 %v19638_v35, %v13624_v57  ;;  %v13667_v17 = vmul.f32 %v19690_v1, %v2493_v54  ;;  %11623 = vmatprep.subr.mxu1 %v10028_v41 }
 0x158   : > { %19687 = vst [vmem:[#allocation160_spill] sm:$0xff] %v13649_v51  ;;  %19688 = vst [vmem:[#allocation161_spill] sm:$0xff] %v13653_v47  ;;  %v5955_v50 = vrot.slane %v5428_v31, 7  ;;  %v2338_v15 = vmin.f32 %v2297_v25, 6.0  ;;  %v2502_v33 = vcombine.high %v2500_v34, %v2500_v34  ;;  %v19692_v16 = vrot.slane %v19668_v63, %v12510_v23  ;;  %v13684_v54 = vpop.f32.mrf.mxu0  ;;  %11624 = vmatpush3.msra.mxu1 %v10028_v41 }
 0x159   : > { %19689 = vst [vmem:[#allocation162_spill] sm:$0xff] %v13662_v28  ;;  %19691 = vst [vmem:[#allocation163_spill] sm:$0xff] %v13667_v17  ;;  %v19694_v28 = vld [vmem:[#allocation6_spill] sm:$0xff]  ;;  %v4476_v63 = vrot.slane %v13617_v13, %v12510_v23 }
 0x15a   : > { %v13676_v11 = vmul.f32 %v19692_v16, %v2501_v49  ;;  %v19695_v57 = vrot.slane %v19694_v28, %v12472_v55  ;;  %19697 = vst [vmem:[#allocation165_spill] sm:$0xff] %v13684_v54  ;;  %v5956_v25 = vsel %vm12500_vm9, %v5954_v52, %v5955_v50  ;;  %v2996_v31 = vcombine.high %v2338_v15, %v2338_v15  ;;  %v19698_v49 = vld [vmem:[#allocation7_spill] sm:$0xff] }
 0x15b   : > { %v13689_v12 = vrot.slane %v2338_v15, %v11937_v10  ;;  %v19699_v28 = vrot.slane %v19698_v49, %v12472_v55  ;;  %v11544_v15 = vpop.f32.mrf.mxu0  ;;  %v6229_v7 = vadd.f32 %v5956_v25, %v5110_v4  ;;  %v19710_v25 = vcombine.high %v13478_v9, %v13478_v9 }
 0x15c   : > { %19693 = vst [vmem:[#allocation164_spill] sm:$0xff] %v13676_v11  ;;  %v13681_v43 = vmul.f32 %v19695_v57, %v2500_v34  ;;  %v13700_v57 = vmul.f32 %v12545_v38, %v13676_v11  ;;  %v13704_v34 = vmul.f32 %v4455_v29, %v2961_v36  ;;  %v5014_v52 = vmul.f32 %v12527_v5, %v13676_v11  ;;  %v19705_v15 = vld [vmem:[#allocation69_spill] sm:$0xff] }
 0x15d   : > { %v13696_v16 = vmul.f32 %v19699_v28, %v2502_v33 }
 0x15e   : > { %19696 = vst [vmem:[#allocation6_spill] sm:$0xff] %v13681_v43  ;;  %19701 = vst [vmem:[#allocation166_spill] sm:$0xff] %v13700_v57  ;;  %v5320_v50 = vmul.f32 %v12515_v30, %v13681_v43  ;;  %v6287_v13 = vmul.f32 %v12549_v39, %v13681_v43  ;;  %v13712_v33 = vmul.f32 %v12629_v26, %v13681_v43  ;;  %v18897_v29 = vrot.slane %v13700_v57, 7  ;;  %v3483_v57 = vpop.permute.xlu0 %3482 }
 0x15f   : > { %19700 = vst [vmem:[#allocation7_spill] sm:$0xff] %v13696_v16  ;;  %19702 = vst [vmem:[#allocation167_spill] sm:$0xff] %v13704_v34  ;;  %v13716_v41 = vmul.f32 %v19645_v46, %v13681_v43  ;;  %v13720_v28 = vmul.f32 %v12489_v0, %v13696_v16  ;;  %v13724_v36 = vmul.f32 %v19601_v2, %v13696_v16 }
 0x160   : > { %19703 = vst [vmem:[#allocation168_spill] sm:$0xff] %v13712_v33  ;;  %v13729_v1 = vmul.f32 %v19705_v15, %v13681_v43  ;;  %v5655_v51 = vrot.slane %v5320_v50, 7  ;;  %v13733_v47 = vmul.f32 %v12518_v32, %v13696_v16  ;;  %v13737_v11 = vmul.f32 %v19604_v37, %v13696_v16  ;;  %v19721_v50 = vld [vmem:[#allocation94_spill] sm:$0xff] }
 0x161   : > { %19704 = vst [vmem:[#allocation169_spill] sm:$0xff] %v13716_v41  ;;  %v5654_v54 = vrot.slane %v18897_v29, 2  ;;  %v13744_v43 = vrot.slane %v2996_v31, %v11937_v10  ;;  %v3011_v16 = vcombine.high %v13689_v12, %v13689_v12  ;;  %v13755_v29 = vadd.f32 %v6383_v27, %v6229_v7  ;;  %v19713_v7 = vld [vmem:[#allocation93_spill] sm:$0xff] }
 0x162   : > { %19706 = vst [vmem:[#allocation170_spill] sm:$0xff] %v13729_v1  ;;  %19707 = vst [vmem:[#allocation171_spill] sm:$0xff] %v13733_v47  ;;  %v13751_v1 = vmul.f32 %v4462_v61, %v13478_v9  ;;  %v13762_v31 = vmul.f32 %v4469_v45, %v19710_v25  ;;  %v13766_v14 = vmul.f32 %v19601_v2, %v13704_v34 }
 0x163   : > { %19708 = vst [vmem:[#allocation172_spill] sm:$0xff] %v13737_v11  ;;  %v5656_v17 = vsel %vm12500_vm9, %v5654_v54, %v5655_v51  ;;  %v13770_v61 = vmul.f32 %v19604_v37, %v13704_v34  ;;  %v13775_v51 = vld [vmem:[%s18719_s3] ss:$0 sm:$0xff]  ;;  %v4483_v9 = vrot.slane %v3475_v44, %v12472_v55  ;;  %v4497_v45 = vrot.slane %v3475_v44, %v12478_v58 }
 0x164   : > { %19709 = vst [vmem:[#allocation173_spill] sm:$0xff] %v13751_v1  ;;  %19711 = vst [vmem:[#allocation174_spill] sm:$0xff] %v13762_v31  ;;  %v6133_v47 = vadd.f32 %v5656_v17, %v5014_v52  ;;  %v2093_v27 = vadd.f32 %v13775_v51, %v19713_v7  ;;  %v4490_v17 = vrot.slane %v3475_v44, %v12475_v56 }
 0x165   : > { %19712 = vst [vmem:[#allocation175_spill] sm:$0xff] %v13766_v14  ;;  %v4504_v54 = vrot.slane %v3475_v44, %v12510_v23  ;;  %v13786_v25 = vmul.f32 %v4476_v63, %v13493_v53  ;;  %v19716_v7 = vcombine.high %v13493_v53, %v13493_v53  ;;  %v19719_v44 = vcombine.high %v13620_v42, %v13620_v42  ;;  %v3479_v63 = vpop.permute.xlu1 %3478 }
 0x166   : > { %v13783_v52 = vadd.f32 %v6287_v13, %v6133_v47  ;;  %v2268_v4 = vmax.f32 %v2093_v27, 0.0  ;;  %v13796_v41 = vmul.f32 %v4490_v17, %v13620_v42  ;;  %v2243_v27 = vadd.f32 %v13775_v51, %v19721_v50  ;;  %v19723_v17 = vld [vmem:[#allocation97_spill] sm:$0xff] }
 0x167   : > { %19715 = vst [vmem:[#allocation176_spill] sm:$0xff] %v13786_v25  ;;  %v13793_v33 = vmul.f32 %v4483_v9, %v19716_v7  ;;  %v13801_v47 = vmul.f32 %v4497_v45, %v19719_v44  ;;  %v2995_v11 = vcombine.high %v13635_v3, %v13635_v3  ;;  %v4511_v53 = vrot.slane %v3479_v63, %v12472_v55 }
 0x168   : > { %19714 = vst [vmem:[#allocation93_spill] sm:$0xff] %v13783_v52  ;;  %19718 = vst [vmem:[#allocation178_spill] sm:$0xff] %v13796_v41  ;;  %v2309_v13 = vmin.f32 %v2268_v4, 6.0  ;;  %v13809_v9 = vmul.f32 %v4504_v54, %v13635_v3  ;;  %v2098_v7 = vadd.f32 %v13775_v51, %v19723_v17  ;;  %v4518_v42 = vrot.slane %v3483_v57, %v12472_v55 }
 0x169   : > { %19717 = vst [vmem:[#allocation177_spill] sm:$0xff] %v13793_v33  ;;  %19720 = vst [vmem:[#allocation179_spill] sm:$0xff] %v13801_v47  ;;  %v4525_v45 = vrot.slane %v3483_v57, %v12475_v56  ;;  %v2298_v52 = vmax.f32 %v2243_v27, 0.0  ;;  %v13816_v50 = vmul.f32 %v4511_v53, %v2995_v11  ;;  %v4532_v40 = vrot.slane %v3483_v57, %v12478_v58 }
 0x16a   : > { %19722 = vst [vmem:[#allocation94_spill] sm:$0xff] %v13809_v9  ;;  %v2503_v44 = vcombine.high %v2309_v13, %v2309_v13  ;;  %v2510_v4 = vrot.slane %v2309_v13, %v11937_v10  ;;  %v2269_v19 = vmax.f32 %v2098_v7, 0.0  ;;  %v4539_v63 = vrot.slane %v3483_v57, %v12510_v23 }
 0x16b   : > { %19724 = vst [vmem:[#allocation97_spill] sm:$0xff] %v13816_v50  ;;  %v4944_v3 = vmul.f32 %v4518_v42, %v13689_v12  ;;  %v2339_v47 = vmin.f32 %v2298_v52, 6.0  ;;  %v13822_v41 = vmul.f32 %v4525_v45, %v3011_v16  ;;  %v13826_v6 = vmul.f32 %v12515_v30, %v13816_v50 }
 0x16c   : > { %v2517_v54 = vrot.slane %v2503_v44, %v11937_v10  ;;  %v2518_v17 = vcombine.high %v2510_v4, %v2510_v4  ;;  %v13830_v11 = vmul.f32 %v12629_v26, %v13816_v50  ;;  %v13834_v13 = vmul.f32 %v19645_v46, %v13816_v50 }
 0x16d   : > { %19725 = vst [vmem:[#allocation180_spill] sm:$0xff] %v13822_v41  ;;  %19726 = vst [vmem:[#allocation181_spill] sm:$0xff] %v13826_v6  ;;  %v2310_v57 = vmin.f32 %v2269_v19, 6.0  ;;  %v19728_v27 = vrot.slane %v19698_v49, %v12475_v56  ;;  %v19730_v16 = vrot.slane %v19698_v49, %v12478_v58  ;;  %v3013_v7 = vcombine.high %v2339_v47, %v2339_v47 }
 0x16e   : > { %19727 = vst [vmem:[#allocation182_spill] sm:$0xff] %v13834_v13  ;;  %v2519_v12 = vcombine.high %v2517_v54, %v2517_v54  ;;  %v19732_v42 = vrot.slane %v19698_v49, %v12510_v23  ;;  %v3020_v44 = vrot.slane %v2339_v47, %v11937_v10  ;;  %v5421_v47 = vmul.f32 %v12531_v24, %v13529_v21 }
 0x16f   : > { %v13839_v52 = vmul.f32 %v19728_v27, %v2510_v4  ;;  %v13844_v53 = vmul.f32 %v19730_v16, %v2518_v17  ;;  %v3027_v4 = vrot.slane %v3013_v7, %v11937_v10  ;;  %v2520_v18 = vcombine.high %v2310_v57, %v2310_v57  ;;  %v19734_v16 = vld [vmem:[#allocation8_spill] sm:$0xff] }
 0x170   : > { %v13849_v45 = vmul.f32 %v19732_v42, %v2517_v54  ;;  %v2527_v17 = vrot.slane %v2310_v57, %v11937_v10  ;;  %v3028_v49 = vcombine.high %v3020_v44, %v3020_v44  ;;  %v13863_v54 = vmul.f32 %v4532_v40, %v13744_v43  ;;  %v19742_v40 = vld [vmem:[#allocation18_spill] sm:$0xff] }
 0x171   : > { %19729 = vst [vmem:[#allocation183_spill] sm:$0xff] %v13839_v52  ;;  %19731 = vst [vmem:[#allocation184_spill] sm:$0xff] %v13844_v53  ;;  %v19735_v53 = vrot.slane %v19734_v16, %v12472_v55  ;;  %v3029_v42 = vcombine.high %v3027_v4, %v3027_v4  ;;  %v2534_v7 = vrot.slane %v2520_v18, %v11937_v10  ;;  %v5934_v41 = vrot.slane %v5421_v47, 7 }
 0x172   : > { %19733 = vst [vmem:[#allocation185_spill] sm:$0xff] %v13849_v45  ;;  %19737 = vst [vmem:[#allocation186_spill] sm:$0xff] %v13863_v54  ;;  %v2535_v19 = vcombine.high %v2527_v17, %v2527_v17  ;;  %v19738_v27 = vcombine.high %v13744_v43, %v13744_v43  ;;  %v6376_v13 = vmul.f32 %v19742_v40, %v13529_v21  ;;  %v19748_v47 = vrot.slane %v13547_v20, 9 }
 0x173   : > { %v13860_v14 = vmul.f32 %v19735_v53, %v2519_v12  ;;  %v19740_v12 = vrot.slane %v19734_v16, %v12475_v56  ;;  %v2536_v45 = vcombine.high %v2534_v7, %v2534_v7  ;;  %v19743_v18 = vrot.slane %v19734_v16, %v12478_v58 }
 0x174   : > { %v13871_v57 = vmul.f32 %v4539_v63, %v19738_v27  ;;  %v13888_v43 = vmul.f32 %v12518_v32, %v4944_v3  ;;  %v6969_v63 = vmul.f32 %v19551_v62, %v13751_v1  ;;  %v19746_v27 = vrot.slane %v19734_v16, %v12510_v23  ;;  %v19757_v62 = vld [vmem:[#allocation99_spill] sm:$0xff] }
 0x175   : > { %19736 = vst [vmem:[#allocation8_spill] sm:$0xff] %v13860_v14  ;;  %v13876_v53 = vmul.f32 %v19740_v12, %v2527_v17  ;;  %v6658_v14 = vmul.f32 %v12518_v32, %v13704_v34  ;;  %v13885_v6 = vmul.f32 %v19743_v18, %v2535_v19  ;;  %v5935_v12 = vsel %vm12500_vm9, %v19748_v47, %v5934_v41  ;;  %v3487_v18 = vpop.permute.xlu1 %3486  ;;  %v19754_v47 = vld [vmem:[#allocation55_spill] sm:$0xff] }
 0x176   : > { %19739 = vst [vmem:[#allocation187_spill] sm:$0xff] %v13871_v57  ;;  %19745 = vst [vmem:[#allocation190_spill] sm:$0xff] %v13888_v43  ;;  %v13895_v17 = vmul.f32 %v19746_v27, %v2534_v7  ;;  %v13901_v21 = vrot.slane %v5934_v41, 2  ;;  %v13904_v19 = vmul.f32 %v19604_v37, %v4944_v3  ;;  %v6222_v16 = vadd.f32 %v5935_v12, %v13557_v22 }
 0x177   : > { %19741 = vst [vmem:[#allocation188_spill] sm:$0xff] %v13876_v53  ;;  %19744 = vst [vmem:[#allocation189_spill] sm:$0xff] %v13885_v6  ;;  %v19751_v6 = vld [vmem:[#allocation9_spill] sm:$0xff]  ;;  %v7482_v7 = vrot.slane %v6969_v63, 7  ;;  %v7924_v20 = vmul.f32 %v12573_v60, %v13751_v1  ;;  %v8206_v41 = vmul.f32 %v19754_v47, %v4944_v3  ;;  %v2248_v57 = vadd.f32 %v13775_v51, %v19757_v62 }
 0x178   : > { %19747 = vst [vmem:[#allocation191_spill] sm:$0xff] %v13895_v17  ;;  %19749 = vst [vmem:[#allocation192_spill] sm:$0xff] %v13901_v21  ;;  %v19752_v53 = vrot.slane %v19751_v6, %v12472_v55  ;;  %v19755_v21 = vld [vmem:[#allocation45_spill] sm:$0xff] }
 0x179   : > { %19750 = vst [vmem:[#allocation193_spill] sm:$0xff] %v13904_v19  ;;  %v13917_v17 = vmul.f32 %v19755_v21, %v4944_v3  ;;  %v19761_v3 = vrot.slane %v13770_v61, 9  ;;  %v13938_v12 = vrot.slane %v7482_v7, 2  ;;  %v2299_v27 = vmax.f32 %v2248_v57, 0.0 }
 0x17a   : > { %v13909_v43 = vmul.f32 %v19752_v53, %v2536_v45  ;;  %v6504_v45 = vadd.f32 %v6376_v13, %v6222_v16  ;;  %v4546_v53 = vrot.slane %v3487_v18, %v12472_v55  ;;  %v4553_v13 = vrot.slane %v3487_v18, %v12475_v56 }
 0x17b   : > { %19756 = vst [vmem:[#allocation194_spill] sm:$0xff] %v13917_v17  ;;  %v7483_v62 = vsel %vm12500_vm9, %v19761_v3, %v7482_v7  ;;  %19762 = vst [vmem:[#allocation197_spill] sm:$0xff] %v13938_v12  ;;  %v2340_v60 = vmin.f32 %v2299_v27, 6.0  ;;  %v4567_v61 = vrot.slane %v3487_v18, %v12510_v23  ;;  %v19764_v7 = vld [vmem:[#allocation102_spill] sm:$0xff] }
 0x17c   : > { %19753 = vst [vmem:[#allocation9_spill] sm:$0xff] %v13909_v43  ;;  %v13923_v6 = vmul.f32 %v12515_v30, %v13909_v43  ;;  %v13927_v22 = vmul.f32 %v12629_v26, %v13909_v43  ;;  %v13932_v63 = vmul.f32 %v12549_v39, %v13909_v43  ;;  %v6786_v47 = vadd.f32 %v6658_v14, %v6504_v45 }
 0x17d   : > { %v13946_v54 = vmul.f32 %v4546_v53, %v3020_v44  ;;  %v2103_v57 = vadd.f32 %v13775_v51, %v19764_v7  ;;  %v13952_v14 = vmul.f32 %v12531_v24, %v13839_v52  ;;  %v3030_v45 = vcombine.high %v2340_v60, %v2340_v60  ;;  %v3491_v53 = vpop.permute.xlu0 %3490 }
 0x17e   : > { %19758 = vst [vmem:[#allocation99_spill] sm:$0xff] %v13923_v6  ;;  %19759 = vst [vmem:[#allocation195_spill] sm:$0xff] %v13927_v22  ;;  %v7770_v43 = vadd.f32 %v7483_v62, %v6786_v47  ;;  %v13955_v3 = vrot.slane %v2340_v60, %v11937_v10  ;;  %v13957_v19 = vmul.f32 %v4553_v13, %v3028_v49 }
 0x17f   : > { %19760 = vst [vmem:[#allocation196_spill] sm:$0xff] %v13932_v63  ;;  %v4560_v63 = vrot.slane %v3487_v18, %v12478_v58  ;;  %19763 = vst [vmem:[#allocation198_spill] sm:$0xff] %v13946_v54  ;;  %v13961_v18 = vmul.f32 %v4567_v61, %v3029_v42  ;;  %v2270_v44 = vmax.f32 %v2103_v57, 0.0  ;;  %v18929_v47 = vrot.slane %v13952_v14, 7 }
 0x180   : > { %19765 = vst [vmem:[#allocation102_spill] sm:$0xff] %v13952_v14  ;;  %19766 = vst [vmem:[#allocation199_spill] sm:$0xff] %v13957_v19  ;;  %v8052_v30 = vadd.f32 %v7924_v20, %v7770_v43  ;;  %v13965_v62 = vrot.slane %v3030_v45, %v11937_v10  ;;  %v6288_v7 = vmul.f32 %v19742_v40, %v13839_v52  ;;  %v19769_v43 = vrot.slane %v13724_v36, 9 }
 0x181   : > { %v13959_v27 = vmul.f32 %v4560_v63, %v3027_v4  ;;  %19768 = vst [vmem:[#allocation201_spill] sm:$0xff] %v13961_v18  ;;  %v4574_v60 = vrot.slane %v3491_v53, %v12472_v55  ;;  %v6665_v49 = vmul.f32 %v19572_v59, %v13809_v9  ;;  %v2311_v42 = vmin.f32 %v2270_v44, 6.0 }
 0x182   : > { %v5660_v20 = vsel %vm12500_vm9, %v19769_v43, %v18929_v47  ;;  %v13982_v63 = vmul.f32 %v19575_v48, %v13809_v9  ;;  %v13984_v13 = vadd.f32 %v8206_v41, %v8052_v30  ;;  %v7931_v30 = vmul.f32 %v19638_v35, %v13816_v50  ;;  %v19773_v41 = vld [vmem:[#allocation56_spill] sm:$0xff]  ;;  %v19809_v50 = vld [vmem:[#allocation186_spill] sm:$0xff] }
 0x183   : > { %19767 = vst [vmem:[#allocation200_spill] sm:$0xff] %v13959_v27  ;;  %v6134_v57 = vadd.f32 %v5660_v20, %v13720_v28  ;;  %v4952_v45 = vmul.f32 %v4574_v60, %v13955_v3  ;;  %v2537_v44 = vcombine.high %v2311_v42, %v2311_v42  ;;  %v2544_v53 = vrot.slane %v2311_v42, %v11937_v10  ;;  %v10027_v28 = vld [vmem:[%s18722_s6] sm:$0xff]  ;;  %v14005_v60 = vpop.f32.mrf.mxu0 }
 0x184   : > { %19770 = vst [vmem:[#allocation202_spill] sm:$0xff] %v13982_v63  ;;  %19771 = vst [vmem:[#allocation203_spill] sm:$0xff] %v13984_v13  ;;  %v6793_v36 = vadd.f32 %v6665_v49, %v13755_v29  ;;  %v18932_v43 = vrot.slane %v13982_v63, 7  ;;  %v14000_v61 = vcombine.high %v19773_v41, %v19773_v41  ;;  %11625 = vmatprep.subr.mxu1 %v10027_v28  ;;  %v19790_v52 = vrot.slane %v13830_v11, 7 }
 0x185   : > { %v6416_v47 = vadd.f32 %v6288_v7, %v6134_v57  ;;  %v13994_v16 = vmul.f32 %v12629_v26, %v4952_v45  ;;  %19775 = vst [vmem:[#allocation206_spill] sm:$0xff] %v14005_v60  ;;  %v2551_v29 = vrot.slane %v2537_v44, %v11937_v10  ;;  %v2552_v49 = vcombine.high %v2544_v53, %v2544_v53  ;;  %v19776_v7 = vld [vmem:[#allocation11_spill] sm:$0xff]  ;;  %v19780_v44 = vld [vmem:[#allocation62_spill] sm:$0xff]  ;;  %v11547_v6 = vpop.f32.mrf.mxu0 }
 0x186   : > { %19774 = vst [vmem:[#allocation205_spill] sm:$0xff] %v14000_v61  ;;  %v19777_v42 = vrot.slane %v19776_v7, %v12472_v55  ;;  %v7502_v57 = vrot.slane %v18932_v43, 2  ;;  %v14017_v13 = vmul.f32 %v19638_v35, %v4952_v45  ;;  %v8213_v17 = vmul.f32 %v14000_v61, %v13961_v18  ;;  %11626 = vmatpush3.msra.mxu1 %v10027_v28 }
 0x187   : > { %19772 = vst [vmem:[#allocation204_spill] sm:$0xff] %v13994_v16  ;;  %v14023_v12 = vmul.f32 %v19780_v44, %v13961_v18  ;;  %v19784_v4 = vrot.slane %v19776_v7, %v12478_v58  ;;  %v8524_v14 = vmul.f32 %v19645_v46, %v4952_v45  ;;  %v19792_v16 = vld [vmem:[#allocation105_spill] sm:$0xff]  ;;  %v19812_v46 = vld [vmem:[#allocation187_spill] sm:$0xff] }
 0x188   : > { %v14011_v20 = vmul.f32 %v19777_v42, %v2544_v53  ;;  %19779 = vst [vmem:[#allocation207_spill] sm:$0xff] %v14017_v13  ;;  %v2553_v53 = vcombine.high %v2551_v29, %v2551_v29  ;;  %v19782_v42 = vrot.slane %v19776_v7, %v12475_v56  ;;  %v7504_v60 = vsel %vm12500_vm9, %v7502_v57, %v19790_v52  ;;  %v19813_v18 = vld [vmem:[#allocation39_spill] sm:$0xff] }
 0x189   : > { %19781 = vst [vmem:[#allocation208_spill] sm:$0xff] %v14023_v12  ;;  %v14033_v63 = vmul.f32 %v19784_v4, %v2551_v29  ;;  %v9051_v13 = vrot.slane %v8524_v14, 7  ;;  %v2253_v11 = vadd.f32 %v13775_v51, %v19792_v16 }
 0x18a   : > { %19778 = vst [vmem:[#allocation11_spill] sm:$0xff] %v14011_v20  ;;  %v14028_v43 = vmul.f32 %v19782_v42, %v2552_v49  ;;  %v5023_v22 = vmul.f32 %v12489_v0, %v14011_v20  ;;  %v5330_v28 = vmul.f32 %v19601_v2, %v14011_v20  ;;  %v6570_v6 = vmul.f32 %v12518_v32, %v14011_v20 }
 0x18b   : > { %19785 = vst [vmem:[#allocation210_spill] sm:$0xff] %v14033_v63  ;;  %v14044_v49 = vmul.f32 %v19604_v37, %v14011_v20  ;;  %v19787_v42 = vrot.slane %v19776_v7, %v12510_v23  ;;  %v14055_v63 = vmul.f32 %v19755_v21, %v14011_v20  ;;  %v7777_v7 = vadd.f32 %v7504_v60, %v6793_v36  ;;  %v3495_v20 = vpop.permute.xlu1 %3494 }
 0x18c   : > { %19783 = vst [vmem:[#allocation209_spill] sm:$0xff] %v14028_v43  ;;  %v5331_v29 = vmul.f32 %v12531_v24, %v14028_v43  ;;  %v11341_v26 = vrot.slane %v5330_v28, 9  ;;  %v6296_v37 = vmul.f32 %v19742_v40, %v14028_v43  ;;  %v14063_v2 = vadd.f32 %v6570_v6, %v6416_v47 }
 0x18d   : > { %19786 = vst [vmem:[#allocation211_spill] sm:$0xff] %v14044_v49  ;;  %v14049_v4 = vmul.f32 %v19787_v42, %v2553_v53  ;;  %19789 = vst [vmem:[#allocation213_spill] sm:$0xff] %v14055_v63  ;;  %v8059_v63 = vadd.f32 %v7931_v30, %v7777_v7  ;;  %v4581_v52 = vrot.slane %v3495_v20, %v12472_v55 }
 0x18e   : > { %19791 = vst [vmem:[#allocation214_spill] sm:$0xff] %v14063_v2  ;;  %v5684_v53 = vrot.slane %v5331_v29, 7  ;;  %v4588_v57 = vrot.slane %v3495_v20, %v12475_v56  ;;  %v9479_v60 = vmul.f32 %v19705_v15, %v4952_v45  ;;  %v4595_v28 = vrot.slane %v3495_v20, %v12478_v58 }
 0x18f   : > { %19788 = vst [vmem:[#allocation212_spill] sm:$0xff] %v14049_v4  ;;  %v18946_v4 = vrot.slane %v14023_v12, 7  ;;  %v8341_v6 = vadd.f32 %v8213_v17, %v8059_v63  ;;  %v2300_v29 = vmax.f32 %v2253_v11, 0.0  ;;  %v4602_v7 = vrot.slane %v3495_v20, %v12510_v23  ;;  %v19798_v20 = vld [vmem:[#allocation17_spill] sm:$0xff] }
 0x190   : > { %v5685_v47 = vsel %vm12500_vm9, %v11341_v26, %v5684_v53  ;;  %v14077_v14 = vrot.slane %v5684_v53, 2  ;;  %v19794_v26 = vcombine.high %v13955_v3, %v13955_v3  ;;  %v19796_v17 = vcombine.high %v13965_v62, %v13965_v62 }
 0x191   : > { %v9050_v36 = vrot.slane %v18946_v4, 2  ;;  %v6142_v30 = vadd.f32 %v5685_v47, %v5023_v22  ;;  %v14088_v4 = vmul.f32 %v4588_v57, %v13965_v62  ;;  %v2341_v12 = vmin.f32 %v2300_v29, 6.0  ;;  %v19799_v47 = vld [vmem:[#allocation30_spill] sm:$0xff] }
 0x192   : > { %19793 = vst [vmem:[#allocation105_spill] sm:$0xff] %v14077_v14  ;;  %v14085_v42 = vmul.f32 %v4581_v52, %v19794_v26  ;;  %v14095_v22 = vmul.f32 %v4595_v28, %v19796_v17  ;;  %v5111_v63 = vmul.f32 %v12489_v0, %v13704_v34  ;;  %v5113_v11 = vmul.f32 %v19798_v20, %v13762_v31 }
 0x193   : > { %v9052_v16 = vsel %vm12500_vm9, %v9050_v36, %v9051_v13  ;;  %v14090_v45 = vadd.f32 %v6296_v37, %v6142_v30  ;;  %v19797_v13 = vld [vmem:[#allocation25_spill] sm:$0xff]  ;;  %v5430_v37 = vmul.f32 %v12531_v24, %v13751_v1  ;;  %v3047_v52 = vcombine.high %v2341_v12, %v2341_v12 }
 0x194   : > { %v9325_v53 = vadd.f32 %v9052_v16, %v8341_v6  ;;  %v5112_v3 = vmul.f32 %v19797_v13, %v13751_v1  ;;  %v14106_v57 = vrot.slane %v2341_v12, %v11937_v10  ;;  %v5114_v62 = vmul.f32 %v12527_v5, %v13786_v25  ;;  %v19801_v6 = vld [vmem:[#allocation34_spill] sm:$0xff]  ;;  %v19810_v5 = vld [vmem:[#allocation35_spill] sm:$0xff] }
 0x195   : > { %19795 = vst [vmem:[#allocation215_spill] sm:$0xff] %v14090_v45  ;;  %v5431_v36 = vmul.f32 %v19799_v47, %v13762_v31  ;;  %v5432_v30 = vmul.f32 %v12545_v38, %v13786_v25  ;;  %v14118_v29 = vmul.f32 %v19801_v6, %v13793_v33  ;;  %v5959_v16 = vrot.slane %v5430_v37, 7  ;;  %v14137_v6 = vpop.f32.mrf.mxu0 }
 0x196   : > { %v14112_v28 = vadd.f32 %v9479_v60, %v9325_v53  ;;  %v14121_v26 = vrot.slane %v3047_v52, %v11937_v10  ;;  %v14124_v12 = vmul.f32 %v4602_v7, %v14106_v57  ;;  %v6384_v34 = vmul.f32 %v19742_v40, %v13751_v1  ;;  %v19802_v60 = vld [vmem:[#allocation175_spill] sm:$0xff]  ;;  %v19804_v52 = vld [vmem:[#allocation28_spill] sm:$0xff] }
 0x197   : > { %v5962_v17 = vrot.slane %v5431_v36, 7  ;;  %v19803_v53 = vrot.slane %v19802_v60, 9  ;;  %v5961_v45 = vrot.slane %v5959_v16, 2  ;;  %v5965_v14 = vrot.slane %v5432_v30, 7  ;;  %v19805_v7 = vld [vmem:[#allocation20_spill] sm:$0xff]  ;;  %19806 = vst [vmem:[#allocation175_spill] sm:$0xff] %v14137_v6  ;;  %v11550_v15 = vpop.f32.mrf.mxu0 }
 0x198   : > { %19800 = vst [vmem:[#allocation216_spill] sm:$0xff] %v14112_v28  ;;  %v6385_v43 = vmul.f32 %v19804_v52, %v13762_v31  ;;  %v6386_v36 = vmul.f32 %v19805_v7, %v13786_v25  ;;  %v19807_v30 = vld [vmem:[#allocation180_spill] sm:$0xff]  ;;  %v6668_v25 = vmul.f32 %v19810_v5, %v19809_v50  ;;  %v19811_v6 = vrot.slane %v14118_v29, 7 }
 0x199   : > { %v5960_v28 = vsel %vm12500_vm9, %v19803_v53, %v5959_v16  ;;  %v5964_v37 = vrot.slane %v5962_v17, 2  ;;  %v5963_v60 = vsel %vm12500_vm9, %v5961_v45, %v5962_v17  ;;  %v5967_v1 = vrot.slane %v5965_v14, 2  ;;  %v19808_v53 = vld [vmem:[#allocation36_spill] sm:$0xff] }
 0x19a   : > { %v6230_v49 = vadd.f32 %v5960_v28, %v5111_v63  ;;  %v6387_v16 = vmul.f32 %v12549_v39, %v13793_v33  ;;  %v6667_v2 = vmul.f32 %v19808_v53, %v19807_v30  ;;  %v6231_v28 = vadd.f32 %v5963_v60, %v5112_v3  ;;  %v19814_v3 = vld [vmem:[#allocation190_spill] sm:$0xff] }
 0x19b   : > { %v5966_v63 = vsel %vm12500_vm9, %v5964_v37, %v5965_v14  ;;  %v5969_v45 = vsel %vm12500_vm9, %v5967_v1, %v19811_v6  ;;  %v6669_v39 = vmul.f32 %v19572_v59, %v19812_v46  ;;  %v6978_v27 = vmul.f32 %v19813_v18, %v19807_v30  ;;  %v19816_v1 = vld [vmem:[#allocation51_spill] sm:$0xff] }
 0x19c   : > { %v6512_v31 = vadd.f32 %v6384_v34, %v6230_v49  ;;  %v6232_v17 = vadd.f32 %v5966_v63, %v5113_v11  ;;  %v6233_v53 = vadd.f32 %v5969_v45, %v5114_v62  ;;  %v6513_v14 = vadd.f32 %v6385_v43, %v6231_v28  ;;  %v19815_v49 = vld [vmem:[#allocation40_spill] sm:$0xff]  ;;  %v19817_v62 = vld [vmem:[#allocation37_spill] sm:$0xff] }
 0x19d   : > { %v6979_v37 = vmul.f32 %v19815_v49, %v19809_v50  ;;  %v6980_v60 = vmul.f32 %v19575_v48, %v19812_v46  ;;  %v14164_v11 = vmul.f32 %v19816_v1, %v13946_v54  ;;  %v7507_v6 = vrot.slane %v6978_v27, 7 }
 0x19e   : > { %v6794_v34 = vadd.f32 %v19814_v3, %v6512_v31  ;;  %v6514_v15 = vadd.f32 %v6386_v36, %v6232_v17  ;;  %v6515_v63 = vadd.f32 %v6387_v16, %v6233_v53  ;;  %v6795_v59 = vadd.f32 %v6667_v2, %v6513_v14  ;;  %v19818_v31 = vld [vmem:[#allocation193_spill] sm:$0xff]  ;;  %v19820_v16 = vld [vmem:[#allocation52_spill] sm:$0xff] }
 0x19f   : > { %v7510_v5 = vrot.slane %v6979_v37, 7  ;;  %v7932_v43 = vmul.f32 %v19817_v62, %v19807_v30  ;;  %v19819_v45 = vrot.slane %v19818_v31, 9  ;;  %v7509_v17 = vrot.slane %v7507_v6, 2 }
 0x1a0   : > { %v6796_v28 = vadd.f32 %v6668_v25, %v6514_v15  ;;  %v7513_v3 = vrot.slane %v6980_v60, 7  ;;  %v6797_v48 = vadd.f32 %v6669_v39, %v6515_v63  ;;  %v18972_v1 = vrot.slane %v14164_v11, 7  ;;  %v19821_v25 = vld [vmem:[#allocation41_spill] sm:$0xff] }
 0x1a1   : > { %v7508_v36 = vsel %vm12500_vm9, %v19819_v45, %v7507_v6  ;;  %v7512_v49 = vrot.slane %v7510_v5, 2  ;;  %v7511_v2 = vsel %vm12500_vm9, %v7509_v17, %v7510_v5  ;;  %v7933_v53 = vmul.f32 %v19820_v16, %v19809_v50  ;;  %v19822_v6 = vld [vmem:[#allocation55_spill] sm:$0xff] }
 0x1a2   : > { %v7778_v18 = vadd.f32 %v7508_v36, %v6794_v34  ;;  %v7515_v27 = vrot.slane %v7513_v3, 2  ;;  %v7934_v14 = vmul.f32 %v19821_v25, %v19812_v46  ;;  %v7779_v15 = vadd.f32 %v7511_v2, %v6795_v59  ;;  %v19824_v2 = vld [vmem:[#allocation57_spill] sm:$0xff] }
 0x1a3   : > { %v7514_v37 = vsel %vm12500_vm9, %v7512_v49, %v7513_v3  ;;  %v7935_v39 = vmul.f32 %v19638_v35, %v13946_v54  ;;  %v14189_v63 = vcombine.high %v19822_v6, %v19822_v6  ;;  %v8214_v31 = vmul.f32 %v19822_v6, %v14085_v42 }
 0x1a4   : > { %v8060_v60 = vadd.f32 %v7932_v43, %v7778_v18  ;;  %v7517_v5 = vsel %vm12500_vm9, %v7515_v27, %v18972_v1  ;;  %v7780_v34 = vadd.f32 %v7514_v37, %v6796_v28  ;;  %v3062_v59 = vcombine.high %v14106_v57, %v14106_v57 }
 0x1a5   : > { %19823 = vst [vmem:[#allocation190_spill] sm:$0xff] %v14189_v63  ;;  %v7781_v49 = vadd.f32 %v7517_v5, %v6797_v48  ;;  %v8061_v45 = vadd.f32 %v7933_v53, %v7779_v15  ;;  %v8216_v18 = vmul.f32 %v19773_v41, %v14095_v22  ;;  %v8215_v36 = vmul.f32 %v14189_v63, %v14088_v4  ;;  %v19825_v48 = vld [vmem:[#allocation58_spill] sm:$0xff]  ;;  %v19826_v5 = vld [vmem:[#allocation60_spill] sm:$0xff] }
 0x1a6   : > { %v8062_v43 = vadd.f32 %v7934_v14, %v7780_v34  ;;  %v8217_v28 = vmul.f32 %v14000_v61, %v14124_v12  ;;  %v8525_v17 = vmul.f32 %v19755_v21, %v14085_v42  ;;  %v8526_v27 = vmul.f32 %v19824_v2, %v14088_v4 }
 0x1a7   : > { %v8063_v3 = vadd.f32 %v7935_v39, %v7781_v49  ;;  %v8527_v57 = vmul.f32 %v19825_v48, %v14095_v22  ;;  %v8528_v53 = vmul.f32 %v19780_v44, %v14124_v12  ;;  %v8342_v14 = vadd.f32 %v8214_v31, %v8060_v60  ;;  %v14216_v49 = vld [vmem:[%s18721_s5] ss:$0 sm:$0xff] }
 0x1a8   : > { %v8343_v37 = vadd.f32 %v8215_v36, %v8061_v45  ;;  %v11384_v15 = vrot.slane %v8525_v17, 9  ;;  %v14211_v34 = vcombine.high %v19826_v5, %v19826_v5  ;;  %v8344_v1 = vadd.f32 %v8216_v18, %v8062_v43  ;;  %v19828_v45 = vld [vmem:[#allocation127_spill] sm:$0xff]  ;;  %v14226_v18 = vpop.permute.xlu0 %3498 }
 0x1a9   : > { %v9055_v46 = vrot.slane %v8526_v27, 7  ;;  %v9058_v42 = vrot.slane %v8527_v57, 7  ;;  %v9061_v39 = vrot.slane %v8528_v53, 7  ;;  %v14218_v50 = vadd.f32 %v8217_v28, %v8063_v3  ;;  %v19829_v57 = vld [vmem:[#allocation63_spill] sm:$0xff] }
 0x1aa   : > { %19827 = vst [vmem:[#allocation193_spill] sm:$0xff] %v14211_v34  ;;  %v9480_v60 = vmul.f32 %v19826_v5, %v14088_v4  ;;  %v9481_v31 = vmul.f32 %v14211_v34, %v14095_v22  ;;  %v2108_v36 = vadd.f32 %v13775_v51, %v19828_v45  ;;  %v9482_v28 = vmul.f32 %v19829_v57, %v14124_v12 }
 0x1ab   : > { %v9056_v43 = vsel %vm12500_vm9, %v11384_v15, %v9055_v46  ;;  %v9057_v17 = vrot.slane %v9055_v46, 2  ;;  %v9060_v27 = vrot.slane %v9058_v42, 2  ;;  %v14232_v3 = vrot.slane %v9061_v39, 2 }
 0x1ac   : > { %v9326_v53 = vadd.f32 %v9056_v43, %v8342_v14  ;;  %v2271_v4 = vmax.f32 %v2108_v36, 0.0  ;;  %v3063_v46 = vcombine.high %v14121_v26, %v14121_v26  ;;  %v4609_v15 = vrot.slane %v14226_v18, %v12472_v55 }
 0x1ad   : > { %v9059_v45 = vsel %vm12500_vm9, %v9057_v17, %v9058_v42  ;;  %v9062_v30 = vsel %vm12500_vm9, %v9060_v27, %v9061_v39  ;;  %v4616_v14 = vrot.slane %v14226_v18, %v12475_v56  ;;  %v4623_v42 = vrot.slane %v14226_v18, %v12478_v58 }
 0x1ae   : > { %v9327_v12 = vadd.f32 %v9059_v45, %v8343_v37  ;;  %v9328_v35 = vadd.f32 %v9062_v30, %v8344_v1  ;;  %v2312_v57 = vmin.f32 %v2271_v4, 6.0  ;;  %v14246_v36 = vadd.f32 %v9480_v60, %v9326_v53  ;;  %v19833_v4 = vld [vmem:[#allocation178_spill] sm:$0xff] }
 0x1af   : > { %v14252_v43 = vmul.f32 %v4609_v15, %v3062_v59  ;;  %v14258_v30 = vmul.f32 %v4616_v14, %v14121_v26  ;;  %v14262_v60 = vmul.f32 %v4623_v42, %v3063_v46  ;;  %v5115_v53 = vmul.f32 %v12489_v0, %v13793_v33  ;;  %v19834_v15 = vld [vmem:[#allocation179_spill] sm:$0xff] }
 0x1b0   : > { %19830 = vst [vmem:[#allocation60_spill] sm:$0xff] %v14246_v36  ;;  %v14254_v17 = vadd.f32 %v9481_v31, %v9327_v12  ;;  %v2554_v27 = vcombine.high %v2312_v57, %v2312_v57  ;;  %v2561_v37 = vrot.slane %v2312_v57, %v11937_v10  ;;  %v14260_v1 = vadd.f32 %v9482_v28, %v9328_v35  ;;  %v19835_v57 = vld [vmem:[#allocation15_spill] sm:$0xff] }
 0x1b1   : > { %v5116_v45 = vmul.f32 %v19797_v13, %v19833_v4  ;;  %v5117_v12 = vmul.f32 %v19798_v20, %v19834_v15  ;;  %v5434_v26 = vmul.f32 %v12531_v24, %v19833_v4  ;;  %v19836_v35 = vrot.slane %v19835_v57, %v12472_v55  ;;  %v19849_v13 = vld [vmem:[#allocation201_spill] sm:$0xff] }
 0x1b2   : > { %19831 = vst [vmem:[#allocation127_spill] sm:$0xff] %v14254_v17  ;;  %19832 = vst [vmem:[#allocation217_spill] sm:$0xff] %v14260_v1  ;;  %v2568_v59 = vrot.slane %v2554_v27, %v11937_v10  ;;  %v2569_v31 = vcombine.high %v2561_v37, %v2561_v37  ;;  %v5435_v46 = vmul.f32 %v19799_v47, %v19834_v15  ;;  %v19838_v42 = vrot.slane %v14118_v29, 7  ;;  %v19845_v29 = vld [vmem:[#allocation200_spill] sm:$0xff] }
 0x1b3   : > { %v14276_v28 = vmul.f32 %v19836_v35, %v2561_v37  ;;  %v14282_v14 = vmul.f32 %v12545_v38, %v13809_v9  ;;  %v19839_v22 = vrot.slane %v19835_v57, %v12475_v56  ;;  %v5971_v17 = vrot.slane %v5434_v26, 7  ;;  %v14293_v35 = vpop.f32.mrf.mxu0 }
 0x1b4   : > { %v5970_v27 = vrot.slane %v19838_v42, 2  ;;  %v2570_v39 = vcombine.high %v2568_v59, %v2568_v59  ;;  %v6388_v37 = vmul.f32 %v19742_v40, %v19833_v4  ;;  %19841 = vst [vmem:[#allocation219_spill] sm:$0xff] %v14293_v35  ;;  %v19842_v36 = vrot.slane %v19835_v57, %v12478_v58 }
 0x1b5   : > { %19837 = vst [vmem:[#allocation15_spill] sm:$0xff] %v14276_v28  ;;  %v14289_v1 = vmul.f32 %v19839_v22, %v2569_v31  ;;  %v5974_v28 = vrot.slane %v5435_v46, 7  ;;  %v6389_v42 = vmul.f32 %v19804_v52, %v19834_v15  ;;  %v5973_v31 = vrot.slane %v5971_v17, 2 }
 0x1b6   : > { %v14298_v33 = vmul.f32 %v19842_v36, %v2568_v59  ;;  %v5972_v22 = vsel %vm12500_vm9, %v5970_v27, %v5971_v17  ;;  %v6390_v26 = vmul.f32 %v19805_v7, %v13809_v9  ;;  %v6670_v4 = vmul.f32 %v12518_v32, %v13946_v54  ;;  %v19844_v59 = vld [vmem:[#allocation36_spill] sm:$0xff]  ;;  %v19847_v17 = vld [vmem:[#allocation39_spill] sm:$0xff]  ;;  %v19850_v54 = vld [vmem:[#allocation49_spill] sm:$0xff] }
 0x1b7   : > { %19840 = vst [vmem:[#allocation218_spill] sm:$0xff] %v14289_v1  ;;  %v11553_v1 = vpop.f32.mrf.mxu0  ;;  %v5976_v47 = vrot.slane %v5974_v28, 2  ;;  %v6234_v36 = vadd.f32 %v5972_v22, %v5115_v53  ;;  %v6671_v46 = vmul.f32 %v19844_v59, %v13957_v19  ;;  %v5975_v15 = vsel %vm12500_vm9, %v5973_v31, %v5974_v28  ;;  %v19848_v7 = vld [vmem:[#allocation40_spill] sm:$0xff] }
 0x1b8   : > { %19843 = vst [vmem:[#allocation220_spill] sm:$0xff] %v14298_v33  ;;  %v19846_v33 = vld [vmem:[#allocation35_spill] sm:$0xff]  ;;  %v6982_v27 = vmul.f32 %v19847_v17, %v13957_v19  ;;  %v6983_v52 = vmul.f32 %v19848_v7, %v19845_v29  ;;  %v14321_v1 = vmul.f32 %v19850_v54, %v19849_v13  ;;  %v19851_v53 = vrot.slane %v14282_v14, 7 }
 0x1b9   : > { %v6672_v20 = vmul.f32 %v19846_v33, %v19845_v29  ;;  %v6235_v40 = vadd.f32 %v5975_v15, %v5116_v45  ;;  %v6516_v35 = vadd.f32 %v6388_v37, %v6234_v36  ;;  %v19852_v33 = vrot.slane %v14164_v11, 7 }
 0x1ba   : > { %v5978_v22 = vsel %vm12500_vm9, %v5976_v47, %v19851_v53  ;;  %v7519_v59 = vrot.slane %v6982_v27, 7  ;;  %v7522_v17 = vrot.slane %v6983_v52, 7  ;;  %v7525_v32 = vrot.slane %v14321_v1, 7  ;;  %v19857_v53 = vld [vmem:[#allocation69_spill] sm:$0xff] }
 0x1bb   : > { %v7518_v28 = vrot.slane %v19852_v33, 2  ;;  %v6236_v31 = vadd.f32 %v5978_v22, %v5117_v12  ;;  %v19853_v7 = vrot.slane %v19835_v57, %v12510_v23  ;;  %v6517_v24 = vadd.f32 %v6389_v42, %v6235_v40 }
 0x1bc   : > { %v6798_v0 = vadd.f32 %v6670_v4, %v6516_v35  ;;  %v7936_v47 = vmul.f32 %v19817_v62, %v13957_v19  ;;  %v7521_v33 = vrot.slane %v7519_v59, 2  ;;  %v7524_v15 = vrot.slane %v7522_v17, 2 }
 0x1bd   : > { %v14333_v54 = vmul.f32 %v19853_v7, %v2570_v39  ;;  %v6518_v45 = vadd.f32 %v6390_v26, %v6236_v31  ;;  %v7520_v11 = vsel %vm12500_vm9, %v7518_v28, %v7519_v59  ;;  %v6799_v12 = vadd.f32 %v6671_v46, %v6517_v24  ;;  %v19855_v24 = vld [vmem:[#allocation59_spill] sm:$0xff] }
 0x1be   : > { %v7782_v52 = vadd.f32 %v7520_v11, %v6798_v0  ;;  %v7937_v37 = vmul.f32 %v19820_v16, %v19845_v29  ;;  %v8218_v7 = vmul.f32 %v19822_v6, %v14252_v43  ;;  %v7523_v40 = vsel %vm12500_vm9, %v7521_v33, %v7522_v17 }
 0x1bf   : > { %19854 = vst [vmem:[#allocation221_spill] sm:$0xff] %v14333_v54  ;;  %v6800_v39 = vadd.f32 %v6672_v20, %v6518_v45  ;;  %v7526_v4 = vsel %vm12500_vm9, %v7524_v15, %v7525_v32  ;;  %v7938_v57 = vmul.f32 %v19821_v25, %v19849_v13  ;;  %v7783_v35 = vadd.f32 %v7523_v40, %v6799_v12  ;;  %v19908_v25 = vld [vmem:[#allocation53_spill] sm:$0xff] }
 0x1c0   : > { %v8064_v42 = vadd.f32 %v7936_v47, %v7782_v52  ;;  %v8219_v0 = vmul.f32 %v14189_v63, %v14258_v30  ;;  %v14355_v26 = vsel %vm12500_vm9, %v19855_v24, %v19755_v21  ;;  %v8530_v59 = vmul.f32 %v19824_v2, %v14258_v30 }
 0x1c1   : > { %19856 = vst [vmem:[#allocation222_spill] sm:$0xff] %v14355_v26  ;;  %v7784_v20 = vadd.f32 %v7526_v4, %v6800_v39  ;;  %v8529_v36 = vmul.f32 %v14355_v26, %v14252_v43  ;;  %v8531_v46 = vmul.f32 %v19825_v48, %v14262_v60  ;;  %v8065_v17 = vadd.f32 %v7937_v37, %v7783_v35 }
 0x1c2   : > { %v8220_v27 = vmul.f32 %v19773_v41, %v14262_v60  ;;  %v8346_v1 = vadd.f32 %v8218_v7, %v8064_v42  ;;  %v9483_v22 = vmul.f32 %v19857_v53, %v14252_v43  ;;  %v9067_v47 = vrot.slane %v8530_v59, 7  ;;  %v19862_v42 = vld [vmem:[#allocation141_spill] sm:$0xff]  ;;  %v19863_v59 = vld [vmem:[#allocation26_spill] sm:$0xff] }
 0x1c3   : > { %v8066_v28 = vadd.f32 %v7938_v57, %v7784_v20  ;;  %v9064_v31 = vrot.slane %v8529_v36, 7  ;;  %v9070_v45 = vrot.slane %v8531_v46, 7  ;;  %v8347_v11 = vadd.f32 %v8219_v0, %v8065_v17  ;;  %v3503_v57 = vpop.permute.xlu1 %3502 }
 0x1c4   : > { %v9484_v33 = vmul.f32 %v19826_v5, %v14258_v30  ;;  %v14371_v15 = vrot.slane %v14216_v49, %v11937_v10  ;;  %v19858_v12 = vcombine.high %v14216_v49, %v14216_v49  ;;  %v9069_v7 = vrot.slane %v9067_v47, 2 }
 0x1c5   : > { %v9065_v43 = vsel %vm12500_vm9, %v14232_v3, %v9064_v31  ;;  %v9066_v37 = vrot.slane %v9064_v31, 2  ;;  %v9485_v39 = vmul.f32 %v14211_v34, %v14262_v60  ;;  %v14384_v30 = vadd.f32 %v8220_v27, %v8066_v28 }
 0x1c6   : > { %v14377_v52 = vrot.slane %v19858_v12, %v11937_v10  ;;  %v14386_v40 = vrot.slane %v9070_v45, 2  ;;  %v9329_v4 = vadd.f32 %v9065_v43, %v14218_v50  ;;  %v14391_v49 = vcombine.high %v14371_v15, %v14371_v15 }
 0x1c7   : > { %v9068_v35 = vsel %vm12500_vm9, %v9066_v37, %v9067_v47  ;;  %v9071_v3 = vsel %vm12500_vm9, %v9069_v7, %v9070_v45  ;;  %v2258_v0 = vadd.f32 %v13775_v51, %v19862_v42  ;;  %v5118_v46 = vmul.f32 %v19863_v59, %v13809_v9  ;;  %v19865_v47 = vld [vmem:[#allocation97_spill] sm:$0xff]  ;;  %v19866_v45 = vld [vmem:[#allocation32_spill] sm:$0xff] }
 0x1c8   : > { %19859 = vst [vmem:[#allocation223_spill] sm:$0xff] %v14377_v52  ;;  %19860 = vst [vmem:[#allocation224_spill] sm:$0xff] %v14391_v49  ;;  %v14399_v60 = vcombine.high %v14377_v52, %v14377_v52  ;;  %v9330_v20 = vadd.f32 %v9068_v35, %v8346_v1  ;;  %v9331_v50 = vadd.f32 %v9071_v3, %v8347_v11  ;;  %v19864_v28 = vrot.slane %v14282_v14, 7  ;;  %v19867_v7 = vld [vmem:[#allocation44_spill] sm:$0xff] }
 0x1c9   : > { %v9611_v36 = vadd.f32 %v9483_v22, %v9329_v4  ;;  %v2301_v17 = vmax.f32 %v2258_v0, 0.0  ;;  %v4637_v27 = vrot.slane %v3503_v57, %v12472_v55  ;;  %v6391_v12 = vmul.f32 %v19866_v45, %v19865_v47  ;;  %v19869_v4 = vld [vmem:[#allocation181_spill] sm:$0xff]  ;;  %v19871_v14 = vld [vmem:[#allocation144_spill] sm:$0xff] }
 0x1ca   : > { %19861 = vst [vmem:[#allocation225_spill] sm:$0xff] %v14399_v60  ;;  %v5979_v31 = vrot.slane %v19864_v28, 2  ;;  %v9612_v43 = vadd.f32 %v9484_v33, %v9330_v20  ;;  %v9613_v37 = vadd.f32 %v9485_v39, %v9331_v50  ;;  %v6673_v42 = vmul.f32 %v19867_v7, %v19849_v13  ;;  %v19873_v39 = vld [vmem:[#allocation204_spill] sm:$0xff] }
 0x1cb   : > { %v7527_v1 = vrot.slane %v7525_v32, 2  ;;  %v14413_v22 = vadd.f32 %v14399_v60, %v9611_v36  ;;  %v2342_v11 = vmin.f32 %v2301_v17, 6.0  ;;  %v19870_v35 = vrot.slane %v19869_v4, 7  ;;  %v19877_v4 = vld [vmem:[#allocation159_spill] sm:$0xff] }
 0x1cc   : > { %v2113_v3 = vadd.f32 %v13775_v51, %v19871_v14  ;;  %v14422_v0 = vadd.f32 %v14371_v15, %v9612_v43  ;;  %v19874_v20 = vrot.slane %v19873_v39, 7  ;;  %v14430_v50 = vmul.f32 %v19863_v59, %v14333_v54  ;;  %v19879_v14 = vld [vmem:[#allocation81_spill] sm:$0xff] }
 0x1cd   : > { %19868 = vst [vmem:[#allocation141_spill] sm:$0xff] %v14413_v22  ;;  %v5981_v57 = vsel %vm12500_vm9, %v5979_v31, %v19870_v35  ;;  %v3070_v36 = vrot.slane %v2342_v11, %v11937_v10  ;;  %v14435_v28 = vmul.f32 %v12545_v38, %v14333_v54  ;;  %v19876_v31 = vld [vmem:[#allocation89_spill] sm:$0xff]  ;;  %v14441_v35 = vadd.f32 %v13775_v51, %v19877_v4 }
 0x1ce   : > { %19872 = vst [vmem:[#allocation181_spill] sm:$0xff] %v14422_v0  ;;  %v6237_v33 = vadd.f32 %v5981_v57, %v5118_v46  ;;  %v7529_v32 = vsel %vm12500_vm9, %v7527_v1, %v19874_v20  ;;  %v2272_v17 = vmax.f32 %v2113_v3, 0.0  ;;  %v2118_v43 = vadd.f32 %v13775_v51, %v19876_v31  ;;  %v19878_v1 = vld [vmem:[#allocation165_spill] sm:$0xff] }
 0x1cf   : > { %19875 = vst [vmem:[#allocation144_spill] sm:$0xff] %v14435_v28  ;;  %v14445_v57 = vadd.f32 %v13775_v51, %v19878_v1  ;;  %v19880_v39 = vld [vmem:[#allocation101_spill] sm:$0xff]  ;;  %v19881_v3 = vrot.slane %v14226_v18, %v12510_v23  ;;  %v3071_v0 = vcombine.high %v3070_v36, %v3070_v36  ;;  %v14458_v31 = vadd.f32 %v14391_v49, %v9613_v37 }
 0x1d0   : > { %v6519_v46 = vadd.f32 %v6391_v12, %v6237_v33  ;;  %v14449_v11 = vadd.f32 %v19880_v39, %v19879_v14  ;;  %v2313_v22 = vmin.f32 %v2272_v17, 6.0  ;;  %v14455_v33 = vpop.f32.mrf.mxu0  ;;  %v2273_v51 = vmax.f32 %v2118_v43, 0.0  ;;  %v19884_v17 = vld [vmem:[#allocation63_spill] sm:$0xff] }
 0x1d1   : > { %v4960_v20 = vmul.f32 %v19881_v3, %v3070_v36  ;;  %19882 = vst [vmem:[#allocation204_spill] sm:$0xff] %v14455_v33  ;;  %19883 = vst [vmem:[#allocation89_spill] sm:$0xff] %v14458_v31  ;;  %v2274_v1 = vmax.f32 %v14441_v35, 0.0  ;;  %v4961_v13 = vmul.f32 %v4637_v27, %v3071_v0  ;;  %v2275_v18 = vmax.f32 %v14445_v57, 0.0  ;;  %v19886_v31 = vld [vmem:[#allocation207_spill] sm:$0xff] }
 0x1d2   : > { %v6801_v4 = vadd.f32 %v6673_v42, %v6519_v46  ;;  %v11556_v36 = vpop.f32.mrf.mxu0  ;;  %v2571_v29 = vcombine.high %v2313_v22, %v2313_v22  ;;  %v2578_v19 = vrot.slane %v2313_v22, %v11937_v10  ;;  %v19885_v43 = vrot.slane %v14435_v28, 7  ;;  %v19887_v57 = vld [vmem:[#allocation19_spill] sm:$0xff] }
 0x1d3   : > { %v8221_v14 = vmul.f32 %v14000_v61, %v4960_v20  ;;  %v8532_v39 = vmul.f32 %v19780_v44, %v4960_v20  ;;  %v9486_v3 = vmul.f32 %v19884_v17, %v4960_v20  ;;  %v8533_v42 = vmul.f32 %v19855_v24, %v4961_v13 }
 0x1d4   : > { %v7785_v12 = vadd.f32 %v7529_v32, %v6801_v4  ;;  %v5704_v46 = vrot.slane %v19885_v43, 2  ;;  %v2314_v35 = vmin.f32 %v2273_v51, 6.0  ;;  %v2585_v27 = vrot.slane %v2571_v29, %v11937_v10 }
 0x1d5   : > { %v9073_v37 = vrot.slane %v8532_v39, 7  ;;  %v2586_v0 = vcombine.high %v2578_v19, %v2578_v19  ;;  %v19888_v36 = vrot.slane %v19887_v57, %v12472_v55  ;;  %v9076_v4 = vrot.slane %v8533_v42, 7 }
 0x1d6   : > { %v8067_v47 = vadd.f32 %v19886_v31, %v7785_v12  ;;  %v9487_v39 = vmul.f32 %v19857_v53, %v4961_v13  ;;  %v2587_v12 = vcombine.high %v2585_v27, %v2585_v27  ;;  %v19890_v31 = vld [vmem:[#allocation29_spill] sm:$0xff]  ;;  %v2588_v42 = vcombine.high %v2314_v35, %v2314_v35 }
 0x1d7   : > { %v14474_v20 = vmul.f32 %v19888_v36, %v2578_v19  ;;  %v9074_v22 = vsel %vm12500_vm9, %v14386_v40, %v9073_v37  ;;  %v9075_v32 = vrot.slane %v9073_v37, 2  ;;  %v19891_v29 = vrot.slane %v19890_v31, %v12472_v55  ;;  %v19895_v37 = vld [vmem:[#allocation23_spill] sm:$0xff] }
 0x1d8   : > { %v9332_v51 = vadd.f32 %v9074_v22, %v14384_v30  ;;  %v8349_v43 = vadd.f32 %v8221_v14, %v8067_v47  ;;  %v19893_v57 = vrot.slane %v19890_v31, %v12475_v56  ;;  %v19896_v14 = vrot.slane %v19890_v31, %v12478_v58  ;;  %v19898_v22 = vld [vmem:[#allocation16_spill] sm:$0xff] }
 0x1d9   : > { %19889 = vst [vmem:[#allocation159_spill] sm:$0xff] %v14474_v20  ;;  %v14484_v9 = vmul.f32 %v19891_v29, %v2586_v0  ;;  %v9077_v19 = vsel %vm12500_vm9, %v9075_v32, %v9076_v4  ;;  %v5338_v13 = vmul.f32 %v19895_v37, %v14474_v20  ;;  %v6303_v0 = vmul.f32 %v19866_v45, %v14474_v20  ;;  %v19900_v29 = vld [vmem:[#allocation27_spill] sm:$0xff] }
 0x1da   : > { %v14491_v40 = vmul.f32 %v19893_v57, %v2585_v27  ;;  %v9614_v30 = vadd.f32 %v9486_v3, %v9332_v51  ;;  %v9333_v47 = vadd.f32 %v9077_v19, %v8349_v43  ;;  %v14498_v36 = vmul.f32 %v19896_v14, %v2587_v12  ;;  %v19899_v27 = vld [vmem:[#allocation10_spill] sm:$0xff]  ;;  %v19901_v51 = vld [vmem:[#allocation24_spill] sm:$0xff]  ;;  %v19903_v12 = vld [vmem:[#allocation47_spill] sm:$0xff] }
 0x1db   : > { %19892 = vst [vmem:[#allocation165_spill] sm:$0xff] %v14484_v9  ;;  %v5031_v32 = vmul.f32 %v19898_v22, %v14484_v9  ;;  %v5339_v4 = vmul.f32 %v19899_v27, %v14484_v9  ;;  %v5705_v28 = vrot.slane %v5338_v13, 7  ;;  %v14510_v43 = vmul.f32 %v19901_v51, %v14484_v9  ;;  %v19905_v14 = vld [vmem:[#allocation21_spill] sm:$0xff] }
 0x1dc   : > { %19894 = vst [vmem:[#allocation81_spill] sm:$0xff] %v14491_v40  ;;  %19897 = vst [vmem:[#allocation101_spill] sm:$0xff] %v14498_v36  ;;  %v5340_v57 = vmul.f32 %v19900_v29, %v14491_v40  ;;  %v9615_v3 = vadd.f32 %v9487_v39, %v9333_v47  ;;  %v14514_v19 = vmul.f32 %v19903_v12, %v14474_v20  ;;  %v2315_v33 = vmin.f32 %v2274_v1, 6.0 }
 0x1dd   : > { %19902 = vst [vmem:[#allocation207_spill] sm:$0xff] %v14510_v43  ;;  %v14518_v36 = vmul.f32 %v19905_v14, %v14484_v9  ;;  %v14521_v54 = vadd.f32 %v14377_v52, %v9614_v30  ;;  %v5706_v40 = vsel %vm12500_vm9, %v5704_v46, %v5705_v28  ;;  %v11342_v13 = vrot.slane %v5339_v4, 9 }
 0x1de   : > { %19904 = vst [vmem:[#allocation19_spill] sm:$0xff] %v14514_v19  ;;  %v5709_v39 = vrot.slane %v5340_v57, 7  ;;  %v9770_v47 = vadd.f32 %v14399_v60, %v9615_v3  ;;  %v6149_v43 = vadd.f32 %v5706_v40, %v14430_v50  ;;  %v14530_v62 = vmul.f32 %v19908_v25, %v14474_v20  ;;  %v19934_v19 = vld [vmem:[#allocation109_spill] sm:$0xff] }
 0x1df   : > { %19906 = vst [vmem:[#allocation29_spill] sm:$0xff] %v14518_v36  ;;  %19907 = vst [vmem:[#allocation226_spill] sm:$0xff] %v14521_v54  ;;  %v2595_v28 = vrot.slane %v2314_v35, %v11937_v10  ;;  %v14542_v50 = vmul.f32 %v19855_v24, %v14474_v20  ;;  %v2602_v40 = vrot.slane %v2588_v42, %v11937_v10  ;;  %v19959_v24 = vld [vmem:[#allocation98_spill] sm:$0xff] }
 0x1e0   : > { %19909 = vst [vmem:[#allocation227_spill] sm:$0xff] %v14530_v62  ;;  %v5710_v9 = vsel %vm12500_vm9, %v11342_v13, %v5709_v39  ;;  %v14534_v30 = vrot.slane %v5709_v39, 2  ;;  %v9898_v46 = vmax.f32 %v9770_v47, 0.0  ;;  %v14545_v57 = vadd.f32 %v6303_v0, %v6149_v43  ;;  %v19930_v62 = vld [vmem:[#allocation42_spill] sm:$0xff] }
 0x1e1   : > { %v14538_v4 = vadd.f32 %v5710_v9, %v5031_v32  ;;  %19912 = vst [vmem:[#allocation230_spill] sm:$0xff] %v14542_v50  ;;  %v2603_v3 = vcombine.high %v2595_v28, %v2595_v28  ;;  %v2316_v13 = vmin.f32 %v2275_v18, 6.0  ;;  %v19915_v35 = vrot.slane %v19890_v31, %v12510_v23  ;;  %v19917_v9 = vld [vmem:[#allocation82_spill] sm:$0xff]  ;;  %v19918_v32 = vld [vmem:[#allocation104_spill] sm:$0xff] }
 0x1e2   : > { %19910 = vst [vmem:[#allocation228_spill] sm:$0xff] %v14534_v30  ;;  %19913 = vst [vmem:[#allocation231_spill] sm:$0xff] %v14545_v57  ;;  %v14547_v39 = vmin.f32 %v9898_v46, 6.0  ;;  %v2604_v30 = vcombine.high %v2602_v40, %v2602_v40  ;;  %v6676_v54 = vadd.f32 %v19918_v32, %v19917_v9  ;;  %v2605_v0 = vcombine.high %v2315_v33, %v2315_v33  ;;  %v19926_v9 = vld [vmem:[#allocation103_spill] sm:$0xff] }
 0x1e3   : > { %19911 = vst [vmem:[#allocation229_spill] sm:$0xff] %v14538_v4  ;;  %v14552_v47 = vmul.f32 %v19915_v35, %v2595_v28  ;;  %v19919_v4 = vld [vmem:[#allocation33_spill] sm:$0xff]  ;;  %v2612_v1 = vrot.slane %v2315_v33, %v11937_v10  ;;  %v2622_v18 = vcombine.high %v2316_v13, %v2316_v13  ;;  %v2629_v35 = vrot.slane %v2316_v13, %v11937_v10 }
 0x1e4   : > { %19914 = vst [vmem:[#allocation232_spill] sm:$0xff] %v14547_v39  ;;  %v19920_v36 = vrot.slane %v19919_v4, %v12475_v56  ;;  %v19922_v43 = vrot.slane %v19919_v4, %v12472_v55  ;;  %v19924_v31 = vrot.slane %v19919_v4, %v12478_v58  ;;  %v19927_v32 = vrot.slane %v19926_v9, 7  ;;  %v19942_v9 = vld [vmem:[#allocation122_spill] sm:$0xff] }
 0x1e5   : > { %19916 = vst [vmem:[#allocation233_spill] sm:$0xff] %v14552_v47  ;;  %v2620_v39 = vcombine.high %v2612_v1, %v2612_v1  ;;  %v19928_v33 = vrot.slane %v19919_v4, %v12510_v23 }
 0x1e6   : > { %v14559_v42 = vmul.f32 %v19920_v36, %v2602_v40  ;;  %v14565_v46 = vmul.f32 %v19922_v43, %v2603_v3  ;;  %v14570_v28 = vmul.f32 %v19924_v31, %v2604_v30  ;;  %v7137_v36 = vrot.slane %v19927_v32, 2 }
 0x1e7   : > { %v2619_v40 = vrot.slane %v2605_v0, %v11937_v10  ;;  %v14579_v57 = vmul.f32 %v19928_v33, %v2612_v1  ;;  %v2636_v3 = vrot.slane %v2622_v18, %v11937_v10  ;;  %v2637_v43 = vcombine.high %v2629_v35, %v2629_v35  ;;  %v19937_v33 = vld [vmem:[#allocation38_spill] sm:$0xff] }
 0x1e8   : > { %19921 = vst [vmem:[#allocation82_spill] sm:$0xff] %v14559_v42  ;;  %19923 = vst [vmem:[#allocation104_spill] sm:$0xff] %v14565_v46  ;;  %v19931_v30 = vrot.slane %v19930_v62, %v12478_v58  ;;  %v19933_v13 = vmov %v19927_v32  ;;  %v19935_v32 = vld [vmem:[#allocation117_spill] sm:$0xff]  ;;  %v19938_v18 = vrot.slane %v19937_v33, %v12472_v55  ;;  %v19944_v46 = vld [vmem:[#allocation126_spill] sm:$0xff] }
 0x1e9   : > { %19925 = vst [vmem:[#allocation33_spill] sm:$0xff] %v14570_v28  ;;  %19929 = vst [vmem:[#allocation103_spill] sm:$0xff] %v14579_v57  ;;  %v7136_v0 = vsel %vm12500_vm9, %v19934_v19, %v19933_v13  ;;  %v19936_v28 = vrot.slane %v19935_v32, 7  ;;  %v2621_v1 = vcombine.high %v2619_v40, %v2619_v40  ;;  %v19946_v13 = vrot.slane %v19930_v62, %v12510_v23 }
 0x1ea   : > { %v14585_v31 = vmul.f32 %v19931_v30, %v2629_v35  ;;  %v14599_v42 = vmul.f32 %v19938_v18, %v2620_v39  ;;  %v19940_v35 = vrot.slane %v19930_v62, %v12472_v55  ;;  %v2638_v39 = vcombine.high %v2636_v3, %v2636_v3  ;;  %v19950_v18 = vld [vmem:[#allocation43_spill] sm:$0xff] }
 0x1eb   : > { %v7139_v4 = vsel %vm12500_vm9, %v7137_v36, %v19936_v28  ;;  %v5038_v28 = vmul.f32 %v19863_v59, %v14579_v57  ;;  %v14615_v36 = vmul.f32 %v12545_v38, %v14579_v57  ;;  %v14620_v32 = vmul.f32 %v19946_v13, %v2637_v43 }
 0x1ec   : > { %19932 = vst [vmem:[#allocation42_spill] sm:$0xff] %v14585_v31  ;;  %19939 = vst [vmem:[#allocation109_spill] sm:$0xff] %v14599_v42  ;;  %v14604_v30 = vmul.f32 %v19940_v35, %v2619_v40  ;;  %v19943_v31 = vrot.slane %v19942_v9, 7  ;;  %v19948_v40 = vrot.slane %v19930_v62, %v12475_v56  ;;  %v19951_v35 = vrot.slane %v19950_v18, %v12472_v55 }
 0x1ed   : > { %19945 = vst [vmem:[#allocation38_spill] sm:$0xff] %v14615_v36  ;;  %19947 = vst [vmem:[#allocation122_spill] sm:$0xff] %v14620_v32  ;;  %v19034_v13 = vrot.slane %v14615_v36, 7  ;;  %v6311_v62 = vmul.f32 %v19866_v45, %v14599_v42  ;;  %v7660_v50 = vadd.f32 %v7139_v4, %v6676_v54  ;;  %v19961_v36 = vld [vmem:[#allocation3_spill] sm:$0xff]  ;;  %v19962_v4 = vld [vmem:[#allocation125_spill] sm:$0xff] }
 0x1ee   : > { %19941 = vst [vmem:[#allocation117_spill] sm:$0xff] %v14604_v30  ;;  %v7142_v19 = vsel %vm12500_vm9, %v19944_v46, %v19943_v31  ;;  %v14625_v33 = vmul.f32 %v19948_v40, %v2621_v1  ;;  %v5347_v46 = vmul.f32 %v19895_v37, %v14599_v42  ;;  %v5348_v31 = vmul.f32 %v19899_v27, %v14604_v30 }
 0x1ef   : > { %v14634_v9 = vmul.f32 %v19951_v35, %v2636_v3  ;;  %v5039_v43 = vmul.f32 %v19898_v22, %v14604_v30  ;;  %v14643_v1 = vmul.f32 %v19903_v12, %v14599_v42  ;;  %v14649_v3 = vmul.f32 %v19901_v51, %v14604_v30 }
 0x1f0   : > { %19949 = vst [vmem:[#allocation126_spill] sm:$0xff] %v14625_v33  ;;  %v5349_v40 = vmul.f32 %v19900_v29, %v14625_v33  ;;  %v5730_v32 = vrot.slane %v5347_v46, 7  ;;  %v14653_v35 = vmul.f32 %v19905_v14, %v14604_v30  ;;  %v11343_v57 = vrot.slane %v5348_v31, 9  ;;  %v19960_v31 = vld [vmem:[#allocation115_spill] sm:$0xff] }
 0x1f1   : > { %19952 = vst [vmem:[#allocation43_spill] sm:$0xff] %v14634_v9  ;;  %19953 = vst [vmem:[#allocation234_spill] sm:$0xff] %v14643_v1  ;;  %v5729_v9 = vrot.slane %v19034_v13, 2  ;;  %v7659_v42 = vadd.f32 %v7136_v0, %v14449_v11  ;;  %v19956_v46 = vrot.slane %v19950_v18, %v12475_v56  ;;  %v7813_v13 = vmul.f32 %v19820_v16, %v19959_v24  ;;  %v19967_v1 = vld [vmem:[#allocation151_spill] sm:$0xff]  ;;  %v19976_v56 = vld [vmem:[#allocation164_spill] sm:$0xff] }
 0x1f2   : > { %19954 = vst [vmem:[#allocation235_spill] sm:$0xff] %v14649_v3  ;;  %19955 = vst [vmem:[#allocation236_spill] sm:$0xff] %v14653_v35  ;;  %v5734_v20 = vrot.slane %v5349_v40, 7  ;;  %v19958_v3 = vld [vmem:[#allocation119_spill] sm:$0xff]  ;;  %v7815_v47 = vmul.f32 %v19908_v25, %v19960_v31  ;;  %v8094_v11 = vmul.f32 %v19822_v6, %v19961_v36 }
 0x1f3   : > { %v14662_v33 = vmul.f32 %v19956_v46, %v2638_v39  ;;  %v7661_v29 = vadd.f32 %v7142_v19, %v19958_v3  ;;  %v5731_v30 = vsel %vm12500_vm9, %v5729_v9, %v5730_v32  ;;  %v7942_v19 = vadd.f32 %v19962_v4, %v7660_v50  ;;  %v19964_v3 = vld [vmem:[#allocation135_spill] sm:$0xff] }
 0x1f4   : > { %v5735_v0 = vsel %vm12500_vm9, %v11343_v57, %v5734_v20  ;;  %v6157_v39 = vadd.f32 %v5731_v30, %v5038_v28  ;;  %v14677_v40 = vrot.slane %v5734_v20, 2  ;;  %v7941_v32 = vadd.f32 %v7813_v13, %v7659_v42  ;;  %v19968_v57 = vld [vmem:[#allocation85_spill] sm:$0xff]  ;;  %v19969_v28 = vld [vmem:[#allocation112_spill] sm:$0xff] }
 0x1f5   : > { %19957 = vst [vmem:[#allocation237_spill] sm:$0xff] %v14662_v33  ;;  %v7943_v9 = vadd.f32 %v7815_v47, %v7661_v29  ;;  %v8095_v24 = vmul.f32 %v14189_v63, %v19964_v3  ;;  %v14681_v46 = vadd.f32 %v5735_v0, %v5039_v43  ;;  %v8096_v33 = vmul.f32 %v19773_v41, %v19967_v1  ;;  %v19970_v13 = vld [vmem:[#allocation5_spill] sm:$0xff] }
 0x1f6   : > { %19963 = vst [vmem:[#allocation119_spill] sm:$0xff] %v14677_v40  ;;  %v14683_v31 = vadd.f32 %v6311_v62, %v6157_v39  ;;  %v8097_v30 = vmul.f32 %v14000_v61, %v19968_v57  ;;  %v8222_v54 = vadd.f32 %v8094_v11, %v19969_v28  ;;  %v8390_v20 = vmul.f32 %v19755_v21, %v19961_v36 }
 0x1f7   : > { %19965 = vst [vmem:[#allocation98_spill] sm:$0xff] %v14681_v46  ;;  %v8391_v29 = vmul.f32 %v19824_v2, %v19964_v3  ;;  %v8392_v50 = vmul.f32 %v19825_v48, %v19967_v1  ;;  %v8223_v47 = vadd.f32 %v8095_v24, %v7941_v32  ;;  %v8224_v42 = vadd.f32 %v8096_v33, %v7942_v19  ;;  %v14704_v32 = vpop.f32.mrf.mxu0 }
 0x1f8   : > { %19966 = vst [vmem:[#allocation115_spill] sm:$0xff] %v14683_v31  ;;  %v8393_v43 = vmul.f32 %v19780_v44, %v19968_v57  ;;  %v8394_v62 = vmul.f32 %v14355_v26, %v19970_v13  ;;  %v8225_v0 = vadd.f32 %v8097_v30, %v7943_v9  ;;  %v11369_v39 = vrot.slane %v8390_v20, 9  ;;  %19971 = vst [vmem:[#allocation3_spill] sm:$0xff] %v14704_v32  ;;  %v19975_v26 = vld [vmem:[#allocation163_spill] sm:$0xff] }
 0x1f9   : > { %v8680_v11 = vrot.slane %v8391_v29, 7  ;;  %v8683_v4 = vrot.slane %v8392_v50, 7  ;;  %v9360_v46 = vmul.f32 %v19826_v5, %v19964_v3  ;;  %v9361_v40 = vmul.f32 %v14211_v34, %v19967_v1 }
 0x1fa   : > { %v8686_v28 = vrot.slane %v8393_v43, 7  ;;  %v8689_v36 = vrot.slane %v8394_v62, 7  ;;  %v9362_v9 = vmul.f32 %v19884_v17, %v19968_v57  ;;  %v9363_v50 = vmul.f32 %v19857_v53, %v19970_v13  ;;  %v11559_v43 = vpop.f32.mrf.mxu0 }
 0x1fb   : > { %v8681_v33 = vsel %vm12500_vm9, %v11369_v39, %v8680_v11  ;;  %v8682_v19 = vrot.slane %v8680_v11, 2  ;;  %v8685_v24 = vrot.slane %v8683_v4, 2  ;;  %v14721_v39 = vld [vmem:[%s18719_s3] ss:$0 sm:$0xff]  ;;  %v8100_v21 = vmul.f32 %v19773_v41, %v19975_v26 }
 0x1fc   : > { %v8688_v30 = vrot.slane %v8686_v28, 2  ;;  %v14710_v20 = vrot.slane %v8689_v36, 2  ;;  %v9206_v29 = vadd.f32 %v8681_v33, %v8222_v54  ;;  %19972 = vst [vmem:[#allocation125_spill] sm:$0xff] %v14721_v39  ;;  %v19973_v11 = vld [vmem:[#allocation206_spill] sm:$0xff]  ;;  %v8098_v54 = vmul.f32 %v19822_v6, %v19970_v13 }
 0x1fd   : > { %v8684_v62 = vsel %vm12500_vm9, %v8682_v19, %v8683_v4  ;;  %v8687_v31 = vsel %vm12500_vm9, %v8685_v24, %v8686_v28  ;;  %v2133_v35 = vadd.f32 %v14721_v39, %v19973_v11  ;;  %v19974_v28 = vld [vmem:[#allocation154_spill] sm:$0xff]  ;;  %v8101_v6 = vmul.f32 %v14000_v61, %v19976_v56 }
 0x1fe   : > { %v8690_v33 = vsel %vm12500_vm9, %v8688_v30, %v8689_v36  ;;  %v9207_v43 = vadd.f32 %v8684_v62, %v8223_v47  ;;  %v9208_v32 = vadd.f32 %v8687_v31, %v8224_v42  ;;  %v9488_v4 = vadd.f32 %v9360_v46, %v9206_v29  ;;  %v19977_v47 = vld [vmem:[#allocation130_spill] sm:$0xff]  ;;  %v19978_v46 = vld [vmem:[#allocation131_spill] sm:$0xff] }
 0x1ff   : > { %v9209_v19 = vadd.f32 %v8690_v33, %v8225_v0  ;;  %v2276_v53 = vmax.f32 %v2133_v35, 0.0  ;;  %v8099_v24 = vmul.f32 %v14189_v63, %v19974_v28  ;;  %v8226_v31 = vadd.f32 %v8098_v54, %v19977_v47  ;;  %v19979_v29 = vld [vmem:[#allocation143_spill] sm:$0xff]  ;;  %v19980_v33 = vld [vmem:[#allocation145_spill] sm:$0xff] }
 0x200   : > { %v9489_v25 = vadd.f32 %v9361_v40, %v9207_v43  ;;  %v9490_v16 = vadd.f32 %v9362_v9, %v9208_v32  ;;  %v9643_v11 = vadd.f32 %v14371_v15, %v9488_v4  ;;  %v8228_v40 = vadd.f32 %v8100_v21, %v19979_v29 }
 0x201   : > { %v9491_v13 = vadd.f32 %v9363_v50, %v9209_v19  ;;  %v2317_v36 = vmin.f32 %v2276_v53, 6.0  ;;  %v14738_v42 = vadd.f32 %v8099_v24, %v19978_v46  ;;  %v8229_v50 = vadd.f32 %v8101_v6, %v19980_v33 }
 0x202   : > { %v9644_v35 = vadd.f32 %v14391_v49, %v9489_v25  ;;  %v9645_v0 = vadd.f32 %v14377_v52, %v9490_v16  ;;  %v9771_v30 = vmax.f32 %v9643_v11, 0.0  ;;  %v8395_v4 = vmul.f32 %v19824_v2, %v19974_v28 }
 0x203   : > { %v9646_v32 = vadd.f32 %v14399_v60, %v9491_v13  ;;  %v2639_v9 = vcombine.high %v2317_v36, %v2317_v36  ;;  %v2646_v62 = vrot.slane %v2317_v36, %v11937_v10  ;;  %v19981_v21 = vrot.slane %v19950_v18, %v12478_v58 }
 0x204   : > { %v9772_v53 = vmax.f32 %v9644_v35, 0.0  ;;  %v9773_v43 = vmax.f32 %v9645_v0, 0.0  ;;  %v9899_v54 = vmin.f32 %v9771_v30, 6.0  ;;  %v8396_v6 = vmul.f32 %v19825_v48, %v19975_v26  ;;  %v19985_v30 = vld [vmem:[#allocation46_spill] sm:$0xff] }
 0x205   : > { %v9774_v25 = vmax.f32 %v9646_v32, 0.0  ;;  %v2653_v16 = vrot.slane %v2639_v9, %v11937_v10  ;;  %v2654_v19 = vcombine.high %v2646_v62, %v2646_v62  ;;  %v14752_v13 = vmul.f32 %v19981_v21, %v2646_v62  ;;  %v19988_v21 = vld [vmem:[#allocation48_spill] sm:$0xff] }
 0x206   : > { %v9900_v24 = vmin.f32 %v9772_v53, 6.0  ;;  %v9901_v11 = vmin.f32 %v9773_v43, 6.0  ;;  %v8397_v36 = vmul.f32 %v19780_v44, %v19976_v56  ;;  %v19983_v35 = vrot.slane %v19950_v18, %v12510_v23 }
 0x207   : > { %19982 = vst [vmem:[#allocation112_spill] sm:$0xff] %v14752_v13  ;;  %v9902_v47 = vmin.f32 %v9774_v25, 6.0  ;;  %v2655_v46 = vcombine.high %v2653_v16, %v2653_v16  ;;  %v19986_v29 = vrot.slane %v19985_v30, %v12472_v55  ;;  %v8692_v62 = vrot.slane %v8395_v4, 7 }
 0x208   : > { %v14761_v0 = vmul.f32 %v19983_v35, %v2654_v19  ;;  %v10164_v9 = vcombine.low %v9899_v54, %v9900_v24  ;;  %v8695_v33 = vrot.slane %v8396_v6, 7  ;;  %v8698_v53 = vrot.slane %v8397_v36, 7 }
 0x209   : > { %v14766_v32 = vmul.f32 %v19986_v29, %v2653_v16  ;;  %v10165_v43 = vcombine.low %v9901_v11, %v9902_v47  ;;  %v19989_v13 = vrot.slane %v19988_v21, %v12472_v55 }
 0x20a   : > { %19984 = vst [vmem:[#allocation206_spill] sm:$0xff] %v14761_v0  ;;  %v5046_v18 = vmul.f32 %v19863_v59, %v14761_v0  ;;  %v14777_v19 = vmul.f32 %v12545_v38, %v14761_v0  ;;  %v10172_v16 = vrot.slane %v10164_v9, %v11937_v10  ;;  %v8694_v0 = vrot.slane %v8692_v62, 2 }
 0x20b   : > { %19987 = vst [vmem:[#allocation130_spill] sm:$0xff] %v14766_v32  ;;  %v14771_v25 = vmul.f32 %v19989_v13, %v2655_v46  ;;  %v5356_v54 = vmul.f32 %v19895_v37, %v14766_v32  ;;  %v6319_v4 = vmul.f32 %v19866_v45, %v14766_v32  ;;  %v14786_v24 = vmul.f32 %v19903_v12, %v14766_v32  ;;  %v19997_v32 = vld [vmem:[#allocation169_spill] sm:$0xff] }
 0x20c   : > { %19991 = vst [vmem:[#allocation143_spill] sm:$0xff] %v14777_v19  ;;  %v10179_v13 = vrot.slane %v10165_v43, %v11937_v10  ;;  %v19055_v36 = vrot.slane %v14777_v19, 7  ;;  %v19998_v19 = vrot.slane %v19997_v32, 7 }
 0x20d   : > { %19990 = vst [vmem:[#allocation131_spill] sm:$0xff] %v14771_v25  ;;  %19992 = vst [vmem:[#allocation145_spill] sm:$0xff] %v14786_v24  ;;  %v14791_v11 = vmul.f32 %v19898_v22, %v14771_v25  ;;  %v14795_v6 = vmul.f32 %v19899_v27, %v14771_v25  ;;  %v5755_v47 = vrot.slane %v5356_v54, 7  ;;  %v14800_v46 = vmul.f32 %v19901_v51, %v14771_v25 }
 0x20e   : > { %v14804_v35 = vmul.f32 %v19905_v14, %v14771_v25  ;;  %v10180_v29 = vcombine.low %v10172_v16, %v10179_v13  ;;  %v5754_v9 = vrot.slane %v19055_v36, 2  ;;  %v8693_v54 = vsel %vm12500_vm9, %v14710_v20, %v8692_v62  ;;  %v20003_v25 = vld [vmem:[#allocation170_spill] sm:$0xff] }
 0x20f   : > { %19993 = vst [vmem:[#allocation46_spill] sm:$0xff] %v14791_v11  ;;  %19994 = vst [vmem:[#allocation48_spill] sm:$0xff] %v14795_v6  ;;  %v8700_v27 = vrot.slane %v8698_v53, 2  ;;  %v9210_v16 = vadd.f32 %v8693_v54, %v8226_v31  ;;  %v9364_v13 = vmul.f32 %v19826_v5, %v19974_v28  ;;  %v9365_v36 = vmul.f32 %v14211_v34, %v19975_v26  ;;  %v14856_v11 = vpop.f32.mrf.mxu0 }
 0x210   : > { %19995 = vst [vmem:[#allocation238_spill] sm:$0xff] %v14800_v46  ;;  %19996 = vst [vmem:[#allocation239_spill] sm:$0xff] %v14804_v35  ;;  %v8697_v46 = vrot.slane %v8695_v33, 2  ;;  %11627 = vmatprep.mubr.msk.f32.mxu1 %vm10708_vm10, %v10180_v29  ;;  %v5756_v30 = vsel %vm12500_vm9, %v5754_v9, %v5755_v47  ;;  %v8696_v20 = vsel %vm12500_vm9, %v8694_v0, %v8695_v33  ;;  %v20001_v33 = vld [vmem:[#allocation106_spill] sm:$0xff] }
 0x211   : > { %v6165_v43 = vadd.f32 %v5756_v30, %v5046_v18  ;;  %v8702_v29 = vsel %vm12500_vm9, %v8700_v27, %v19998_v19  ;;  %v9211_v31 = vadd.f32 %v8696_v20, %v14738_v42  ;;  %v9366_v54 = vmul.f32 %v19884_v17, %v19976_v56  ;;  %v20000_v30 = vld [vmem:[#allocation175_spill] sm:$0xff]  ;;  %v20004_v42 = vld [vmem:[#allocation36_spill] sm:$0xff] }
 0x212   : > { %v8699_v62 = vsel %vm12500_vm9, %v8697_v46, %v8698_v53  ;;  %v9213_v9 = vadd.f32 %v8702_v29, %v8229_v50  ;;  %v9492_v18 = vadd.f32 %v9364_v13, %v9210_v16  ;;  %v2138_v0 = vadd.f32 %v14721_v39, %v20000_v30  ;;  %v20002_v53 = vld [vmem:[#allocation100_spill] sm:$0xff]  ;;  %20011 = vst [vmem:[#allocation175_spill] sm:$0xff] %v14856_v11 }
 0x213   : > { %v9212_v47 = vadd.f32 %v8699_v62, %v8228_v40  ;;  %v14832_v35 = vadd.f32 %v6319_v4, %v6165_v43  ;;  %v6401_v46 = vadd.f32 %v20002_v53, %v20001_v33  ;;  %v9493_v32 = vadd.f32 %v9365_v36, %v9211_v31  ;;  %v20005_v4 = vld [vmem:[#allocation35_spill] sm:$0xff] }
 0x214   : > { %v9495_v27 = vadd.f32 %v20003_v25, %v9213_v9  ;;  %v6555_v40 = vmul.f32 %v20004_v42, %v19964_v3  ;;  %v9647_v50 = vadd.f32 %v14371_v15, %v9492_v18  ;;  %v2277_v19 = vmax.f32 %v2138_v0, 0.0  ;;  %v20006_v62 = vld [vmem:[#allocation107_spill] sm:$0xff]  ;;  %v20007_v25 = vld [vmem:[#allocation136_spill] sm:$0xff] }
 0x215   : > { %19999 = vst [vmem:[#allocation169_spill] sm:$0xff] %v14832_v35  ;;  %v9494_v24 = vadd.f32 %v9366_v54, %v9212_v47  ;;  %v6556_v43 = vmul.f32 %v20005_v4, %v19967_v1  ;;  %v6557_v16 = vmul.f32 %v19867_v7, %v19968_v57  ;;  %v9648_v13 = vadd.f32 %v14391_v49, %v9493_v32  ;;  %v20008_v54 = vld [vmem:[#allocation120_spill] sm:$0xff]  ;;  %v20009_v53 = vld [vmem:[#allocation123_spill] sm:$0xff] }
 0x216   : > { %v9650_v36 = vadd.f32 %v14399_v60, %v9495_v27  ;;  %v6682_v29 = vadd.f32 %v20007_v25, %v20006_v62  ;;  %v9775_v31 = vmax.f32 %v9647_v50, 0.0  ;;  %v2318_v47 = vmin.f32 %v2277_v19, 6.0  ;;  %v20016_v25 = vld [vmem:[#allocation49_spill] sm:$0xff] }
 0x217   : > { %v9649_v20 = vadd.f32 %v14377_v52, %v9494_v24  ;;  %v6683_v9 = vadd.f32 %v6555_v40, %v6401_v46  ;;  %v6684_v18 = vadd.f32 %v6556_v43, %v20008_v54  ;;  %v9776_v30 = vmax.f32 %v9648_v13, 0.0  ;;  %v20010_v24 = vld [vmem:[#allocation39_spill] sm:$0xff]  ;;  %v20012_v46 = vld [vmem:[#allocation40_spill] sm:$0xff] }
 0x218   : > { %v9778_v33 = vmax.f32 %v9650_v36, 0.0  ;;  %v6685_v35 = vadd.f32 %v6557_v16, %v20009_v53  ;;  %v9903_v14 = vmin.f32 %v9775_v31, 6.0  ;;  %v2656_v22 = vcombine.high %v2318_v47, %v2318_v47  ;;  %v20013_v16 = vld [vmem:[#allocation13_spill] sm:$0xff] }
 0x219   : > { %v9777_v0 = vmax.f32 %v9649_v20, 0.0  ;;  %v2663_v32 = vrot.slane %v2318_v47, %v11937_v10  ;;  %v6852_v27 = vmul.f32 %v20010_v24, %v19964_v3  ;;  %v9904_v62 = vmin.f32 %v9776_v30, 6.0  ;;  %v11562_v47 = vpop.f32.mrf.mxu0  ;;  %v20017_v30 = vld [vmem:[#allocation5_spill] sm:$0xff] }
 0x21a   : > { %v9906_v19 = vmin.f32 %v9778_v33, 6.0  ;;  %v6853_v40 = vmul.f32 %v20012_v46, %v19967_v1  ;;  %v2670_v43 = vrot.slane %v2656_v22, %v11937_v10  ;;  %v20014_v20 = vrot.slane %v19988_v21, %v20013_v16 }
 0x21b   : > { %v9905_v50 = vmin.f32 %v9777_v0, 6.0  ;;  %v2671_v13 = vcombine.high %v2663_v32, %v2663_v32  ;;  %v6854_v31 = vmul.f32 %v20016_v25, %v19968_v57  ;;  %v10181_v54 = vcombine.low %v9903_v14, %v9904_v62  ;;  %v20018_v0 = vld [vmem:[#allocation51_spill] sm:$0xff] }
 0x21c   : > { %v14864_v36 = vmul.f32 %v20014_v20, %v2663_v32  ;;  %v14870_v33 = vmul.f32 %v20018_v0, %v20017_v30  ;;  %v7157_v11 = vrot.slane %v6852_v27, 7  ;;  %v2672_v38 = vcombine.high %v2670_v43, %v2670_v43  ;;  %v20025_v0 = vld [vmem:[#allocation50_spill] sm:$0xff] }
 0x21d   : > { %v10182_v53 = vcombine.low %v9905_v50, %v9906_v19  ;;  %v20019_v22 = vrot.slane %v19988_v21, %v12478_v58  ;;  %v20021_v32 = vrot.slane %v19988_v21, %v12510_v23  ;;  %v7160_v59 = vrot.slane %v6853_v40, 7  ;;  %v20023_v50 = vld [vmem:[#allocation137_spill] sm:$0xff] }
 0x21e   : > { %20015 = vst [vmem:[#allocation106_spill] sm:$0xff] %v14864_v36  ;;  %v10189_v14 = vrot.slane %v10181_v54, %v11937_v10  ;;  %v20024_v19 = vrot.slane %v20023_v50, 9  ;;  %v7159_v47 = vrot.slane %v7157_v11, 2  ;;  %v7163_v21 = vrot.slane %v6854_v31, 7 }
 0x21f   : > { %v14875_v6 = vmul.f32 %v20019_v22, %v2671_v13  ;;  %v14880_v20 = vmul.f32 %v20021_v32, %v2670_v43  ;;  %v10196_v62 = vrot.slane %v10182_v53, %v11937_v10  ;;  %v20026_v13 = vrot.slane %v20025_v0, %v12472_v55  ;;  %v20028_v32 = vld [vmem:[#allocation37_spill] sm:$0xff] }
 0x220   : > { %v7158_v27 = vsel %vm12500_vm9, %v20024_v19, %v7157_v11  ;;  %v19074_v43 = vrot.slane %v14870_v33, 7  ;;  %v7161_v54 = vsel %vm12500_vm9, %v7159_v47, %v7160_v59  ;;  %v7820_v50 = vmul.f32 %v20028_v32, %v19964_v3  ;;  %v20036_v3 = vld [vmem:[#allocation185_spill] sm:$0xff] }
 0x221   : > { %20020 = vst [vmem:[#allocation100_spill] sm:$0xff] %v14875_v6  ;;  %20022 = vst [vmem:[#allocation170_spill] sm:$0xff] %v14880_v20  ;;  %v14891_v22 = vmul.f32 %v20026_v13, %v2672_v38  ;;  %v7162_v6 = vrot.slane %v7160_v59, 2  ;;  %v10197_v40 = vcombine.low %v10189_v14, %v10196_v62  ;;  %v7666_v53 = vadd.f32 %v7158_v27, %v6682_v29  ;;  %v20029_v38 = vld [vmem:[#allocation52_spill] sm:$0xff]  ;;  %v20030_v14 = vld [vmem:[#allocation41_spill] sm:$0xff] }
 0x222   : > { %v7165_v19 = vrot.slane %v7163_v21, 2  ;;  %v7667_v20 = vadd.f32 %v7161_v54, %v6683_v9  ;;  %v7821_v13 = vmul.f32 %v20029_v38, %v19967_v1  ;;  %v7822_v62 = vmul.f32 %v20030_v14, %v19968_v57  ;;  %v20031_v59 = vld [vmem:[#allocation53_spill] sm:$0xff]  ;;  %v20032_v9 = vld [vmem:[#allocation7_spill] sm:$0xff]  ;;  %v20035_v1 = vld [vmem:[#allocation184_spill] sm:$0xff] }
 0x223   : > { %20027 = vst [vmem:[#allocation107_spill] sm:$0xff] %v14891_v22  ;;  %v7164_v11 = vsel %vm12500_vm9, %v7162_v6, %v7163_v21  ;;  %11628 = vmatmul.mubr.msk.f32.vlgmr.msra.gmra.mxu1 %vm10708_vm10, %v10197_v40  ;;  %v7823_v29 = vmul.f32 %v20031_v59, %v20017_v30  ;;  %v7948_v27 = vadd.f32 %v7820_v50, %v7666_v53  ;;  %v20033_v21 = vld [vmem:[#allocation55_spill] sm:$0xff]  ;;  %v20037_v59 = vld [vmem:[#allocation45_spill] sm:$0xff] }
 0x224   : > { %v7668_v31 = vadd.f32 %v7164_v11, %v6684_v18  ;;  %v7167_v6 = vsel %vm12500_vm9, %v7165_v19, %v19074_v43  ;;  %v7949_v47 = vadd.f32 %v7821_v13, %v7667_v20  ;;  %v8102_v54 = vmul.f32 %v20033_v21, %v20032_v9  ;;  %v20034_v22 = vld [vmem:[#allocation183_spill] sm:$0xff] }
 0x225   : > { %v8103_v40 = vmul.f32 %v14189_v63, %v20034_v22  ;;  %v7669_v18 = vadd.f32 %v7167_v6, %v6685_v35  ;;  %v8104_v57 = vmul.f32 %v19773_v41, %v20035_v1  ;;  %v8105_v53 = vmul.f32 %v14000_v61, %v20036_v3  ;;  %v20039_v6 = vld [vmem:[#allocation222_spill] sm:$0xff] }
 0x226   : > { %v7950_v11 = vadd.f32 %v7822_v62, %v7668_v31  ;;  %v8230_v50 = vadd.f32 %v8102_v54, %v7948_v27  ;;  %v8399_v19 = vmul.f32 %v20037_v59, %v20032_v9  ;;  %v8400_v20 = vmul.f32 %v19824_v2, %v20034_v22  ;;  %v20038_v62 = vld [vmem:[#allocation8_spill] sm:$0xff] }
 0x227   : > { %v8231_v36 = vadd.f32 %v8103_v40, %v7949_v47  ;;  %v7951_v13 = vadd.f32 %v7823_v29, %v7669_v18  ;;  %v8401_v35 = vmul.f32 %v19825_v48, %v20035_v1  ;;  %v8402_v31 = vmul.f32 %v19780_v44, %v20036_v3 }
 0x228   : > { %v8232_v43 = vadd.f32 %v8104_v57, %v7950_v11  ;;  %v14929_v41 = vmul.f32 %v20039_v6, %v20038_v62  ;;  %v11370_v27 = vrot.slane %v8399_v19, 9  ;;  %v8705_v47 = vrot.slane %v8400_v20, 7 }
 0x229   : > { %v9368_v9 = vmul.f32 %v19826_v5, %v20034_v22  ;;  %v8233_v54 = vadd.f32 %v8105_v53, %v7951_v13  ;;  %v8708_v40 = vrot.slane %v8401_v35, 7  ;;  %v8711_v59 = vrot.slane %v8402_v31, 7  ;;  %v20040_v22 = vld [vmem:[#allocation69_spill] sm:$0xff]  ;;  %v20041_v35 = vld [vmem:[#allocation219_spill] sm:$0xff] }
 0x22a   : > { %v9369_v57 = vmul.f32 %v14211_v34, %v20035_v1  ;;  %v8706_v29 = vsel %vm12500_vm9, %v11370_v27, %v8705_v47  ;;  %v8707_v18 = vrot.slane %v8705_v47, 2  ;;  %v9370_v6 = vmul.f32 %v19884_v17, %v20036_v3  ;;  %v20042_v1 = vld [vmem:[#allocation121_spill] sm:$0xff]  ;;  %v20043_v27 = vld [vmem:[#allocation118_spill] sm:$0xff] }
 0x22b   : > { %v8710_v19 = vrot.slane %v8708_v40, 2  ;;  %v8713_v20 = vrot.slane %v8711_v59, 2  ;;  %v9214_v44 = vadd.f32 %v8706_v29, %v8230_v50  ;;  %v9371_v53 = vmul.f32 %v20040_v22, %v20038_v62 }
 0x22c   : > { %v8709_v13 = vsel %vm12500_vm9, %v8707_v18, %v8708_v40  ;;  %v2143_v31 = vadd.f32 %v14721_v39, %v20041_v35  ;;  %v6405_v47 = vadd.f32 %v20043_v27, %v20042_v1  ;;  %v6558_v11 = vmul.f32 %v19901_v51, %v20017_v30 }
 0x22d   : > { %v8712_v3 = vsel %vm12500_vm9, %v8710_v19, %v8711_v59  ;;  %v20044_v50 = vrot.slane %v14929_v41, 7  ;;  %v9215_v22 = vadd.f32 %v8709_v13, %v8231_v36  ;;  %v9496_v17 = vadd.f32 %v9368_v9, %v9214_v44  ;;  %v20045_v36 = vld [vmem:[#allocation124_spill] sm:$0xff] }
 0x22e   : > { %v9216_v40 = vadd.f32 %v8712_v3, %v8232_v43  ;;  %v2278_v34 = vmax.f32 %v2143_v31, 0.0  ;;  %v6559_v35 = vmul.f32 %v20004_v42, %v19974_v28  ;;  %v6560_v51 = vmul.f32 %v20005_v4, %v19975_v26 }
 0x22f   : > { %v8715_v29 = vsel %vm12500_vm9, %v8713_v20, %v20044_v50  ;;  %v9497_v1 = vadd.f32 %v9369_v57, %v9215_v22  ;;  %v9651_v27 = vadd.f32 %v14371_v15, %v9496_v17  ;;  %v6561_v59 = vmul.f32 %v19867_v7, %v19976_v56 }
 0x230   : > { %v9217_v18 = vadd.f32 %v8715_v29, %v8233_v54  ;;  %v9498_v19 = vadd.f32 %v9370_v6, %v9216_v40  ;;  %v2319_v20 = vmin.f32 %v2278_v34, 6.0  ;;  %v6686_v44 = vadd.f32 %v6558_v11, %v20045_v36  ;;  %v20046_v54 = vld [vmem:[#allocation138_spill] sm:$0xff] }
 0x231   : > { %v9652_v3 = vadd.f32 %v14391_v49, %v9497_v1  ;;  %v9779_v43 = vmax.f32 %v9651_v27, 0.0  ;;  %v6687_v9 = vadd.f32 %v6559_v35, %v6405_v47  ;;  %v6688_v13 = vadd.f32 %v6560_v51, %v20046_v54  ;;  %v20047_v6 = vld [vmem:[#allocation142_spill] sm:$0xff] }
 0x232   : > { %v9499_v30 = vadd.f32 %v9371_v53, %v9217_v18  ;;  %v9653_v22 = vadd.f32 %v14377_v52, %v9498_v19  ;;  %v2673_v57 = vcombine.high %v2319_v20, %v2319_v20  ;;  %v2680_v31 = vrot.slane %v2319_v20, %v11937_v10 }
 0x233   : > { %v9780_v50 = vmax.f32 %v9652_v3, 0.0  ;;  %v9907_v29 = vmin.f32 %v9779_v43, 6.0  ;;  %v6689_v53 = vadd.f32 %v6561_v59, %v20047_v6  ;;  %v6856_v34 = vmul.f32 %v20010_v24, %v19974_v28  ;;  %v20055_v6 = vld [vmem:[#allocation54_spill] sm:$0xff] }
 0x234   : > { %v9654_v17 = vadd.f32 %v14399_v60, %v9499_v30  ;;  %v9781_v11 = vmax.f32 %v9653_v22, 0.0  ;;  %v2687_v47 = vrot.slane %v2673_v57, %v11937_v10  ;;  %v2688_v18 = vcombine.high %v2680_v31, %v2680_v31 }
 0x235   : > { %v9908_v51 = vmin.f32 %v9780_v50, 6.0  ;;  %v20048_v35 = vrot.slane %v20025_v0, %v20013_v16  ;;  %v6857_v1 = vmul.f32 %v20012_v46, %v19975_v26  ;;  %v6858_v27 = vmul.f32 %v20016_v25, %v19976_v56 }
 0x236   : > { %v9782_v40 = vmax.f32 %v9654_v17, 0.0  ;;  %v9909_v59 = vmin.f32 %v9781_v11, 6.0  ;;  %v2689_v20 = vcombine.high %v2687_v47, %v2687_v47  ;;  %v20050_v36 = vrot.slane %v20025_v0, %v12478_v58 }
 0x237   : > { %v14976_v30 = vmul.f32 %v20048_v35, %v2680_v31  ;;  %v10198_v43 = vcombine.low %v9907_v29, %v9908_v51  ;;  %v20052_v54 = vrot.slane %v20025_v0, %v12510_v23  ;;  %v20054_v17 = vrot.slane %v14870_v33, 7 }
 0x238   : > { %v9910_v19 = vmin.f32 %v9782_v40, 6.0  ;;  %v14985_v3 = vmul.f32 %v20050_v36, %v2688_v18  ;;  %v7169_v31 = vrot.slane %v6856_v34, 7  ;;  %v20056_v11 = vrot.slane %v20055_v6, %v12472_v55 }
 0x239   : > { %20049 = vst [vmem:[#allocation136_spill] sm:$0xff] %v14976_v30  ;;  %v14990_v22 = vmul.f32 %v20052_v54, %v2687_v47  ;;  %v7168_v57 = vrot.slane %v20054_v17, 2  ;;  %v7172_v35 = vrot.slane %v6857_v1, 7  ;;  %v7175_v30 = vrot.slane %v6858_v27, 7 }
 0x23a   : > { %20051 = vst [vmem:[#allocation120_spill] sm:$0xff] %v14985_v3  ;;  %v10199_v50 = vcombine.low %v9909_v59, %v9910_v19  ;;  %v14997_v40 = vmul.f32 %v20056_v11, %v2689_v20  ;;  %v10206_v18 = vrot.slane %v10198_v43, %v11937_v10  ;;  %v7171_v0 = vrot.slane %v7169_v31, 2 }
 0x23b   : > { %20053 = vst [vmem:[#allocation123_spill] sm:$0xff] %v14990_v22  ;;  %v7170_v29 = vsel %vm12500_vm9, %v7168_v57, %v7169_v31  ;;  %v7824_v47 = vmul.f32 %v20028_v32, %v19974_v28  ;;  %v7174_v59 = vrot.slane %v7172_v35, 2  ;;  %v7177_v19 = vrot.slane %v7175_v30, 2  ;;  %v20061_v31 = vld [vmem:[#allocation168_spill] sm:$0xff] }
 0x23c   : > { %20057 = vst [vmem:[#allocation137_spill] sm:$0xff] %v14997_v40  ;;  %v10213_v33 = vrot.slane %v10199_v50, %v11937_v10  ;;  %v15007_v34 = vmul.f32 %v19895_v37, %v14997_v40  ;;  %v15011_v51 = vmul.f32 %v19866_v45, %v14997_v40  ;;  %v15015_v1 = vmul.f32 %v19903_v12, %v14997_v40  ;;  %v20079_v12 = vld [vmem:[#allocation27_spill] sm:$0xff] }
 0x23d   : > { %v7173_v27 = vsel %vm12500_vm9, %v7171_v0, %v7172_v35  ;;  %v7670_v20 = vadd.f32 %v7170_v29, %v6686_v44  ;;  %v7176_v57 = vsel %vm12500_vm9, %v7174_v59, %v7175_v30  ;;  %v20062_v50 = vrot.slane %v20061_v31, 7  ;;  %v20063_v29 = vld [vmem:[#allocation6_spill] sm:$0xff]  ;;  %v20065_v59 = vld [vmem:[#allocation188_spill] sm:$0xff]  ;;  %v20066_v31 = vld [vmem:[#allocation189_spill] sm:$0xff] }
 0x23e   : > { %20058 = vst [vmem:[#allocation50_spill] sm:$0xff] %v15007_v34  ;;  %20059 = vst [vmem:[#allocation7_spill] sm:$0xff] %v15011_v51  ;;  %v10214_v36 = vcombine.low %v10206_v18, %v10213_v33  ;;  %v7671_v17 = vadd.f32 %v7173_v27, %v6687_v9  ;;  %v7825_v11 = vmul.f32 %v20029_v38, %v19975_v26  ;;  %v20064_v9 = vld [vmem:[#allocation53_spill] sm:$0xff]  ;;  %v20068_v34 = vld [vmem:[#allocation191_spill] sm:$0xff] }
 0x23f   : > { %20060 = vst [vmem:[#allocation8_spill] sm:$0xff] %v15015_v1  ;;  %v7179_v6 = vsel %vm12500_vm9, %v7177_v19, %v20062_v50  ;;  %v7826_v44 = vmul.f32 %v20030_v14, %v19976_v56  ;;  %v7672_v35 = vadd.f32 %v7176_v57, %v6688_v13  ;;  %v7827_v0 = vmul.f32 %v20064_v9, %v20063_v29  ;;  %v20067_v50 = vld [vmem:[#allocation56_spill] sm:$0xff]  ;;  %v20070_v57 = vld [vmem:[#allocation62_spill] sm:$0xff] }
 0x240   : > { %11630 = vmatprep.mubr.msk.f32.mxu1 %vm10708_vm10, %v10214_v36  ;;  %v7673_v18 = vadd.f32 %v7179_v6, %v6689_v53  ;;  %v7952_v33 = vadd.f32 %v7824_v47, %v7670_v20  ;;  %v7953_v30 = vadd.f32 %v7825_v11, %v7671_v17  ;;  %v8106_v27 = vmul.f32 %v20033_v21, %v20038_v62  ;;  %v15044_v36 = vpop.f32.mrf.mxu0 }
 0x241   : > { %v8107_v19 = vmul.f32 %v14189_v63, %v20065_v59  ;;  %v8108_v43 = vmul.f32 %v20067_v50, %v20066_v31  ;;  %v7954_v54 = vadd.f32 %v7826_v44, %v7672_v35  ;;  %v8109_v13 = vmul.f32 %v14000_v61, %v20068_v34  ;;  %20069 = vst [vmem:[#allocation219_spill] sm:$0xff] %v15044_v36  ;;  %v20071_v44 = vld [vmem:[#allocation9_spill] sm:$0xff]  ;;  %v20072_v35 = vld [vmem:[#allocation59_spill] sm:$0xff] }
 0x242   : > { %v7955_v51 = vadd.f32 %v7827_v0, %v7673_v18  ;;  %v8404_v53 = vmul.f32 %v19824_v2, %v20065_v59  ;;  %v8234_v47 = vadd.f32 %v8106_v27, %v7952_v33  ;;  %v8405_v17 = vmul.f32 %v19825_v48, %v20066_v31  ;;  %v11565_v40 = vpop.f32.mrf.mxu0  ;;  %v20074_v27 = vld [vmem:[#allocation193_spill] sm:$0xff] }
 0x243   : > { %v8235_v20 = vadd.f32 %v8107_v19, %v7953_v30  ;;  %v8406_v6 = vmul.f32 %v20070_v57, %v20068_v34  ;;  %v8236_v11 = vadd.f32 %v8108_v43, %v7954_v54  ;;  %v8407_v18 = vmul.f32 %v20072_v35, %v20071_v44  ;;  %v20075_v43 = vld [vmem:[#allocation63_spill] sm:$0xff]  ;;  %v20076_v54 = vld [vmem:[#allocation69_spill] sm:$0xff] }
 0x244   : > { %v8237_v29 = vadd.f32 %v8109_v13, %v7955_v51  ;;  %v20073_v0 = vrot.slane %v14929_v41, 7  ;;  %v8717_v22 = vrot.slane %v8404_v53, 7  ;;  %v8720_v3 = vrot.slane %v8405_v17, 7 }
 0x245   : > { %v8723_v36 = vrot.slane %v8406_v6, 7  ;;  %v9372_v33 = vmul.f32 %v19826_v5, %v20065_v59  ;;  %v8726_v30 = vrot.slane %v8407_v18, 7  ;;  %v9373_v19 = vmul.f32 %v20074_v27, %v20066_v31  ;;  %v20078_v18 = vld [vmem:[#allocation106_spill] sm:$0xff] }
 0x246   : > { %v8716_v1 = vrot.slane %v20073_v0, 2  ;;  %v9374_v51 = vmul.f32 %v20075_v43, %v20068_v34  ;;  %v9375_v13 = vmul.f32 %v20076_v54, %v20071_v44  ;;  %v8719_v40 = vrot.slane %v8717_v22, 2  ;;  %v20077_v0 = vld [vmem:[#allocation204_spill] sm:$0xff]  ;;  %v20081_v31 = vld [vmem:[#allocation18_spill] sm:$0xff]  ;;  %v20084_v54 = vld [vmem:[#allocation151_spill] sm:$0xff] }
 0x247   : > { %v8722_v53 = vrot.slane %v8720_v3, 2  ;;  %v8725_v17 = vrot.slane %v8723_v36, 2  ;;  %v2148_v35 = vadd.f32 %v14721_v39, %v20077_v0  ;;  %v15068_v37 = vmul.f32 %v20079_v12, %v20078_v18  ;;  %v20085_v43 = vld [vmem:[#allocation17_spill] sm:$0xff] }
 0x248   : > { %v8718_v41 = vsel %vm12500_vm9, %v8716_v1, %v8717_v22  ;;  %v6320_v34 = vmul.f32 %v20081_v31, %v20078_v18  ;;  %v8721_v44 = vsel %vm12500_vm9, %v8719_v40, %v8720_v3  ;;  %v15085_v3 = vmul.f32 %v20085_v43, %v20084_v54  ;;  %v20086_v40 = vld [vmem:[#allocation85_spill] sm:$0xff] }
 0x249   : > { %v9218_v6 = vadd.f32 %v8718_v41, %v8234_v47  ;;  %20080 = vst [vmem:[#allocation121_spill] sm:$0xff] %v15068_v37  ;;  %v8724_v1 = vsel %vm12500_vm9, %v8722_v53, %v8723_v36  ;;  %v8727_v22 = vsel %vm12500_vm9, %v8725_v17, %v8726_v30  ;;  %v20082_v47 = vld [vmem:[#allocation135_spill] sm:$0xff]  ;;  %v20083_v41 = vld [vmem:[#allocation25_spill] sm:$0xff]  ;;  %v9219_v0 = vadd.f32 %v8721_v44, %v8235_v20  ;;  %v20087_v36 = vld [vmem:[#allocation26_spill] sm:$0xff] }
 0x24a   : > { %v15080_v59 = vmul.f32 %v20083_v41, %v20082_v47  ;;  %v9220_v56 = vadd.f32 %v8724_v1, %v8236_v11  ;;  %v9221_v26 = vadd.f32 %v8727_v22, %v8237_v29  ;;  %v2279_v39 = vmax.f32 %v2148_v35, 0.0  ;;  %v20088_v11 = vld [vmem:[#allocation48_spill] sm:$0xff]  ;;  %v20090_v35 = vld [vmem:[#allocation30_spill] sm:$0xff] }
 0x24b   : > { %v9500_v28 = vadd.f32 %v9372_v33, %v9218_v6  ;;  %v19103_v18 = vrot.slane %v15068_v37, 7  ;;  %v15089_v53 = vmul.f32 %v20087_v36, %v20086_v40  ;;  %v9501_v30 = vadd.f32 %v9373_v19, %v9219_v0  ;;  %v20091_v6 = vld [vmem:[#allocation31_spill] sm:$0xff]  ;;  %v20093_v0 = vld [vmem:[#allocation5_spill] sm:$0xff] }
 0x24c   : > { %v9502_v17 = vadd.f32 %v9374_v51, %v9220_v56  ;;  %v9503_v27 = vadd.f32 %v9375_v13, %v9221_v26  ;;  %v2320_v20 = vmin.f32 %v2279_v39, 6.0  ;;  %v20089_v29 = vrot.slane %v20088_v11, 9  ;;  %v20092_v13 = vld [vmem:[#allocation46_spill] sm:$0xff] }
 0x24d   : > { %v9655_v41 = vadd.f32 %v14371_v15, %v9500_v28  ;;  %v5314_v33 = vmul.f32 %v20090_v35, %v20084_v54  ;;  %v5315_v1 = vmul.f32 %v20091_v6, %v20086_v40  ;;  %v9656_v19 = vadd.f32 %v14391_v49, %v9501_v30  ;;  %v20094_v11 = vld [vmem:[#allocation34_spill] sm:$0xff] }
 0x24e   : > { %v5760_v44 = vsel %vm12500_vm9, %v20089_v29, %v19103_v18  ;;  %v9657_v56 = vadd.f32 %v14377_v52, %v9502_v17  ;;  %v9658_v26 = vadd.f32 %v14399_v60, %v9503_v27  ;;  %v2690_v28 = vcombine.high %v2320_v20, %v2320_v20  ;;  %v20095_v17 = vld [vmem:[#allocation61_spill] sm:$0xff] }
 0x24f   : > { %v9783_v39 = vmax.f32 %v9655_v41, 0.0  ;;  %v2697_v51 = vrot.slane %v2320_v20, %v11937_v10  ;;  %v6166_v22 = vadd.f32 %v5760_v44, %v20092_v13  ;;  %v15109_v29 = vmul.f32 %v20094_v11, %v20093_v0 }
 0x250   : > { %v9784_v18 = vmax.f32 %v9656_v19, 0.0  ;;  %v9785_v37 = vmax.f32 %v9657_v56, 0.0  ;;  %v9786_v36 = vmax.f32 %v9658_v26, 0.0  ;;  %v2704_v30 = vrot.slane %v2690_v28, %v11937_v10  ;;  %v20102_v28 = vld [vmem:[#allocation16_spill] sm:$0xff] }
 0x251   : > { %v9911_v6 = vmin.f32 %v9783_v39, 6.0  ;;  %v2705_v49 = vcombine.high %v2697_v51, %v2697_v51  ;;  %v20096_v27 = vrot.slane %v20095_v17, %v12472_v55  ;;  %v6448_v60 = vadd.f32 %v6320_v34, %v6166_v22 }
 0x252   : > { %v9912_v20 = vmin.f32 %v9784_v18, 6.0  ;;  %v9913_v52 = vmin.f32 %v9785_v37, 6.0  ;;  %v9914_v44 = vmin.f32 %v9786_v36, 6.0  ;;  %v5637_v13 = vrot.slane %v5314_v33, 7  ;;  %v20103_v37 = vld [vmem:[#allocation10_spill] sm:$0xff]  ;;  %v20104_v36 = vld [vmem:[#allocation24_spill] sm:$0xff] }
 0x253   : > { %v15115_v41 = vmul.f32 %v20096_v27, %v2697_v51  ;;  %v2706_v35 = vcombine.high %v2704_v30, %v2704_v30  ;;  %v20098_v19 = vrot.slane %v20095_v17, %v20013_v16  ;;  %v20100_v26 = vrot.slane %v20095_v17, %v12478_v58 }
 0x254   : > { %v10215_v27 = vcombine.low %v9911_v6, %v9912_v20  ;;  %v10216_v34 = vcombine.low %v9913_v52, %v9914_v44  ;;  %v20107_v6 = vld [vmem:[#allocation21_spill] sm:$0xff]  ;;  %v5639_v11 = vrot.slane %v5637_v13, 2 }
 0x255   : > { %20097 = vst [vmem:[#allocation118_spill] sm:$0xff] %v15115_v41  ;;  %v15120_v56 = vmul.f32 %v20098_v19, %v2705_v49  ;;  %v15125_v39 = vmul.f32 %v20100_v26, %v2704_v30  ;;  %v5055_v51 = vmul.f32 %v20102_v28, %v15115_v41  ;;  %v5366_v18 = vmul.f32 %v20103_v37, %v15115_v41  ;;  %v20112_v37 = vld [vmem:[#allocation139_spill] sm:$0xff] }
 0x256   : > { %v6602_v33 = vmul.f32 %v20104_v36, %v15115_v41  ;;  %v20105_v49 = vrot.slane %v20095_v17, %v12510_v23  ;;  %v15144_v52 = vmul.f32 %v20107_v6, %v15115_v41  ;;  %v10223_v20 = vrot.slane %v10215_v27, %v11937_v10 }
 0x257   : > { %20099 = vst [vmem:[#allocation124_spill] sm:$0xff] %v15120_v56  ;;  %20101 = vst [vmem:[#allocation138_spill] sm:$0xff] %v15125_v39  ;;  %v5367_v30 = vmul.f32 %v20079_v12, %v15120_v56  ;;  %v6328_v19 = vmul.f32 %v20081_v31, %v15120_v56  ;;  %v10230_v44 = vrot.slane %v10216_v34, %v11937_v10  ;;  %v11345_v26 = vrot.slane %v5366_v18, 9 }
 0x258   : > { %v15136_v22 = vmul.f32 %v20105_v49, %v2706_v35  ;;  %20108 = vst [vmem:[#allocation54_spill] sm:$0xff] %v15144_v52  ;;  %v15148_v39 = vadd.f32 %v6602_v33, %v6448_v60  ;;  %v20110_v49 = vld [vmem:[#allocation45_spill] sm:$0xff]  ;;  %v5638_v56 = vsel %vm12500_vm9, %v20112_v37, %v5637_v13  ;;  %v5640_v36 = vrot.slane %v5315_v1, 7  ;;  %v20114_v1 = vld [vmem:[#allocation28_spill] sm:$0xff] }
 0x259   : > { %v5784_v17 = vrot.slane %v5367_v30, 7  ;;  %v10231_v6 = vcombine.low %v10223_v20, %v10230_v44  ;;  %v19115_v27 = vrot.slane %v15109_v29, 7  ;;  %v6127_v18 = vadd.f32 %v5638_v56, %v15080_v59  ;;  %v20116_v56 = vld [vmem:[#allocation140_spill] sm:$0xff] }
 0x25a   : > { %20106 = vst [vmem:[#allocation142_spill] sm:$0xff] %v15136_v22  ;;  %20109 = vst [vmem:[#allocation168_spill] sm:$0xff] %v15148_v39  ;;  %v15153_v22 = vmul.f32 %v20110_v49, %v15115_v41  ;;  %v6280_v33 = vmul.f32 %v20081_v31, %v20082_v47  ;;  %v5641_v37 = vsel %vm12500_vm9, %v5639_v11, %v5640_v36  ;;  %v5642_v13 = vrot.slane %v5640_v36, 2  ;;  %v20118_v36 = vld [vmem:[#allocation183_spill] sm:$0xff] }
 0x25b   : > { %v5785_v60 = vsel %vm12500_vm9, %v11345_v26, %v5784_v17  ;;  %v15161_v34 = vrot.slane %v5784_v17, 2  ;;  %11631 = vmatmul.mubr.msk.f32.gmra.mxu1 %vm10708_vm10, %v10231_v6  ;;  %v6281_v20 = vmul.f32 %v20114_v1, %v20084_v54  ;;  %v6128_v44 = vadd.f32 %v5641_v37, %v15085_v3  ;;  %v20115_v26 = vld [vmem:[#allocation20_spill] sm:$0xff]  ;;  %v20120_v37 = vld [vmem:[#allocation185_spill] sm:$0xff] }
 0x25c   : > { %20111 = vst [vmem:[#allocation6_spill] sm:$0xff] %v15153_v22  ;;  %v6174_v30 = vadd.f32 %v5785_v60, %v5055_v51  ;;  %v6282_v17 = vmul.f32 %v20115_v26, %v20086_v40  ;;  %v6283_v59 = vmul.f32 %v19866_v45, %v20093_v0  ;;  %v6408_v47 = vadd.f32 %v6280_v33, %v20116_v56  ;;  %v20119_v40 = vld [vmem:[#allocation184_spill] sm:$0xff] }
 0x25d   : > { %20113 = vst [vmem:[#allocation204_spill] sm:$0xff] %v15161_v34  ;;  %v5644_v11 = vsel %vm12500_vm9, %v5642_v13, %v19115_v27  ;;  %v6409_v51 = vadd.f32 %v6281_v20, %v6127_v18  ;;  %v6563_v54 = vmul.f32 %v20004_v42, %v20118_v36  ;;  %v6564_v60 = vmul.f32 %v20005_v4, %v20119_v40 }
 0x25e   : > { %v15177_v35 = vadd.f32 %v6328_v19, %v6174_v30  ;;  %v6129_v3 = vadd.f32 %v5644_v11, %v15089_v53  ;;  %v6410_v6 = vadd.f32 %v6282_v17, %v6128_v44  ;;  %v6565_v33 = vmul.f32 %v19867_v7, %v20120_v37  ;;  %v20121_v19 = vld [vmem:[#allocation171_spill] sm:$0xff] }
 0x25f   : > { %v6690_v30 = vadd.f32 %v20121_v19, %v6408_v47  ;;  %v6691_v56 = vadd.f32 %v6563_v54, %v6409_v51  ;;  %v6862_v18 = vmul.f32 %v20012_v46, %v20119_v40  ;;  %v6863_v53 = vmul.f32 %v20016_v25, %v20120_v37  ;;  %v20122_v44 = vld [vmem:[#allocation51_spill] sm:$0xff]  ;;  %v15205_v54 = vpop.f32.mrf.mxu0 }
 0x260   : > { %20117 = vst [vmem:[#allocation135_spill] sm:$0xff] %v15177_v35  ;;  %v6861_v35 = vmul.f32 %v20010_v24, %v20118_v36  ;;  %v6411_v13 = vadd.f32 %v6283_v59, %v6129_v3  ;;  %v6692_v20 = vadd.f32 %v6564_v60, %v6410_v6  ;;  %v15199_v17 = vmul.f32 %v20122_v44, %v20038_v62  ;;  %v20124_v60 = vld [vmem:[#allocation172_spill] sm:$0xff] }
 0x261   : > { %v7185_v27 = vrot.slane %v6862_v18, 7  ;;  %v7828_v47 = vmul.f32 %v20028_v32, %v20118_v36  ;;  %v7829_v51 = vmul.f32 %v20029_v38, %v20119_v40  ;;  %20123 = vst [vmem:[#allocation151_spill] sm:$0xff] %v15205_v54  ;;  %v7188_v59 = vrot.slane %v6863_v53, 7  ;;  %v11568_v22 = vpop.f32.mrf.mxu0  ;;  %v20127_v53 = vld [vmem:[#allocation209_spill] sm:$0xff]  ;;  %v20129_v44 = vld [vmem:[#allocation212_spill] sm:$0xff] }
 0x262   : > { %v7182_v11 = vrot.slane %v6861_v35, 7  ;;  %v6693_v19 = vadd.f32 %v6565_v33, %v6411_v13  ;;  %v7830_v6 = vmul.f32 %v20030_v14, %v20120_v37  ;;  %v20125_v34 = vrot.slane %v20124_v60, 9  ;;  %v20126_v33 = vld [vmem:[#allocation11_spill] sm:$0xff] }
 0x263   : > { %v7187_v39 = vrot.slane %v7185_v27, 2  ;;  %v7831_v52 = vmul.f32 %v20064_v9, %v20038_v62  ;;  %v7190_v41 = vrot.slane %v7188_v59, 2  ;;  %v8110_v13 = vmul.f32 %v20033_v21, %v20126_v33  ;;  %v15232_v40 = vpop.f32.mrf.mxu0 }
 0x264   : > { %v7183_v35 = vsel %vm12500_vm9, %v20125_v34, %v7182_v11  ;;  %v7184_v18 = vrot.slane %v7182_v11, 2  ;;  %v8111_v3 = vmul.f32 %v14189_v63, %v20127_v53  ;;  %v20128_v11 = vld [vmem:[#allocation210_spill] sm:$0xff]  ;;  %v8113_v22 = vmul.f32 %v14000_v61, %v20129_v44  ;;  %20131 = vst [vmem:[#allocation85_spill] sm:$0xff] %v15232_v40  ;;  %v20132_v63 = vld [vmem:[#allocation15_spill] sm:$0xff] }
 0x265   : > { %v7674_v54 = vadd.f32 %v7183_v35, %v6690_v30  ;;  %v7189_v34 = vsel %vm12500_vm9, %v7187_v39, %v7188_v59  ;;  %v8112_v49 = vmul.f32 %v20067_v50, %v20128_v11  ;;  %v20130_v30 = vrot.slane %v15199_v17, 7 }
 0x266   : > { %v7186_v60 = vsel %vm12500_vm9, %v7184_v18, %v7185_v27  ;;  %v7676_v45 = vadd.f32 %v7189_v34, %v6692_v20  ;;  %v8409_v39 = vmul.f32 %v19824_v2, %v20127_v53  ;;  %v8410_v59 = vmul.f32 %v19825_v48, %v20128_v11  ;;  %v11571_v20 = vpop.f32.mrf.mxu0 }
 0x267   : > { %v7192_v35 = vsel %vm12500_vm9, %v7190_v41, %v20130_v30  ;;  %v7675_v33 = vadd.f32 %v7186_v60, %v6691_v56  ;;  %v7956_v37 = vadd.f32 %v7828_v47, %v7674_v54  ;;  %v8411_v18 = vmul.f32 %v20070_v57, %v20129_v44  ;;  %v20133_v41 = vld [vmem:[#allocation222_spill] sm:$0xff]  ;;  %v20134_v54 = vld [vmem:[#allocation213_spill] sm:$0xff] }
 0x268   : > { %v7677_v27 = vadd.f32 %v7192_v35, %v6693_v19  ;;  %v7958_v61 = vadd.f32 %v7830_v6, %v7676_v45  ;;  %v15242_v56 = vmul.f32 %v20133_v41, %v20132_v63  ;;  %v11371_v19 = vrot.slane %v20134_v54, 9  ;;  %v20138_v54 = vld [vmem:[#allocation3_spill] sm:$0xff] }
 0x269   : > { %v7957_v36 = vadd.f32 %v7829_v51, %v7675_v33  ;;  %v8238_v50 = vadd.f32 %v8110_v13, %v7956_v37  ;;  %v8730_v60 = vrot.slane %v8409_v39, 7  ;;  %v8733_v34 = vrot.slane %v8410_v59, 7  ;;  %v20135_v33 = vld [vmem:[#allocation193_spill] sm:$0xff] }
 0x26a   : > { %v7959_v47 = vadd.f32 %v7831_v52, %v7677_v27  ;;  %v8240_v35 = vadd.f32 %v8112_v49, %v7958_v61  ;;  %v8736_v40 = vrot.slane %v8411_v18, 7  ;;  %v19131_v48 = vrot.slane %v15242_v56, 7 }
 0x26b   : > { %v8239_v30 = vadd.f32 %v8111_v3, %v7957_v36  ;;  %v8731_v45 = vsel %vm12500_vm9, %v11371_v19, %v8730_v60  ;;  %v8732_v37 = vrot.slane %v8730_v60, 2  ;;  %v8735_v51 = vrot.slane %v8733_v34, 2  ;;  %v20136_v36 = vld [vmem:[#allocation63_spill] sm:$0xff]  ;;  %v20139_v19 = vld [vmem:[#allocation125_spill] sm:$0xff] }
 0x26c   : > { %v8241_v2 = vadd.f32 %v8113_v22, %v7959_v47  ;;  %v8738_v6 = vrot.slane %v8736_v40, 2  ;;  %v9222_v13 = vadd.f32 %v8731_v45, %v8238_v50  ;;  %v9376_v52 = vmul.f32 %v19826_v5, %v20127_v53  ;;  %v20137_v22 = vld [vmem:[#allocation69_spill] sm:$0xff] }
 0x26d   : > { %v9377_v27 = vmul.f32 %v20135_v33, %v20128_v11  ;;  %v8734_v61 = vsel %vm12500_vm9, %v8732_v37, %v8733_v34  ;;  %v8737_v49 = vsel %vm12500_vm9, %v8735_v51, %v8736_v40  ;;  %v9378_v3 = vmul.f32 %v20136_v36, %v20129_v44  ;;  %v20140_v34 = vld [vmem:[#allocation154_spill] sm:$0xff]  ;;  %v20141_v45 = vld [vmem:[#allocation25_spill] sm:$0xff]  ;;  %v20142_v11 = vld [vmem:[#allocation163_spill] sm:$0xff] }
 0x26e   : > { %v9379_v39 = vmul.f32 %v20137_v22, %v20132_v63  ;;  %v8740_v50 = vsel %vm12500_vm9, %v8738_v6, %v19131_v48  ;;  %v9223_v59 = vadd.f32 %v8734_v61, %v8239_v30  ;;  %v9224_v18 = vadd.f32 %v8737_v49, %v8240_v35  ;;  %v20144_v61 = vld [vmem:[#allocation224_spill] sm:$0xff]  ;;  %v20145_v49 = vld [vmem:[#allocation223_spill] sm:$0xff] }
 0x26f   : > { %v9504_v20 = vadd.f32 %v9376_v52, %v9222_v13  ;;  %v9225_v47 = vadd.f32 %v8740_v50, %v8241_v2  ;;  %v2153_v60 = vadd.f32 %v20139_v19, %v20138_v54  ;;  %v5011_v40 = vmul.f32 %v20102_v28, %v20093_v0  ;;  %v20143_v13 = vld [vmem:[#allocation30_spill] sm:$0xff] }
 0x270   : > { %v5012_v37 = vmul.f32 %v20141_v45, %v20140_v34  ;;  %v9505_v51 = vadd.f32 %v9377_v27, %v9223_v59  ;;  %v9506_v41 = vadd.f32 %v9378_v3, %v9224_v18  ;;  %v5013_v6 = vmul.f32 %v20085_v43, %v20142_v11  ;;  %v20147_v59 = vld [vmem:[#allocation225_spill] sm:$0xff] }
 0x271   : > { %v9659_v44 = vadd.f32 %v14371_v15, %v9504_v20  ;;  %v9507_v30 = vadd.f32 %v9379_v39, %v9225_v47  ;;  %v2280_v35 = vmax.f32 %v2153_v60, 0.0  ;;  %v5317_v2 = vmul.f32 %v20079_v12, %v20140_v34 }
 0x272   : > { %v5318_v52 = vmul.f32 %v20143_v13, %v20142_v11  ;;  %v9660_v0 = vadd.f32 %v20144_v61, %v9505_v51  ;;  %v9661_v50 = vadd.f32 %v20145_v49, %v9506_v41  ;;  %v20146_v27 = vrot.slane %v15109_v29, 7 }
 0x273   : > { %v9787_v54 = vmax.f32 %v9659_v44, 0.0  ;;  %v9662_v18 = vadd.f32 %v20147_v59, %v9507_v30  ;;  %v2321_v20 = vmin.f32 %v2280_v35, 6.0  ;;  %v5646_v19 = vrot.slane %v5317_v2, 7 }
 0x274   : > { %v5645_v3 = vrot.slane %v20146_v27, 2  ;;  %v5649_v39 = vrot.slane %v5318_v52, 7  ;;  %v9788_v47 = vmax.f32 %v9660_v0, 0.0  ;;  %v9789_v60 = vmax.f32 %v9661_v50, 0.0  ;;  %v20148_v0 = vld [vmem:[#allocation64_spill] sm:$0xff] }
 0x275   : > { %v9915_v48 = vmin.f32 %v9787_v54, 6.0  ;;  %v6284_v53 = vmul.f32 %v20081_v31, %v20140_v34  ;;  %v9790_v12 = vmax.f32 %v9662_v18, 0.0  ;;  %v2707_v28 = vcombine.high %v2321_v20, %v2321_v20 }
 0x276   : > { %v2714_v51 = vrot.slane %v2321_v20, %v11937_v10  ;;  %v5647_v44 = vsel %vm12500_vm9, %v5645_v3, %v5646_v19  ;;  %v9916_v29 = vmin.f32 %v9788_v47, 6.0  ;;  %v9917_v41 = vmin.f32 %v9789_v60, 6.0  ;;  %v20151_v20 = vld [vmem:[#allocation166_spill] sm:$0xff] }
 0x277   : > { %v5648_v27 = vrot.slane %v5646_v19, 2  ;;  %v5651_v30 = vrot.slane %v5649_v39, 2  ;;  %v9918_v35 = vmin.f32 %v9790_v12, 6.0  ;;  %v2721_v2 = vrot.slane %v2707_v28, %v11937_v10 }
 0x278   : > { %v2722_v52 = vcombine.high %v2714_v51, %v2714_v51  ;;  %v20149_v50 = vrot.slane %v20148_v0, %v12472_v55  ;;  %v10232_v34 = vcombine.low %v9915_v48, %v9916_v29  ;;  %v20152_v31 = vrot.slane %v20151_v20, 7 }
 0x279   : > { %v5650_v18 = vsel %vm12500_vm9, %v5648_v27, %v5649_v39  ;;  %v6130_v19 = vadd.f32 %v5647_v44, %v5011_v40  ;;  %v10233_v47 = vcombine.low %v9917_v41, %v9918_v35  ;;  %v2723_v12 = vcombine.high %v2721_v2, %v2721_v2 }
 0x27a   : > { %v15291_v54 = vmul.f32 %v20149_v50, %v2714_v51  ;;  %v5653_v3 = vsel %vm12500_vm9, %v5651_v30, %v20152_v31  ;;  %v20153_v28 = vrot.slane %v20148_v0, %v20013_v16  ;;  %v20155_v51 = vrot.slane %v20148_v0, %v12478_v58  ;;  %v20159_v30 = vld [vmem:[#allocation164_spill] sm:$0xff] }
 0x27b   : > { %v10240_v39 = vrot.slane %v10232_v34, %v11937_v10  ;;  %v6131_v29 = vadd.f32 %v5650_v18, %v5012_v37  ;;  %v6132_v27 = vadd.f32 %v5653_v3, %v5013_v6  ;;  %v6285_v31 = vmul.f32 %v20114_v1, %v20142_v11  ;;  %v20160_v50 = vld [vmem:[#allocation24_spill] sm:$0xff]  ;;  %v20162_v18 = vld [vmem:[#allocation189_spill] sm:$0xff] }
 0x27c   : > { %20150 = vst [vmem:[#allocation48_spill] sm:$0xff] %v15291_v54  ;;  %v15302_v60 = vmul.f32 %v20153_v28, %v2722_v52  ;;  %v15307_v48 = vmul.f32 %v20155_v51, %v2721_v2  ;;  %v10247_v40 = vrot.slane %v10233_v47, %v11937_v10  ;;  %v20157_v44 = vrot.slane %v20148_v0, %v12510_v23  ;;  %v20161_v37 = vld [vmem:[#allocation188_spill] sm:$0xff]  ;;  %v20163_v47 = vld [vmem:[#allocation191_spill] sm:$0xff]  ;;  %v20171_v54 = vld [vmem:[#allocation221_spill] sm:$0xff] }
 0x27d   : > { %v6286_v35 = vmul.f32 %v20115_v26, %v20159_v30  ;;  %v6412_v52 = vadd.f32 %v6284_v53, %v6130_v19  ;;  %v6413_v2 = vadd.f32 %v6285_v31, %v6131_v29  ;;  %v6566_v34 = vmul.f32 %v20160_v50, %v20038_v62  ;;  %v20164_v31 = vld [vmem:[#allocation93_spill] sm:$0xff] }
 0x27e   : > { %20154 = vst [vmem:[#allocation46_spill] sm:$0xff] %v15302_v60  ;;  %20156 = vst [vmem:[#allocation5_spill] sm:$0xff] %v15307_v48  ;;  %v15316_v41 = vmul.f32 %v20157_v44, %v2723_v12  ;;  %v6567_v6 = vmul.f32 %v20004_v42, %v20161_v37  ;;  %v6568_v11 = vmul.f32 %v20005_v4, %v20162_v18  ;;  %v20172_v23 = vld [vmem:[#allocation205_spill] sm:$0xff] }
 0x27f   : > { %v10248_v20 = vcombine.low %v10240_v39, %v10247_v40  ;;  %v6414_v3 = vadd.f32 %v6286_v35, %v6132_v27  ;;  %v6569_v0 = vmul.f32 %v19867_v7, %v20163_v47  ;;  %v6865_v12 = vmul.f32 %v20010_v24, %v20161_v37 }
 0x280   : > { %20158 = vst [vmem:[#allocation61_spill] sm:$0xff] %v15316_v41  ;;  %v6694_v28 = vadd.f32 %v6566_v34, %v6412_v52  ;;  %v6695_v53 = vadd.f32 %v6567_v6, %v6413_v2  ;;  %v6866_v19 = vmul.f32 %v20012_v46, %v20162_v18  ;;  %v6867_v51 = vmul.f32 %v20016_v25, %v20163_v47 }
 0x281   : > { %11633 = vmatprep.mubr.msk.f32.mxu1 %vm10708_vm10, %v10248_v20  ;;  %v6696_v29 = vadd.f32 %v6568_v11, %v6414_v3  ;;  %v6697_v39 = vadd.f32 %v6569_v0, %v20164_v31  ;;  %v20165_v27 = vrot.slane %v15199_v17, 7  ;;  %v7194_v44 = vrot.slane %v6865_v12, 7  ;;  %v20166_v20 = vld [vmem:[#allocation9_spill] sm:$0xff]  ;;  %v20167_v31 = vld [vmem:[#allocation218_spill] sm:$0xff] }
 0x282   : > { %v7197_v30 = vrot.slane %v6866_v19, 7  ;;  %v7200_v35 = vrot.slane %v6867_v51, 7  ;;  %v7832_v52 = vmul.f32 %v20028_v32, %v20161_v37  ;;  %v7833_v2 = vmul.f32 %v20029_v38, %v20162_v18  ;;  %v20173_v18 = vld [vmem:[#allocation195_spill] sm:$0xff] }
 0x283   : > { %v7193_v40 = vrot.slane %v20165_v27, 2  ;;  %v7196_v6 = vrot.slane %v7194_v44, 2  ;;  %v7834_v11 = vmul.f32 %v20030_v14, %v20163_v47  ;;  %v7835_v17 = vmul.f32 %v20064_v9, %v20166_v20  ;;  %v20168_v27 = vld [vmem:[#allocation190_spill] sm:$0xff] }
 0x284   : > { %v7199_v3 = vrot.slane %v7197_v30, 2  ;;  %v7202_v0 = vrot.slane %v7200_v35, 2  ;;  %v8114_v19 = vmul.f32 %v20033_v21, %v20132_v63  ;;  %v8115_v48 = vmul.f32 %v20168_v27, %v20167_v31  ;;  %v20175_v27 = vld [vmem:[#allocation57_spill] sm:$0xff] }
 0x285   : > { %v7195_v34 = vsel %vm12500_vm9, %v7193_v40, %v7194_v44  ;;  %v7198_v51 = vsel %vm12500_vm9, %v7196_v6, %v7197_v30  ;;  %v20169_v40 = vld [vmem:[#allocation220_spill] sm:$0xff]  ;;  %v8117_v47 = vmul.f32 %v20172_v23, %v20171_v54  ;;  %v8413_v14 = vmul.f32 %v20175_v27, %v20167_v31 }
 0x286   : > { %v7678_v12 = vadd.f32 %v7195_v34, %v6694_v28  ;;  %v20170_v44 = vld [vmem:[#allocation56_spill] sm:$0xff]  ;;  %v7201_v20 = vsel %vm12500_vm9, %v7199_v3, %v7200_v35  ;;  %v20174_v28 = vrot.slane %v20173_v18, 7  ;;  %v7679_v37 = vadd.f32 %v7198_v51, %v6695_v53 }
 0x287   : > { %v8116_v60 = vmul.f32 %v20170_v44, %v20169_v40  ;;  %v7680_v30 = vadd.f32 %v7201_v20, %v6696_v29  ;;  %v20176_v44 = vld [vmem:[#allocation58_spill] sm:$0xff]  ;;  %v8415_v35 = vmul.f32 %v20070_v57, %v20171_v54  ;;  %v20177_v18 = vrot.slane %v15242_v56, 7 }
 0x288   : > { %v7204_v34 = vsel %vm12500_vm9, %v7202_v0, %v20174_v28  ;;  %v7960_v21 = vadd.f32 %v7832_v52, %v7678_v12  ;;  %v8414_v38 = vmul.f32 %v20176_v44, %v20169_v40  ;;  %v7961_v32 = vadd.f32 %v7833_v2, %v7679_v37  ;;  %v20178_v12 = vld [vmem:[#allocation230_spill] sm:$0xff] }
 0x289   : > { %v7681_v6 = vadd.f32 %v7204_v34, %v6697_v39  ;;  %v8741_v3 = vrot.slane %v20177_v18, 2  ;;  %v7962_v63 = vadd.f32 %v7834_v11, %v7680_v30  ;;  %v8742_v53 = vrot.slane %v8413_v14, 7 }
 0x28a   : > { %v8242_v23 = vadd.f32 %v8114_v19, %v7960_v21  ;;  %v8745_v52 = vrot.slane %v8414_v38, 7  ;;  %v8243_v29 = vadd.f32 %v8115_v48, %v7961_v32  ;;  %v8748_v39 = vrot.slane %v8415_v35, 7  ;;  %v15379_v38 = vpop.f32.mrf.mxu0 }
 0x28b   : > { %v7963_v0 = vadd.f32 %v7835_v17, %v7681_v6  ;;  %v8751_v51 = vrot.slane %v20178_v12, 7  ;;  %v9380_v20 = vmul.f32 %v19826_v5, %v20167_v31  ;;  %v8244_v28 = vadd.f32 %v8116_v60, %v7962_v63  ;;  %20179 = vst [vmem:[#allocation139_spill] sm:$0xff] %v15379_v38  ;;  %v20180_v63 = vld [vmem:[#allocation159_spill] sm:$0xff] }
 0x28c   : > { %v8743_v21 = vsel %vm12500_vm9, %v8741_v3, %v8742_v53  ;;  %v8744_v2 = vrot.slane %v8742_v53, 2  ;;  %v8747_v19 = vrot.slane %v8745_v52, 2  ;;  %v8750_v56 = vrot.slane %v8748_v39, 2  ;;  %v11574_v18 = vpop.f32.mrf.mxu0 }
 0x28d   : > { %v8245_v37 = vadd.f32 %v8117_v47, %v7963_v0  ;;  %v9226_v34 = vadd.f32 %v8743_v21, %v8242_v23  ;;  %v9381_v14 = vmul.f32 %v20135_v33, %v20169_v40  ;;  %v9382_v48 = vmul.f32 %v20136_v36, %v20171_v54  ;;  %v15390_v47 = vld [vmem:[%s18719_s3] ss:$0 sm:$0xff]  ;;  %v20182_v23 = vld [vmem:[#allocation175_spill] sm:$0xff] }
 0x28e   : > { %v8746_v32 = vsel %vm12500_vm9, %v8744_v2, %v8745_v52  ;;  %v9383_v60 = vmul.f32 %v20137_v22, %v20180_v63  ;;  %20181 = vst [vmem:[#allocation28_spill] sm:$0xff] %v15390_v47  ;;  %v2158_v11 = vadd.f32 %v15390_v47, %v20182_v23  ;;  %v8749_v17 = vsel %vm12500_vm9, %v8747_v19, %v8748_v39  ;;  %v20183_v52 = vld [vmem:[#allocation26_spill] sm:$0xff]  ;;  %v20184_v63 = vld [vmem:[#allocation31_spill] sm:$0xff] }
 0x28f   : > { %v8752_v30 = vsel %vm12500_vm9, %v8750_v56, %v8751_v51  ;;  %v9227_v6 = vadd.f32 %v8746_v32, %v8243_v29  ;;  %v9508_v35 = vadd.f32 %v9380_v20, %v9226_v34  ;;  %v9228_v3 = vadd.f32 %v8749_v17, %v8244_v28  ;;  %v20186_v39 = vld [vmem:[#allocation183_spill] sm:$0xff]  ;;  %v20187_v28 = vld [vmem:[#allocation184_spill] sm:$0xff]  ;;  %v20188_v32 = vld [vmem:[#allocation185_spill] sm:$0xff] }
 0x290   : > { %v9229_v0 = vadd.f32 %v8752_v30, %v8245_v37  ;;  %v2281_v53 = vmax.f32 %v2158_v11, 0.0  ;;  %v5062_v12 = vmul.f32 %v20183_v52, %v15316_v41  ;;  %v15403_v23 = vmul.f32 %v20184_v63, %v15316_v41 }
 0x291   : > { %v9509_v21 = vadd.f32 %v9381_v14, %v9227_v6  ;;  %v9663_v2 = vadd.f32 %v14371_v15, %v9508_v35  ;;  %v15407_v19 = vmul.f32 %v20141_v45, %v20186_v39  ;;  %v9510_v29 = vadd.f32 %v9382_v48, %v9228_v3 }
 0x292   : > { %20185 = vst [vmem:[#allocation20_spill] sm:$0xff] %v15403_v23  ;;  %v9511_v51 = vadd.f32 %v9383_v60, %v9229_v0  ;;  %v2322_v20 = vmin.f32 %v2281_v53, 6.0  ;;  %v15411_v37 = vmul.f32 %v20085_v43, %v20187_v28  ;;  %v19151_v14 = vrot.slane %v15403_v23, 7 }
 0x293   : > { %v9664_v56 = vadd.f32 %v20144_v61, %v9509_v21  ;;  %v9791_v34 = vmax.f32 %v9663_v2, 0.0  ;;  %v15417_v11 = vmul.f32 %v20183_v52, %v20188_v32  ;;  %v9665_v17 = vadd.f32 %v20145_v49, %v9510_v29  ;;  %v20189_v29 = vld [vmem:[#allocation65_spill] sm:$0xff] }
 0x294   : > { %v9666_v30 = vadd.f32 %v20147_v59, %v9511_v51  ;;  %v2724_v48 = vcombine.high %v2322_v20, %v2322_v20  ;;  %v2731_v60 = vrot.slane %v2322_v20, %v11937_v10  ;;  %v5804_v18 = vrot.slane %v19151_v14, 2 }
 0x295   : > { %v9792_v6 = vmax.f32 %v9664_v56, 0.0  ;;  %v9919_v35 = vmin.f32 %v9791_v34, 6.0  ;;  %v5323_v3 = vmul.f32 %v20143_v13, %v20187_v28  ;;  %v9793_v0 = vmax.f32 %v9665_v17, 0.0  ;;  %v20192_v56 = vld [vmem:[#allocation34_spill] sm:$0xff] }
 0x296   : > { %v9794_v53 = vmax.f32 %v9666_v30, 0.0  ;;  %v2738_v21 = vrot.slane %v2724_v48, %v11937_v10  ;;  %v2739_v2 = vcombine.high %v2731_v60, %v2731_v60  ;;  %v20190_v51 = vrot.slane %v20189_v29, %v12472_v55  ;;  %v20193_v30 = vld [vmem:[#allocation66_spill] sm:$0xff] }
 0x297   : > { %v9920_v39 = vmin.f32 %v9792_v6, 6.0  ;;  %v5324_v20 = vmul.f32 %v20184_v63, %v20188_v32  ;;  %v15436_v34 = vmul.f32 %v20192_v56, %v20038_v62  ;;  %v9921_v14 = vmin.f32 %v9793_v0, 6.0  ;;  %v20199_v56 = vld [vmem:[#allocation32_spill] sm:$0xff] }
 0x298   : > { %v15430_v41 = vmul.f32 %v20190_v51, %v2731_v60  ;;  %v9922_v23 = vmin.f32 %v9794_v53, 6.0  ;;  %v2740_v17 = vcombine.high %v2738_v21, %v2738_v21  ;;  %v20194_v48 = vrot.slane %v20193_v30, %v12472_v55  ;;  %v20198_v51 = vld [vmem:[#allocation23_spill] sm:$0xff] }
 0x299   : > { %v10249_v6 = vcombine.low %v9919_v35, %v9920_v39  ;;  %v20196_v60 = vrot.slane %v20193_v30, %v20013_v16  ;;  %v20200_v53 = vrot.slane %v20193_v30, %v12478_v58  ;;  %v20203_v39 = vld [vmem:[#allocation10_spill] sm:$0xff]  ;;  %v20208_v58 = vld [vmem:[#allocation21_spill] sm:$0xff]  ;;  %v5662_v30 = vrot.slane %v5323_v3, 7  ;;  %v20221_v55 = vld [vmem:[#allocation15_spill] sm:$0xff] }
 0x29a   : > { %20191 = vst [vmem:[#allocation140_spill] sm:$0xff] %v15430_v41  ;;  %v15441_v38 = vmul.f32 %v20194_v48, %v2739_v2  ;;  %v5374_v54 = vmul.f32 %v20198_v51, %v15430_v41  ;;  %v6335_v40 = vmul.f32 %v20199_v56, %v15430_v41  ;;  %v10250_v0 = vcombine.low %v9921_v14, %v9922_v23  ;;  %v20202_v2 = vld [vmem:[#allocation16_spill] sm:$0xff] }
 0x29b   : > { %v15446_v29 = vmul.f32 %v20196_v60, %v2738_v21  ;;  %v15455_v31 = vmul.f32 %v20200_v53, %v2740_v17  ;;  %v10257_v21 = vrot.slane %v10249_v6, %v11937_v10  ;;  %v20204_v60 = vld [vmem:[#allocation27_spill] sm:$0xff] }
 0x29c   : > { %20195 = vst [vmem:[#allocation171_spill] sm:$0xff] %v15441_v38  ;;  %v5063_v35 = vmul.f32 %v20202_v2, %v15441_v38  ;;  %v5375_v48 = vmul.f32 %v20203_v39, %v15441_v38  ;;  %v5805_v16 = vrot.slane %v5374_v54, 7  ;;  %v15466_v23 = vmul.f32 %v20160_v50, %v15441_v38  ;;  %v20206_v53 = vld [vmem:[#allocation47_spill] sm:$0xff] }
 0x29d   : > { %20197 = vst [vmem:[#allocation172_spill] sm:$0xff] %v15446_v29  ;;  %20201 = vst [vmem:[#allocation11_spill] sm:$0xff] %v15455_v31  ;;  %v5376_v51 = vmul.f32 %v20204_v60, %v15446_v29  ;;  %v10264_v14 = vrot.slane %v10250_v0, %v11937_v10  ;;  %v15471_v31 = vmul.f32 %v20206_v53, %v15430_v41  ;;  %v20222_v53 = vld [vmem:[#allocation51_spill] sm:$0xff] }
 0x29e   : > { %20205 = vst [vmem:[#allocation213_spill] sm:$0xff] %v15466_v23  ;;  %v11346_v17 = vrot.slane %v5375_v48, 9  ;;  %v15475_v39 = vmul.f32 %v20208_v58, %v15441_v38  ;;  %v5806_v6 = vsel %vm12500_vm9, %v5804_v18, %v5805_v16  ;;  %v15481_v54 = vmul.f32 %v20064_v9, %v15430_v41  ;;  %v20211_v23 = vld [vmem:[#allocation59_spill] sm:$0xff]  ;;  %v20214_v16 = vld [vmem:[#allocation102_spill] sm:$0xff] }
 0x29f   : > { %20207 = vst [vmem:[#allocation3_spill] sm:$0xff] %v15471_v31  ;;  %v5809_v29 = vrot.slane %v5376_v51, 7  ;;  %v15485_v0 = vmul.f32 %v20211_v23, %v15430_v41  ;;  %v10265_v48 = vcombine.low %v10257_v21, %v10264_v14  ;;  %v6181_v50 = vadd.f32 %v5806_v6, %v5062_v12  ;;  %v20226_v23 = vld [vmem:[#allocation214_spill] sm:$0xff] }
 0x2a0   : > { %20209 = vst [vmem:[#allocation125_spill] sm:$0xff] %v15475_v39  ;;  %20210 = vst [vmem:[#allocation154_spill] sm:$0xff] %v15481_v54  ;;  %v20215_v18 = vrot.slane %v20214_v16, 7  ;;  %v5665_v12 = vrot.slane %v5324_v20, 7  ;;  %v19171_v21 = vrot.slane %v15436_v34, 7  ;;  %v5664_v6 = vrot.slane %v5662_v30, 2 }
 0x2a1   : > { %20212 = vst [vmem:[#allocation163_spill] sm:$0xff] %v15485_v0  ;;  %v5810_v38 = vsel %vm12500_vm9, %v11346_v17, %v5809_v29  ;;  %v15491_v58 = vrot.slane %v5809_v29, 2  ;;  %11634 = vmatmul.mubr.msk.f32.gmra.mxu1 %vm10708_vm10, %v10265_v48  ;;  %v15498_v41 = vadd.f32 %v6335_v40, %v6181_v50  ;;  %v6289_v29 = vmul.f32 %v20114_v1, %v20187_v28  ;;  %v20218_v40 = vld [vmem:[#allocation209_spill] sm:$0xff]  ;;  %v20220_v16 = vld [vmem:[#allocation212_spill] sm:$0xff] }
 0x2a2   : > { %v5661_v51 = vrot.slane %v20215_v18, 2  ;;  %v15496_v54 = vadd.f32 %v5810_v38, %v5063_v35  ;;  %v6290_v17 = vmul.f32 %v20115_v26, %v20188_v32  ;;  %v5667_v3 = vrot.slane %v5665_v12, 2  ;;  %v20219_v35 = vld [vmem:[#allocation210_spill] sm:$0xff] }
 0x2a3   : > { %20213 = vst [vmem:[#allocation224_spill] sm:$0xff] %v15491_v58  ;;  %20217 = vst [vmem:[#allocation64_spill] sm:$0xff] %v15498_v41  ;;  %v6291_v50 = vmul.f32 %v20199_v56, %v20038_v62  ;;  %v6571_v38 = vmul.f32 %v20004_v42, %v20218_v40  ;;  %v5666_v20 = vsel %vm12500_vm9, %v5664_v6, %v5665_v12 }
 0x2a4   : > { %20216 = vst [vmem:[#allocation223_spill] sm:$0xff] %v15496_v54  ;;  %v5663_v14 = vsel %vm12500_vm9, %v5661_v51, %v5662_v30  ;;  %v6572_v30 = vmul.f32 %v20005_v4, %v20219_v35  ;;  %v6573_v28 = vmul.f32 %v19867_v7, %v20220_v16  ;;  %v6870_v32 = vmul.f32 %v20010_v24, %v20218_v40 }
 0x2a5   : > { %v6135_v48 = vadd.f32 %v5663_v14, %v15407_v19  ;;  %v5669_v19 = vsel %vm12500_vm9, %v5667_v3, %v19171_v21  ;;  %v6136_v18 = vadd.f32 %v5666_v20, %v15411_v37  ;;  %v6871_v12 = vmul.f32 %v20012_v46, %v20219_v35  ;;  %v20223_v3 = vld [vmem:[#allocation37_spill] sm:$0xff] }
 0x2a6   : > { %v6137_v14 = vadd.f32 %v5669_v19, %v15417_v11  ;;  %v6872_v6 = vmul.f32 %v20016_v25, %v20220_v16  ;;  %v15532_v54 = vmul.f32 %v20222_v53, %v20221_v55  ;;  %v7207_v58 = vrot.slane %v6870_v32, 7 }
 0x2a7   : > { %v6417_v51 = vadd.f32 %v6289_v29, %v6135_v48  ;;  %v6418_v41 = vadd.f32 %v6290_v17, %v6136_v18  ;;  %v7210_v31 = vrot.slane %v6871_v12, 7  ;;  %v7836_v37 = vmul.f32 %v20223_v3, %v20218_v40  ;;  %v20224_v48 = vld [vmem:[#allocation211_spill] sm:$0xff]  ;;  %v20236_v40 = vld [vmem:[#allocation205_spill] sm:$0xff] }
 0x2a8   : > { %v6419_v29 = vadd.f32 %v6291_v50, %v6137_v14  ;;  %v20225_v20 = vrot.slane %v20224_v48, 9  ;;  %v7209_v19 = vrot.slane %v7207_v58, 2  ;;  %v7213_v21 = vrot.slane %v6872_v6, 7  ;;  %v20227_v50 = vld [vmem:[#allocation52_spill] sm:$0xff]  ;;  %v20229_v6 = vld [vmem:[#allocation165_spill] sm:$0xff] }
 0x2a9   : > { %v6699_v39 = vadd.f32 %v6571_v38, %v6417_v51  ;;  %v6700_v0 = vadd.f32 %v6572_v30, %v6418_v41  ;;  %v7212_v56 = vrot.slane %v7210_v31, 2  ;;  %v19177_v53 = vrot.slane %v15532_v54, 7 }
 0x2aa   : > { %v7208_v11 = vsel %vm12500_vm9, %v20225_v20, %v7207_v58  ;;  %v6701_v17 = vadd.f32 %v6573_v28, %v6419_v29  ;;  %v7211_v38 = vsel %vm12500_vm9, %v7209_v19, %v7210_v31  ;;  %v7215_v18 = vrot.slane %v7213_v21, 2  ;;  %v20228_v58 = vld [vmem:[#allocation41_spill] sm:$0xff]  ;;  %v20230_v29 = vld [vmem:[#allocation55_spill] sm:$0xff] }
 0x2ab   : > { %v7682_v32 = vadd.f32 %v7208_v11, %v20226_v23  ;;  %v7837_v51 = vmul.f32 %v20227_v50, %v20219_v35  ;;  %v7214_v12 = vsel %vm12500_vm9, %v7212_v56, %v7213_v21  ;;  %v7683_v14 = vadd.f32 %v7211_v38, %v6699_v39  ;;  %v20231_v56 = vld [vmem:[#allocation81_spill] sm:$0xff]  ;;  %v20232_v39 = vld [vmem:[#allocation190_spill] sm:$0xff]  ;;  %v20234_v38 = vld [vmem:[#allocation56_spill] sm:$0xff] }
 0x2ac   : > { %v7838_v41 = vmul.f32 %v20228_v58, %v20220_v16  ;;  %v7839_v30 = vmul.f32 %v20064_v9, %v20221_v55  ;;  %v7217_v23 = vsel %vm12500_vm9, %v7215_v18, %v19177_v53  ;;  %v7684_v31 = vadd.f32 %v7214_v12, %v6700_v0  ;;  %v20233_v19 = vld [vmem:[#allocation101_spill] sm:$0xff] }
 0x2ad   : > { %v7964_v28 = vadd.f32 %v7836_v37, %v7682_v32  ;;  %v8118_v48 = vmul.f32 %v20230_v29, %v20229_v6  ;;  %v7685_v20 = vadd.f32 %v7217_v23, %v6701_v17  ;;  %v7965_v11 = vadd.f32 %v7837_v51, %v7683_v14  ;;  %v20235_v9 = vld [vmem:[#allocation233_spill] sm:$0xff]  ;;  %v20239_v23 = vld [vmem:[#allocation222_spill] sm:$0xff] }
 0x2ae   : > { %v8119_v21 = vmul.f32 %v20232_v39, %v20231_v56  ;;  %v8120_v16 = vmul.f32 %v20234_v38, %v20233_v19  ;;  %v7966_v35 = vadd.f32 %v7838_v41, %v7684_v31  ;;  %v8121_v58 = vmul.f32 %v20236_v40, %v20235_v9  ;;  %v20237_v18 = vld [vmem:[#allocation45_spill] sm:$0xff]  ;;  %v20238_v41 = vld [vmem:[#allocation104_spill] sm:$0xff] }
 0x2af   : > { %v8246_v50 = vadd.f32 %v8118_v48, %v7964_v28  ;;  %v8417_v0 = vmul.f32 %v20237_v18, %v20229_v6  ;;  %v7967_v37 = vadd.f32 %v7839_v30, %v7685_v20  ;;  %v8418_v17 = vmul.f32 %v20175_v27, %v20231_v56  ;;  %v15576_v48 = vpop.f32.mrf.mxu0 }
 0x2b0   : > { %v8247_v32 = vadd.f32 %v8119_v21, %v7965_v11  ;;  %v8419_v51 = vmul.f32 %v20176_v44, %v20233_v19  ;;  %v8248_v12 = vadd.f32 %v8120_v16, %v7966_v35  ;;  %v8420_v14 = vmul.f32 %v20070_v57, %v20235_v9  ;;  %20240 = vst [vmem:[#allocation166_spill] sm:$0xff] %v15576_v48 }
 0x2b1   : > { %v15574_v31 = vmul.f32 %v20239_v23, %v20238_v41  ;;  %v11372_v28 = vrot.slane %v8417_v0, 9  ;;  %v8249_v6 = vadd.f32 %v8121_v58, %v7967_v37  ;;  %v8755_v30 = vrot.slane %v8418_v17, 7  ;;  %v11577_v23 = vpop.f32.mrf.mxu0 }
 0x2b2   : > { %v8758_v20 = vrot.slane %v8419_v51, 7  ;;  %v9384_v11 = vmul.f32 %v19826_v5, %v20231_v56  ;;  %v8761_v21 = vrot.slane %v8420_v14, 7  ;;  %v9385_v35 = vmul.f32 %v20135_v33, %v20233_v19  ;;  %v20241_v14 = vld [vmem:[#allocation219_spill] sm:$0xff]  ;;  %v20243_v19 = vld [vmem:[#allocation189_spill] sm:$0xff] }
 0x2b3   : > { %v9386_v16 = vmul.f32 %v20136_v36, %v20235_v9  ;;  %v8756_v0 = vsel %vm12500_vm9, %v11372_v28, %v8755_v30  ;;  %v8757_v48 = vrot.slane %v8755_v30, 2  ;;  %v9387_v37 = vmul.f32 %v20137_v22, %v20238_v41  ;;  %v20242_v28 = vld [vmem:[#allocation188_spill] sm:$0xff] }
 0x2b4   : > { %v8760_v58 = vrot.slane %v8758_v20, 2  ;;  %v8763_v17 = vrot.slane %v8761_v21, 2  ;;  %v9230_v51 = vadd.f32 %v8756_v0, %v8246_v50  ;;  %v2163_v53 = vadd.f32 %v15390_v47, %v20241_v14 }
 0x2b5   : > { %v5019_v18 = vmul.f32 %v20202_v2, %v20038_v62  ;;  %v8759_v9 = vsel %vm12500_vm9, %v8757_v48, %v8758_v20  ;;  %v5020_v30 = vmul.f32 %v20141_v45, %v20242_v28  ;;  %v5021_v56 = vmul.f32 %v20085_v43, %v20243_v19  ;;  %v20245_v48 = vld [vmem:[#allocation191_spill] sm:$0xff] }
 0x2b6   : > { %v8762_v23 = vsel %vm12500_vm9, %v8760_v58, %v8761_v21  ;;  %v20244_v50 = vrot.slane %v15574_v31, 7  ;;  %v9231_v14 = vadd.f32 %v8759_v9, %v8247_v32  ;;  %v9512_v62 = vadd.f32 %v9384_v11, %v9230_v51 }
 0x2b7   : > { %v9232_v47 = vadd.f32 %v8762_v23, %v8248_v12  ;;  %v2282_v22 = vmax.f32 %v2163_v53, 0.0  ;;  %v5022_v20 = vmul.f32 %v20183_v52, %v20245_v48  ;;  %v5326_v21 = vmul.f32 %v20204_v60, %v20242_v28 }
 0x2b8   : > { %v8765_v0 = vsel %vm12500_vm9, %v8763_v17, %v20244_v50  ;;  %v9513_v58 = vadd.f32 %v9385_v35, %v9231_v14  ;;  %v9667_v43 = vadd.f32 %v14371_v15, %v9512_v62  ;;  %v5327_v36 = vmul.f32 %v20143_v13, %v20243_v19  ;;  %v20247_v62 = vld [vmem:[#allocation66_spill] sm:$0xff] }
 0x2b9   : > { %v9233_v2 = vadd.f32 %v8765_v0, %v8249_v6  ;;  %v9514_v45 = vadd.f32 %v9386_v16, %v9232_v47  ;;  %v2323_v17 = vmin.f32 %v2282_v22, 6.0  ;;  %v5328_v9 = vmul.f32 %v20184_v63, %v20245_v48 }
 0x2ba   : > { %v20246_v53 = vrot.slane %v15436_v34, 7  ;;  %v9668_v12 = vadd.f32 %v20144_v61, %v9513_v58  ;;  %v9795_v11 = vmax.f32 %v9667_v43, 0.0  ;;  %v5671_v35 = vrot.slane %v5326_v21, 7 }
 0x2bb   : > { %v9515_v33 = vadd.f32 %v9387_v37, %v9233_v2  ;;  %v9669_v6 = vadd.f32 %v20145_v49, %v9514_v45  ;;  %v2741_v16 = vcombine.high %v2323_v17, %v2323_v17  ;;  %v2748_v51 = vrot.slane %v2323_v17, %v11937_v10  ;;  %v20248_v45 = vld [vmem:[#allocation22_spill] sm:$0xff] }
 0x2bc   : > { %v5670_v32 = vrot.slane %v20246_v53, 2  ;;  %v5674_v23 = vrot.slane %v5327_v36, 7  ;;  %v9796_v2 = vmax.f32 %v9668_v12, 0.0  ;;  %v9923_v37 = vmin.f32 %v9795_v11, 6.0  ;;  %v20252_v11 = vld [vmem:[#allocation12_spill] sm:$0xff] }
 0x2bd   : > { %v9670_v47 = vadd.f32 %v20147_v59, %v9515_v33  ;;  %v9797_v22 = vmax.f32 %v9669_v6, 0.0  ;;  %v2755_v0 = vrot.slane %v2741_v16, %v11937_v10  ;;  %v2756_v14 = vcombine.high %v2748_v51, %v2748_v51  ;;  %v20251_v6 = vld [vmem:[#allocation67_spill] sm:$0xff] }
 0x2be   : > { %v5672_v50 = vsel %vm12500_vm9, %v5670_v32, %v5671_v35  ;;  %v20249_v43 = vrot.slane %v20247_v62, %v20248_v45  ;;  %v9924_v33 = vmin.f32 %v9796_v2, 6.0  ;;  %v5673_v53 = vrot.slane %v5671_v35, 2  ;;  %v20255_v32 = vld [vmem:[#allocation13_spill] sm:$0xff] }
 0x2bf   : > { %v9798_v34 = vmax.f32 %v9670_v47, 0.0  ;;  %v9925_v58 = vmin.f32 %v9797_v22, 6.0  ;;  %v5676_v17 = vrot.slane %v5674_v23, 2  ;;  %v2757_v12 = vcombine.high %v2755_v0, %v2755_v0 }
 0x2c0   : > { %v15626_v21 = vmul.f32 %v20249_v43, %v2748_v51  ;;  %v20253_v60 = vrot.slane %v20251_v6, %v20252_v11  ;;  %v20256_v47 = vrot.slane %v20251_v6, %v20255_v32  ;;  %v10266_v13 = vcombine.low %v9923_v37, %v9924_v33 }
 0x2c1   : > { %v9926_v36 = vmin.f32 %v9798_v34, 6.0  ;;  %v5675_v51 = vsel %vm12500_vm9, %v5673_v53, %v5674_v23  ;;  %v5677_v2 = vrot.slane %v5328_v9, 7  ;;  %v6138_v22 = vadd.f32 %v5672_v50, %v5019_v18  ;;  %v20258_v34 = vld [vmem:[#allocation14_spill] sm:$0xff]  ;;  %v20264_v53 = vld [vmem:[#allocation24_spill] sm:$0xff] }
 0x2c2   : > { %20250 = vst [vmem:[#allocation164_spill] sm:$0xff] %v15626_v21  ;;  %v15631_v63 = vmul.f32 %v20253_v60, %v2756_v14  ;;  %v15636_v16 = vmul.f32 %v20256_v47, %v2755_v0  ;;  %v20259_v62 = vrot.slane %v20251_v6, %v20258_v34  ;;  %v6139_v21 = vadd.f32 %v5675_v51, %v5020_v30  ;;  %v20261_v60 = vld [vmem:[#allocation18_spill] sm:$0xff]  ;;  %v20262_v30 = vld [vmem:[#allocation99_spill] sm:$0xff] }
 0x2c3   : > { %v10267_v35 = vcombine.low %v9925_v58, %v9926_v36  ;;  %v6292_v14 = vmul.f32 %v20261_v60, %v20242_v28  ;;  %v5678_v37 = vsel %vm12500_vm9, %v5676_v17, %v5677_v2  ;;  %v5679_v0 = vrot.slane %v5677_v2, 2  ;;  %v20265_v36 = vld [vmem:[#allocation218_spill] sm:$0xff] }
 0x2c4   : > { %20254 = vst [vmem:[#allocation93_spill] sm:$0xff] %v15631_v63  ;;  %20257 = vst [vmem:[#allocation9_spill] sm:$0xff] %v15636_v16  ;;  %v15643_v43 = vmul.f32 %v20259_v62, %v2757_v12  ;;  %v10274_v63 = vrot.slane %v10266_v13, %v11937_v10  ;;  %v6293_v9 = vmul.f32 %v20114_v1, %v20243_v19  ;;  %v20263_v58 = vrot.slane %v20262_v30, 7 }
 0x2c5   : > { %v10281_v18 = vrot.slane %v10267_v35, %v11937_v10  ;;  %v6140_v23 = vadd.f32 %v5678_v37, %v5021_v56  ;;  %v6294_v50 = vmul.f32 %v20115_v26, %v20245_v48  ;;  %v6420_v33 = vadd.f32 %v6292_v14, %v6138_v22  ;;  %v20266_v56 = vld [vmem:[#allocation220_spill] sm:$0xff]  ;;  %v20267_v48 = vld [vmem:[#allocation221_spill] sm:$0xff] }
 0x2c6   : > { %20260 = vst [vmem:[#allocation195_spill] sm:$0xff] %v15643_v43  ;;  %v5681_v28 = vsel %vm12500_vm9, %v5679_v0, %v20263_v58  ;;  %v6421_v13 = vadd.f32 %v6293_v9, %v6139_v21  ;;  %v6574_v17 = vmul.f32 %v20264_v53, %v20221_v55  ;;  %v6575_v12 = vmul.f32 %v20004_v42, %v20265_v36  ;;  %v20268_v14 = vld [vmem:[#allocation196_spill] sm:$0xff]  ;;  %v20273_v43 = vld [vmem:[#allocation33_spill] sm:$0xff] }
 0x2c7   : > { %v10282_v19 = vcombine.low %v10274_v63, %v10281_v18  ;;  %v6141_v47 = vadd.f32 %v5681_v28, %v5022_v20  ;;  %v6422_v51 = vadd.f32 %v6294_v50, %v6140_v23  ;;  %v6576_v2 = vmul.f32 %v20005_v4, %v20266_v56 }
 0x2c8   : > { %v6577_v22 = vmul.f32 %v19867_v7, %v20267_v48  ;;  %v6702_v35 = vadd.f32 %v6574_v17, %v6420_v33  ;;  %v6703_v62 = vadd.f32 %v6575_v12, %v6421_v13  ;;  %v6874_v21 = vmul.f32 %v20010_v24, %v20265_v36  ;;  %v20270_v33 = vld [vmem:[#allocation52_spill] sm:$0xff]  ;;  %v20271_v17 = vld [vmem:[#allocation41_spill] sm:$0xff] }
 0x2c9   : > { %11636 = vmatprep.mubr.msk.f32.mxu1 %vm10708_vm10, %v10282_v19  ;;  %v6423_v37 = vadd.f32 %v20268_v14, %v6141_v47  ;;  %v6704_v0 = vadd.f32 %v6576_v2, %v6422_v51  ;;  %v6875_v63 = vmul.f32 %v20012_v46, %v20266_v56  ;;  %v6876_v20 = vmul.f32 %v20016_v25, %v20267_v48  ;;  %v20272_v51 = vld [vmem:[#allocation82_spill] sm:$0xff] }
 0x2ca   : > { %v20269_v9 = vrot.slane %v15532_v54, 7  ;;  %v7219_v23 = vrot.slane %v6874_v21, 7  ;;  %v7840_v50 = vmul.f32 %v20223_v3, %v20265_v36  ;;  %v7841_v30 = vmul.f32 %v20270_v33, %v20266_v56 }
 0x2cb   : > { %v6705_v58 = vadd.f32 %v6577_v22, %v6423_v37  ;;  %v7222_v28 = vrot.slane %v6875_v63, 7  ;;  %v7225_v13 = vrot.slane %v6876_v20, 7  ;;  %v7842_v12 = vmul.f32 %v20271_v17, %v20267_v48  ;;  %v20274_v63 = vld [vmem:[#allocation103_spill] sm:$0xff] }
 0x2cc   : > { %v7218_v18 = vrot.slane %v20269_v9, 2  ;;  %v7221_v47 = vrot.slane %v7219_v23, 2  ;;  %v8122_v54 = vmul.f32 %v20230_v29, %v20238_v41  ;;  %v8123_v2 = vmul.f32 %v20232_v39, %v20272_v51  ;;  %v20275_v48 = vld [vmem:[#allocation19_spill] sm:$0xff] }
 0x2cd   : > { %v7224_v21 = vrot.slane %v7222_v28, 2  ;;  %v7227_v14 = vrot.slane %v7225_v13, 2  ;;  %v8124_v22 = vmul.f32 %v20234_v38, %v20273_v43  ;;  %v8125_v20 = vmul.f32 %v20236_v40, %v20274_v63  ;;  %v20277_v40 = vld [vmem:[#allocation109_spill] sm:$0xff] }
 0x2ce   : > { %v7220_v19 = vsel %vm12500_vm9, %v7218_v18, %v7219_v23  ;;  %v7223_v37 = vsel %vm12500_vm9, %v7221_v47, %v7222_v28  ;;  %v8422_v18 = vmul.f32 %v20175_v27, %v20272_v51  ;;  %v8423_v23 = vmul.f32 %v20176_v44, %v20273_v43  ;;  %v20278_v27 = vld [vmem:[#allocation59_spill] sm:$0xff] }
 0x2cf   : > { %v7686_v9 = vadd.f32 %v7220_v19, %v6702_v35  ;;  %v7226_v16 = vsel %vm12500_vm9, %v7224_v21, %v7225_v13  ;;  %v20276_v35 = vrot.slane %v20275_v48, 7  ;;  %v7687_v60 = vadd.f32 %v7223_v37, %v6703_v62  ;;  %v15711_v48 = vpop.f32.mrf.mxu0 }
 0x2d0   : > { %v7688_v28 = vadd.f32 %v7226_v16, %v6704_v0  ;;  %v8424_v36 = vmul.f32 %v20070_v57, %v20274_v63  ;;  %v8425_v38 = vmul.f32 %v20278_v27, %v20277_v40  ;;  %v20279_v29 = vrot.slane %v15574_v31, 7  ;;  %20280 = vst [vmem:[#allocation230_spill] sm:$0xff] %v15711_v48 }
 0x2d1   : > { %v7229_v19 = vsel %vm12500_vm9, %v7227_v14, %v20276_v35  ;;  %v7968_v56 = vadd.f32 %v7840_v50, %v7686_v9  ;;  %v7969_v39 = vadd.f32 %v7841_v30, %v7687_v60  ;;  %v8767_v21 = vrot.slane %v8422_v18, 7  ;;  %v20281_v14 = vld [vmem:[#allocation227_spill] sm:$0xff]  ;;  %v11580_v35 = vpop.f32.mrf.mxu0 }
 0x2d2   : > { %v7689_v47 = vadd.f32 %v7229_v19, %v6705_v58  ;;  %v8766_v13 = vrot.slane %v20279_v29, 2  ;;  %v7970_v17 = vadd.f32 %v7842_v12, %v7688_v28  ;;  %v8770_v50 = vrot.slane %v8423_v23, 7 }
 0x2d3   : > { %v8250_v44 = vadd.f32 %v8122_v54, %v7968_v56  ;;  %v8773_v16 = vrot.slane %v8424_v36, 7  ;;  %v8251_v0 = vadd.f32 %v8123_v2, %v7969_v39  ;;  %v8769_v9 = vrot.slane %v8767_v21, 2  ;;  %v20282_v36 = vld [vmem:[#allocation193_spill] sm:$0xff] }
 0x2d4   : > { %v7971_v62 = vadd.f32 %v20281_v14, %v7689_v47  ;;  %v8768_v58 = vsel %vm12500_vm9, %v8766_v13, %v8767_v21  ;;  %v8776_v37 = vrot.slane %v8425_v38, 7  ;;  %v8252_v60 = vadd.f32 %v8124_v22, %v7970_v17  ;;  %v20283_v22 = vld [vmem:[#allocation63_spill] sm:$0xff]  ;;  %v20286_v21 = vld [vmem:[#allocation28_spill] sm:$0xff] }
 0x2d5   : > { %v8772_v30 = vrot.slane %v8770_v50, 2  ;;  %v8775_v31 = vrot.slane %v8773_v16, 2  ;;  %v8771_v29 = vsel %vm12500_vm9, %v8769_v9, %v8770_v50  ;;  %v9234_v54 = vadd.f32 %v8768_v58, %v8250_v44  ;;  %v20284_v44 = vld [vmem:[#allocation69_spill] sm:$0xff]  ;;  %v20285_v13 = vld [vmem:[#allocation151_spill] sm:$0xff] }
 0x2d6   : > { %v8253_v56 = vadd.f32 %v8125_v20, %v7971_v62  ;;  %v9388_v12 = vmul.f32 %v19826_v5, %v20272_v51  ;;  %v9389_v39 = vmul.f32 %v20282_v36, %v20273_v43  ;;  %v9235_v17 = vadd.f32 %v8771_v29, %v8251_v0  ;;  %v20287_v62 = vld [vmem:[#allocation85_spill] sm:$0xff] }
 0x2d7   : > { %v8774_v2 = vsel %vm12500_vm9, %v8772_v30, %v8773_v16  ;;  %v8777_v38 = vsel %vm12500_vm9, %v8775_v31, %v8776_v37  ;;  %v9390_v20 = vmul.f32 %v20283_v22, %v20274_v63  ;;  %v9391_v19 = vmul.f32 %v20284_v44, %v20277_v40  ;;  %v20288_v16 = vld [vmem:[#allocation209_spill] sm:$0xff] }
 0x2d8   : > { %v9236_v18 = vadd.f32 %v8774_v2, %v8252_v60  ;;  %v9237_v23 = vadd.f32 %v8777_v38, %v8253_v56  ;;  %v9516_v28 = vadd.f32 %v9388_v12, %v9234_v54  ;;  %v9517_v47 = vadd.f32 %v9389_v39, %v9235_v17  ;;  %v20289_v58 = vld [vmem:[#allocation25_spill] sm:$0xff]  ;;  %v20290_v60 = vld [vmem:[#allocation210_spill] sm:$0xff]  ;;  %v20292_v12 = vld [vmem:[#allocation212_spill] sm:$0xff] }
 0x2d9   : > { %v2168_v14 = vadd.f32 %v20286_v21, %v20285_v13  ;;  %v2173_v50 = vadd.f32 %v20286_v21, %v20287_v62  ;;  %v15736_v9 = vmul.f32 %v20289_v58, %v20288_v16  ;;  %v20291_v56 = vld [vmem:[#allocation17_spill] sm:$0xff]  ;;  %v15746_v39 = vmul.f32 %v20183_v52, %v20292_v12  ;;  %v20294_v13 = vld [vmem:[#allocation31_spill] sm:$0xff]  ;;  %v20295_v16 = vld [vmem:[#allocation34_spill] sm:$0xff] }
 0x2da   : > { %v9518_v0 = vadd.f32 %v9390_v20, %v9236_v18  ;;  %v9519_v37 = vadd.f32 %v9391_v19, %v9237_v23  ;;  %v9671_v35 = vadd.f32 %v14371_v15, %v9516_v28  ;;  %v15741_v30 = vmul.f32 %v20291_v56, %v20290_v60  ;;  %v20293_v20 = vld [vmem:[#allocation30_spill] sm:$0xff] }
 0x2db   : > { %v9672_v31 = vadd.f32 %v20144_v61, %v9517_v47  ;;  %v2283_v29 = vmax.f32 %v2168_v14, 0.0  ;;  %v2284_v54 = vmax.f32 %v2173_v50, 0.0  ;;  %v5332_v18 = vmul.f32 %v20293_v20, %v20290_v60 }
 0x2dc   : > { %v9673_v2 = vadd.f32 %v20145_v49, %v9518_v0  ;;  %v9674_v38 = vadd.f32 %v20147_v59, %v9519_v37  ;;  %v9799_v17 = vmax.f32 %v9671_v35, 0.0  ;;  %v5333_v47 = vmul.f32 %v20294_v13, %v20292_v12 }
 0x2dd   : > { %v9800_v23 = vmax.f32 %v9672_v31, 0.0  ;;  %v2324_v19 = vmin.f32 %v2283_v29, 6.0  ;;  %v2325_v28 = vmin.f32 %v2284_v54, 6.0  ;;  %v15756_v48 = vmul.f32 %v20295_v16, %v20221_v55 }
 0x2de   : > { %v9801_v14 = vmax.f32 %v9673_v2, 0.0  ;;  %v9802_v62 = vmax.f32 %v9674_v38, 0.0  ;;  %v9927_v50 = vmin.f32 %v9799_v17, 6.0  ;;  %v5687_v29 = vrot.slane %v5332_v18, 7 }
 0x2df   : > { %v9928_v0 = vmin.f32 %v9800_v23, 6.0  ;;  %v2758_v27 = vcombine.high %v2324_v19, %v2324_v19  ;;  %v2765_v37 = vrot.slane %v2324_v19, %v11937_v10  ;;  %v2775_v35 = vcombine.high %v2325_v28, %v2325_v28  ;;  %v20298_v19 = vld [vmem:[#allocation70_spill] sm:$0xff] }
 0x2e0   : > { %v9929_v40 = vmin.f32 %v9801_v14, 6.0  ;;  %v9930_v63 = vmin.f32 %v9802_v62, 6.0  ;;  %v2782_v31 = vrot.slane %v2325_v28, %v11937_v10  ;;  %v20296_v38 = vrot.slane %v20251_v6, %v20248_v45 }
 0x2e1   : > { %v10283_v54 = vcombine.low %v9927_v50, %v9928_v0  ;;  %v2772_v43 = vrot.slane %v2758_v27, %v11937_v10  ;;  %v2773_v2 = vcombine.high %v2765_v37, %v2765_v37  ;;  %v2789_v23 = vrot.slane %v2775_v35, %v11937_v10  ;;  %v20301_v50 = vld [vmem:[#allocation68_spill] sm:$0xff] }
 0x2e2   : > { %v15764_v17 = vmul.f32 %v20296_v38, %v2765_v37  ;;  %v10284_v16 = vcombine.low %v9929_v40, %v9930_v63  ;;  %v2790_v51 = vcombine.high %v2782_v31, %v2782_v31  ;;  %v20299_v14 = vrot.slane %v20298_v19, %v20258_v34  ;;  %v20309_v38 = vld [vmem:[#allocation16_spill] sm:$0xff] }
 0x2e3   : > { %v10291_v18 = vrot.slane %v10283_v54, %v11937_v10  ;;  %v2774_v28 = vcombine.high %v2772_v43, %v2772_v43  ;;  %v20302_v27 = vrot.slane %v20301_v50, %v20252_v11  ;;  %v20304_v6 = vrot.slane %v20298_v19, %v20252_v11 }
 0x2e4   : > { %20297 = vst [vmem:[#allocation159_spill] sm:$0xff] %v15764_v17  ;;  %v15770_v62 = vmul.f32 %v20299_v14, %v2782_v31  ;;  %v10298_v63 = vrot.slane %v10284_v16, %v11937_v10  ;;  %v5070_v37 = vmul.f32 %v20183_v52, %v15764_v17  ;;  %v15788_v35 = vmul.f32 %v20294_v13, %v15764_v17  ;;  %v20311_v16 = vld [vmem:[#allocation10_spill] sm:$0xff]  ;;  %v20312_v17 = vld [vmem:[#allocation32_spill] sm:$0xff] }
 0x2e5   : > { %v15776_v0 = vmul.f32 %v20302_v27, %v2773_v2  ;;  %v15781_v40 = vmul.f32 %v20304_v6, %v2772_v43  ;;  %v2791_v31 = vcombine.high %v2789_v23, %v2789_v23  ;;  %v20307_v54 = vrot.slane %v20298_v19, %v20255_v32  ;;  %v20310_v43 = vld [vmem:[#allocation23_spill] sm:$0xff] }
 0x2e6   : > { %20300 = vst [vmem:[#allocation175_spill] sm:$0xff] %v15770_v62  ;;  %20306 = vst [vmem:[#allocation185_spill] sm:$0xff] %v15788_v35  ;;  %v10299_v6 = vcombine.low %v10291_v18, %v10298_v63  ;;  %v19223_v62 = vrot.slane %v15788_v35, 7  ;;  %v20317_v63 = vld [vmem:[#allocation21_spill] sm:$0xff] }
 0x2e7   : > { %20303 = vst [vmem:[#allocation183_spill] sm:$0xff] %v15776_v0  ;;  %20305 = vst [vmem:[#allocation184_spill] sm:$0xff] %v15781_v40  ;;  %v15793_v2 = vmul.f32 %v20307_v54, %v2774_v28  ;;  %v5071_v14 = vmul.f32 %v20309_v38, %v15781_v40  ;;  %v5383_v50 = vmul.f32 %v20310_v43, %v15776_v0  ;;  %v20314_v28 = vld [vmem:[#allocation27_spill] sm:$0xff] }
 0x2e8   : > { %v5384_v27 = vmul.f32 %v20311_v16, %v15781_v40  ;;  %v6343_v13 = vmul.f32 %v20312_v17, %v15776_v0  ;;  %v15806_v52 = vmul.f32 %v20264_v53, %v15781_v40  ;;  %v20315_v43 = vld [vmem:[#allocation47_spill] sm:$0xff]  ;;  %11637 = vmatmul.mubr.msk.f32.gmra.mxu1 %vm10708_vm10, %v10299_v6  ;;  %v5829_v18 = vrot.slane %v19223_v62, 2 }
 0x2e9   : > { %20308 = vst [vmem:[#allocation65_spill] sm:$0xff] %v15793_v2  ;;  %v5385_v54 = vmul.f32 %v20314_v28, %v15793_v2  ;;  %v5830_v34 = vrot.slane %v5383_v50, 7  ;;  %v15812_v59 = vmul.f32 %v20315_v43, %v15776_v0  ;;  %v15819_v16 = vmul.f32 %v20317_v63, %v15781_v40  ;;  %v20321_v50 = vld [vmem:[#allocation72_spill] sm:$0xff]  ;;  %v20326_v40 = vld [vmem:[#allocation105_spill] sm:$0xff] }
 0x2ea   : > { %20313 = vst [vmem:[#allocation102_spill] sm:$0xff] %v15806_v52  ;;  %v11347_v10 = vrot.slane %v5384_v27, 9  ;;  %v20319_v52 = vrot.slane %v20298_v19, %v20248_v45  ;;  %v20322_v27 = vrot.slane %v20321_v50, %v20252_v11  ;;  %v20324_v62 = vrot.slane %v20321_v50, %v20255_v32 }
 0x2eb   : > { %20316 = vst [vmem:[#allocation15_spill] sm:$0xff] %v15812_v59  ;;  %20318 = vst [vmem:[#allocation211_spill] sm:$0xff] %v15819_v16  ;;  %v5834_v0 = vrot.slane %v5385_v54, 7  ;;  %v5688_v63 = vsel %vm12500_vm9, %v20326_v40, %v5687_v29  ;;  %v5689_v19 = vrot.slane %v5687_v29, 2  ;;  %v6298_v29 = vmul.f32 %v20115_v26, %v20292_v12 }
 0x2ec   : > { %v15824_v53 = vmul.f32 %v20319_v52, %v2790_v51  ;;  %v15829_v2 = vmul.f32 %v20322_v27, %v2789_v23  ;;  %v15835_v35 = vmul.f32 %v20324_v62, %v2791_v31  ;;  %v5831_v52 = vsel %vm12500_vm9, %v5829_v18, %v5830_v34 }
 0x2ed   : > { %v5690_v23 = vrot.slane %v5333_v47, 7  ;;  %v5835_v54 = vsel %vm12500_vm9, %v11347_v10, %v5834_v0  ;;  %v15845_v27 = vrot.slane %v5834_v0, 2  ;;  %v6189_v6 = vadd.f32 %v5831_v52, %v5070_v37  ;;  %v20332_v52 = vld [vmem:[#allocation233_spill] sm:$0xff] }
 0x2ee   : > { %20320 = vst [vmem:[#allocation214_spill] sm:$0xff] %v15824_v53  ;;  %20323 = vst [vmem:[#allocation165_spill] sm:$0xff] %v15829_v2  ;;  %v19228_v62 = vrot.slane %v15756_v48, 7  ;;  %v15848_v31 = vadd.f32 %v5835_v54, %v5071_v14  ;;  %v6143_v34 = vadd.f32 %v5688_v63, %v15736_v9  ;;  %v6297_v10 = vmul.f32 %v20114_v1, %v20290_v60  ;;  %v20330_v14 = vld [vmem:[#allocation81_spill] sm:$0xff]  ;;  %v20343_v2 = vld [vmem:[#allocation55_spill] sm:$0xff] }
 0x2ef   : > { %20325 = vst [vmem:[#allocation104_spill] sm:$0xff] %v15835_v35  ;;  %20327 = vst [vmem:[#allocation219_spill] sm:$0xff] %v15845_v27  ;;  %v5691_v40 = vsel %vm12500_vm9, %v5689_v19, %v5690_v23  ;;  %v5692_v59 = vrot.slane %v5690_v23, 2  ;;  %v15853_v18 = vadd.f32 %v6343_v13, %v6189_v6  ;;  %v6299_v37 = vmul.f32 %v20312_v17, %v20221_v55  ;;  %v20331_v13 = vld [vmem:[#allocation101_spill] sm:$0xff]  ;;  %v20333_v19 = vld [vmem:[#allocation215_spill] sm:$0xff] }
 0x2f0   : > { %20328 = vst [vmem:[#allocation188_spill] sm:$0xff] %v15848_v31  ;;  %v6144_v47 = vadd.f32 %v5691_v40, %v15741_v30  ;;  %v6579_v9 = vmul.f32 %v20004_v42, %v20330_v14  ;;  %v6580_v30 = vmul.f32 %v20005_v4, %v20331_v13  ;;  %v6425_v60 = vadd.f32 %v6297_v10, %v6143_v34  ;;  %v20334_v23 = vld [vmem:[#allocation207_spill] sm:$0xff] }
 0x2f1   : > { %20329 = vst [vmem:[#allocation189_spill] sm:$0xff] %v15853_v18  ;;  %v5694_v0 = vsel %vm12500_vm9, %v5692_v59, %v19228_v62  ;;  %v6581_v12 = vmul.f32 %v19867_v7, %v20332_v52  ;;  %v6706_v54 = vadd.f32 %v20334_v23, %v20333_v19  ;;  %v6879_v59 = vmul.f32 %v20010_v24, %v20330_v14  ;;  %v20335_v34 = vld [vmem:[#allocation51_spill] sm:$0xff]  ;;  %v15887_v23 = vpop.f32.mrf.mxu0  ;;  %v20342_v18 = vld [vmem:[#allocation117_spill] sm:$0xff] }
 0x2f2   : > { %v6145_v63 = vadd.f32 %v5694_v0, %v15746_v39  ;;  %v6426_v6 = vadd.f32 %v6298_v29, %v6144_v47  ;;  %v6880_v40 = vmul.f32 %v20012_v46, %v20331_v13  ;;  %v6881_v51 = vmul.f32 %v20016_v25, %v20332_v52  ;;  %20337 = vst [vmem:[#allocation66_spill] sm:$0xff] %v15887_v23  ;;  %v20344_v23 = vld [vmem:[#allocation126_spill] sm:$0xff] }
 0x2f3   : > { %v6707_v31 = vadd.f32 %v6579_v9, %v6425_v60  ;;  %v15883_v47 = vmul.f32 %v20335_v34, %v20238_v41  ;;  %v7232_v10 = vrot.slane %v6879_v59, 7  ;;  %v7844_v19 = vmul.f32 %v20223_v3, %v20330_v14  ;;  %v20338_v9 = vld [vmem:[#allocation41_spill] sm:$0xff]  ;;  %v11583_v16 = vpop.f32.mrf.mxu0  ;;  %v20345_v34 = vld [vmem:[#allocation190_spill] sm:$0xff] }
 0x2f4   : > { %v6427_v62 = vadd.f32 %v6299_v37, %v6145_v63  ;;  %v6708_v39 = vadd.f32 %v6580_v30, %v6426_v6  ;;  %v7235_v29 = vrot.slane %v6880_v40, 7  ;;  %v7238_v0 = vrot.slane %v6881_v51, 7  ;;  %v20339_v63 = vld [vmem:[#allocation29_spill] sm:$0xff]  ;;  %v20353_v3 = vld [vmem:[#allocation58_spill] sm:$0xff] }
 0x2f5   : > { %20336 = vst [vmem:[#allocation191_spill] sm:$0xff] %v15883_v47  ;;  %v7845_v37 = vmul.f32 %v20270_v33, %v20331_v13  ;;  %v7846_v30 = vmul.f32 %v20338_v9, %v20332_v52  ;;  %v20340_v60 = vrot.slane %v20339_v63, 9  ;;  %v7234_v51 = vrot.slane %v7232_v10, 2  ;;  %v20349_v9 = vld [vmem:[#allocation122_spill] sm:$0xff] }
 0x2f6   : > { %v6709_v27 = vadd.f32 %v6581_v12, %v6427_v62  ;;  %v7237_v59 = vrot.slane %v7235_v29, 2  ;;  %v7240_v40 = vrot.slane %v7238_v0, 2  ;;  %v20341_v62 = vld [vmem:[#allocation53_spill] sm:$0xff]  ;;  %v8126_v53 = vmul.f32 %v20343_v2, %v20342_v18 }
 0x2f7   : > { %v7233_v6 = vsel %vm12500_vm9, %v20340_v60, %v7232_v10  ;;  %v7847_v12 = vmul.f32 %v20341_v62, %v20238_v41  ;;  %v8127_v32 = vmul.f32 %v20345_v34, %v20344_v23  ;;  %v7236_v63 = vsel %vm12500_vm9, %v7234_v51, %v7235_v29  ;;  %v20350_v34 = vld [vmem:[#allocation205_spill] sm:$0xff] }
 0x2f8   : > { %v7690_v35 = vadd.f32 %v7233_v6, %v6706_v54  ;;  %v7239_v60 = vsel %vm12500_vm9, %v7237_v59, %v7238_v0  ;;  %v20346_v10 = vrot.slane %v15883_v47, 7  ;;  %v20347_v54 = vld [vmem:[#allocation42_spill] sm:$0xff]  ;;  %v20348_v6 = vld [vmem:[#allocation56_spill] sm:$0xff]  ;;  %v7691_v13 = vadd.f32 %v7236_v63, %v6707_v31  ;;  %v20351_v29 = vld [vmem:[#allocation45_spill] sm:$0xff] }
 0x2f9   : > { %v8128_v52 = vmul.f32 %v20348_v6, %v20347_v54  ;;  %v7692_v14 = vadd.f32 %v7239_v60, %v6708_v39  ;;  %v8129_v33 = vmul.f32 %v20350_v34, %v20349_v9  ;;  %v8426_v51 = vmul.f32 %v20351_v29, %v20342_v18  ;;  %v20352_v0 = vld [vmem:[#allocation57_spill] sm:$0xff]  ;;  %v20355_v31 = vld [vmem:[#allocation222_spill] sm:$0xff] }
 0x2fa   : > { %v7242_v16 = vsel %vm12500_vm9, %v7240_v40, %v20346_v10  ;;  %v7972_v62 = vadd.f32 %v7844_v19, %v7690_v35  ;;  %v8427_v59 = vmul.f32 %v20352_v0, %v20344_v23  ;;  %v8428_v47 = vmul.f32 %v20353_v3, %v20347_v54  ;;  %v20354_v35 = vld [vmem:[#allocation43_spill] sm:$0xff] }
 0x2fb   : > { %v7693_v2 = vadd.f32 %v7242_v16, %v6709_v27  ;;  %v7973_v40 = vadd.f32 %v7845_v37, %v7691_v13  ;;  %v7974_v10 = vadd.f32 %v7846_v30, %v7692_v14  ;;  %v8429_v27 = vmul.f32 %v20070_v57, %v20349_v9 }
 0x2fc   : > { %v8254_v6 = vadd.f32 %v8126_v53, %v7972_v62  ;;  %v15926_v39 = vmul.f32 %v20355_v31, %v20354_v35  ;;  %v11373_v19 = vrot.slane %v8426_v51, 9  ;;  %v8780_v63 = vrot.slane %v8427_v59, 7 }
 0x2fd   : > { %v7975_v25 = vadd.f32 %v7847_v12, %v7693_v2  ;;  %v8255_v18 = vadd.f32 %v8127_v32, %v7973_v40  ;;  %v8256_v60 = vadd.f32 %v8128_v52, %v7974_v10  ;;  %v8783_v29 = vrot.slane %v8428_v47, 7  ;;  %v20357_v10 = vld [vmem:[#allocation218_spill] sm:$0xff] }
 0x2fe   : > { %v8781_v3 = vsel %vm12500_vm9, %v11373_v19, %v8780_v63  ;;  %v8782_v13 = vrot.slane %v8780_v63, 2  ;;  %v8786_v14 = vrot.slane %v8429_v27, 7  ;;  %v19241_v53 = vrot.slane %v15926_v39, 7 }
 0x2ff   : > { %v8257_v16 = vadd.f32 %v8129_v33, %v7975_v25  ;;  %v8785_v2 = vrot.slane %v8783_v29, 2  ;;  %v9238_v37 = vadd.f32 %v8781_v3, %v8254_v6  ;;  %v9392_v30 = vmul.f32 %v19826_v5, %v20344_v23  ;;  %v20356_v6 = vld [vmem:[#allocation139_spill] sm:$0xff] }
 0x300   : > { %v9393_v62 = vmul.f32 %v20282_v36, %v20347_v54  ;;  %v8784_v32 = vsel %vm12500_vm9, %v8782_v13, %v8783_v29  ;;  %v8788_v25 = vrot.slane %v8786_v14, 2  ;;  %v9394_v33 = vmul.f32 %v20283_v22, %v20349_v9 }
 0x301   : > { %v9395_v52 = vmul.f32 %v20284_v44, %v20354_v35  ;;  %v8787_v47 = vsel %vm12500_vm9, %v8785_v2, %v8786_v14  ;;  %v9239_v3 = vadd.f32 %v8784_v32, %v8255_v18  ;;  %v9520_v12 = vadd.f32 %v9392_v30, %v9238_v37  ;;  %v20358_v2 = vld [vmem:[#allocation220_spill] sm:$0xff] }
 0x302   : > { %v2178_v51 = vadd.f32 %v20286_v21, %v20356_v6  ;;  %v8790_v29 = vsel %vm12500_vm9, %v8788_v25, %v19241_v53  ;;  %v9240_v59 = vadd.f32 %v8787_v47, %v8256_v60  ;;  %v5027_v40 = vmul.f32 %v20309_v38, %v20221_v55 }
 0x303   : > { %v5028_v27 = vmul.f32 %v20289_v58, %v20357_v10  ;;  %v9241_v19 = vadd.f32 %v8790_v29, %v8257_v16  ;;  %v9521_v63 = vadd.f32 %v9393_v62, %v9239_v3  ;;  %v9675_v18 = vadd.f32 %v14371_v15, %v9520_v12  ;;  %v20360_v12 = vld [vmem:[#allocation225_spill] sm:$0xff] }
 0x304   : > { %v2285_v13 = vmax.f32 %v2178_v51, 0.0  ;;  %v9522_v14 = vadd.f32 %v9394_v33, %v9240_v59  ;;  %v5029_v21 = vmul.f32 %v20291_v56, %v20358_v2  ;;  %v5335_v37 = vmul.f32 %v20314_v28, %v20357_v10  ;;  %v20361_v28 = vld [vmem:[#allocation2_spill] sm:$0xff] }
 0x305   : > { %v5336_v60 = vmul.f32 %v20293_v20, %v20358_v2  ;;  %v9523_v30 = vadd.f32 %v9395_v52, %v9241_v19  ;;  %v9676_v55 = vadd.f32 %v20144_v61, %v9521_v63  ;;  %v9803_v32 = vmax.f32 %v9675_v18, 0.0 }
 0x306   : > { %v2326_v25 = vmin.f32 %v2285_v13, 6.0  ;;  %v9677_v16 = vadd.f32 %v20145_v49, %v9522_v14  ;;  %v20359_v62 = vrot.slane %v15756_v48, 7  ;;  %v5696_v33 = vrot.slane %v5335_v37, 7 }
 0x307   : > { %v5699_v3 = vrot.slane %v5336_v60, 7  ;;  %v9678_v6 = vadd.f32 %v20360_v12, %v9523_v30  ;;  %v9804_v51 = vmax.f32 %v9676_v55, 0.0  ;;  %v9931_v29 = vmin.f32 %v9803_v32, 6.0  ;;  %v20362_v60 = vld [vmem:[#allocation14_spill] sm:$0xff] }
 0x308   : > { %v5695_v47 = vrot.slane %v20359_v62, 2  ;;  %v2792_v59 = vcombine.high %v2326_v25, %v2326_v25  ;;  %v9805_v53 = vmax.f32 %v9677_v16, 0.0  ;;  %v2799_v31 = vrot.slane %v2326_v25, %v20361_v28 }
 0x309   : > { %v5698_v19 = vrot.slane %v5696_v33, 2  ;;  %v9806_v63 = vmax.f32 %v9678_v6, 0.0  ;;  %v9932_v18 = vmin.f32 %v9804_v51, 6.0  ;;  %v5701_v48 = vrot.slane %v5699_v3, 2 }
 0x30a   : > { %v5697_v52 = vsel %vm12500_vm9, %v5695_v47, %v5696_v33  ;;  %v2806_v13 = vrot.slane %v2792_v59, %v20361_v28  ;;  %v9933_v14 = vmin.f32 %v9805_v53, 6.0  ;;  %v2807_v37 = vcombine.high %v2799_v31, %v2799_v31  ;;  %v20365_v47 = vld [vmem:[#allocation73_spill] sm:$0xff]  ;;  %v20370_v59 = vld [vmem:[#allocation144_spill] sm:$0xff] }
 0x30b   : > { %v20363_v30 = vrot.slane %v20321_v50, %v20362_v60  ;;  %v5700_v32 = vsel %vm12500_vm9, %v5698_v19, %v5699_v3  ;;  %v9934_v25 = vmin.f32 %v9806_v63, 6.0  ;;  %v10300_v16 = vcombine.low %v9931_v29, %v9932_v18  ;;  %v20372_v63 = vld [vmem:[#allocation74_spill] sm:$0xff] }
 0x30c   : > { %v2808_v62 = vcombine.high %v2806_v13, %v2806_v13  ;;  %v20366_v33 = vrot.slane %v20365_v47, %v20252_v11  ;;  %v20368_v53 = vrot.slane %v20321_v50, %v20248_v45  ;;  %v20371_v9 = vrot.slane %v20370_v59, 7  ;;  %v20375_v47 = vld [vmem:[#allocation23_spill] sm:$0xff] }
 0x30d   : > { %v15972_v55 = vmul.f32 %v20363_v30, %v2799_v31  ;;  %v6146_v30 = vadd.f32 %v5697_v52, %v5027_v40  ;;  %v6147_v3 = vadd.f32 %v5700_v32, %v5028_v27  ;;  %v10301_v19 = vcombine.low %v9933_v14, %v9934_v25 }
 0x30e   : > { %v15979_v6 = vmul.f32 %v20366_v33, %v2806_v13  ;;  %v15984_v51 = vmul.f32 %v20368_v53, %v2807_v37  ;;  %v5703_v31 = vsel %vm12500_vm9, %v5701_v48, %v20371_v9  ;;  %v10308_v29 = vrot.slane %v10300_v16, %v20361_v28  ;;  %v20376_v37 = vld [vmem:[#allocation26_spill] sm:$0xff]  ;;  %v20377_v53 = vld [vmem:[#allocation31_spill] sm:$0xff]  ;;  %v20383_v16 = vld [vmem:[#allocation24_spill] sm:$0xff] }
 0x30f   : > { %20364 = vst [vmem:[#allocation22_spill] sm:$0xff] %v15972_v55  ;;  %v20373_v18 = vrot.slane %v20372_v63, %v20252_v11  ;;  %v10315_v27 = vrot.slane %v10301_v19, %v20361_v28  ;;  %v20381_v48 = vld [vmem:[#allocation10_spill] sm:$0xff]  ;;  %v20391_v55 = vld [vmem:[#allocation103_spill] sm:$0xff] }
 0x310   : > { %20367 = vst [vmem:[#allocation67_spill] sm:$0xff] %v15979_v6  ;;  %20369 = vst [vmem:[#allocation12_spill] sm:$0xff] %v15984_v51  ;;  %v5392_v50 = vmul.f32 %v20375_v47, %v15979_v6  ;;  %v5078_v33 = vmul.f32 %v20376_v37, %v15984_v51  ;;  %v16002_v59 = vmul.f32 %v20377_v53, %v15984_v51 }
 0x311   : > { %v15994_v13 = vmul.f32 %v20373_v18, %v2808_v62  ;;  %v6351_v9 = vmul.f32 %v20312_v17, %v15979_v6  ;;  %v16008_v40 = vmul.f32 %v20315_v43, %v15979_v6  ;;  %v20385_v18 = vld [vmem:[#allocation21_spill] sm:$0xff]  ;;  %v10316_v51 = vcombine.low %v10308_v29, %v10315_v27 }
 0x312   : > { %20378 = vst [vmem:[#allocation196_spill] sm:$0xff] %v16002_v59  ;;  %v5855_v32 = vrot.slane %v5392_v50, 7  ;;  %v19253_v25 = vrot.slane %v16002_v59, 7  ;;  %v20390_v27 = vld [vmem:[#allocation33_spill] sm:$0xff] }
 0x313   : > { %20374 = vst [vmem:[#allocation99_spill] sm:$0xff] %v15994_v13  ;;  %20379 = vst [vmem:[#allocation19_spill] sm:$0xff] %v16008_v40  ;;  %v16013_v52 = vmul.f32 %v20309_v38, %v15994_v13  ;;  %v16017_v14 = vmul.f32 %v20381_v48, %v15994_v13  ;;  %v16022_v62 = vmul.f32 %v20383_v16, %v15994_v13  ;;  %v20387_v48 = vld [vmem:[#allocation18_spill] sm:$0xff]  ;;  %v20388_v38 = vld [vmem:[#allocation221_spill] sm:$0xff]  ;;  %11639 = vmatprep.mubr.msk.f32.mxu1 %vm10708_vm10, %v10316_v51 }
 0x314   : > { %v16026_v6 = vmul.f32 %v20385_v18, %v15994_v13  ;;  %v6300_v43 = vmul.f32 %v20387_v48, %v20357_v10  ;;  %v5854_v50 = vrot.slane %v19253_v25, 2  ;;  %v6302_v13 = vmul.f32 %v20115_v26, %v20388_v38  ;;  %v20392_v18 = vld [vmem:[#allocation231_spill] sm:$0xff] }
 0x315   : > { %20380 = vst [vmem:[#allocation227_spill] sm:$0xff] %v16013_v52  ;;  %20382 = vst [vmem:[#allocation193_spill] sm:$0xff] %v16017_v14  ;;  %v6148_v52 = vadd.f32 %v5703_v31, %v5029_v21  ;;  %v6582_v21 = vmul.f32 %v20383_v16, %v20238_v41  ;;  %v20389_v31 = vld [vmem:[#allocation82_spill] sm:$0xff]  ;;  %v6584_v25 = vmul.f32 %v20005_v4, %v20390_v27  ;;  %v20393_v16 = vld [vmem:[#allocation49_spill] sm:$0xff] }
 0x316   : > { %20384 = vst [vmem:[#allocation63_spill] sm:$0xff] %v16022_v62  ;;  %20386 = vst [vmem:[#allocation69_spill] sm:$0xff] %v16026_v6  ;;  %v6301_v62 = vmul.f32 %v20114_v1, %v20358_v2  ;;  %v6428_v29 = vadd.f32 %v6300_v43, %v6146_v30  ;;  %v6583_v10 = vmul.f32 %v20004_v42, %v20389_v31 }
 0x317   : > { %v5856_v47 = vsel %vm12500_vm9, %v5854_v50, %v5855_v32  ;;  %v6430_v2 = vadd.f32 %v6302_v13, %v6148_v52  ;;  %v6585_v38 = vmul.f32 %v19867_v7, %v20391_v55  ;;  %v6883_v43 = vmul.f32 %v20010_v24, %v20389_v31  ;;  %v20395_v13 = vld [vmem:[#allocation191_spill] sm:$0xff] }
 0x318   : > { %v6429_v19 = vadd.f32 %v6301_v62, %v6147_v3  ;;  %v6197_v59 = vadd.f32 %v5856_v47, %v5078_v33  ;;  %v6710_v51 = vadd.f32 %v6582_v21, %v6428_v29  ;;  %v6884_v30 = vmul.f32 %v20012_v46, %v20390_v27  ;;  %v20397_v29 = vld [vmem:[#allocation37_spill] sm:$0xff]  ;;  %v20398_v46 = vld [vmem:[#allocation52_spill] sm:$0xff]  ;;  %v20413_v7 = vld [vmem:[#allocation59_spill] sm:$0xff] }
 0x319   : > { %v6712_v40 = vadd.f32 %v6584_v25, %v6430_v2  ;;  %v6713_v14 = vadd.f32 %v6585_v38, %v20392_v18  ;;  %v6885_v32 = vmul.f32 %v20393_v16, %v20391_v55  ;;  %v20396_v52 = vrot.slane %v20395_v13, 7  ;;  %v20399_v25 = vld [vmem:[#allocation41_spill] sm:$0xff]  ;;  %v20408_v16 = vld [vmem:[#allocation206_spill] sm:$0xff] }
 0x31a   : > { %v6711_v6 = vadd.f32 %v6583_v10, %v6429_v19  ;;  %v16057_v3 = vadd.f32 %v6351_v9, %v6197_v59  ;;  %v7244_v47 = vrot.slane %v6883_v43, 7  ;;  %v7247_v33 = vrot.slane %v6884_v30, 7  ;;  %v16067_v10 = vpop.f32.mrf.mxu0  ;;  %v20401_v38 = vld [vmem:[#allocation109_spill] sm:$0xff] }
 0x31b   : > { %v7243_v62 = vrot.slane %v20396_v52, 2  ;;  %v7250_v50 = vrot.slane %v6885_v32, 7  ;;  %v7848_v21 = vmul.f32 %v20397_v29, %v20389_v31  ;;  %v7849_v19 = vmul.f32 %v20398_v46, %v20390_v27  ;;  %20400 = vst [vmem:[#allocation28_spill] sm:$0xff] %v16067_v10  ;;  %v20402_v43 = vld [vmem:[#allocation53_spill] sm:$0xff]  ;;  %v20403_v52 = vld [vmem:[#allocation55_spill] sm:$0xff]  ;;  %v20405_v27 = vld [vmem:[#allocation190_spill] sm:$0xff] }
 0x31c   : > { %20394 = vst [vmem:[#allocation151_spill] sm:$0xff] %v16057_v3  ;;  %v7850_v18 = vmul.f32 %v20399_v25, %v20391_v55  ;;  %v7246_v9 = vrot.slane %v7244_v47, 2  ;;  %v7249_v2 = vrot.slane %v7247_v33, 2  ;;  %v7851_v30 = vmul.f32 %v20402_v43, %v20401_v38  ;;  %v20404_v31 = vld [vmem:[#allocation237_spill] sm:$0xff]  ;;  %v11586_v29 = vpop.f32.mrf.mxu0  ;;  %v20407_v55 = vld [vmem:[#allocation56_spill] sm:$0xff] }
 0x31d   : > { %v7245_v59 = vsel %vm12500_vm9, %v7243_v62, %v7244_v47  ;;  %v7252_v32 = vrot.slane %v7250_v50, 2  ;;  %v8130_v3 = vmul.f32 %v20403_v52, %v20354_v35  ;;  %v8131_v46 = vmul.f32 %v20405_v27, %v20404_v31  ;;  %v20406_v47 = vld [vmem:[#allocation112_spill] sm:$0xff] }
 0x31e   : > { %v7694_v13 = vadd.f32 %v7245_v59, %v6710_v51  ;;  %v7248_v10 = vsel %vm12500_vm9, %v7246_v9, %v7247_v33  ;;  %v7251_v62 = vsel %vm12500_vm9, %v7249_v2, %v7250_v50  ;;  %v8132_v25 = vmul.f32 %v20407_v55, %v20406_v47  ;;  %v20409_v51 = vld [vmem:[#allocation234_spill] sm:$0xff] }
 0x31f   : > { %v8133_v38 = vmul.f32 %v20350_v34, %v20408_v16  ;;  %v20410_v59 = vrot.slane %v20409_v51, 7  ;;  %v7695_v43 = vadd.f32 %v7248_v10, %v6711_v6  ;;  %v7696_v27 = vadd.f32 %v7251_v62, %v6712_v40  ;;  %v20411_v50 = vld [vmem:[#allocation58_spill] sm:$0xff] }
 0x320   : > { %v7976_v29 = vadd.f32 %v7848_v21, %v7694_v13  ;;  %v8431_v33 = vmul.f32 %v20352_v0, %v20404_v31  ;;  %v8432_v9 = vmul.f32 %v20411_v50, %v20406_v47  ;;  %v8433_v2 = vmul.f32 %v20070_v57, %v20408_v16  ;;  %v20412_v51 = vld [vmem:[#allocation130_spill] sm:$0xff] }
 0x321   : > { %v7254_v52 = vsel %vm12500_vm9, %v7252_v32, %v20410_v59  ;;  %v7977_v55 = vadd.f32 %v7849_v19, %v7695_v43  ;;  %v7978_v34 = vadd.f32 %v7850_v18, %v7696_v27  ;;  %v8434_v4 = vmul.f32 %v20413_v7, %v20412_v51 }
 0x322   : > { %v7697_v35 = vadd.f32 %v7254_v52, %v6713_v14  ;;  %v8258_v24 = vadd.f32 %v8130_v3, %v7976_v29  ;;  %v20414_v6 = vrot.slane %v15926_v39, 7  ;;  %v8792_v14 = vrot.slane %v8431_v33, 7  ;;  %v20415_v29 = vld [vmem:[#allocation166_spill] sm:$0xff] }
 0x323   : > { %v8795_v21 = vrot.slane %v8432_v9, 7  ;;  %v8259_v10 = vadd.f32 %v8131_v46, %v7977_v55  ;;  %v8260_v13 = vadd.f32 %v8132_v25, %v7978_v34  ;;  %v8798_v52 = vrot.slane %v8433_v2, 7  ;;  %v20416_v9 = vld [vmem:[#allocation81_spill] sm:$0xff] }
 0x324   : > { %v7979_v32 = vadd.f32 %v7851_v30, %v7697_v35  ;;  %v8791_v40 = vrot.slane %v20414_v6, 2  ;;  %v8801_v62 = vrot.slane %v8434_v4, 7  ;;  %v8794_v19 = vrot.slane %v8792_v14, 2 }
 0x325   : > { %v8797_v27 = vrot.slane %v8795_v21, 2  ;;  %v8800_v3 = vrot.slane %v8798_v52, 2  ;;  %v9396_v35 = vmul.f32 %v19826_v5, %v20404_v31  ;;  %v9397_v39 = vmul.f32 %v20282_v36, %v20406_v47 }
 0x326   : > { %v8261_v59 = vadd.f32 %v8133_v38, %v7979_v32  ;;  %v8793_v57 = vsel %vm12500_vm9, %v8791_v40, %v8792_v14  ;;  %v8796_v46 = vsel %vm12500_vm9, %v8794_v19, %v8795_v21  ;;  %v9398_v34 = vmul.f32 %v20283_v22, %v20408_v16  ;;  %v16118_v38 = vld [vmem:[%s18719_s3] ss:$0 sm:$0xff]  ;;  %v20417_v32 = vld [vmem:[#allocation101_spill] sm:$0xff] }
 0x327   : > { %v9242_v18 = vadd.f32 %v8793_v57, %v8258_v24  ;;  %v8799_v4 = vsel %vm12500_vm9, %v8797_v27, %v8798_v52  ;;  %v9399_v55 = vmul.f32 %v20284_v44, %v20412_v51  ;;  %v8802_v24 = vsel %vm12500_vm9, %v8800_v3, %v8801_v62  ;;  %v20448_v51 = vld [vmem:[#allocation131_spill] sm:$0xff] }
 0x328   : > { %v9243_v57 = vadd.f32 %v8796_v46, %v8259_v10  ;;  %v9244_v25 = vadd.f32 %v8799_v4, %v8260_v13  ;;  %v9245_v30 = vadd.f32 %v8802_v24, %v8261_v59  ;;  %v2183_v33 = vadd.f32 %v16118_v38, %v20415_v29  ;;  %v20418_v10 = vld [vmem:[#allocation233_spill] sm:$0xff] }
 0x329   : > { %v9524_v43 = vadd.f32 %v9396_v35, %v9242_v18  ;;  %v5032_v2 = vmul.f32 %v20289_v58, %v20416_v9  ;;  %v5033_v6 = vmul.f32 %v20291_v56, %v20417_v32  ;;  %v5034_v13 = vmul.f32 %v20376_v37, %v20418_v10  ;;  %v20419_v35 = vld [vmem:[#allocation34_spill] sm:$0xff] }
 0x32a   : > { %v9525_v40 = vadd.f32 %v9397_v39, %v9243_v57  ;;  %v9526_v14 = vadd.f32 %v9398_v34, %v9244_v25  ;;  %v9527_v52 = vadd.f32 %v9399_v55, %v9245_v30  ;;  %v2286_v62 = vmax.f32 %v2183_v33, 0.0 }
 0x32b   : > { %v9679_v21 = vadd.f32 %v14371_v15, %v9524_v43  ;;  %v5341_v59 = vmul.f32 %v20293_v20, %v20417_v32  ;;  %v5342_v19 = vmul.f32 %v20377_v53, %v20418_v10  ;;  %v16137_v39 = vmul.f32 %v20419_v35, %v20238_v41 }
 0x32c   : > { %v9680_v27 = vadd.f32 %v20144_v61, %v9525_v40  ;;  %v9681_v3 = vadd.f32 %v20145_v49, %v9526_v14  ;;  %v9682_v46 = vadd.f32 %v20360_v12, %v9527_v52  ;;  %v2327_v4 = vmin.f32 %v2286_v62, 6.0  ;;  %v20420_v40 = vld [vmem:[#allocation228_spill] sm:$0xff] }
 0x32d   : > { %v9807_v18 = vmax.f32 %v9679_v21, 0.0  ;;  %v5712_v34 = vrot.slane %v5341_v59, 7  ;;  %v5715_v55 = vrot.slane %v5342_v19, 7  ;;  %v19270_v43 = vrot.slane %v16137_v39, 7 }
 0x32e   : > { %v9808_v24 = vmax.f32 %v9680_v27, 0.0  ;;  %v9809_v57 = vmax.f32 %v9681_v3, 0.0  ;;  %v9810_v30 = vmax.f32 %v9682_v46, 0.0  ;;  %v2809_v29 = vcombine.high %v2327_v4, %v2327_v4  ;;  %v20421_v27 = vld [vmem:[#allocation13_spill] sm:$0xff] }
 0x32f   : > { %v9935_v25 = vmin.f32 %v9807_v18, 6.0  ;;  %v2816_v33 = vrot.slane %v2327_v4, %v20361_v28  ;;  %v5713_v14 = vsel %vm12500_vm9, %v20420_v40, %v5712_v34  ;;  %v5714_v53 = vrot.slane %v5712_v34, 2 }
 0x330   : > { %v9936_v21 = vmin.f32 %v9808_v24, 6.0  ;;  %v9937_v35 = vmin.f32 %v9809_v57, 6.0  ;;  %v5717_v52 = vrot.slane %v5715_v55, 2  ;;  %v9938_v62 = vmin.f32 %v9810_v30, 6.0 }
 0x331   : > { %v2823_v59 = vrot.slane %v2809_v29, %v20361_v28  ;;  %v2824_v19 = vcombine.high %v2816_v33, %v2816_v33  ;;  %v20422_v3 = vrot.slane %v20372_v63, %v20421_v27  ;;  %v5716_v4 = vsel %vm12500_vm9, %v5714_v53, %v5715_v55 }
 0x332   : > { %v10317_v46 = vcombine.low %v9935_v25, %v9936_v21  ;;  %v5719_v24 = vsel %vm12500_vm9, %v5717_v52, %v19270_v43  ;;  %v6151_v34 = vadd.f32 %v5713_v14, %v5032_v2  ;;  %v10318_v57 = vcombine.low %v9937_v35, %v9938_v62  ;;  %v20428_v35 = vld [vmem:[#allocation75_spill] sm:$0xff] }
 0x333   : > { %v16149_v18 = vmul.f32 %v20422_v3, %v2816_v33  ;;  %v2825_v30 = vcombine.high %v2823_v59, %v2823_v59  ;;  %v20424_v29 = vrot.slane %v20372_v63, %v20362_v60  ;;  %v20426_v33 = vrot.slane %v20372_v63, %v20248_v45  ;;  %v20432_v3 = vld [vmem:[#allocation35_spill] sm:$0xff] }
 0x334   : > { %v10325_v53 = vrot.slane %v10317_v46, %v20361_v28  ;;  %v6152_v55 = vadd.f32 %v5716_v4, %v5033_v6  ;;  %v6153_v21 = vadd.f32 %v5719_v24, %v5034_v13  ;;  %v6304_v52 = vmul.f32 %v20387_v48, %v20416_v9  ;;  %v20431_v13 = vld [vmem:[#allocation229_spill] sm:$0xff]  ;;  %v20436_v43 = vld [vmem:[#allocation39_spill] sm:$0xff] }
 0x335   : > { %20423 = vst [vmem:[#allocation85_spill] sm:$0xff] %v16149_v18  ;;  %v16160_v40 = vmul.f32 %v20424_v29, %v2824_v19  ;;  %v16165_v25 = vmul.f32 %v20426_v33, %v2823_v59  ;;  %v10332_v2 = vrot.slane %v10318_v57, %v20361_v28  ;;  %v20429_v14 = vrot.slane %v20428_v35, %v20252_v11  ;;  %v20434_v29 = vld [vmem:[#allocation44_spill] sm:$0xff]  ;;  %v20449_v18 = vld [vmem:[#allocation55_spill] sm:$0xff] }
 0x336   : > { %v6305_v19 = vmul.f32 %v20114_v1, %v20417_v32  ;;  %v6306_v63 = vmul.f32 %v20115_v26, %v20418_v10  ;;  %v6307_v6 = vmul.f32 %v20312_v17, %v20238_v41  ;;  %v6432_v59 = vadd.f32 %v6304_v52, %v20431_v13  ;;  %v20437_v52 = vld [vmem:[#allocation40_spill] sm:$0xff] }
 0x337   : > { %20425 = vst [vmem:[#allocation209_spill] sm:$0xff] %v16160_v40  ;;  %20427 = vst [vmem:[#allocation25_spill] sm:$0xff] %v16165_v25  ;;  %v16174_v62 = vmul.f32 %v20429_v14, %v2825_v30  ;;  %v6587_v9 = vmul.f32 %v20004_v42, %v20344_v23  ;;  %v6588_v46 = vmul.f32 %v20432_v3, %v20347_v54  ;;  %v20433_v30 = vld [vmem:[#allocation122_spill] sm:$0xff]  ;;  %v20435_v14 = vld [vmem:[#allocation235_spill] sm:$0xff] }
 0x338   : > { %v10333_v4 = vcombine.low %v10325_v53, %v10332_v2  ;;  %v6433_v24 = vadd.f32 %v6305_v19, %v6151_v34  ;;  %v6434_v57 = vadd.f32 %v6306_v63, %v6152_v55  ;;  %v6589_v32 = vmul.f32 %v20434_v29, %v20433_v30  ;;  %v20438_v53 = vld [vmem:[#allocation49_spill] sm:$0xff]  ;;  %v20439_v55 = vld [vmem:[#allocation43_spill] sm:$0xff] }
 0x339   : > { %20430 = vst [vmem:[#allocation210_spill] sm:$0xff] %v16174_v62  ;;  %v6435_v33 = vadd.f32 %v6307_v6, %v6153_v21  ;;  %v6714_v10 = vadd.f32 %v20435_v14, %v6432_v59  ;;  %v6888_v62 = vmul.f32 %v20436_v43, %v20344_v23  ;;  %v6889_v13 = vmul.f32 %v20437_v52, %v20347_v54  ;;  %v20440_v2 = vld [vmem:[#allocation51_spill] sm:$0xff]  ;;  %v20442_v59 = vld [vmem:[#allocation37_spill] sm:$0xff]  ;;  %v20454_v52 = vld [vmem:[#allocation170_spill] sm:$0xff] }
 0x33a   : > { %11640 = vmatmul.mubr.msk.f32.gmra.mxu1 %vm10708_vm10, %v10333_v4  ;;  %v6715_v25 = vadd.f32 %v6587_v9, %v6433_v24  ;;  %v6716_v40 = vadd.f32 %v6588_v46, %v6434_v57  ;;  %v6890_v34 = vmul.f32 %v20438_v53, %v20433_v30  ;;  %v16199_v19 = vmul.f32 %v20440_v2, %v20439_v55  ;;  %v20443_v4 = vld [vmem:[#allocation52_spill] sm:$0xff]  ;;  %v20444_v46 = vld [vmem:[#allocation41_spill] sm:$0xff]  ;;  %v20450_v53 = vld [vmem:[#allocation106_spill] sm:$0xff] }
 0x33b   : > { %v6717_v21 = vadd.f32 %v6589_v32, %v6435_v33  ;;  %v7257_v63 = vrot.slane %v6888_v62, 7  ;;  %v7260_v6 = vrot.slane %v6889_v13, 7  ;;  %v7852_v14 = vmul.f32 %v20442_v59, %v20344_v23  ;;  %v20445_v57 = vld [vmem:[#allocation236_spill] sm:$0xff]  ;;  %v20447_v33 = vld [vmem:[#allocation53_spill] sm:$0xff] }
 0x33c   : > { %20441 = vst [vmem:[#allocation17_spill] sm:$0xff] %v16199_v19  ;;  %v7263_v37 = vrot.slane %v6890_v34, 7  ;;  %v7853_v9 = vmul.f32 %v20443_v4, %v20347_v54  ;;  %v7854_v24 = vmul.f32 %v20444_v46, %v20433_v30  ;;  %v20446_v7 = vrot.slane %v20445_v57, 9  ;;  %v20451_v54 = vld [vmem:[#allocation190_spill] sm:$0xff]  ;;  %v20455_v43 = vld [vmem:[#allocation205_spill] sm:$0xff] }
 0x33d   : > { %v7259_v32 = vrot.slane %v7257_v63, 2  ;;  %v7262_v62 = vrot.slane %v7260_v6, 2  ;;  %v7855_v13 = vmul.f32 %v20447_v33, %v20439_v55  ;;  %v8134_v59 = vmul.f32 %v20449_v18, %v20448_v51 }
 0x33e   : > { %v7258_v2 = vsel %vm12500_vm9, %v20446_v7, %v7257_v63  ;;  %v7265_v23 = vrot.slane %v7263_v37, 2  ;;  %v8135_v4 = vmul.f32 %v20451_v54, %v20450_v53  ;;  %v20452_v7 = vld [vmem:[#allocation100_spill] sm:$0xff]  ;;  %v8137_v33 = vmul.f32 %v20455_v43, %v20454_v52 }
 0x33f   : > { %v7698_v34 = vadd.f32 %v7258_v2, %v6714_v10  ;;  %v7261_v30 = vsel %vm12500_vm9, %v7259_v32, %v7260_v6  ;;  %v7264_v57 = vsel %vm12500_vm9, %v7262_v62, %v7263_v37  ;;  %v20453_v63 = vld [vmem:[#allocation56_spill] sm:$0xff]  ;;  %v20456_v10 = vrot.slane %v16199_v19, 7  ;;  %v20457_v6 = vld [vmem:[#allocation45_spill] sm:$0xff]  ;;  %v20458_v19 = vld [vmem:[#allocation62_spill] sm:$0xff] }
 0x340   : > { %v8136_v46 = vmul.f32 %v20453_v63, %v20452_v7  ;;  %v7699_v18 = vadd.f32 %v7261_v30, %v6715_v25  ;;  %v7700_v29 = vadd.f32 %v7264_v57, %v6716_v40  ;;  %v8435_v32 = vmul.f32 %v20457_v6, %v20448_v51  ;;  %v20459_v25 = vld [vmem:[#allocation107_spill] sm:$0xff]  ;;  %v20460_v40 = vld [vmem:[#allocation222_spill] sm:$0xff] }
 0x341   : > { %v7267_v2 = vsel %vm12500_vm9, %v7265_v23, %v20456_v10  ;;  %v7980_v54 = vadd.f32 %v7852_v14, %v7698_v34  ;;  %v8436_v37 = vmul.f32 %v20352_v0, %v20450_v53  ;;  %v8437_v62 = vmul.f32 %v20411_v50, %v20452_v7 }
 0x342   : > { %v7701_v16 = vadd.f32 %v7267_v2, %v6717_v21  ;;  %v7981_v63 = vadd.f32 %v7853_v9, %v7699_v18  ;;  %v7982_v43 = vadd.f32 %v7854_v24, %v7700_v29  ;;  %v8438_v3 = vmul.f32 %v20458_v19, %v20454_v52 }
 0x343   : > { %v8262_v17 = vadd.f32 %v8134_v59, %v7980_v54  ;;  %v16240_v30 = vmul.f32 %v20460_v40, %v20459_v25  ;;  %v11374_v21 = vrot.slane %v8435_v32, 9  ;;  %v8805_v14 = vrot.slane %v8436_v37, 7 }
 0x344   : > { %v7983_v23 = vadd.f32 %v7855_v13, %v7701_v16  ;;  %v8263_v51 = vadd.f32 %v8135_v4, %v7981_v63  ;;  %v8264_v34 = vadd.f32 %v8136_v46, %v7982_v43  ;;  %v8808_v57 = vrot.slane %v8437_v62, 7  ;;  %v20461_v62 = vld [vmem:[#allocation230_spill] sm:$0xff] }
 0x345   : > { %v8811_v10 = vrot.slane %v8438_v3, 7  ;;  %v8806_v18 = vsel %vm12500_vm9, %v11374_v21, %v8805_v14  ;;  %v8807_v29 = vrot.slane %v8805_v14, 2  ;;  %v19283_v54 = vrot.slane %v16240_v30, 7  ;;  %v20462_v21 = vld [vmem:[#allocation16_spill] sm:$0xff] }
 0x346   : > { %v8265_v2 = vadd.f32 %v8137_v33, %v7983_v23  ;;  %v8810_v59 = vrot.slane %v8808_v57, 2  ;;  %v9246_v16 = vadd.f32 %v8806_v18, %v8262_v17  ;;  %v9400_v24 = vmul.f32 %v19826_v5, %v20450_v53 }
 0x347   : > { %v8813_v9 = vrot.slane %v8811_v10, 2  ;;  %v8809_v13 = vsel %vm12500_vm9, %v8807_v29, %v8808_v57  ;;  %v9401_v43 = vmul.f32 %v20282_v36, %v20452_v7  ;;  %v9402_v3 = vmul.f32 %v20283_v22, %v20454_v52  ;;  %v20463_v29 = vld [vmem:[#allocation82_spill] sm:$0xff] }
 0x348   : > { %v9403_v4 = vmul.f32 %v20284_v44, %v20459_v25  ;;  %v8812_v46 = vsel %vm12500_vm9, %v8810_v59, %v8811_v10  ;;  %v9247_v33 = vadd.f32 %v8809_v13, %v8263_v51  ;;  %v9528_v63 = vadd.f32 %v9400_v24, %v9246_v16  ;;  %v20464_v59 = vld [vmem:[#allocation33_spill] sm:$0xff] }
 0x349   : > { %v8815_v17 = vsel %vm12500_vm9, %v8813_v9, %v19283_v54  ;;  %v9248_v32 = vadd.f32 %v8812_v46, %v8264_v34  ;;  %v2188_v23 = vadd.f32 %v16118_v38, %v20461_v62  ;;  %v5035_v14 = vmul.f32 %v20462_v21, %v20238_v41  ;;  %v20465_v34 = vld [vmem:[#allocation27_spill] sm:$0xff] }
 0x34a   : > { %v9249_v37 = vadd.f32 %v8815_v17, %v8265_v2  ;;  %v9529_v57 = vadd.f32 %v9401_v43, %v9247_v33  ;;  %v9683_v18 = vadd.f32 %v14371_v15, %v9528_v63  ;;  %v5036_v10 = vmul.f32 %v20289_v58, %v20463_v29 }
 0x34b   : > { %v5037_v40 = vmul.f32 %v20291_v56, %v20464_v59  ;;  %v9530_v9 = vadd.f32 %v9402_v3, %v9248_v32  ;;  %v2287_v16 = vmax.f32 %v2188_v23, 0.0  ;;  %v5344_v2 = vmul.f32 %v20465_v34, %v20463_v29 }
 0x34c   : > { %v9531_v51 = vadd.f32 %v9403_v4, %v9249_v37  ;;  %v9684_v24 = vadd.f32 %v20144_v61, %v9529_v57  ;;  %v9811_v13 = vmax.f32 %v9683_v18, 0.0  ;;  %v5345_v41 = vmul.f32 %v20293_v20, %v20464_v59 }
 0x34d   : > { %v20466_v43 = vrot.slane %v16137_v39, 7  ;;  %v9685_v17 = vadd.f32 %v20145_v49, %v9530_v9  ;;  %v2328_v63 = vmin.f32 %v2287_v16, 6.0  ;;  %v5721_v3 = vrot.slane %v5344_v2, 7 }
 0x34e   : > { %v9686_v33 = vadd.f32 %v20360_v12, %v9531_v51  ;;  %v9812_v4 = vmax.f32 %v9684_v24, 0.0  ;;  %v9939_v32 = vmin.f32 %v9811_v13, 6.0  ;;  %v5724_v37 = vrot.slane %v5345_v41, 7 }
 0x34f   : > { %v5720_v46 = vrot.slane %v20466_v43, 2  ;;  %v6308_v62 = vmul.f32 %v20387_v48, %v20463_v29  ;;  %v9813_v23 = vmax.f32 %v9685_v17, 0.0  ;;  %v2826_v18 = vcombine.high %v2328_v63, %v2328_v63 }
 0x350   : > { %v9814_v57 = vmax.f32 %v9686_v33, 0.0  ;;  %v2833_v54 = vrot.slane %v2328_v63, %v20361_v28  ;;  %v9940_v52 = vmin.f32 %v9812_v4, 6.0  ;;  %v5723_v9 = vrot.slane %v5721_v3, 2  ;;  %v20469_v33 = vld [vmem:[#allocation38_spill] sm:$0xff] }
 0x351   : > { %v5722_v39 = vsel %vm12500_vm9, %v5720_v46, %v5721_v3  ;;  %v5726_v43 = vrot.slane %v5724_v37, 2  ;;  %v9941_v51 = vmin.f32 %v9813_v23, 6.0  ;;  %v2840_v2 = vrot.slane %v2826_v18, %v20361_v28 }
 0x352   : > { %v9942_v16 = vmin.f32 %v9814_v57, 6.0  ;;  %v2841_v24 = vcombine.high %v2833_v54, %v2833_v54  ;;  %v10334_v13 = vcombine.low %v9939_v32, %v9940_v52  ;;  %v20467_v29 = vrot.slane %v20428_v35, %v20421_v27 }
 0x353   : > { %v5725_v17 = vsel %vm12500_vm9, %v5723_v9, %v5724_v37  ;;  %v20470_v63 = vrot.slane %v20469_v33, 7  ;;  %v2842_v4 = vcombine.high %v2840_v2, %v2840_v2  ;;  %v20471_v23 = vrot.slane %v20428_v35, %v20362_v60  ;;  %v20478_v33 = vld [vmem:[#allocation103_spill] sm:$0xff] }
 0x354   : > { %v16288_v41 = vmul.f32 %v20467_v29, %v2833_v54  ;;  %v10335_v3 = vcombine.low %v9941_v51, %v9942_v16  ;;  %v20473_v52 = vrot.slane %v20428_v35, %v20248_v45  ;;  %v10342_v32 = vrot.slane %v10334_v13, %v20361_v28 }
 0x355   : > { %v5728_v46 = vsel %vm12500_vm9, %v5726_v43, %v20470_v63  ;;  %v16299_v57 = vmul.f32 %v20471_v23, %v2841_v24  ;;  %v6154_v37 = vadd.f32 %v5722_v39, %v5035_v14  ;;  %v6155_v18 = vadd.f32 %v5725_v17, %v5036_v10  ;;  %v20475_v43 = vld [vmem:[#allocation83_spill] sm:$0xff]  ;;  %v20479_v63 = vld [vmem:[#allocation24_spill] sm:$0xff] }
 0x356   : > { %20468 = vst [vmem:[#allocation212_spill] sm:$0xff] %v16288_v41  ;;  %v16304_v54 = vmul.f32 %v20473_v52, %v2840_v2  ;;  %v6156_v9 = vadd.f32 %v5728_v46, %v5037_v40  ;;  %v10349_v29 = vrot.slane %v10335_v3, %v20361_v28  ;;  %v20476_v51 = vrot.slane %v20475_v43, %v20252_v11  ;;  %v20480_v14 = vld [vmem:[#allocation35_spill] sm:$0xff]  ;;  %v20488_v43 = vld [vmem:[#allocation44_spill] sm:$0xff] }
 0x357   : > { %20472 = vst [vmem:[#allocation30_spill] sm:$0xff] %v16299_v57  ;;  %v6309_v24 = vmul.f32 %v20114_v1, %v20464_v59  ;;  %v6310_v35 = vmul.f32 %v20115_v26, %v20478_v33  ;;  %v6436_v2 = vadd.f32 %v6308_v62, %v6154_v37  ;;  %v6590_v13 = vmul.f32 %v20479_v63, %v20439_v55  ;;  %v20481_v17 = vld [vmem:[#allocation23_spill] sm:$0xff]  ;;  %v20483_v59 = vld [vmem:[#allocation32_spill] sm:$0xff]  ;;  %v20487_v37 = vld [vmem:[#allocation206_spill] sm:$0xff] }
 0x358   : > { %20474 = vst [vmem:[#allocation70_spill] sm:$0xff] %v16304_v54  ;;  %v16311_v16 = vmul.f32 %v20476_v51, %v2842_v4  ;;  %v6591_v40 = vmul.f32 %v20004_v42, %v20404_v31  ;;  %v6592_v10 = vmul.f32 %v20480_v14, %v20406_v47  ;;  %v10350_v39 = vcombine.low %v10342_v32, %v10349_v29  ;;  %v20485_v62 = vld [vmem:[#allocation47_spill] sm:$0xff]  ;;  %v20495_v29 = vld [vmem:[#allocation37_spill] sm:$0xff] }
 0x359   : > { %v6437_v23 = vadd.f32 %v6309_v24, %v6155_v18  ;;  %v6438_v52 = vadd.f32 %v6310_v35, %v6156_v9  ;;  %v6593_v51 = vmul.f32 %v20488_v43, %v20487_v37  ;;  %v6718_v33 = vadd.f32 %v6590_v13, %v6436_v2  ;;  %v20491_v18 = vld [vmem:[#allocation115_spill] sm:$0xff]  ;;  %v20492_v24 = vld [vmem:[#allocation49_spill] sm:$0xff] }
 0x35a   : > { %20477 = vst [vmem:[#allocation68_spill] sm:$0xff] %v16311_v16  ;;  %v16325_v46 = vmul.f32 %v20481_v17, %v16311_v16  ;;  %v16329_v3 = vmul.f32 %v20483_v59, %v16311_v16  ;;  %v16333_v4 = vmul.f32 %v20485_v62, %v16311_v16  ;;  %11642 = vmatprep.mubr.msk.f32.mxu1 %vm10708_vm10, %v10350_v39  ;;  %v20489_v17 = vld [vmem:[#allocation39_spill] sm:$0xff]  ;;  %v20493_v2 = vld [vmem:[#allocation17_spill] sm:$0xff] }
 0x35b   : > { %v6892_v54 = vmul.f32 %v20489_v17, %v20404_v31  ;;  %v6719_v62 = vadd.f32 %v6591_v40, %v6437_v23  ;;  %v6720_v16 = vadd.f32 %v6592_v10, %v6438_v52  ;;  %v6721_v9 = vadd.f32 %v6593_v51, %v20491_v18  ;;  %v20496_v17 = vld [vmem:[#allocation52_spill] sm:$0xff]  ;;  %v20497_v40 = vld [vmem:[#allocation41_spill] sm:$0xff]  ;;  %v20498_v23 = vld [vmem:[#allocation130_spill] sm:$0xff] }
 0x35c   : > { %20482 = vst [vmem:[#allocation72_spill] sm:$0xff] %v16325_v46  ;;  %20484 = vst [vmem:[#allocation105_spill] sm:$0xff] %v16329_v3  ;;  %v20490_v3 = vld [vmem:[#allocation40_spill] sm:$0xff]  ;;  %v6894_v35 = vmul.f32 %v20492_v24, %v20487_v37  ;;  %v20494_v13 = vrot.slane %v20493_v2, 7  ;;  %v7856_v46 = vmul.f32 %v20495_v29, %v20404_v31  ;;  %v7857_v43 = vmul.f32 %v20496_v17, %v20406_v47  ;;  %v20499_v52 = vld [vmem:[#allocation53_spill] sm:$0xff] }
 0x35d   : > { %20486 = vst [vmem:[#allocation215_spill] sm:$0xff] %v16333_v4  ;;  %v6893_v57 = vmul.f32 %v20490_v3, %v20406_v47  ;;  %v7269_v41 = vrot.slane %v6892_v54, 7  ;;  %v7858_v10 = vmul.f32 %v20497_v40, %v20487_v37  ;;  %v7859_v51 = vmul.f32 %v20499_v52, %v20498_v23  ;;  %v20502_v29 = vld [vmem:[#allocation190_spill] sm:$0xff]  ;;  %v20503_v47 = vld [vmem:[#allocation120_spill] sm:$0xff]  ;;  %v20507_v40 = vld [vmem:[#allocation145_spill] sm:$0xff] }
 0x35e   : > { %v7268_v39 = vrot.slane %v20494_v13, 2  ;;  %v7275_v4 = vrot.slane %v6894_v35, 7  ;;  %v20501_v35 = vld [vmem:[#allocation136_spill] sm:$0xff] }
 0x35f   : > { %v7272_v32 = vrot.slane %v6893_v57, 7  ;;  %v7271_v2 = vrot.slane %v7269_v41, 2  ;;  %v20500_v57 = vld [vmem:[#allocation55_spill] sm:$0xff]  ;;  %v8139_v3 = vmul.f32 %v20502_v29, %v20501_v35  ;;  %v20504_v17 = vld [vmem:[#allocation56_spill] sm:$0xff] }
 0x360   : > { %v7270_v18 = vsel %vm12500_vm9, %v7268_v39, %v7269_v41  ;;  %v8138_v54 = vmul.f32 %v20500_v57, %v20459_v25  ;;  %v7277_v24 = vrot.slane %v7275_v4, 2  ;;  %v8140_v14 = vmul.f32 %v20504_v17, %v20503_v47  ;;  %v20505_v39 = vld [vmem:[#allocation123_spill] sm:$0xff]  ;;  %v20506_v41 = vld [vmem:[#allocation205_spill] sm:$0xff] }
 0x361   : > { %v7274_v13 = vrot.slane %v7272_v32, 2  ;;  %v7702_v31 = vadd.f32 %v7270_v18, %v6718_v33  ;;  %v7273_v37 = vsel %vm12500_vm9, %v7271_v2, %v7272_v32  ;;  %v8141_v52 = vmul.f32 %v20506_v41, %v20505_v39  ;;  %v20509_v2 = vld [vmem:[#allocation137_spill] sm:$0xff] }
 0x362   : > { %v8440_v57 = vmul.f32 %v20352_v0, %v20501_v35  ;;  %v20508_v33 = vrot.slane %v20507_v40, 7  ;;  %v7703_v29 = vadd.f32 %v7273_v37, %v6719_v62  ;;  %v8441_v32 = vmul.f32 %v20411_v50, %v20503_v47 }
 0x363   : > { %v7276_v23 = vsel %vm12500_vm9, %v7274_v13, %v7275_v4  ;;  %v7984_v17 = vadd.f32 %v7856_v46, %v7702_v31  ;;  %v8442_v4 = vmul.f32 %v20458_v19, %v20505_v39  ;;  %v20510_v13 = vld [vmem:[#allocation59_spill] sm:$0xff]  ;;  %v20511_v40 = vrot.slane %v16240_v30, 7 }
 0x364   : > { %v7279_v18 = vsel %vm12500_vm9, %v7277_v24, %v20508_v33  ;;  %v7704_v25 = vadd.f32 %v7276_v23, %v6720_v16  ;;  %v8443_v41 = vmul.f32 %v20510_v13, %v20509_v2  ;;  %v7985_v42 = vadd.f32 %v7857_v43, %v7703_v29 }
 0x365   : > { %v7705_v7 = vadd.f32 %v7279_v18, %v6721_v9  ;;  %v8266_v53 = vadd.f32 %v8138_v54, %v7984_v17  ;;  %v8816_v59 = vrot.slane %v20511_v40, 2  ;;  %v8817_v37 = vrot.slane %v8440_v57, 7 }
 0x366   : > { %v7986_v0 = vadd.f32 %v7858_v10, %v7704_v25  ;;  %v8820_v16 = vrot.slane %v8441_v32, 7  ;;  %v8823_v31 = vrot.slane %v8442_v4, 7  ;;  %v8267_v46 = vadd.f32 %v8139_v3, %v7985_v42 }
 0x367   : > { %v7987_v24 = vadd.f32 %v7859_v51, %v7705_v7  ;;  %v8826_v9 = vrot.slane %v8443_v41, 7  ;;  %v9404_v23 = vmul.f32 %v19826_v5, %v20501_v35  ;;  %v8818_v18 = vsel %vm12500_vm9, %v8816_v59, %v8817_v37  ;;  %v20512_v59 = vld [vmem:[#allocation66_spill] sm:$0xff]  ;;  %v20513_v41 = vld [vmem:[#allocation85_spill] sm:$0xff] }
 0x368   : > { %v8268_v62 = vadd.f32 %v8140_v14, %v7986_v0  ;;  %v8819_v43 = vrot.slane %v8817_v37, 2  ;;  %v8822_v25 = vrot.slane %v8820_v16, 2  ;;  %v8825_v29 = vrot.slane %v8823_v31, 2 }
 0x369   : > { %v8269_v33 = vadd.f32 %v8141_v52, %v7987_v24  ;;  %v9250_v17 = vadd.f32 %v8818_v18, %v8266_v53  ;;  %v9405_v7 = vmul.f32 %v20282_v36, %v20503_v47  ;;  %v9406_v30 = vmul.f32 %v20283_v22, %v20505_v39  ;;  %v20573_v47 = vld [vmem:[#allocation222_spill] sm:$0xff] }
 0x36a   : > { %v8821_v42 = vsel %vm12500_vm9, %v8819_v43, %v8820_v16  ;;  %v8824_v0 = vsel %vm12500_vm9, %v8822_v25, %v8823_v31  ;;  %v9407_v14 = vmul.f32 %v20284_v44, %v20509_v2  ;;  %v2193_v3 = vadd.f32 %v16118_v38, %v20512_v59  ;;  %v20515_v16 = vld [vmem:[#allocation126_spill] sm:$0xff] }
 0x36b   : > { %v8827_v53 = vsel %vm12500_vm9, %v8825_v29, %v8826_v9  ;;  %v9251_v10 = vadd.f32 %v8821_v42, %v8267_v46  ;;  %v9252_v52 = vadd.f32 %v8824_v0, %v8268_v62  ;;  %v9532_v51 = vadd.f32 %v9404_v23, %v9250_v17  ;;  %v20516_v23 = vld [vmem:[#allocation42_spill] sm:$0xff] }
 0x36c   : > { %v9253_v57 = vadd.f32 %v8827_v53, %v8269_v33  ;;  %v2288_v54 = vmax.f32 %v2193_v3, 0.0  ;;  %v16405_v32 = vmul.f32 %v20465_v34, %v20513_v41  ;;  %v6352_v4 = vmul.f32 %v20387_v48, %v20513_v41  ;;  %v20517_v29 = vld [vmem:[#allocation122_spill] sm:$0xff] }
 0x36d   : > { %v9533_v40 = vadd.f32 %v9405_v7, %v9251_v10  ;;  %v9534_v24 = vadd.f32 %v9406_v30, %v9252_v52  ;;  %v9687_v37 = vadd.f32 %v14371_v15, %v9532_v51  ;;  %v5040_v31 = vmul.f32 %v20289_v58, %v20515_v16  ;;  %v20518_v17 = vld [vmem:[#allocation26_spill] sm:$0xff]  ;;  %v20521_v51 = vld [vmem:[#allocation227_spill] sm:$0xff] }
 0x36e   : > { %20514 = vst [vmem:[#allocation207_spill] sm:$0xff] %v16405_v32  ;;  %v9535_v9 = vadd.f32 %v9407_v14, %v9253_v57  ;;  %v2329_v46 = vmin.f32 %v2288_v54, 6.0  ;;  %v19302_v62 = vrot.slane %v16405_v32, 7  ;;  %v16415_v33 = vmul.f32 %v20291_v56, %v20516_v23  ;;  %v20519_v14 = vld [vmem:[#allocation193_spill] sm:$0xff] }
 0x36f   : > { %v9688_v18 = vadd.f32 %v20144_v61, %v9533_v40  ;;  %v9689_v43 = vadd.f32 %v20145_v49, %v9534_v24  ;;  %v9815_v25 = vmax.f32 %v9687_v37, 0.0  ;;  %v5042_v7 = vmul.f32 %v20518_v17, %v20517_v29  ;;  %v20522_v37 = vld [vmem:[#allocation88_spill] sm:$0xff] }
 0x370   : > { %v9690_v30 = vadd.f32 %v20360_v12, %v9535_v9  ;;  %v2843_v42 = vcombine.high %v2329_v46, %v2329_v46  ;;  %v2850_v0 = vrot.slane %v2329_v46, %v20361_v28  ;;  %v20520_v59 = vrot.slane %v20519_v14, 9 }
 0x371   : > { %v9816_v53 = vmax.f32 %v9688_v18, 0.0  ;;  %v9817_v10 = vmax.f32 %v9689_v43, 0.0  ;;  %v9943_v52 = vmin.f32 %v9815_v25, 6.0  ;;  %v20523_v9 = vrot.slane %v20522_v37, %v20252_v11 }
 0x372   : > { %v5860_v3 = vsel %vm12500_vm9, %v20520_v59, %v19302_v62  ;;  %v9818_v54 = vmax.f32 %v9690_v30, 0.0  ;;  %v2857_v40 = vrot.slane %v2843_v42, %v20361_v28  ;;  %v2858_v24 = vcombine.high %v2850_v0, %v2850_v0 }
 0x373   : > { %v6198_v57 = vadd.f32 %v5860_v3, %v20521_v51  ;;  %v16434_v46 = vmul.f32 %v20523_v9, %v2850_v0  ;;  %v9944_v32 = vmin.f32 %v9816_v53, 6.0  ;;  %v9945_v41 = vmin.f32 %v9817_v10, 6.0 }
 0x374   : > { %v5350_v59 = vmul.f32 %v20293_v20, %v20516_v23  ;;  %v9946_v18 = vmin.f32 %v9818_v54, 6.0  ;;  %v2859_v43 = vcombine.high %v2857_v40, %v2857_v40  ;;  %v20525_v25 = vrot.slane %v20522_v37, %v20421_v27 }
 0x375   : > { %20524 = vst [vmem:[#allocation29_spill] sm:$0xff] %v16434_v46  ;;  %v6480_v14 = vadd.f32 %v6352_v4, %v6198_v57  ;;  %v20527_v42 = vrot.slane %v20522_v37, %v20362_v60  ;;  %v10351_v0 = vcombine.low %v9943_v52, %v9944_v32  ;;  %v5087_v53 = vmul.f32 %v20462_v21, %v16434_v46  ;;  %v20529_v4 = vld [vmem:[#allocation10_spill] sm:$0xff] }
 0x376   : > { %v16441_v30 = vmul.f32 %v20525_v25, %v2858_v24  ;;  %v5402_v10 = vmul.f32 %v20529_v4, %v16434_v46  ;;  %v6634_v51 = vmul.f32 %v20479_v63, %v16434_v46  ;;  %v10352_v57 = vcombine.low %v9945_v41, %v9946_v18 }
 0x377   : > { %v16446_v3 = vmul.f32 %v20527_v42, %v2857_v40  ;;  %v20530_v54 = vrot.slane %v20522_v37, %v20248_v45  ;;  %v10359_v52 = vrot.slane %v10351_v0, %v20361_v28  ;;  %v20533_v42 = vld [vmem:[#allocation21_spill] sm:$0xff]  ;;  %v16473_v18 = vmul.f32 %v20457_v6, %v16434_v46  ;;  %v20537_v0 = vld [vmem:[#allocation34_spill] sm:$0xff]  ;;  %v20550_v6 = vld [vmem:[#allocation39_spill] sm:$0xff] }
 0x378   : > { %20526 = vst [vmem:[#allocation117_spill] sm:$0xff] %v16441_v30  ;;  %v5403_v40 = vmul.f32 %v20465_v34, %v16441_v30  ;;  %v6360_v32 = vmul.f32 %v20387_v48, %v16441_v30  ;;  %v11349_v9 = vrot.slane %v5402_v10, 9  ;;  %v16464_v25 = vadd.f32 %v6634_v51, %v6480_v14 }
 0x379   : > { %20528 = vst [vmem:[#allocation139_spill] sm:$0xff] %v16446_v3  ;;  %v16457_v24 = vmul.f32 %v20530_v54, %v2859_v43  ;;  %v16468_v4 = vmul.f32 %v20533_v42, %v16434_v46  ;;  %v10366_v41 = vrot.slane %v10352_v57, %v20361_v28  ;;  %20535 = vst [vmem:[#allocation2_spill] sm:$0xff] %v16473_v18  ;;  %v20536_v43 = vld [vmem:[#allocation31_spill] sm:$0xff]  ;;  %v5737_v10 = vrot.slane %v5350_v59, 7  ;;  %v20549_v46 = vld [vmem:[#allocation238_spill] sm:$0xff] }
 0x37a   : > { %20532 = vst [vmem:[#allocation220_spill] sm:$0xff] %v16464_v25  ;;  %v5884_v37 = vrot.slane %v5403_v40, 7  ;;  %v5351_v54 = vmul.f32 %v20536_v43, %v20517_v29  ;;  %v16480_v14 = vmul.f32 %v20537_v0, %v20439_v55  ;;  %v6312_v51 = vmul.f32 %v20387_v48, %v20515_v16  ;;  %v20556_v0 = vld [vmem:[#allocation37_spill] sm:$0xff] }
 0x37b   : > { %20531 = vst [vmem:[#allocation218_spill] sm:$0xff] %v16457_v24  ;;  %20534 = vst [vmem:[#allocation225_spill] sm:$0xff] %v16468_v4  ;;  %v10367_v42 = vcombine.low %v10359_v52, %v10366_v41  ;;  %v20539_v24 = vld [vmem:[#allocation119_spill] sm:$0xff]  ;;  %v5739_v4 = vrot.slane %v5737_v10, 2  ;;  %v6313_v16 = vmul.f32 %v20114_v1, %v20516_v23  ;;  %v6314_v52 = vmul.f32 %v20115_v26, %v20517_v29  ;;  %v20544_v29 = vld [vmem:[#allocation36_spill] sm:$0xff] }
 0x37c   : > { %v5885_v57 = vsel %vm12500_vm9, %v11349_v9, %v5884_v37  ;;  %v16486_v40 = vrot.slane %v5884_v37, 2  ;;  %v5740_v25 = vrot.slane %v5351_v54, 7  ;;  %v5738_v62 = vsel %vm12500_vm9, %v20539_v24, %v5737_v10  ;;  %v20541_v24 = vld [vmem:[#allocation32_spill] sm:$0xff]  ;;  %v20542_v37 = vld [vmem:[#allocation98_spill] sm:$0xff] }
 0x37d   : > { %v6206_v18 = vadd.f32 %v5885_v57, %v5087_v53  ;;  %v19310_v3 = vrot.slane %v16480_v14, 7  ;;  %11643 = vmatmul.mubr.msk.f32.gmra.mxu1 %vm10708_vm10, %v10367_v42  ;;  %v6159_v30 = vadd.f32 %v5738_v62, %v5040_v31  ;;  %v6315_v41 = vmul.f32 %v20541_v24, %v20439_v55  ;;  %v20543_v10 = vld [vmem:[#allocation106_spill] sm:$0xff]  ;;  %v20545_v42 = vld [vmem:[#allocation100_spill] sm:$0xff]  ;;  %v20546_v57 = vld [vmem:[#allocation35_spill] sm:$0xff] }
 0x37e   : > { %20538 = vst [vmem:[#allocation14_spill] sm:$0xff] %v16486_v40  ;;  %v5742_v59 = vrot.slane %v5740_v25, 2  ;;  %v5741_v53 = vsel %vm12500_vm9, %v5739_v4, %v5740_v25  ;;  %v6440_v54 = vadd.f32 %v6312_v51, %v20542_v37  ;;  %v6596_v25 = vmul.f32 %v20546_v57, %v20545_v42  ;;  %v20547_v4 = vld [vmem:[#allocation170_spill] sm:$0xff] }
 0x37f   : > { %v16497_v9 = vadd.f32 %v6360_v32, %v6206_v18  ;;  %v6160_v62 = vadd.f32 %v5741_v53, %v16415_v33  ;;  %v6441_v23 = vadd.f32 %v6313_v16, %v6159_v30  ;;  %v6595_v32 = vmul.f32 %v20544_v29, %v20543_v10  ;;  %v20551_v33 = vld [vmem:[#allocation40_spill] sm:$0xff]  ;;  %v20552_v53 = vld [vmem:[#allocation49_spill] sm:$0xff] }
 0x380   : > { %v5744_v31 = vsel %vm12500_vm9, %v5742_v59, %v19310_v3  ;;  %v6722_v51 = vadd.f32 %v20549_v46, %v6440_v54  ;;  %v6897_v59 = vmul.f32 %v20550_v6, %v20543_v10  ;;  %v6898_v30 = vmul.f32 %v20551_v33, %v20545_v42  ;;  %v20554_v3 = vld [vmem:[#allocation51_spill] sm:$0xff] }
 0x381   : > { %20540 = vst [vmem:[#allocation73_spill] sm:$0xff] %v16497_v9  ;;  %v6161_v18 = vadd.f32 %v5744_v31, %v5042_v7  ;;  %v20548_v9 = vld [vmem:[#allocation44_spill] sm:$0xff]  ;;  %v6442_v37 = vadd.f32 %v6314_v52, %v6160_v62  ;;  %v6723_v13 = vadd.f32 %v6595_v32, %v6441_v23  ;;  %v6899_v7 = vmul.f32 %v20552_v53, %v20547_v4  ;;  %v20553_v31 = vld [vmem:[#allocation107_spill] sm:$0xff] }
 0x382   : > { %v6597_v40 = vmul.f32 %v20548_v9, %v20547_v4  ;;  %v16524_v24 = vmul.f32 %v20554_v3, %v20553_v31  ;;  %v7860_v43 = vmul.f32 %v20556_v0, %v20543_v10  ;;  %v7282_v52 = vrot.slane %v6897_v59, 7  ;;  %v20557_v62 = vld [vmem:[#allocation52_spill] sm:$0xff]  ;;  %v20559_v53 = vld [vmem:[#allocation239_spill] sm:$0xff]  ;;  %v20568_v0 = vld [vmem:[#allocation142_spill] sm:$0xff] }
 0x383   : > { %v6443_v16 = vadd.f32 %v6315_v41, %v6161_v18  ;;  %v6724_v46 = vadd.f32 %v6596_v25, %v6442_v37  ;;  %v7285_v54 = vrot.slane %v6898_v30, 7  ;;  %v7861_v23 = vmul.f32 %v20557_v62, %v20545_v42  ;;  %v20558_v18 = vld [vmem:[#allocation41_spill] sm:$0xff]  ;;  %v20562_v42 = vld [vmem:[#allocation118_spill] sm:$0xff] }
 0x384   : > { %20555 = vst [vmem:[#allocation144_spill] sm:$0xff] %v16524_v24  ;;  %v7288_v17 = vrot.slane %v6899_v7, 7  ;;  %v7862_v2 = vmul.f32 %v20558_v18, %v20547_v4  ;;  %v20560_v33 = vrot.slane %v20559_v53, 9  ;;  %v7284_v6 = vrot.slane %v7282_v52, 2  ;;  %v20561_v25 = vld [vmem:[#allocation53_spill] sm:$0xff]  ;;  %v20564_v7 = vld [vmem:[#allocation124_spill] sm:$0xff] }
 0x385   : > { %v6725_v32 = vadd.f32 %v6597_v40, %v6443_v16  ;;  %v7287_v10 = vrot.slane %v7285_v54, 2  ;;  %v7863_v37 = vmul.f32 %v20561_v25, %v20553_v31  ;;  %v20563_v40 = vld [vmem:[#allocation55_spill] sm:$0xff]  ;;  %v20565_v41 = vld [vmem:[#allocation190_spill] sm:$0xff]  ;;  %v20569_v9 = vld [vmem:[#allocation205_spill] sm:$0xff] }
 0x386   : > { %v7283_v3 = vsel %vm12500_vm9, %v20560_v33, %v7282_v52  ;;  %v7290_v59 = vrot.slane %v7288_v17, 2  ;;  %v8142_v16 = vmul.f32 %v20563_v40, %v20562_v42  ;;  %v8143_v62 = vmul.f32 %v20565_v41, %v20564_v7  ;;  %v20566_v33 = vld [vmem:[#allocation138_spill] sm:$0xff]  ;;  %v20567_v52 = vld [vmem:[#allocation56_spill] sm:$0xff] }
 0x387   : > { %v7706_v30 = vadd.f32 %v7283_v3, %v6722_v51  ;;  %v7286_v4 = vsel %vm12500_vm9, %v7284_v6, %v7285_v54  ;;  %v7289_v53 = vsel %vm12500_vm9, %v7287_v10, %v7288_v17  ;;  %v8144_v18 = vmul.f32 %v20567_v52, %v20566_v33  ;;  %v20571_v6 = vld [vmem:[#allocation57_spill] sm:$0xff] }
 0x388   : > { %v8145_v25 = vmul.f32 %v20569_v9, %v20568_v0  ;;  %v20570_v3 = vrot.slane %v16524_v24, 7  ;;  %v7707_v51 = vadd.f32 %v7286_v4, %v6723_v13  ;;  %v7708_v40 = vadd.f32 %v7289_v53, %v6724_v46  ;;  %v20572_v24 = vld [vmem:[#allocation48_spill] sm:$0xff]  ;;  %v20574_v4 = vld [vmem:[#allocation6_spill] sm:$0xff] }
 0x389   : > { %v7988_v41 = vadd.f32 %v7860_v43, %v7706_v30  ;;  %v8445_v54 = vmul.f32 %v20571_v6, %v20564_v7  ;;  %v8446_v17 = vmul.f32 %v20411_v50, %v20566_v33  ;;  %v8447_v10 = vmul.f32 %v20458_v19, %v20568_v0 }
 0x38a   : > { %v7292_v42 = vsel %vm12500_vm9, %v7290_v59, %v20570_v3  ;;  %v7989_v52 = vadd.f32 %v7861_v23, %v7707_v51  ;;  %v7990_v9 = vadd.f32 %v7862_v2, %v7708_v40  ;;  %v16563_v29 = vmul.f32 %v20573_v47, %v20572_v24 }
 0x38b   : > { %v7709_v39 = vadd.f32 %v7292_v42, %v6725_v32  ;;  %v8270_v57 = vadd.f32 %v8142_v16, %v7988_v41  ;;  %v11375_v43 = vrot.slane %v20574_v4, 9  ;;  %v8830_v46 = vrot.slane %v8445_v54, 7 }
 0x38c   : > { %v8833_v32 = vrot.slane %v8446_v17, 7  ;;  %v8271_v59 = vadd.f32 %v8143_v62, %v7989_v52  ;;  %v8272_v30 = vadd.f32 %v8144_v18, %v7990_v9  ;;  %v8836_v53 = vrot.slane %v8447_v10, 7  ;;  %v20575_v10 = vld [vmem:[#allocation28_spill] sm:$0xff] }
 0x38d   : > { %v7991_v13 = vadd.f32 %v7863_v37, %v7709_v39  ;;  %v19318_v3 = vrot.slane %v16563_v29, 7  ;;  %v8831_v23 = vsel %vm12500_vm9, %v11375_v43, %v8830_v46  ;;  %v8832_v2 = vrot.slane %v8830_v46, 2  ;;  %v20576_v43 = vld [vmem:[#allocation237_spill] sm:$0xff] }
 0x38e   : > { %v8835_v41 = vrot.slane %v8833_v32, 2  ;;  %v8838_v40 = vrot.slane %v8836_v53, 2  ;;  %v9254_v16 = vadd.f32 %v8831_v23, %v8270_v57  ;;  %v9408_v39 = vmul.f32 %v19826_v5, %v20564_v7 }
 0x38f   : > { %v8273_v42 = vadd.f32 %v8145_v25, %v7991_v13  ;;  %v9409_v37 = vmul.f32 %v20282_v36, %v20566_v33  ;;  %v8834_v9 = vsel %vm12500_vm9, %v8832_v2, %v8833_v32  ;;  %v9410_v18 = vmul.f32 %v20283_v22, %v20568_v0  ;;  %v20577_v2 = vld [vmem:[#allocation112_spill] sm:$0xff] }
 0x390   : > { %v8837_v62 = vsel %vm12500_vm9, %v8835_v41, %v8836_v53  ;;  %v9411_v25 = vmul.f32 %v20284_v44, %v20572_v24  ;;  %v8840_v57 = vsel %vm12500_vm9, %v8838_v40, %v19318_v3  ;;  %v9255_v52 = vadd.f32 %v8834_v9, %v8271_v59 }
 0x391   : > { %v9256_v51 = vadd.f32 %v8837_v62, %v8272_v30  ;;  %v9536_v54 = vadd.f32 %v9408_v39, %v9254_v16  ;;  %v9257_v17 = vadd.f32 %v8840_v57, %v8273_v42  ;;  %v2198_v13 = vadd.f32 %v16118_v38, %v20575_v10 }
 0x392   : > { %v5043_v4 = vmul.f32 %v20462_v21, %v20439_v55  ;;  %v5044_v46 = vmul.f32 %v20289_v58, %v20576_v43  ;;  %v9537_v32 = vadd.f32 %v9409_v37, %v9255_v52  ;;  %v5045_v41 = vmul.f32 %v20291_v56, %v20577_v2  ;;  %v20614_v21 = vld [vmem:[#allocation8_spill] sm:$0xff] }
 0x393   : > { %v9538_v53 = vadd.f32 %v9410_v18, %v9256_v51  ;;  %v9691_v23 = vadd.f32 %v14371_v15, %v9536_v54  ;;  %v9539_v59 = vadd.f32 %v9411_v25, %v9257_v17  ;;  %v2289_v30 = vmax.f32 %v2198_v13, 0.0 }
 0x394   : > { %v5353_v42 = vmul.f32 %v20465_v34, %v20576_v43  ;;  %v5354_v38 = vmul.f32 %v20293_v20, %v20577_v2  ;;  %v9692_v55 = vadd.f32 %v20144_v61, %v9537_v32  ;;  %v20578_v39 = vrot.slane %v16480_v14, 7 }
 0x395   : > { %v9693_v40 = vadd.f32 %v20145_v49, %v9538_v53  ;;  %v9819_v16 = vmax.f32 %v9691_v23, 0.0  ;;  %v9694_v9 = vadd.f32 %v20360_v12, %v9539_v59  ;;  %v2330_v62 = vmin.f32 %v2289_v30, 6.0 }
 0x396   : > { %v5745_v37 = vrot.slane %v20578_v39, 2  ;;  %v5746_v18 = vrot.slane %v5353_v42, 7  ;;  %v5749_v25 = vrot.slane %v5354_v38, 7  ;;  %v9820_v57 = vmax.f32 %v9692_v55, 0.0  ;;  %v20579_v55 = vld [vmem:[#allocation90_spill] sm:$0xff] }
 0x397   : > { %v9821_v52 = vmax.f32 %v9693_v40, 0.0  ;;  %v9947_v51 = vmin.f32 %v9819_v16, 6.0  ;;  %v6316_v54 = vmul.f32 %v20387_v48, %v20576_v43  ;;  %v9822_v17 = vmax.f32 %v9694_v9, 0.0  ;;  %v20582_v9 = vld [vmem:[#allocation143_spill] sm:$0xff] }
 0x398   : > { %v2860_v10 = vcombine.high %v2330_v62, %v2330_v62  ;;  %v2867_v13 = vrot.slane %v2330_v62, %v20361_v28  ;;  %v5747_v32 = vsel %vm12500_vm9, %v5745_v37, %v5746_v18  ;;  %v9948_v14 = vmin.f32 %v9820_v57, 6.0 }
 0x399   : > { %v9949_v53 = vmin.f32 %v9821_v52, 6.0  ;;  %v5748_v23 = vrot.slane %v5746_v18, 2  ;;  %v5751_v59 = vrot.slane %v5749_v25, 2  ;;  %v9950_v30 = vmin.f32 %v9822_v17, 6.0 }
 0x39a   : > { %v2874_v42 = vrot.slane %v2860_v10, %v20361_v28  ;;  %v2875_v38 = vcombine.high %v2867_v13, %v2867_v13  ;;  %v20580_v40 = vrot.slane %v20579_v55, %v20252_v11  ;;  %v10368_v43 = vcombine.low %v9947_v51, %v9948_v14 }
 0x39b   : > { %v5750_v39 = vsel %vm12500_vm9, %v5748_v23, %v5749_v25  ;;  %v20583_v62 = vrot.slane %v20582_v9, 7  ;;  %v6162_v18 = vadd.f32 %v5747_v32, %v5043_v4  ;;  %v10369_v57 = vcombine.low %v9949_v53, %v9950_v30  ;;  %v20590_v53 = vld [vmem:[#allocation206_spill] sm:$0xff]  ;;  %v20594_v9 = vld [vmem:[#allocation123_spill] sm:$0xff] }
 0x39c   : > { %v16612_v16 = vmul.f32 %v20580_v40, %v2867_v13  ;;  %v2876_v52 = vcombine.high %v2874_v42, %v2874_v42  ;;  %v20584_v17 = vrot.slane %v20579_v55, %v20421_v27  ;;  %v20586_v11 = vrot.slane %v20579_v55, %v20362_v60 }
 0x39d   : > { %v5753_v37 = vsel %vm12500_vm9, %v5751_v59, %v20583_v62  ;;  %v10376_v25 = vrot.slane %v10368_v43, %v20361_v28  ;;  %v6163_v13 = vadd.f32 %v5750_v39, %v5044_v46  ;;  %v6317_v23 = vmul.f32 %v20114_v1, %v20577_v2  ;;  %v20591_v46 = vld [vmem:[#allocation36_spill] sm:$0xff]  ;;  %v20593_v2 = vld [vmem:[#allocation35_spill] sm:$0xff] }
 0x39e   : > { %20581 = vst [vmem:[#allocation74_spill] sm:$0xff] %v16612_v16  ;;  %v16623_v10 = vmul.f32 %v20584_v17, %v2875_v38  ;;  %v16628_v51 = vmul.f32 %v20586_v11, %v2874_v42  ;;  %v6164_v14 = vadd.f32 %v5753_v37, %v5045_v41  ;;  %v10383_v4 = vrot.slane %v10369_v57, %v20361_v28  ;;  %v20592_v38 = vld [vmem:[#allocation120_spill] sm:$0xff]  ;;  %v20596_v62 = vld [vmem:[#allocation39_spill] sm:$0xff]  ;;  %v20598_v17 = vld [vmem:[#allocation49_spill] sm:$0xff] }
 0x39f   : > { %v20588_v32 = vrot.slane %v20579_v55, %v20248_v45  ;;  %v6318_v59 = vmul.f32 %v20115_v26, %v20590_v53  ;;  %v6444_v60 = vadd.f32 %v6316_v54, %v6162_v18  ;;  %v6445_v30 = vadd.f32 %v6317_v23, %v6163_v13  ;;  %v20595_v45 = vld [vmem:[#allocation44_spill] sm:$0xff]  ;;  %v20599_v23 = vld [vmem:[#allocation169_spill] sm:$0xff]  ;;  %v20608_v16 = vld [vmem:[#allocation46_spill] sm:$0xff] }
 0x3a0   : > { %20585 = vst [vmem:[#allocation221_spill] sm:$0xff] %v16623_v10  ;;  %20587 = vst [vmem:[#allocation231_spill] sm:$0xff] %v16628_v51  ;;  %v6598_v42 = vmul.f32 %v20479_v63, %v20553_v31  ;;  %v6599_v41 = vmul.f32 %v20591_v46, %v20501_v35  ;;  %v6600_v40 = vmul.f32 %v20593_v2, %v20592_v38  ;;  %v20597_v18 = vld [vmem:[#allocation40_spill] sm:$0xff]  ;;  %v20609_v63 = vld [vmem:[#allocation190_spill] sm:$0xff] }
 0x3a1   : > { %v16637_v27 = vmul.f32 %v20588_v32, %v2876_v52  ;;  %v10384_v43 = vcombine.low %v10376_v25, %v10383_v4  ;;  %v6446_v39 = vadd.f32 %v6318_v59, %v6164_v14  ;;  %v6601_v55 = vmul.f32 %v20595_v45, %v20594_v9  ;;  %v20600_v14 = vld [vmem:[#allocation144_spill] sm:$0xff] }
 0x3a2   : > { %v6901_v37 = vmul.f32 %v20596_v62, %v20501_v35  ;;  %v6726_v57 = vadd.f32 %v6598_v42, %v6444_v60  ;;  %v6727_v54 = vadd.f32 %v6599_v41, %v6445_v30  ;;  %v6902_v52 = vmul.f32 %v20597_v18, %v20592_v38  ;;  %v20602_v60 = vld [vmem:[#allocation37_spill] sm:$0xff]  ;;  %v20603_v42 = vld [vmem:[#allocation52_spill] sm:$0xff] }
 0x3a3   : > { %20589 = vst [vmem:[#allocation191_spill] sm:$0xff] %v16637_v27  ;;  %v6903_v11 = vmul.f32 %v20598_v17, %v20594_v9  ;;  %11645 = vmatprep.mubr.msk.f32.mxu1 %vm10708_vm10, %v10384_v43  ;;  %v6728_v13 = vadd.f32 %v6600_v40, %v6446_v39  ;;  %v6729_v25 = vadd.f32 %v6601_v55, %v20599_v23  ;;  %v20601_v4 = vrot.slane %v20600_v14, 7  ;;  %v20604_v40 = vld [vmem:[#allocation41_spill] sm:$0xff] }
 0x3a4   : > { %v7294_v53 = vrot.slane %v6901_v37, 7  ;;  %v7297_v59 = vrot.slane %v6902_v52, 7  ;;  %v7864_v30 = vmul.f32 %v20602_v60, %v20501_v35  ;;  %v7865_v41 = vmul.f32 %v20603_v42, %v20592_v38  ;;  %v20605_v39 = vld [vmem:[#allocation137_spill] sm:$0xff] }
 0x3a5   : > { %v7293_v32 = vrot.slane %v20601_v4, 2  ;;  %v7300_v3 = vrot.slane %v6903_v11, 7  ;;  %v7866_v43 = vmul.f32 %v20604_v40, %v20594_v9  ;;  %v20606_v55 = vld [vmem:[#allocation53_spill] sm:$0xff]  ;;  %v20607_v11 = vld [vmem:[#allocation55_spill] sm:$0xff]  ;;  %v8147_v48 = vmul.f32 %v20609_v63, %v20608_v16 }
 0x3a6   : > { %v7296_v51 = vrot.slane %v7294_v53, 2  ;;  %v7867_v23 = vmul.f32 %v20606_v55, %v20605_v39  ;;  %v7299_v14 = vrot.slane %v7297_v59, 2  ;;  %v8146_v4 = vmul.f32 %v20607_v11, %v20572_v24  ;;  %v20612_v38 = vld [vmem:[#allocation61_spill] sm:$0xff] }
 0x3a7   : > { %v7295_v27 = vsel %vm12500_vm9, %v7293_v32, %v7294_v53  ;;  %v7302_v37 = vrot.slane %v7300_v3, 2  ;;  %v20610_v32 = vld [vmem:[#allocation5_spill] sm:$0xff]  ;;  %v20611_v53 = vld [vmem:[#allocation56_spill] sm:$0xff]  ;;  %v8449_v63 = vmul.f32 %v20571_v6, %v20608_v16 }
 0x3a8   : > { %v7710_v52 = vadd.f32 %v7295_v27, %v6726_v57  ;;  %v7298_v10 = vsel %vm12500_vm9, %v7296_v51, %v7297_v59  ;;  %v8148_v34 = vmul.f32 %v20611_v53, %v20610_v32  ;;  %v20613_v9 = vld [vmem:[#allocation205_spill] sm:$0xff]  ;;  %v7301_v39 = vsel %vm12500_vm9, %v7299_v14, %v7300_v3 }
 0x3a9   : > { %v8149_v35 = vmul.f32 %v20613_v9, %v20612_v38  ;;  %v20615_v27 = vrot.slane %v20614_v21, 7  ;;  %v7711_v47 = vadd.f32 %v7298_v10, %v6727_v54  ;;  %v7712_v51 = vadd.f32 %v7301_v39, %v6728_v13 }
 0x3aa   : > { %v7992_v11 = vadd.f32 %v7864_v30, %v7710_v52  ;;  %v8450_v53 = vmul.f32 %v20411_v50, %v20610_v32  ;;  %v8451_v3 = vmul.f32 %v20458_v19, %v20612_v38  ;;  %v20616_v21 = vrot.slane %v16563_v29, 7  ;;  %v20617_v30 = vld [vmem:[#allocation163_spill] sm:$0xff] }
 0x3ab   : > { %v7304_v57 = vsel %vm12500_vm9, %v7302_v37, %v20615_v27  ;;  %v7993_v55 = vadd.f32 %v7865_v41, %v7711_v47  ;;  %v7994_v40 = vadd.f32 %v7866_v43, %v7712_v51  ;;  %v8842_v10 = vrot.slane %v8449_v63, 7 }
 0x3ac   : > { %v7713_v59 = vadd.f32 %v7304_v57, %v6729_v25  ;;  %v8274_v9 = vadd.f32 %v8146_v4, %v7992_v11  ;;  %v8841_v14 = vrot.slane %v20616_v21, 2  ;;  %v8845_v54 = vrot.slane %v8450_v53, 7  ;;  %v20620_v21 = vld [vmem:[#allocation100_spill] sm:$0xff] }
 0x3ad   : > { %v8275_v13 = vadd.f32 %v8147_v48, %v7993_v55  ;;  %v8848_v25 = vrot.slane %v8451_v3, 7  ;;  %v8851_v52 = vrot.slane %v20617_v30, 7  ;;  %v9412_v39 = vmul.f32 %v19826_v5, %v20608_v16  ;;  %v20618_v55 = vld [vmem:[#allocation140_spill] sm:$0xff] }
 0x3ae   : > { %v7995_v37 = vadd.f32 %v7867_v23, %v7713_v59  ;;  %v8276_v27 = vadd.f32 %v8148_v34, %v7994_v40  ;;  %v8843_v41 = vsel %vm12500_vm9, %v8841_v14, %v8842_v10  ;;  %v8844_v11 = vrot.slane %v8842_v10, 2  ;;  %v20622_v10 = vld [vmem:[#allocation26_spill] sm:$0xff] }
 0x3af   : > { %v8847_v4 = vrot.slane %v8845_v54, 2  ;;  %v8850_v29 = vrot.slane %v8848_v25, 2  ;;  %v9258_v57 = vadd.f32 %v8843_v41, %v8274_v9  ;;  %v9413_v63 = vmul.f32 %v20282_v36, %v20610_v32 }
 0x3b0   : > { %v8277_v47 = vadd.f32 %v8149_v35, %v7995_v37  ;;  %v8846_v48 = vsel %vm12500_vm9, %v8844_v11, %v8845_v54  ;;  %v9414_v43 = vmul.f32 %v20283_v22, %v20612_v38  ;;  %v9415_v34 = vmul.f32 %v20284_v44, %v20618_v55  ;;  %v20619_v35 = vld [vmem:[#allocation106_spill] sm:$0xff] }
 0x3b1   : > { %v5048_v40 = vmul.f32 %v20289_v58, %v20619_v35  ;;  %v8849_v23 = vsel %vm12500_vm9, %v8847_v4, %v8848_v25  ;;  %v8852_v9 = vsel %vm12500_vm9, %v8850_v29, %v8851_v52  ;;  %v9259_v53 = vadd.f32 %v8846_v48, %v8275_v13  ;;  %v20621_v37 = vld [vmem:[#allocation170_spill] sm:$0xff]  ;;  %v20623_v25 = vld [vmem:[#allocation31_spill] sm:$0xff] }
 0x3b2   : > { %v9540_v51 = vadd.f32 %v9412_v39, %v9258_v57  ;;  %v9260_v59 = vadd.f32 %v8849_v23, %v8276_v27  ;;  %v9261_v3 = vadd.f32 %v8852_v9, %v8277_v47  ;;  %v5049_v14 = vmul.f32 %v20291_v56, %v20620_v21  ;;  %v20624_v39 = vld [vmem:[#allocation34_spill] sm:$0xff]  ;;  %v20625_v47 = vld [vmem:[#allocation121_spill] sm:$0xff] }
 0x3b3   : > { %v5050_v54 = vmul.f32 %v20622_v10, %v20621_v37  ;;  %v9541_v30 = vadd.f32 %v9413_v63, %v9259_v53  ;;  %v5359_v11 = vmul.f32 %v20293_v20, %v20620_v21  ;;  %v5360_v4 = vmul.f32 %v20623_v25, %v20621_v37 }
 0x3b4   : > { %v9695_v41 = vadd.f32 %v14371_v15, %v9540_v51  ;;  %v9542_v52 = vadd.f32 %v9414_v43, %v9260_v59  ;;  %v9543_v13 = vadd.f32 %v9415_v34, %v9261_v3  ;;  %v16723_v27 = vmul.f32 %v20624_v39, %v20553_v31  ;;  %v20639_v39 = vld [vmem:[#allocation11_spill] sm:$0xff] }
 0x3b5   : > { %v20626_v29 = vrot.slane %v20625_v47, 7  ;;  %v9696_v48 = vadd.f32 %v20144_v61, %v9541_v30  ;;  %v5762_v55 = vrot.slane %v5359_v11, 7  ;;  %v5765_v35 = vrot.slane %v5360_v4, 7 }
 0x3b6   : > { %v9823_v63 = vmax.f32 %v9695_v41, 0.0  ;;  %v9697_v23 = vadd.f32 %v20145_v49, %v9542_v52  ;;  %v9698_v9 = vadd.f32 %v20360_v12, %v9543_v13  ;;  %v19330_v53 = vrot.slane %v16723_v27, 7 }
 0x3b7   : > { %v5761_v57 = vrot.slane %v20626_v29, 2  ;;  %v6321_v43 = vmul.f32 %v20114_v1, %v20620_v21  ;;  %v9824_v34 = vmax.f32 %v9696_v48, 0.0  ;;  %v5764_v3 = vrot.slane %v5762_v55, 2  ;;  %v20627_v29 = vld [vmem:[#allocation32_spill] sm:$0xff] }
 0x3b8   : > { %v9951_v51 = vmin.f32 %v9823_v63, 6.0  ;;  %v9825_v47 = vmax.f32 %v9697_v23, 0.0  ;;  %v9826_v30 = vmax.f32 %v9698_v9, 0.0  ;;  %v5767_v41 = vrot.slane %v5765_v35, 2 }
 0x3b9   : > { %v5763_v59 = vsel %vm12500_vm9, %v5761_v57, %v5762_v55  ;;  %v9952_v4 = vmin.f32 %v9824_v34, 6.0  ;;  %v5766_v52 = vsel %vm12500_vm9, %v5764_v3, %v5765_v35  ;;  %v6322_v13 = vmul.f32 %v20115_v26, %v20621_v37 }
 0x3ba   : > { %v6167_v11 = vadd.f32 %v5763_v59, %v5048_v40  ;;  %v6323_v21 = vmul.f32 %v20627_v29, %v20553_v31  ;;  %v9953_v48 = vmin.f32 %v9825_v47, 6.0  ;;  %v9954_v63 = vmin.f32 %v9826_v30, 6.0 }
 0x3bb   : > { %v5769_v57 = vsel %vm12500_vm9, %v5767_v41, %v19330_v53  ;;  %v6168_v55 = vadd.f32 %v5766_v52, %v5049_v14  ;;  %v10385_v23 = vcombine.low %v9951_v51, %v9952_v4  ;;  %v6603_v35 = vmul.f32 %v20591_v46, %v20564_v7  ;;  %v20628_v4 = vld [vmem:[#allocation51_spill] sm:$0xff]  ;;  %v20637_v53 = vld [vmem:[#allocation172_spill] sm:$0xff] }
 0x3bc   : > { %v6169_v40 = vadd.f32 %v5769_v57, %v5050_v54  ;;  %v6449_v9 = vadd.f32 %v6321_v43, %v6167_v11  ;;  %v10386_v34 = vcombine.low %v9953_v48, %v9954_v63  ;;  %v6604_v37 = vmul.f32 %v20593_v2, %v20566_v33 }
 0x3bd   : > { %v6450_v59 = vadd.f32 %v6322_v13, %v6168_v55  ;;  %v6605_v3 = vmul.f32 %v20595_v45, %v20568_v0  ;;  %v10393_v47 = vrot.slane %v10385_v23, %v20361_v28  ;;  %v6906_v14 = vmul.f32 %v20596_v62, %v20564_v7  ;;  %v20630_v23 = vld [vmem:[#allocation54_spill] sm:$0xff] }
 0x3be   : > { %v6451_v30 = vadd.f32 %v6323_v21, %v6169_v40  ;;  %v6731_v29 = vadd.f32 %v6603_v35, %v6449_v9  ;;  %v10400_v54 = vrot.slane %v10386_v34, %v20361_v28  ;;  %v6907_v51 = vmul.f32 %v20597_v18, %v20566_v33  ;;  %v20638_v34 = vld [vmem:[#allocation190_spill] sm:$0xff] }
 0x3bf   : > { %v6732_v43 = vadd.f32 %v6604_v37, %v6450_v59  ;;  %v6908_v41 = vmul.f32 %v20598_v17, %v20568_v0  ;;  %v16761_v52 = vmul.f32 %v20628_v4, %v20572_v24  ;;  %v7307_v13 = vrot.slane %v6906_v14, 7  ;;  %v20632_v59 = vld [vmem:[#allocation41_spill] sm:$0xff] }
 0x3c0   : > { %v6733_v11 = vadd.f32 %v6605_v3, %v6451_v30  ;;  %v7868_v21 = vmul.f32 %v20602_v60, %v20564_v7  ;;  %v10401_v48 = vcombine.low %v10393_v47, %v10400_v54  ;;  %v7310_v63 = vrot.slane %v6907_v51, 7  ;;  %v20633_v30 = vld [vmem:[#allocation168_spill] sm:$0xff]  ;;  %v20634_v54 = vld [vmem:[#allocation53_spill] sm:$0xff] }
 0x3c1   : > { %20629 = vst [vmem:[#allocation109_spill] sm:$0xff] %v16761_v52  ;;  %v7313_v57 = vrot.slane %v6908_v41, 7  ;;  %v7869_v55 = vmul.f32 %v20603_v42, %v20566_v33  ;;  %v20631_v40 = vrot.slane %v20630_v23, 9  ;;  %v7309_v35 = vrot.slane %v7307_v13, 2  ;;  %v20635_v23 = vld [vmem:[#allocation171_spill] sm:$0xff] }
 0x3c2   : > { %v7870_v37 = vmul.f32 %v20632_v59, %v20568_v0  ;;  %11646 = vmatmul.mubr.msk.f32.gmra.mxu1 %vm10708_vm10, %v10401_v48  ;;  %v7312_v3 = vrot.slane %v7310_v63, 2  ;;  %v7871_v51 = vmul.f32 %v20634_v54, %v20572_v24  ;;  %v8151_v4 = vmul.f32 %v20638_v34, %v20637_v53  ;;  %v20640_v0 = vld [vmem:[#allocation56_spill] sm:$0xff]  ;;  %v20644_v34 = vld [vmem:[#allocation45_spill] sm:$0xff] }
 0x3c3   : > { %v7308_v9 = vsel %vm12500_vm9, %v20631_v40, %v7307_v13  ;;  %v7315_v47 = vrot.slane %v7313_v57, 2  ;;  %v7311_v41 = vsel %vm12500_vm9, %v7309_v35, %v7310_v63  ;;  %v20636_v40 = vld [vmem:[#allocation55_spill] sm:$0xff]  ;;  %v8152_v33 = vmul.f32 %v20640_v0, %v20639_v39  ;;  %v20642_v59 = vld [vmem:[#allocation164_spill] sm:$0xff] }
 0x3c4   : > { %v7714_v14 = vadd.f32 %v7308_v9, %v20633_v30  ;;  %v8150_v13 = vmul.f32 %v20636_v40, %v20635_v23  ;;  %v7314_v48 = vsel %vm12500_vm9, %v7312_v3, %v7313_v57  ;;  %v20641_v9 = vrot.slane %v16761_v52, 7  ;;  %v20643_v40 = vld [vmem:[#allocation205_spill] sm:$0xff] }
 0x3c5   : > { %v7715_v54 = vadd.f32 %v7311_v41, %v6731_v29  ;;  %v7716_v63 = vadd.f32 %v7314_v48, %v6732_v43  ;;  %v8153_v42 = vmul.f32 %v20643_v40, %v20642_v59  ;;  %v8453_v60 = vmul.f32 %v20644_v34, %v20635_v23  ;;  %v20645_v43 = vld [vmem:[#allocation93_spill] sm:$0xff]  ;;  %v20651_v34 = vld [vmem:[#allocation27_spill] sm:$0xff] }
 0x3c6   : > { %v7317_v30 = vsel %vm12500_vm9, %v7315_v47, %v20641_v9  ;;  %v7996_v7 = vadd.f32 %v7868_v21, %v7714_v14  ;;  %v8454_v57 = vmul.f32 %v20571_v6, %v20637_v53  ;;  %v8455_v3 = vmul.f32 %v20411_v50, %v20639_v39 }
 0x3c7   : > { %v7717_v35 = vadd.f32 %v7317_v30, %v6733_v11  ;;  %v7997_v17 = vadd.f32 %v7869_v55, %v7715_v54  ;;  %v7998_v52 = vadd.f32 %v7870_v37, %v7716_v63  ;;  %v8456_v29 = vmul.f32 %v20458_v19, %v20642_v59  ;;  %v20646_v11 = vld [vmem:[#allocation222_spill] sm:$0xff] }
 0x3c8   : > { %v8278_v0 = vadd.f32 %v8150_v13, %v7996_v7  ;;  %v16804_v21 = vmul.f32 %v20646_v11, %v20645_v43  ;;  %v11376_v41 = vrot.slane %v8453_v60, 9  ;;  %v8855_v23 = vrot.slane %v8454_v57, 7 }
 0x3c9   : > { %v7999_v47 = vadd.f32 %v7871_v51, %v7717_v35  ;;  %v8279_v14 = vadd.f32 %v8151_v4, %v7997_v17  ;;  %v8858_v55 = vrot.slane %v8455_v3, 7  ;;  %v8280_v7 = vadd.f32 %v8152_v33, %v7998_v52  ;;  %v20647_v52 = vld [vmem:[#allocation16_spill] sm:$0xff] }
 0x3ca   : > { %v8861_v13 = vrot.slane %v8456_v29, 7  ;;  %v19338_v48 = vrot.slane %v16804_v21, 7  ;;  %v8856_v37 = vsel %vm12500_vm9, %v11376_v41, %v8855_v23  ;;  %v8857_v51 = vrot.slane %v8855_v23, 2  ;;  %v20648_v23 = vld [vmem:[#allocation136_spill] sm:$0xff] }
 0x3cb   : > { %v8281_v54 = vadd.f32 %v8153_v42, %v7999_v47  ;;  %v8860_v9 = vrot.slane %v8858_v55, 2  ;;  %v9416_v30 = vmul.f32 %v19826_v5, %v20637_v53  ;;  %v9262_v35 = vadd.f32 %v8856_v37, %v8278_v0  ;;  %v20649_v37 = vld [vmem:[#allocation120_spill] sm:$0xff] }
 0x3cc   : > { %v8863_v63 = vrot.slane %v8861_v13, 2  ;;  %v9417_v17 = vmul.f32 %v20282_v36, %v20639_v39  ;;  %v9418_v33 = vmul.f32 %v20283_v22, %v20642_v59  ;;  %v8859_v60 = vsel %vm12500_vm9, %v8857_v51, %v8858_v55  ;;  %v20650_v51 = vld [vmem:[#allocation123_spill] sm:$0xff] }
 0x3cd   : > { %v8862_v42 = vsel %vm12500_vm9, %v8860_v9, %v8861_v13  ;;  %v9419_v4 = vmul.f32 %v20284_v44, %v20645_v43  ;;  %v5051_v57 = vmul.f32 %v20647_v52, %v20553_v31  ;;  %v9263_v3 = vadd.f32 %v8859_v60, %v8279_v14 }
 0x3ce   : > { %v8865_v0 = vsel %vm12500_vm9, %v8863_v63, %v19338_v48  ;;  %v9264_v47 = vadd.f32 %v8862_v42, %v8280_v7  ;;  %v9544_v29 = vadd.f32 %v9416_v30, %v9262_v35  ;;  %v5052_v55 = vmul.f32 %v20289_v58, %v20648_v23 }
 0x3cf   : > { %v9265_v41 = vadd.f32 %v8865_v0, %v8281_v54  ;;  %v5053_v13 = vmul.f32 %v20291_v56, %v20649_v37  ;;  %v5054_v9 = vmul.f32 %v20622_v10, %v20650_v51  ;;  %v9545_v11 = vadd.f32 %v9417_v17, %v9263_v3 }
 0x3d0   : > { %v9546_v31 = vadd.f32 %v9418_v33, %v9264_v47  ;;  %v9699_v52 = vadd.f32 %v14371_v15, %v9544_v29  ;;  %v5362_v63 = vmul.f32 %v20651_v34, %v20648_v23  ;;  %v5363_v7 = vmul.f32 %v20293_v20, %v20649_v37 }
 0x3d1   : > { %v9547_v14 = vadd.f32 %v9419_v4, %v9265_v41  ;;  %v5364_v54 = vmul.f32 %v20623_v25, %v20650_v51  ;;  %v20652_v30 = vrot.slane %v16723_v27, 7  ;;  %v9700_v60 = vadd.f32 %v20144_v61, %v9545_v11  ;;  %v20653_v4 = vld [vmem:[#allocation18_spill] sm:$0xff] }
 0x3d2   : > { %v9701_v17 = vadd.f32 %v20145_v49, %v9546_v31  ;;  %v9827_v33 = vmax.f32 %v9699_v52, 0.0  ;;  %v5771_v42 = vrot.slane %v5362_v63, 7  ;;  %v5774_v3 = vrot.slane %v5363_v7, 7 }
 0x3d3   : > { %v5770_v35 = vrot.slane %v20652_v30, 2  ;;  %v9702_v0 = vadd.f32 %v20360_v12, %v9547_v14  ;;  %v5777_v47 = vrot.slane %v5364_v54, 7  ;;  %v6324_v29 = vmul.f32 %v20653_v4, %v20648_v23 }
 0x3d4   : > { %v9828_v41 = vmax.f32 %v9700_v60, 0.0  ;;  %v9829_v48 = vmax.f32 %v9701_v17, 0.0  ;;  %v9955_v34 = vmin.f32 %v9827_v33, 6.0  ;;  %v5773_v59 = vrot.slane %v5771_v42, 2  ;;  %v20654_v60 = vld [vmem:[#allocation50_spill] sm:$0xff] }
 0x3d5   : > { %v5772_v27 = vsel %vm12500_vm9, %v5770_v35, %v5771_v42  ;;  %v9830_v30 = vmax.f32 %v9702_v0, 0.0  ;;  %v5776_v11 = vrot.slane %v5774_v3, 2  ;;  %v5779_v39 = vrot.slane %v5777_v47, 2 }
 0x3d6   : > { %v9956_v31 = vmin.f32 %v9828_v41, 6.0  ;;  %v9957_v52 = vmin.f32 %v9829_v48, 6.0  ;;  %v6170_v63 = vadd.f32 %v5772_v27, %v5051_v57  ;;  %v6325_v14 = vmul.f32 %v20114_v1, %v20649_v37  ;;  %v20656_v27 = vld [vmem:[#allocation24_spill] sm:$0xff] }
 0x3d7   : > { %v9958_v7 = vmin.f32 %v9830_v30, 6.0  ;;  %v5775_v23 = vsel %vm12500_vm9, %v5773_v59, %v5774_v3  ;;  %v5778_v54 = vsel %vm12500_vm9, %v5776_v11, %v5777_v47  ;;  %v20655_v17 = vrot.slane %v20654_v60, 7  ;;  %v20657_v30 = vld [vmem:[#allocation7_spill] sm:$0xff]  ;;  %v20659_v60 = vld [vmem:[#allocation109_spill] sm:$0xff] }
 0x3d8   : > { %v10402_v33 = vcombine.low %v9955_v34, %v9956_v31  ;;  %v6171_v42 = vadd.f32 %v5775_v23, %v5052_v55  ;;  %v6172_v0 = vadd.f32 %v5778_v54, %v5053_v13  ;;  %v6326_v37 = vmul.f32 %v20115_v26, %v20650_v51  ;;  %v20658_v23 = vld [vmem:[#allocation49_spill] sm:$0xff] }
 0x3d9   : > { %v5781_v35 = vsel %vm12500_vm9, %v5779_v39, %v20655_v17  ;;  %v10403_v57 = vcombine.low %v9957_v52, %v9958_v7  ;;  %v6452_v41 = vadd.f32 %v6324_v29, %v6170_v63  ;;  %v6606_v59 = vmul.f32 %v20656_v27, %v20572_v24 }
 0x3da   : > { %v6173_v48 = vadd.f32 %v5781_v35, %v5054_v9  ;;  %v10410_v3 = vrot.slane %v10402_v33, %v20361_v28  ;;  %v6453_v47 = vadd.f32 %v6325_v14, %v6171_v42  ;;  %v6607_v39 = vmul.f32 %v20591_v46, %v20608_v16 }
 0x3db   : > { %v10417_v34 = vrot.slane %v10403_v57, %v20361_v28  ;;  %v6454_v55 = vadd.f32 %v6326_v37, %v6172_v0  ;;  %v6608_v13 = vmul.f32 %v20593_v2, %v20610_v32  ;;  %v6609_v51 = vmul.f32 %v20595_v45, %v20612_v38  ;;  %v20661_v0 = vld [vmem:[#allocation37_spill] sm:$0xff]  ;;  %v20662_v37 = vld [vmem:[#allocation52_spill] sm:$0xff] }
 0x3dc   : > { %v6455_v11 = vadd.f32 %v20657_v30, %v6173_v48  ;;  %v6734_v9 = vadd.f32 %v6606_v59, %v6452_v41  ;;  %v6735_v29 = vadd.f32 %v6607_v39, %v6453_v47  ;;  %v6910_v31 = vmul.f32 %v20596_v62, %v20608_v16  ;;  %v20663_v59 = vld [vmem:[#allocation41_spill] sm:$0xff]  ;;  %v20664_v47 = vld [vmem:[#allocation55_spill] sm:$0xff] }
 0x3dd   : > { %v6911_v52 = vmul.f32 %v20597_v18, %v20610_v32  ;;  %v10418_v63 = vcombine.low %v10410_v3, %v10417_v34  ;;  %v6736_v14 = vadd.f32 %v6608_v13, %v6454_v55  ;;  %v6912_v54 = vmul.f32 %v20658_v23, %v20612_v38  ;;  %v20665_v55 = vld [vmem:[#allocation9_spill] sm:$0xff]  ;;  %v20666_v13 = vld [vmem:[#allocation190_spill] sm:$0xff] }
 0x3de   : > { %v6737_v7 = vadd.f32 %v6609_v51, %v6455_v11  ;;  %v20660_v17 = vrot.slane %v20659_v60, 7  ;;  %v7319_v33 = vrot.slane %v6910_v31, 7  ;;  %v7872_v48 = vmul.f32 %v20661_v0, %v20608_v16  ;;  %v20675_v0 = vld [vmem:[#allocation154_spill] sm:$0xff] }
 0x3df   : > { %v7322_v42 = vrot.slane %v6911_v52, 7  ;;  %11648 = vmatprep.mubr.msk.f32.mxu1 %vm10708_vm10, %v10418_v63  ;;  %v7325_v57 = vrot.slane %v6912_v54, 7  ;;  %v7873_v41 = vmul.f32 %v20662_v37, %v20610_v32  ;;  %v7874_v3 = vmul.f32 %v20663_v59, %v20612_v38  ;;  %v20667_v63 = vld [vmem:[#allocation195_spill] sm:$0xff]  ;;  %v20668_v54 = vld [vmem:[#allocation56_spill] sm:$0xff] }
 0x3e0   : > { %v7318_v35 = vrot.slane %v20660_v17, 2  ;;  %v8154_v30 = vmul.f32 %v20664_v47, %v20645_v43  ;;  %v7321_v39 = vrot.slane %v7319_v33, 2  ;;  %v8155_v51 = vmul.f32 %v20666_v13, %v20665_v55  ;;  %v20669_v17 = vld [vmem:[#allocation159_spill] sm:$0xff] }
 0x3e1   : > { %v7324_v34 = vrot.slane %v7322_v42, 2  ;;  %v7327_v31 = vrot.slane %v7325_v57, 2  ;;  %v8156_v60 = vmul.f32 %v20668_v54, %v20667_v63  ;;  %v8157_v27 = vmul.f32 %v20643_v40, %v20669_v17  ;;  %v20670_v32 = vld [vmem:[#allocation3_spill] sm:$0xff] }
 0x3e2   : > { %v7320_v11 = vsel %vm12500_vm9, %v7318_v35, %v7319_v33  ;;  %v7323_v38 = vsel %vm12500_vm9, %v7321_v39, %v7322_v42  ;;  %v8458_v35 = vmul.f32 %v20571_v6, %v20665_v55  ;;  %v8459_v33 = vmul.f32 %v20411_v50, %v20667_v63  ;;  %v20672_v39 = vld [vmem:[#allocation183_spill] sm:$0xff] }
 0x3e3   : > { %v7718_v52 = vadd.f32 %v7320_v11, %v6734_v9  ;;  %v7326_v4 = vsel %vm12500_vm9, %v7324_v34, %v7325_v57  ;;  %v20671_v9 = vrot.slane %v20670_v32, 7  ;;  %v7719_v16 = vadd.f32 %v7323_v38, %v6735_v29  ;;  %v20673_v57 = vld [vmem:[#allocation59_spill] sm:$0xff] }
 0x3e4   : > { %v7720_v54 = vadd.f32 %v7326_v4, %v6736_v14  ;;  %v8460_v42 = vmul.f32 %v20458_v19, %v20669_v17  ;;  %v8461_v34 = vmul.f32 %v20673_v57, %v20672_v39  ;;  %v20674_v6 = vrot.slane %v16804_v21, 7 }
 0x3e5   : > { %v7329_v11 = vsel %vm12500_vm9, %v7327_v31, %v20671_v9  ;;  %v8000_v40 = vadd.f32 %v7872_v48, %v7718_v52  ;;  %v8001_v59 = vadd.f32 %v7873_v41, %v7719_v16  ;;  %v8867_v32 = vrot.slane %v8458_v35, 7 }
 0x3e6   : > { %v7721_v13 = vadd.f32 %v7329_v11, %v6737_v7  ;;  %v8866_v47 = vrot.slane %v20674_v6, 2  ;;  %v8002_v50 = vadd.f32 %v7874_v3, %v7720_v54  ;;  %v8870_v31 = vrot.slane %v8459_v33, 7 }
 0x3e7   : > { %v8282_v37 = vadd.f32 %v8154_v30, %v8000_v40  ;;  %v8873_v38 = vrot.slane %v8460_v42, 7  ;;  %v8876_v4 = vrot.slane %v8461_v34, 7  ;;  %v8283_v29 = vadd.f32 %v8155_v51, %v8001_v59  ;;  %v20677_v51 = vld [vmem:[#allocation138_spill] sm:$0xff] }
 0x3e8   : > { %v8003_v43 = vadd.f32 %v20675_v0, %v7721_v13  ;;  %v8284_v14 = vadd.f32 %v8156_v60, %v8002_v50  ;;  %v8868_v7 = vsel %vm12500_vm9, %v8866_v47, %v8867_v32  ;;  %v8869_v48 = vrot.slane %v8867_v32, 2  ;;  %v20676_v47 = vld [vmem:[#allocation124_spill] sm:$0xff]  ;;  %v20678_v60 = vld [vmem:[#allocation142_spill] sm:$0xff] }
 0x3e9   : > { %v8872_v9 = vrot.slane %v8870_v31, 2  ;;  %v8875_v11 = vrot.slane %v8873_v38, 2  ;;  %v9266_v21 = vadd.f32 %v8868_v7, %v8282_v37  ;;  %v9420_v16 = vmul.f32 %v19826_v5, %v20665_v55 }
 0x3ea   : > { %v8285_v52 = vadd.f32 %v8157_v27, %v8003_v43  ;;  %v8871_v6 = vsel %vm12500_vm9, %v8869_v48, %v8870_v31  ;;  %v9421_v40 = vmul.f32 %v20282_v36, %v20667_v63  ;;  %v9422_v50 = vmul.f32 %v20283_v22, %v20669_v17 }
 0x3eb   : > { %v8874_v0 = vsel %vm12500_vm9, %v8872_v9, %v8873_v38  ;;  %v8877_v43 = vsel %vm12500_vm9, %v8875_v11, %v8876_v4  ;;  %v9267_v27 = vadd.f32 %v8871_v6, %v8283_v29  ;;  %v9423_v37 = vmul.f32 %v20284_v44, %v20672_v39  ;;  %v20679_v4 = vld [vmem:[#allocation34_spill] sm:$0xff]  ;;  %v20680_v6 = vld [vmem:[#allocation204_spill] sm:$0xff] }
 0x3ec   : > { %v9268_v41 = vadd.f32 %v8874_v0, %v8284_v14  ;;  %v9269_v59 = vadd.f32 %v8877_v43, %v8285_v52  ;;  %v9548_v3 = vadd.f32 %v9420_v16, %v9266_v21  ;;  %v5056_v30 = vmul.f32 %v20289_v58, %v20676_v47 }
 0x3ed   : > { %v9549_v13 = vadd.f32 %v9421_v40, %v9267_v27  ;;  %v5057_v54 = vmul.f32 %v20291_v56, %v20677_v51  ;;  %v5058_v35 = vmul.f32 %v20622_v10, %v20678_v60  ;;  %v5368_v33 = vmul.f32 %v20293_v20, %v20677_v51  ;;  %v20699_v10 = vld [vmem:[#allocation56_spill] sm:$0xff] }
 0x3ee   : > { %v9550_v42 = vadd.f32 %v9422_v50, %v9268_v41  ;;  %v9551_v34 = vadd.f32 %v9423_v37, %v9269_v59  ;;  %v9703_v32 = vadd.f32 %v14371_v15, %v9548_v3  ;;  %v5369_v31 = vmul.f32 %v20623_v25, %v20678_v60 }
 0x3ef   : > { %v9704_v38 = vadd.f32 %v20144_v61, %v9549_v13  ;;  %v16946_v29 = vmul.f32 %v20679_v4, %v20572_v24  ;;  %v5787_v14 = vrot.slane %v5368_v33, 7  ;;  %v6329_v7 = vmul.f32 %v20114_v1, %v20677_v51  ;;  %v20697_v4 = vld [vmem:[#allocation190_spill] sm:$0xff] }
 0x3f0   : > { %v9705_v48 = vadd.f32 %v20145_v49, %v9550_v42  ;;  %v9706_v52 = vadd.f32 %v20360_v12, %v9551_v34  ;;  %v9831_v9 = vmax.f32 %v9703_v32, 0.0  ;;  %v5790_v11 = vrot.slane %v5369_v31, 7  ;;  %v20681_v31 = vld [vmem:[#allocation32_spill] sm:$0xff] }
 0x3f1   : > { %v9832_v21 = vmax.f32 %v9704_v38, 0.0  ;;  %v5788_v16 = vsel %vm12500_vm9, %v20680_v6, %v5787_v14  ;;  %v5789_v40 = vrot.slane %v5787_v14, 2  ;;  %v19348_v50 = vrot.slane %v16946_v29, 7  ;;  %v20683_v6 = vld [vmem:[#allocation164_spill] sm:$0xff] }
 0x3f2   : > { %v9833_v0 = vmax.f32 %v9705_v48, 0.0  ;;  %v9834_v43 = vmax.f32 %v9706_v52, 0.0  ;;  %v9959_v27 = vmin.f32 %v9831_v9, 6.0  ;;  %v5792_v37 = vrot.slane %v5790_v11, 2 }
 0x3f3   : > { %v9960_v41 = vmin.f32 %v9832_v21, 6.0  ;;  %v5791_v59 = vsel %vm12500_vm9, %v5789_v40, %v5790_v11  ;;  %v6175_v3 = vadd.f32 %v5788_v16, %v5056_v30  ;;  %v6330_v47 = vmul.f32 %v20115_v26, %v20678_v60  ;;  %v20682_v60 = vld [vmem:[#allocation11_spill] sm:$0xff] }
 0x3f4   : > { %v9961_v13 = vmin.f32 %v9833_v0, 6.0  ;;  %v9962_v51 = vmin.f32 %v9834_v43, 6.0  ;;  %v5794_v33 = vsel %vm12500_vm9, %v5792_v37, %v19348_v50  ;;  %v6176_v42 = vadd.f32 %v5791_v59, %v5057_v54  ;;  %v20684_v16 = vld [vmem:[#allocation135_spill] sm:$0xff] }
 0x3f5   : > { %v10419_v34 = vcombine.low %v9959_v27, %v9960_v41  ;;  %v6177_v32 = vadd.f32 %v5794_v33, %v5058_v35  ;;  %v6331_v38 = vmul.f32 %v20681_v31, %v20572_v24  ;;  %v6457_v14 = vadd.f32 %v6329_v7, %v6175_v3  ;;  %v20685_v35 = vld [vmem:[#allocation213_spill] sm:$0xff]  ;;  %v20695_v50 = vld [vmem:[#allocation55_spill] sm:$0xff] }
 0x3f6   : > { %v10420_v48 = vcombine.low %v9961_v13, %v9962_v51  ;;  %v6458_v52 = vadd.f32 %v6330_v47, %v6176_v42  ;;  %v6611_v30 = vmul.f32 %v20591_v46, %v20637_v53  ;;  %v6612_v9 = vmul.f32 %v20593_v2, %v20682_v60  ;;  %v20686_v3 = vld [vmem:[#allocation93_spill] sm:$0xff]  ;;  %v20687_v47 = vld [vmem:[#allocation51_spill] sm:$0xff] }
 0x3f7   : > { %v10427_v11 = vrot.slane %v10419_v34, %v20361_v28  ;;  %v6459_v21 = vadd.f32 %v6331_v38, %v6177_v32  ;;  %v6613_v54 = vmul.f32 %v20595_v45, %v20683_v6  ;;  %v6738_v40 = vadd.f32 %v20685_v35, %v20684_v16  ;;  %v20688_v42 = vld [vmem:[#allocation37_spill] sm:$0xff]  ;;  %v20689_v32 = vld [vmem:[#allocation52_spill] sm:$0xff] }
 0x3f8   : > { %v10434_v0 = vrot.slane %v10420_v48, %v20361_v28  ;;  %v6739_v7 = vadd.f32 %v6611_v30, %v6457_v14  ;;  %v6740_v43 = vadd.f32 %v6612_v9, %v6458_v52  ;;  %v6915_v27 = vmul.f32 %v20596_v62, %v20637_v53  ;;  %v20690_v30 = vld [vmem:[#allocation41_spill] sm:$0xff] }
 0x3f9   : > { %v6741_v37 = vadd.f32 %v6613_v54, %v6459_v21  ;;  %v6916_v41 = vmul.f32 %v20597_v18, %v20682_v60  ;;  %v6917_v59 = vmul.f32 %v20658_v23, %v20683_v6  ;;  %v16984_v13 = vmul.f32 %v20687_v47, %v20686_v3  ;;  %v20691_v21 = vld [vmem:[#allocation125_spill] sm:$0xff] }
 0x3fa   : > { %v10435_v51 = vcombine.low %v10427_v11, %v10434_v0  ;;  %v7332_v33 = vrot.slane %v6915_v27, 7  ;;  %v7876_v34 = vmul.f32 %v20688_v42, %v20637_v53  ;;  %v7877_v38 = vmul.f32 %v20689_v32, %v20682_v60  ;;  %v20693_v35 = vld [vmem:[#allocation53_spill] sm:$0xff]  ;;  %v20694_v27 = vld [vmem:[#allocation184_spill] sm:$0xff] }
 0x3fb   : > { %v7335_v14 = vrot.slane %v6916_v41, 7  ;;  %v7338_v48 = vrot.slane %v6917_v59, 7  ;;  %v7878_v9 = vmul.f32 %v20690_v30, %v20683_v6  ;;  %v20692_v54 = vrot.slane %v20691_v21, 9  ;;  %v20696_v31 = vld [vmem:[#allocation65_spill] sm:$0xff]  ;;  %v20698_v21 = vld [vmem:[#allocation175_spill] sm:$0xff] }
 0x3fc   : > { %11649 = vmatmul.mubr.msk.f32.gmra.mxu1 %vm10708_vm10, %v10435_v51  ;;  %v7334_v16 = vrot.slane %v7332_v33, 2  ;;  %v7879_v0 = vmul.f32 %v20693_v35, %v20686_v3  ;;  %v8158_v41 = vmul.f32 %v20695_v50, %v20694_v27  ;;  %v8159_v25 = vmul.f32 %v20697_v4, %v20696_v31  ;;  %v20702_v53 = vld [vmem:[#allocation45_spill] sm:$0xff] }
 0x3fd   : > { %v7333_v11 = vsel %vm12500_vm9, %v20692_v54, %v7332_v33  ;;  %v7337_v59 = vrot.slane %v7335_v14, 2  ;;  %v7340_v47 = vrot.slane %v7338_v48, 2  ;;  %v8160_v6 = vmul.f32 %v20699_v10, %v20698_v21  ;;  %v20700_v54 = vld [vmem:[#allocation214_spill] sm:$0xff]  ;;  %v20701_v33 = vld [vmem:[#allocation205_spill] sm:$0xff] }
 0x3fe   : > { %v7722_v52 = vadd.f32 %v7333_v11, %v6738_v40  ;;  %v7336_v51 = vsel %vm12500_vm9, %v7334_v16, %v7335_v14  ;;  %v8161_v60 = vmul.f32 %v20701_v33, %v20700_v54  ;;  %v8462_v57 = vmul.f32 %v20702_v53, %v20694_v27  ;;  %v20704_v10 = vld [vmem:[#allocation57_spill] sm:$0xff]  ;;  %v20705_v33 = vld [vmem:[#allocation58_spill] sm:$0xff] }
 0x3ff   : > { %v7339_v50 = vsel %vm12500_vm9, %v7337_v59, %v7338_v48  ;;  %v20703_v40 = vrot.slane %v16984_v13, 7  ;;  %v7723_v4 = vadd.f32 %v7336_v51, %v6739_v7  ;;  %v8463_v39 = vmul.f32 %v20704_v10, %v20696_v31  ;;  %v20706_v59 = vld [vmem:[#allocation165_spill] sm:$0xff]  ;;  %v20707_v53 = vld [vmem:[#allocation222_spill] sm:$0xff] }
 0x400   : > { %v8004_v35 = vadd.f32 %v7876_v34, %v7722_v52  ;;  %v7724_v14 = vadd.f32 %v7339_v50, %v6740_v43  ;;  %v8464_v30 = vmul.f32 %v20705_v33, %v20698_v21  ;;  %v8465_v48 = vmul.f32 %v20458_v19, %v20700_v54 }
 0x401   : > { %v7342_v11 = vsel %vm12500_vm9, %v7340_v47, %v20703_v40  ;;  %v8005_v32 = vadd.f32 %v7877_v38, %v7723_v4  ;;  %v17026_v42 = vmul.f32 %v20707_v53, %v20706_v59  ;;  %v11377_v34 = vrot.slane %v8462_v57, 9 }
 0x402   : > { %v7725_v16 = vadd.f32 %v7342_v11, %v6741_v37  ;;  %v8286_v27 = vadd.f32 %v8158_v41, %v8004_v35  ;;  %v8006_v47 = vadd.f32 %v7878_v9, %v7724_v14  ;;  %v8880_v50 = vrot.slane %v8463_v39, 7 }
 0x403   : > { %v8287_v43 = vadd.f32 %v8159_v25, %v8005_v32  ;;  %v8883_v37 = vrot.slane %v8464_v30, 7  ;;  %v8886_v52 = vrot.slane %v8465_v48, 7  ;;  %v19356_v51 = vrot.slane %v17026_v42, 7 }
 0x404   : > { %v8007_v7 = vadd.f32 %v7879_v0, %v7725_v16  ;;  %v8288_v40 = vadd.f32 %v8160_v6, %v8006_v47  ;;  %v8881_v4 = vsel %vm12500_vm9, %v11377_v34, %v8880_v50  ;;  %v8882_v38 = vrot.slane %v8880_v50, 2  ;;  %v20709_v47 = vld [vmem:[#allocation46_spill] sm:$0xff] }
 0x405   : > { %v8885_v35 = vrot.slane %v8883_v37, 2  ;;  %v8888_v41 = vrot.slane %v8886_v52, 2  ;;  %v9270_v19 = vadd.f32 %v8881_v4, %v8286_v27  ;;  %v9424_v9 = vmul.f32 %v19826_v5, %v20696_v31  ;;  %v20708_v27 = vld [vmem:[#allocation16_spill] sm:$0xff]  ;;  %v20711_v4 = vld [vmem:[#allocation27_spill] sm:$0xff] }
 0x406   : > { %v8289_v11 = vadd.f32 %v8161_v60, %v8007_v7  ;;  %v8884_v39 = vsel %vm12500_vm9, %v8882_v38, %v8883_v37  ;;  %v9425_v25 = vmul.f32 %v20282_v36, %v20698_v21  ;;  %v9426_v57 = vmul.f32 %v20283_v22, %v20700_v54  ;;  %v20710_v37 = vld [vmem:[#allocation5_spill] sm:$0xff] }
 0x407   : > { %v9427_v60 = vmul.f32 %v20284_v44, %v20706_v59  ;;  %v8887_v6 = vsel %vm12500_vm9, %v8885_v35, %v8886_v52  ;;  %v8890_v32 = vsel %vm12500_vm9, %v8888_v41, %v19356_v51  ;;  %v9271_v30 = vadd.f32 %v8884_v39, %v8287_v43  ;;  %v20713_v39 = vld [vmem:[#allocation18_spill] sm:$0xff]  ;;  %v20716_v51 = vld [vmem:[#allocation20_spill] sm:$0xff] }
 0x408   : > { %v9552_v0 = vadd.f32 %v9424_v9, %v9270_v19  ;;  %v9272_v14 = vadd.f32 %v8887_v6, %v8288_v40  ;;  %v9273_v16 = vadd.f32 %v8890_v32, %v8289_v11  ;;  %v5059_v48 = vmul.f32 %v20708_v27, %v20572_v24  ;;  %v20732_v27 = vld [vmem:[#allocation15_spill] sm:$0xff] }
 0x409   : > { %v5060_v7 = vmul.f32 %v20289_v58, %v20709_v47  ;;  %v9553_v34 = vadd.f32 %v9425_v25, %v9271_v30  ;;  %v5061_v52 = vmul.f32 %v20291_v56, %v20710_v37  ;;  %v5371_v38 = vmul.f32 %v20711_v4, %v20709_v47 }
 0x40a   : > { %v9707_v50 = vadd.f32 %v14371_v15, %v9552_v0  ;;  %v9554_v35 = vadd.f32 %v9426_v57, %v9272_v14  ;;  %v9555_v43 = vadd.f32 %v9427_v60, %v9273_v16  ;;  %v5372_v19 = vmul.f32 %v20293_v20, %v20710_v37 }
 0x40b   : > { %v20712_v40 = vrot.slane %v16946_v29, 7  ;;  %v9708_v11 = vadd.f32 %v20144_v61, %v9553_v34  ;;  %v5796_v9 = vrot.slane %v5371_v38, 7  ;;  %v6332_v25 = vmul.f32 %v20713_v39, %v20709_v47 }
 0x40c   : > { %v9835_v41 = vmax.f32 %v9707_v50, 0.0  ;;  %v9709_v6 = vadd.f32 %v20145_v49, %v9554_v35  ;;  %v9710_v32 = vadd.f32 %v20360_v12, %v9555_v43  ;;  %v5799_v30 = vrot.slane %v5372_v19, 7  ;;  %v20714_v35 = vld [vmem:[#allocation61_spill] sm:$0xff]  ;;  %v20715_v19 = vld [vmem:[#allocation24_spill] sm:$0xff] }
 0x40d   : > { %v5795_v24 = vrot.slane %v20712_v40, 2  ;;  %v6333_v57 = vmul.f32 %v20114_v1, %v20710_v37  ;;  %v9836_v60 = vmax.f32 %v9708_v11, 0.0  ;;  %v5798_v14 = vrot.slane %v5796_v9, 2 }
 0x40e   : > { %v9963_v0 = vmin.f32 %v9835_v41, 6.0  ;;  %v9837_v16 = vmax.f32 %v9709_v6, 0.0  ;;  %v9838_v34 = vmax.f32 %v9710_v32, 0.0  ;;  %v5801_v50 = vrot.slane %v5799_v30, 2 }
 0x40f   : > { %v5797_v29 = vsel %vm12500_vm9, %v5795_v24, %v5796_v9  ;;  %v9964_v40 = vmin.f32 %v9836_v60, 6.0  ;;  %v5800_v47 = vsel %vm12500_vm9, %v5798_v14, %v5799_v30  ;;  %v6334_v43 = vmul.f32 %v20115_v26, %v20714_v35 }
 0x410   : > { %v6178_v38 = vadd.f32 %v5797_v29, %v5059_v48  ;;  %v6614_v37 = vmul.f32 %v20715_v19, %v20686_v3  ;;  %v9965_v11 = vmin.f32 %v9837_v16, 6.0  ;;  %v9966_v41 = vmin.f32 %v9838_v34, 6.0  ;;  %v20729_v19 = vld [vmem:[#allocation56_spill] sm:$0xff] }
 0x411   : > { %v20717_v4 = vrot.slane %v20716_v51, 7  ;;  %v6179_v9 = vadd.f32 %v5800_v47, %v5060_v7  ;;  %v10436_v6 = vcombine.low %v9963_v0, %v9964_v40  ;;  %v6615_v30 = vmul.f32 %v20591_v46, %v20665_v55 }
 0x412   : > { %v6460_v32 = vadd.f32 %v6332_v25, %v6178_v38  ;;  %v10437_v60 = vcombine.low %v9965_v11, %v9966_v41  ;;  %v6616_v14 = vmul.f32 %v20593_v2, %v20667_v63  ;;  %v6617_v16 = vmul.f32 %v20595_v45, %v20669_v17  ;;  %v20718_v25 = vld [vmem:[#allocation64_spill] sm:$0xff]  ;;  %v20720_v41 = vld [vmem:[#allocation37_spill] sm:$0xff] }
 0x413   : > { %v5803_v24 = vsel %vm12500_vm9, %v5801_v50, %v20717_v4  ;;  %v6461_v29 = vadd.f32 %v6333_v57, %v6179_v9  ;;  %v10444_v51 = vrot.slane %v10436_v6, %v20361_v28  ;;  %v6919_v7 = vmul.f32 %v20596_v62, %v20665_v55  ;;  %v20721_v9 = vld [vmem:[#allocation52_spill] sm:$0xff] }
 0x414   : > { %v6180_v48 = vadd.f32 %v5803_v24, %v5061_v52  ;;  %v6742_v35 = vadd.f32 %v6614_v37, %v6460_v32  ;;  %v10451_v52 = vrot.slane %v10437_v60, %v20361_v28  ;;  %v6745_v0 = vadd.f32 %v6617_v16, %v20718_v25  ;;  %v20722_v60 = vld [vmem:[#allocation41_spill] sm:$0xff]  ;;  %v20723_v16 = vld [vmem:[#allocation183_spill] sm:$0xff] }
 0x415   : > { %v6743_v4 = vadd.f32 %v6615_v30, %v6461_v29  ;;  %v6920_v57 = vmul.f32 %v20597_v18, %v20667_v63  ;;  %v6921_v38 = vmul.f32 %v20658_v23, %v20669_v17  ;;  %v20719_v40 = vrot.slane %v16984_v13, 7 }
 0x416   : > { %v6462_v34 = vadd.f32 %v6334_v43, %v6180_v48  ;;  %v7344_v43 = vrot.slane %v6919_v7, 7  ;;  %v10452_v37 = vcombine.low %v10444_v51, %v10451_v52  ;;  %v7880_v24 = vmul.f32 %v20720_v41, %v20665_v55  ;;  %v20724_v51 = vld [vmem:[#allocation53_spill] sm:$0xff]  ;;  %v20725_v7 = vld [vmem:[#allocation55_spill] sm:$0xff] }
 0x417   : > { %v7343_v47 = vrot.slane %v20719_v40, 2  ;;  %v7347_v11 = vrot.slane %v6920_v57, 7  ;;  %v7881_v6 = vmul.f32 %v20721_v9, %v20667_v63  ;;  %v7350_v30 = vrot.slane %v6921_v38, 7  ;;  %v20726_v40 = vld [vmem:[#allocation104_spill] sm:$0xff] }
 0x418   : > { %v6744_v50 = vadd.f32 %v6616_v14, %v6462_v34  ;;  %v7346_v32 = vrot.slane %v7344_v43, 2  ;;  %v7882_v29 = vmul.f32 %v20722_v60, %v20669_v17  ;;  %11651 = vmatprep.mubr.msk.f32.mxu1 %vm10708_vm10, %v10452_v37  ;;  %v7883_v34 = vmul.f32 %v20724_v51, %v20723_v16  ;;  %v20730_v63 = vld [vmem:[#allocation12_spill] sm:$0xff]  ;;  %v20731_v16 = vld [vmem:[#allocation205_spill] sm:$0xff] }
 0x419   : > { %v7345_v48 = vsel %vm12500_vm9, %v7343_v47, %v7344_v43  ;;  %v7349_v13 = vrot.slane %v7347_v11, 2  ;;  %v8162_v52 = vmul.f32 %v20725_v7, %v20706_v59  ;;  %v7352_v57 = vrot.slane %v7350_v30, 2  ;;  %v20727_v47 = vld [vmem:[#allocation190_spill] sm:$0xff] }
 0x41a   : > { %v7726_v14 = vadd.f32 %v7345_v48, %v6742_v35  ;;  %v7348_v25 = vsel %vm12500_vm9, %v7346_v32, %v7347_v11  ;;  %v8163_v38 = vmul.f32 %v20727_v47, %v20726_v40  ;;  %v20728_v43 = vld [vmem:[#allocation22_spill] sm:$0xff]  ;;  %v8165_v55 = vmul.f32 %v20731_v16, %v20730_v63 }
 0x41b   : > { %v8164_v17 = vmul.f32 %v20729_v19, %v20728_v43  ;;  %v7351_v37 = vsel %vm12500_vm9, %v7349_v13, %v7350_v30  ;;  %v7727_v35 = vadd.f32 %v7348_v25, %v6743_v4  ;;  %v20733_v53 = vrot.slane %v20732_v27, 7  ;;  %v20734_v4 = vld [vmem:[#allocation62_spill] sm:$0xff]  ;;  %v20736_v25 = vld [vmem:[#allocation59_spill] sm:$0xff] }
 0x41c   : > { %v8008_v48 = vadd.f32 %v7880_v24, %v7726_v14  ;;  %v7728_v32 = vadd.f32 %v7351_v37, %v6744_v50  ;;  %v8467_v47 = vmul.f32 %v20704_v10, %v20726_v40  ;;  %v8468_v19 = vmul.f32 %v20705_v33, %v20728_v43  ;;  %v20735_v14 = vld [vmem:[#allocation67_spill] sm:$0xff] }
 0x41d   : > { %v7354_v11 = vsel %vm12500_vm9, %v7352_v57, %v20733_v53  ;;  %v8009_v51 = vadd.f32 %v7881_v6, %v7727_v35  ;;  %v8469_v24 = vmul.f32 %v20734_v4, %v20730_v63  ;;  %v8470_v27 = vmul.f32 %v20736_v25, %v20735_v14  ;;  %v20761_v25 = vld [vmem:[#allocation25_spill] sm:$0xff] }
 0x41e   : > { %v7729_v7 = vadd.f32 %v7354_v11, %v6745_v0  ;;  %v8290_v30 = vadd.f32 %v8162_v52, %v8008_v48  ;;  %v8010_v13 = vadd.f32 %v7882_v29, %v7728_v32  ;;  %v20737_v16 = vrot.slane %v17026_v42, 7 }
 0x41f   : > { %v8892_v50 = vrot.slane %v8467_v47, 7  ;;  %v8291_v37 = vadd.f32 %v8163_v38, %v8009_v51  ;;  %v8895_v10 = vrot.slane %v8468_v19, 7  ;;  %v8898_v60 = vrot.slane %v8469_v24, 7 }
 0x420   : > { %v8891_v53 = vrot.slane %v20737_v16, 2  ;;  %v8011_v57 = vadd.f32 %v7883_v34, %v7729_v7  ;;  %v8292_v9 = vadd.f32 %v8164_v17, %v8010_v13  ;;  %v8901_v52 = vrot.slane %v8470_v27, 7  ;;  %v20738_v16 = vld [vmem:[#allocation172_spill] sm:$0xff]  ;;  %v20739_v13 = vld [vmem:[#allocation11_spill] sm:$0xff] }
 0x421   : > { %v8894_v6 = vrot.slane %v8892_v50, 2  ;;  %v8897_v48 = vrot.slane %v8895_v10, 2  ;;  %v8900_v29 = vrot.slane %v8898_v60, 2  ;;  %v9428_v42 = vmul.f32 %v19826_v5, %v20726_v40 }
 0x422   : > { %v8893_v0 = vsel %vm12500_vm9, %v8891_v53, %v8892_v50  ;;  %v8293_v35 = vadd.f32 %v8165_v55, %v8011_v57  ;;  %v9429_v19 = vmul.f32 %v20282_v36, %v20728_v43  ;;  %v9430_v17 = vmul.f32 %v20283_v22, %v20730_v63  ;;  %v20740_v53 = vld [vmem:[#allocation164_spill] sm:$0xff]  ;;  %v20741_v50 = vld [vmem:[#allocation26_spill] sm:$0xff] }
 0x423   : > { %v9274_v11 = vadd.f32 %v8893_v0, %v8290_v30  ;;  %v8896_v32 = vsel %vm12500_vm9, %v8894_v6, %v8895_v10  ;;  %v8899_v51 = vsel %vm12500_vm9, %v8897_v48, %v8898_v60  ;;  %v8902_v55 = vsel %vm12500_vm9, %v8900_v29, %v8901_v52  ;;  %v20743_v48 = vld [vmem:[#allocation34_spill] sm:$0xff] }
 0x424   : > { %v9275_v34 = vadd.f32 %v8896_v32, %v8291_v37  ;;  %v9431_v7 = vmul.f32 %v20284_v44, %v20735_v14  ;;  %v9276_v10 = vadd.f32 %v8899_v51, %v8292_v9  ;;  %v9277_v47 = vadd.f32 %v8902_v55, %v8293_v35  ;;  %v20742_v9 = vld [vmem:[#allocation31_spill] sm:$0xff] }
 0x425   : > { %v9556_v38 = vadd.f32 %v9428_v42, %v9274_v11  ;;  %v5064_v30 = vmul.f32 %v20289_v58, %v20738_v16  ;;  %v5065_v27 = vmul.f32 %v20291_v56, %v20739_v13  ;;  %v5066_v60 = vmul.f32 %v20741_v50, %v20740_v53 }
 0x426   : > { %v9557_v24 = vadd.f32 %v9429_v19, %v9275_v34  ;;  %v5377_v57 = vmul.f32 %v20293_v20, %v20739_v13  ;;  %v9558_v37 = vadd.f32 %v9430_v17, %v9276_v10  ;;  %v9559_v0 = vadd.f32 %v9431_v7, %v9277_v47  ;;  %v20744_v34 = vld [vmem:[#allocation224_spill] sm:$0xff] }
 0x427   : > { %v9711_v6 = vadd.f32 %v14371_v15, %v9556_v38  ;;  %v5378_v52 = vmul.f32 %v20742_v9, %v20740_v53  ;;  %v17163_v29 = vmul.f32 %v20743_v48, %v20686_v3  ;;  %v6336_v32 = vmul.f32 %v20713_v39, %v20738_v16 }
 0x428   : > { %v9712_v35 = vadd.f32 %v20144_v61, %v9557_v24  ;;  %v5812_v11 = vrot.slane %v5377_v57, 7  ;;  %v9713_v42 = vadd.f32 %v20145_v49, %v9558_v37  ;;  %v9714_v19 = vadd.f32 %v20360_v12, %v9559_v0 }
 0x429   : > { %v9839_v17 = vmax.f32 %v9711_v6, 0.0  ;;  %v5815_v51 = vrot.slane %v5378_v52, 7  ;;  %v19361_v47 = vrot.slane %v17163_v29, 7  ;;  %v6337_v0 = vmul.f32 %v20114_v1, %v20739_v13 }
 0x42a   : > { %v9840_v55 = vmax.f32 %v9712_v35, 0.0  ;;  %v5813_v7 = vsel %vm12500_vm9, %v20744_v34, %v5812_v11  ;;  %v5814_v10 = vrot.slane %v5812_v11, 2  ;;  %v9841_v38 = vmax.f32 %v9713_v42, 0.0  ;;  %v20746_v34 = vld [vmem:[#allocation223_spill] sm:$0xff] }
 0x42b   : > { %v9842_v24 = vmax.f32 %v9714_v19, 0.0  ;;  %v9967_v57 = vmin.f32 %v9839_v17, 6.0  ;;  %v5817_v48 = vrot.slane %v5815_v51, 2  ;;  %v6183_v37 = vadd.f32 %v5813_v7, %v5064_v30 }
 0x42c   : > { %v9968_v9 = vmin.f32 %v9840_v55, 6.0  ;;  %v5816_v16 = vsel %vm12500_vm9, %v5814_v10, %v5815_v51  ;;  %v9969_v6 = vmin.f32 %v9841_v38, 6.0  ;;  %v6338_v17 = vmul.f32 %v20115_v26, %v20740_v53  ;;  %v20745_v55 = vld [vmem:[#allocation32_spill] sm:$0xff] }
 0x42d   : > { %v9970_v52 = vmin.f32 %v9842_v24, 6.0  ;;  %v5819_v35 = vsel %vm12500_vm9, %v5817_v48, %v19361_v47  ;;  %v6184_v11 = vadd.f32 %v5816_v16, %v5065_v27  ;;  %v6339_v51 = vmul.f32 %v20745_v55, %v20686_v3  ;;  %v20757_v55 = vld [vmem:[#allocation85_spill] sm:$0xff] }
 0x42e   : > { %v10453_v42 = vcombine.low %v9967_v57, %v9968_v9  ;;  %v6185_v19 = vadd.f32 %v5819_v35, %v5066_v60  ;;  %v6464_v7 = vadd.f32 %v6336_v32, %v20746_v34  ;;  %v6465_v13 = vadd.f32 %v6337_v0, %v6183_v37  ;;  %v20747_v9 = vld [vmem:[#allocation102_spill] sm:$0xff]  ;;  %v20750_v34 = vld [vmem:[#allocation52_spill] sm:$0xff] }
 0x42f   : > { %v10454_v30 = vcombine.low %v9969_v6, %v9970_v52  ;;  %v6619_v10 = vmul.f32 %v20591_v46, %v20696_v31  ;;  %v6466_v24 = vadd.f32 %v6338_v17, %v6184_v11  ;;  %v6620_v27 = vmul.f32 %v20593_v2, %v20698_v21  ;;  %v20748_v11 = vld [vmem:[#allocation51_spill] sm:$0xff] }
 0x430   : > { %v10461_v38 = vrot.slane %v10453_v42, %v20361_v28  ;;  %v6467_v48 = vadd.f32 %v6339_v51, %v6185_v19  ;;  %v6621_v53 = vmul.f32 %v20595_v45, %v20700_v54  ;;  %v6746_v57 = vadd.f32 %v20747_v9, %v6464_v7  ;;  %v20755_v9 = vld [vmem:[#allocation211_spill] sm:$0xff] }
 0x431   : > { %v10468_v60 = vrot.slane %v10454_v30, %v20361_v28  ;;  %v6747_v16 = vadd.f32 %v6619_v10, %v6465_v13  ;;  %v6748_v32 = vadd.f32 %v6620_v27, %v6466_v24  ;;  %v6924_v37 = vmul.f32 %v20596_v62, %v20696_v31  ;;  %v20751_v10 = vld [vmem:[#allocation41_spill] sm:$0xff]  ;;  %v20753_v27 = vld [vmem:[#allocation99_spill] sm:$0xff]  ;;  %v20758_v13 = vld [vmem:[#allocation190_spill] sm:$0xff] }
 0x432   : > { %v6925_v0 = vmul.f32 %v20597_v18, %v20698_v21  ;;  %v6926_v6 = vmul.f32 %v20658_v23, %v20700_v54  ;;  %v6749_v35 = vadd.f32 %v6621_v53, %v6467_v48  ;;  %v17203_v42 = vmul.f32 %v20748_v11, %v20706_v59  ;;  %v20752_v24 = vld [vmem:[#allocation53_spill] sm:$0xff] }
 0x433   : > { %v10469_v52 = vcombine.low %v10461_v38, %v10468_v60  ;;  %v7884_v19 = vmul.f32 %v20720_v41, %v20696_v31  ;;  %v7357_v17 = vrot.slane %v6924_v37, 7  ;;  %v7885_v7 = vmul.f32 %v20750_v34, %v20698_v21  ;;  %v20754_v60 = vld [vmem:[#allocation55_spill] sm:$0xff]  ;;  %v20759_v21 = vld [vmem:[#allocation209_spill] sm:$0xff] }
 0x434   : > { %20749 = vst [vmem:[#allocation234_spill] sm:$0xff] %v17203_v42  ;;  %v7360_v51 = vrot.slane %v6925_v0, 7  ;;  %v7363_v30 = vrot.slane %v6926_v6, 7  ;;  %v7886_v38 = vmul.f32 %v20751_v10, %v20700_v54  ;;  %v7887_v48 = vmul.f32 %v20752_v24, %v20706_v59  ;;  %v20760_v54 = vld [vmem:[#allocation56_spill] sm:$0xff]  ;;  %v20762_v24 = vld [vmem:[#allocation205_spill] sm:$0xff] }
 0x435   : > { %11652 = vmatmul.mubr.msk.f32.gmra.mxu1 %vm10708_vm10, %v10469_v52  ;;  %v8166_v53 = vmul.f32 %v20754_v60, %v20753_v27  ;;  %v20756_v37 = vrot.slane %v20755_v9, 9  ;;  %v7359_v6 = vrot.slane %v7357_v17, 2  ;;  %v8167_v50 = vmul.f32 %v20758_v13, %v20757_v55 }
 0x436   : > { %v7362_v47 = vrot.slane %v7360_v51, 2  ;;  %v7365_v11 = vrot.slane %v7363_v30, 2  ;;  %v8168_v31 = vmul.f32 %v20760_v54, %v20759_v21  ;;  %v8169_v14 = vmul.f32 %v20762_v24, %v20761_v25  ;;  %v20765_v24 = vld [vmem:[#allocation57_spill] sm:$0xff] }
 0x437   : > { %v7358_v0 = vsel %vm12500_vm9, %v20756_v37, %v7357_v17  ;;  %v7361_v60 = vsel %vm12500_vm9, %v7359_v6, %v7360_v51  ;;  %v20763_v17 = vrot.slane %v17203_v42, 7  ;;  %v20764_v37 = vld [vmem:[#allocation45_spill] sm:$0xff]  ;;  %v8472_v41 = vmul.f32 %v20765_v24, %v20757_v55  ;;  %v20767_v6 = vld [vmem:[#allocation222_spill] sm:$0xff] }
 0x438   : > { %v7730_v52 = vadd.f32 %v7358_v0, %v6746_v57  ;;  %v7364_v9 = vsel %vm12500_vm9, %v7362_v47, %v7363_v30  ;;  %v8471_v0 = vmul.f32 %v20764_v37, %v20753_v27  ;;  %v7731_v13 = vadd.f32 %v7361_v60, %v6747_v16  ;;  %v20766_v30 = vld [vmem:[#allocation210_spill] sm:$0xff] }
 0x439   : > { %v7367_v57 = vsel %vm12500_vm9, %v7365_v11, %v20763_v17  ;;  %v7732_v10 = vadd.f32 %v7364_v9, %v6748_v32  ;;  %v8473_v51 = vmul.f32 %v20705_v33, %v20759_v21  ;;  %v8474_v47 = vmul.f32 %v20734_v4, %v20761_v25 }
 0x43a   : > { %v7733_v54 = vadd.f32 %v7367_v57, %v6749_v35  ;;  %v8012_v34 = vadd.f32 %v7884_v19, %v7730_v52  ;;  %v17245_v42 = vmul.f32 %v20767_v6, %v20766_v30  ;;  %v8013_v11 = vadd.f32 %v7885_v7, %v7731_v13 }
 0x43b   : > { %v8014_v17 = vadd.f32 %v7886_v38, %v7732_v10  ;;  %v11378_v32 = vrot.slane %v8471_v0, 9  ;;  %v8905_v35 = vrot.slane %v8472_v41, 7  ;;  %v8908_v19 = vrot.slane %v8473_v51, 7  ;;  %v20769_v0 = vld [vmem:[#allocation9_spill] sm:$0xff]  ;;  %v20770_v51 = vld [vmem:[#allocation195_spill] sm:$0xff] }
 0x43c   : > { %v8015_v27 = vadd.f32 %v7887_v48, %v7733_v54  ;;  %v8294_v16 = vadd.f32 %v8166_v53, %v8012_v34  ;;  %v8911_v60 = vrot.slane %v8474_v47, 7  ;;  %v8295_v52 = vadd.f32 %v8167_v50, %v8013_v11  ;;  %v20768_v48 = vld [vmem:[#allocation16_spill] sm:$0xff]  ;;  %v20771_v47 = vld [vmem:[#allocation27_spill] sm:$0xff] }
 0x43d   : > { %v8296_v9 = vadd.f32 %v8168_v31, %v8014_v17  ;;  %v19371_v37 = vrot.slane %v17245_v42, 7  ;;  %v8906_v4 = vsel %vm12500_vm9, %v11378_v32, %v8905_v35  ;;  %v8907_v33 = vrot.slane %v8905_v35, 2 }
 0x43e   : > { %v8297_v57 = vadd.f32 %v8169_v14, %v8015_v27  ;;  %v8910_v24 = vrot.slane %v8908_v19, 2  ;;  %v8913_v6 = vrot.slane %v8911_v60, 2  ;;  %v9278_v23 = vadd.f32 %v8906_v4, %v8294_v16 }
 0x43f   : > { %v9432_v54 = vmul.f32 %v19826_v5, %v20757_v55  ;;  %v9433_v41 = vmul.f32 %v20282_v36, %v20759_v21  ;;  %v9434_v50 = vmul.f32 %v20283_v22, %v20761_v25  ;;  %v8909_v31 = vsel %vm12500_vm9, %v8907_v33, %v8908_v19 }
 0x440   : > { %v8912_v14 = vsel %vm12500_vm9, %v8910_v24, %v8911_v60  ;;  %v8915_v4 = vsel %vm12500_vm9, %v8913_v6, %v19371_v37  ;;  %v9435_v34 = vmul.f32 %v20284_v44, %v20766_v30  ;;  %v9279_v7 = vadd.f32 %v8909_v31, %v8295_v52  ;;  %v20790_v37 = vld [vmem:[#allocation56_spill] sm:$0xff] }
 0x441   : > { %v9280_v13 = vadd.f32 %v8912_v14, %v8296_v9  ;;  %v9281_v10 = vadd.f32 %v8915_v4, %v8297_v57  ;;  %v9560_v38 = vadd.f32 %v9432_v54, %v9278_v23  ;;  %v5067_v53 = vmul.f32 %v20768_v48, %v20686_v3 }
 0x442   : > { %v5068_v33 = vmul.f32 %v20289_v58, %v20769_v0  ;;  %v5069_v24 = vmul.f32 %v20291_v56, %v20770_v51  ;;  %v5380_v11 = vmul.f32 %v20771_v47, %v20769_v0  ;;  %v9561_v6 = vadd.f32 %v9433_v41, %v9279_v7 }
 0x443   : > { %v9562_v17 = vadd.f32 %v9434_v50, %v9280_v13  ;;  %v9563_v27 = vadd.f32 %v9435_v34, %v9281_v10  ;;  %v9715_v16 = vadd.f32 %v14371_v15, %v9560_v38  ;;  %v5381_v23 = vmul.f32 %v20293_v20, %v20770_v51  ;;  %v20773_v38 = vld [vmem:[#allocation159_spill] sm:$0xff] }
 0x444   : > { %v20772_v32 = vrot.slane %v17163_v29, 7  ;;  %v5821_v35 = vrot.slane %v5380_v11, 7  ;;  %v6340_v19 = vmul.f32 %v20713_v39, %v20769_v0  ;;  %v9716_v60 = vadd.f32 %v20144_v61, %v9561_v6 }
 0x445   : > { %v9717_v52 = vadd.f32 %v20145_v49, %v9562_v17  ;;  %v9718_v9 = vadd.f32 %v20360_v12, %v9563_v27  ;;  %v9843_v57 = vmax.f32 %v9715_v16, 0.0  ;;  %v5824_v50 = vrot.slane %v5381_v23, 7  ;;  %v20774_v16 = vld [vmem:[#allocation185_spill] sm:$0xff] }
 0x446   : > { %v5820_v3 = vrot.slane %v20772_v32, 2  ;;  %v5823_v41 = vrot.slane %v5821_v35, 2  ;;  %v6341_v29 = vmul.f32 %v20114_v1, %v20770_v51  ;;  %v9844_v31 = vmax.f32 %v9716_v60, 0.0 }
 0x447   : > { %v9845_v14 = vmax.f32 %v9717_v52, 0.0  ;;  %v9846_v4 = vmax.f32 %v9718_v9, 0.0  ;;  %v9971_v34 = vmin.f32 %v9843_v57, 6.0  ;;  %v5826_v13 = vrot.slane %v5824_v50, 2 }
 0x448   : > { %v5822_v54 = vsel %vm12500_vm9, %v5820_v3, %v5821_v35  ;;  %v5825_v7 = vsel %vm12500_vm9, %v5823_v41, %v5824_v50  ;;  %v6342_v0 = vmul.f32 %v20115_v26, %v20773_v38  ;;  %v9972_v11 = vmin.f32 %v9844_v31, 6.0  ;;  %v20776_v3 = vld [vmem:[#allocation24_spill] sm:$0xff] }
 0x449   : > { %v6186_v10 = vadd.f32 %v5822_v54, %v5067_v53  ;;  %v9973_v6 = vmin.f32 %v9845_v14, 6.0  ;;  %v9974_v17 = vmin.f32 %v9846_v4, 6.0  ;;  %v6187_v27 = vadd.f32 %v5825_v7, %v5068_v33 }
 0x44a   : > { %v20775_v23 = vrot.slane %v20774_v16, 7  ;;  %v6622_v35 = vmul.f32 %v20776_v3, %v20706_v59  ;;  %v6623_v60 = vmul.f32 %v20591_v46, %v20726_v40  ;;  %v10470_v53 = vcombine.low %v9971_v34, %v9972_v11  ;;  %v20777_v34 = vld [vmem:[#allocation189_spill] sm:$0xff] }
 0x44b   : > { %v6468_v32 = vadd.f32 %v6340_v19, %v6186_v10  ;;  %v10471_v52 = vcombine.low %v9973_v6, %v9974_v17  ;;  %v6469_v57 = vadd.f32 %v6341_v29, %v6187_v27  ;;  %v6624_v54 = vmul.f32 %v20593_v2, %v20728_v43  ;;  %v20778_v29 = vld [vmem:[#allocation49_spill] sm:$0xff]  ;;  %v20779_v10 = vld [vmem:[#allocation234_spill] sm:$0xff] }
 0x44c   : > { %v5828_v51 = vsel %vm12500_vm9, %v5826_v13, %v20775_v23  ;;  %v6625_v33 = vmul.f32 %v20595_v45, %v20730_v63  ;;  %v6928_v19 = vmul.f32 %v20596_v62, %v20726_v40  ;;  %v10478_v50 = vrot.slane %v10470_v53, %v20361_v28  ;;  %v20781_v16 = vld [vmem:[#allocation37_spill] sm:$0xff] }
 0x44d   : > { %v6188_v9 = vadd.f32 %v5828_v51, %v5069_v24  ;;  %v6750_v41 = vadd.f32 %v6622_v35, %v6468_v32  ;;  %v10485_v31 = vrot.slane %v10471_v52, %v20361_v28  ;;  %v6751_v4 = vadd.f32 %v6623_v60, %v6469_v57  ;;  %v20782_v32 = vld [vmem:[#allocation52_spill] sm:$0xff]  ;;  %v20783_v60 = vld [vmem:[#allocation41_spill] sm:$0xff]  ;;  %v20784_v57 = vld [vmem:[#allocation67_spill] sm:$0xff] }
 0x44e   : > { %v6753_v7 = vadd.f32 %v6625_v33, %v20777_v34  ;;  %v6929_v24 = vmul.f32 %v20597_v18, %v20728_v43  ;;  %v6930_v13 = vmul.f32 %v20778_v29, %v20730_v63  ;;  %v20780_v38 = vrot.slane %v20779_v10, 7 }
 0x44f   : > { %v6470_v14 = vadd.f32 %v6342_v0, %v6188_v9  ;;  %v10486_v6 = vcombine.low %v10478_v50, %v10485_v31  ;;  %v7369_v27 = vrot.slane %v6928_v19, 7  ;;  %v7888_v23 = vmul.f32 %v20781_v16, %v20726_v40  ;;  %v20786_v19 = vld [vmem:[#allocation55_spill] sm:$0xff] }
 0x450   : > { %v7368_v11 = vrot.slane %v20780_v38, 2  ;;  %v7372_v51 = vrot.slane %v6929_v24, 7  ;;  %v7375_v0 = vrot.slane %v6930_v13, 7  ;;  %v7889_v35 = vmul.f32 %v20782_v32, %v20728_v43  ;;  %v20787_v24 = vld [vmem:[#allocation212_spill] sm:$0xff]  ;;  %v20788_v13 = vld [vmem:[#allocation190_spill] sm:$0xff]  ;;  %v20794_v40 = vld [vmem:[#allocation19_spill] sm:$0xff] }
 0x451   : > { %v6752_v17 = vadd.f32 %v6624_v54, %v6470_v14  ;;  %v7890_v53 = vmul.f32 %v20783_v60, %v20730_v63  ;;  %11654 = vmatprep.mubr.msk.f32.mxu1 %vm10708_vm10, %v10486_v6  ;;  %v7371_v9 = vrot.slane %v7369_v27, 2  ;;  %v20785_v54 = vld [vmem:[#allocation53_spill] sm:$0xff]  ;;  %v8170_v50 = vmul.f32 %v20786_v19, %v20766_v30  ;;  %v20789_v6 = vld [vmem:[#allocation30_spill] sm:$0xff]  ;;  %v20798_v32 = vld [vmem:[#allocation68_spill] sm:$0xff] }
 0x452   : > { %v7370_v52 = vsel %vm12500_vm9, %v7368_v11, %v7369_v27  ;;  %v7891_v33 = vmul.f32 %v20785_v54, %v20784_v57  ;;  %v7374_v31 = vrot.slane %v7372_v51, 2  ;;  %v7377_v14 = vrot.slane %v7375_v0, 2  ;;  %v20791_v11 = vld [vmem:[#allocation70_spill] sm:$0xff]  ;;  %v20792_v27 = vld [vmem:[#allocation205_spill] sm:$0xff]  ;;  %v20799_v16 = vld [vmem:[#allocation59_spill] sm:$0xff] }
 0x453   : > { %v7734_v34 = vadd.f32 %v7370_v52, %v6750_v41  ;;  %v8171_v10 = vmul.f32 %v20788_v13, %v20787_v24  ;;  %v7373_v38 = vsel %vm12500_vm9, %v7371_v9, %v7372_v51  ;;  %v8172_v3 = vmul.f32 %v20790_v37, %v20789_v6  ;;  %v20793_v57 = vld [vmem:[#allocation57_spill] sm:$0xff]  ;;  %v20796_v37 = vld [vmem:[#allocation58_spill] sm:$0xff] }
 0x454   : > { %v8173_v63 = vmul.f32 %v20792_v27, %v20791_v11  ;;  %v8476_v47 = vmul.f32 %v20793_v57, %v20787_v24  ;;  %v7376_v43 = vsel %vm12500_vm9, %v7374_v31, %v7375_v0  ;;  %v20795_v41 = vrot.slane %v20794_v40, 7  ;;  %v20797_v27 = vld [vmem:[#allocation62_spill] sm:$0xff] }
 0x455   : > { %v7735_v48 = vadd.f32 %v7373_v38, %v6751_v4  ;;  %v8016_v13 = vadd.f32 %v7888_v23, %v7734_v34  ;;  %v7736_v51 = vadd.f32 %v7376_v43, %v6752_v17  ;;  %v8477_v19 = vmul.f32 %v20796_v37, %v20789_v6 }
 0x456   : > { %v7379_v52 = vsel %vm12500_vm9, %v7377_v14, %v20795_v41  ;;  %v8478_v54 = vmul.f32 %v20797_v27, %v20791_v11  ;;  %v8479_v0 = vmul.f32 %v20799_v16, %v20798_v32  ;;  %v20800_v40 = vrot.slane %v17245_v42, 7 }
 0x457   : > { %v7737_v9 = vadd.f32 %v7379_v52, %v6753_v7  ;;  %v8017_v60 = vadd.f32 %v7889_v35, %v7735_v48  ;;  %v8298_v57 = vadd.f32 %v8170_v50, %v8016_v13  ;;  %v8018_v30 = vadd.f32 %v7890_v53, %v7736_v51  ;;  %v20802_v52 = vld [vmem:[#allocation175_spill] sm:$0xff] }
 0x458   : > { %v8916_v31 = vrot.slane %v20800_v40, 2  ;;  %v8917_v4 = vrot.slane %v8476_v47, 7  ;;  %v8920_v23 = vrot.slane %v8477_v19, 7  ;;  %v8923_v7 = vrot.slane %v8478_v54, 7 }
 0x459   : > { %v8019_v14 = vadd.f32 %v7891_v33, %v7737_v9  ;;  %v8299_v43 = vadd.f32 %v8171_v10, %v8017_v60  ;;  %v8926_v17 = vrot.slane %v8479_v0, 7  ;;  %v9436_v34 = vmul.f32 %v19826_v5, %v20787_v24  ;;  %v20803_v9 = vld [vmem:[#allocation214_spill] sm:$0xff] }
 0x45a   : > { %v8300_v38 = vadd.f32 %v8172_v3, %v8018_v30  ;;  %v8918_v48 = vsel %vm12500_vm9, %v8916_v31, %v8917_v4  ;;  %v8919_v35 = vrot.slane %v8917_v4, 2  ;;  %v8922_v16 = vrot.slane %v8920_v23, 2  ;;  %v20804_v0 = vld [vmem:[#allocation26_spill] sm:$0xff] }
 0x45b   : > { %v8301_v41 = vadd.f32 %v8173_v63, %v8019_v14  ;;  %v8925_v50 = vrot.slane %v8923_v7, 2  ;;  %v9282_v42 = vadd.f32 %v8918_v48, %v8298_v57  ;;  %v9437_v53 = vmul.f32 %v20282_v36, %v20789_v6  ;;  %v20801_v63 = vld [vmem:[#allocation65_spill] sm:$0xff] }
 0x45c   : > { %v8921_v47 = vsel %vm12500_vm9, %v8919_v35, %v8920_v23  ;;  %v9438_v60 = vmul.f32 %v20283_v22, %v20791_v11  ;;  %v9439_v30 = vmul.f32 %v20284_v44, %v20798_v32  ;;  %v5072_v3 = vmul.f32 %v20289_v58, %v20801_v63  ;;  %v20805_v23 = vld [vmem:[#allocation31_spill] sm:$0xff] }
 0x45d   : > { %v8924_v54 = vsel %vm12500_vm9, %v8922_v16, %v8923_v7  ;;  %v8927_v33 = vsel %vm12500_vm9, %v8925_v50, %v8926_v17  ;;  %v9283_v19 = vadd.f32 %v8921_v47, %v8299_v43  ;;  %v9564_v13 = vadd.f32 %v9436_v34, %v9282_v42  ;;  %v20806_v34 = vld [vmem:[#allocation34_spill] sm:$0xff] }
 0x45e   : > { %v9284_v10 = vadd.f32 %v8924_v54, %v8300_v38  ;;  %v9285_v57 = vadd.f32 %v8927_v33, %v8301_v41  ;;  %v5073_v51 = vmul.f32 %v20291_v56, %v20802_v52  ;;  %v5074_v40 = vmul.f32 %v20804_v0, %v20803_v9  ;;  %v20807_v33 = vld [vmem:[#allocation219_spill] sm:$0xff] }
 0x45f   : > { %v9565_v31 = vadd.f32 %v9437_v53, %v9283_v19  ;;  %v9719_v14 = vadd.f32 %v14371_v15, %v9564_v13  ;;  %v5386_v4 = vmul.f32 %v20293_v20, %v20802_v52  ;;  %v5387_v7 = vmul.f32 %v20805_v23, %v20803_v9  ;;  %v20823_v23 = vld [vmem:[#allocation190_spill] sm:$0xff] }
 0x460   : > { %v9566_v17 = vadd.f32 %v9438_v60, %v9284_v10  ;;  %v9567_v43 = vadd.f32 %v9439_v30, %v9285_v57  ;;  %v17381_v38 = vmul.f32 %v20806_v34, %v20706_v59  ;;  %v6344_v41 = vmul.f32 %v20713_v39, %v20801_v63  ;;  %v20822_v34 = vld [vmem:[#allocation117_spill] sm:$0xff] }
 0x461   : > { %v9720_v48 = vadd.f32 %v20144_v61, %v9565_v31  ;;  %v9847_v35 = vmax.f32 %v9719_v14, 0.0  ;;  %v5837_v16 = vrot.slane %v5386_v4, 7  ;;  %v5840_v50 = vrot.slane %v5387_v7, 7 }
 0x462   : > { %v9721_v42 = vadd.f32 %v20145_v49, %v9566_v17  ;;  %v9722_v53 = vadd.f32 %v20360_v12, %v9567_v43  ;;  %v19376_v47 = vrot.slane %v17381_v38, 7  ;;  %v6345_v60 = vmul.f32 %v20114_v1, %v20802_v52  ;;  %v20808_v52 = vld [vmem:[#allocation32_spill] sm:$0xff] }
 0x463   : > { %v9848_v30 = vmax.f32 %v9720_v48, 0.0  ;;  %v9975_v54 = vmin.f32 %v9847_v35, 6.0  ;;  %v5838_v63 = vsel %vm12500_vm9, %v20807_v33, %v5837_v16  ;;  %v5839_v19 = vrot.slane %v5837_v16, 2 }
 0x464   : > { %v9849_v13 = vmax.f32 %v9721_v42, 0.0  ;;  %v9850_v10 = vmax.f32 %v9722_v53, 0.0  ;;  %v5842_v57 = vrot.slane %v5840_v50, 2  ;;  %v6191_v31 = vadd.f32 %v5838_v63, %v5072_v3  ;;  %v20809_v53 = vld [vmem:[#allocation188_spill] sm:$0xff] }
 0x465   : > { %v9976_v14 = vmin.f32 %v9848_v30, 6.0  ;;  %v5841_v4 = vsel %vm12500_vm9, %v5839_v19, %v5840_v50  ;;  %v6346_v7 = vmul.f32 %v20115_v26, %v20803_v9  ;;  %v6347_v17 = vmul.f32 %v20808_v52, %v20706_v59 }
 0x466   : > { %v9977_v43 = vmin.f32 %v9849_v13, 6.0  ;;  %v9978_v48 = vmin.f32 %v9850_v10, 6.0  ;;  %v5844_v35 = vsel %vm12500_vm9, %v5842_v57, %v19376_v47  ;;  %v6192_v16 = vadd.f32 %v5841_v4, %v5073_v51  ;;  %v20810_v51 = vld [vmem:[#allocation63_spill] sm:$0xff]  ;;  %v20820_v47 = vld [vmem:[#allocation29_spill] sm:$0xff] }
 0x467   : > { %v10487_v42 = vcombine.low %v9975_v54, %v9976_v14  ;;  %v6193_v3 = vadd.f32 %v5844_v35, %v5074_v40  ;;  %v6472_v30 = vadd.f32 %v6344_v41, %v20809_v53  ;;  %v6473_v33 = vadd.f32 %v6345_v60, %v6191_v31  ;;  %v20815_v53 = vld [vmem:[#allocation52_spill] sm:$0xff] }
 0x468   : > { %v10488_v50 = vcombine.low %v9977_v43, %v9978_v48  ;;  %v6474_v63 = vadd.f32 %v6346_v7, %v6192_v16  ;;  %v6627_v9 = vmul.f32 %v20591_v46, %v20757_v55  ;;  %v6628_v19 = vmul.f32 %v20593_v2, %v20759_v21  ;;  %v20812_v43 = vld [vmem:[#allocation51_spill] sm:$0xff] }
 0x469   : > { %v10495_v13 = vrot.slane %v10487_v42, %v20361_v28  ;;  %v6475_v10 = vadd.f32 %v6347_v17, %v6193_v3  ;;  %v6629_v57 = vmul.f32 %v20595_v45, %v20761_v25  ;;  %v6754_v54 = vadd.f32 %v20810_v51, %v6472_v30  ;;  %v20811_v17 = vld [vmem:[#allocation210_spill] sm:$0xff]  ;;  %v20814_v42 = vld [vmem:[#allocation37_spill] sm:$0xff] }
 0x46a   : > { %v10502_v40 = vrot.slane %v10488_v50, %v20361_v28  ;;  %v6755_v41 = vadd.f32 %v6627_v9, %v6473_v33  ;;  %v6756_v60 = vadd.f32 %v6628_v19, %v6474_v63  ;;  %v6933_v31 = vmul.f32 %v20596_v62, %v20757_v55  ;;  %v20816_v9 = vld [vmem:[#allocation41_spill] sm:$0xff] }
 0x46b   : > { %v6757_v14 = vadd.f32 %v6629_v57, %v6475_v10  ;;  %v6934_v4 = vmul.f32 %v20597_v18, %v20759_v21  ;;  %v6935_v7 = vmul.f32 %v20778_v29, %v20761_v25  ;;  %v17422_v48 = vmul.f32 %v20812_v43, %v20811_v17  ;;  %v20817_v10 = vld [vmem:[#allocation69_spill] sm:$0xff]  ;;  %v20821_v43 = vld [vmem:[#allocation55_spill] sm:$0xff] }
 0x46c   : > { %v10503_v35 = vcombine.low %v10495_v13, %v10502_v40  ;;  %v7382_v16 = vrot.slane %v6933_v31, 7  ;;  %v7892_v3 = vmul.f32 %v20814_v42, %v20757_v55  ;;  %v7893_v30 = vmul.f32 %v20815_v53, %v20759_v21  ;;  %v20819_v40 = vld [vmem:[#allocation53_spill] sm:$0xff]  ;;  %v20830_v53 = vld [vmem:[#allocation74_spill] sm:$0xff] }
 0x46d   : > { %20813 = vst [vmem:[#allocation166_spill] sm:$0xff] %v17422_v48  ;;  %v7385_v33 = vrot.slane %v6934_v4, 7  ;;  %v7388_v50 = vrot.slane %v6935_v7, 7  ;;  %v7894_v19 = vmul.f32 %v20816_v9, %v20761_v25  ;;  %v20818_v57 = vrot.slane %v20817_v10, 9  ;;  %v20824_v10 = vld [vmem:[#allocation139_spill] sm:$0xff]  ;;  %v20825_v25 = vld [vmem:[#allocation56_spill] sm:$0xff] }
 0x46e   : > { %11655 = vmatmul.mubr.msk.f32.gmra.mxu1 %vm10708_vm10, %v10503_v35  ;;  %v7384_v51 = vrot.slane %v7382_v16, 2  ;;  %v7895_v31 = vmul.f32 %v20819_v40, %v20811_v17  ;;  %v8174_v4 = vmul.f32 %v20821_v43, %v20820_v47  ;;  %v8175_v0 = vmul.f32 %v20823_v23, %v20822_v34  ;;  %v20828_v40 = vld [vmem:[#allocation57_spill] sm:$0xff]  ;;  %v20831_v42 = vld [vmem:[#allocation222_spill] sm:$0xff] }
 0x46f   : > { %v7383_v13 = vsel %vm12500_vm9, %v20818_v57, %v7382_v16  ;;  %v7387_v7 = vrot.slane %v7385_v33, 2  ;;  %v7390_v52 = vrot.slane %v7388_v50, 2  ;;  %v8176_v21 = vmul.f32 %v20825_v25, %v20824_v10  ;;  %v20826_v57 = vld [vmem:[#allocation218_spill] sm:$0xff]  ;;  %v20827_v16 = vld [vmem:[#allocation205_spill] sm:$0xff] }
 0x470   : > { %v7738_v63 = vadd.f32 %v7383_v13, %v6754_v54  ;;  %v7386_v35 = vsel %vm12500_vm9, %v7384_v51, %v7385_v33  ;;  %v8177_v55 = vmul.f32 %v20827_v16, %v20826_v57  ;;  %v8481_v32 = vmul.f32 %v20828_v40, %v20822_v34 }
 0x471   : > { %v7389_v47 = vsel %vm12500_vm9, %v7387_v7, %v7388_v50  ;;  %v20829_v54 = vrot.slane %v17422_v48, 7  ;;  %v7739_v23 = vadd.f32 %v7386_v35, %v6755_v41  ;;  %v8482_v25 = vmul.f32 %v20796_v37, %v20824_v10  ;;  %v20832_v7 = vld [vmem:[#allocation2_spill] sm:$0xff] }
 0x472   : > { %v8020_v43 = vadd.f32 %v7892_v3, %v7738_v63  ;;  %v7740_v33 = vadd.f32 %v7389_v47, %v6756_v60  ;;  %v8483_v16 = vmul.f32 %v20797_v27, %v20826_v57  ;;  %v17462_v50 = vmul.f32 %v20831_v42, %v20830_v53  ;;  %v20858_v42 = vld [vmem:[#allocation191_spill] sm:$0xff] }
 0x473   : > { %v7392_v13 = vsel %vm12500_vm9, %v7390_v52, %v20829_v54  ;;  %v8021_v9 = vadd.f32 %v7893_v30, %v7739_v23  ;;  %v11379_v48 = vrot.slane %v20832_v7, 9  ;;  %v8930_v41 = vrot.slane %v8481_v32, 7  ;;  %v20835_v7 = vld [vmem:[#allocation22_spill] sm:$0xff] }
 0x474   : > { %v7741_v51 = vadd.f32 %v7392_v13, %v6757_v14  ;;  %v8302_v40 = vadd.f32 %v8174_v4, %v8020_v43  ;;  %v8022_v29 = vadd.f32 %v7894_v19, %v7740_v33  ;;  %v8933_v3 = vrot.slane %v8482_v25, 7  ;;  %v20834_v33 = vld [vmem:[#allocation104_spill] sm:$0xff] }
 0x475   : > { %v8303_v60 = vadd.f32 %v8175_v0, %v8021_v9  ;;  %v8936_v14 = vrot.slane %v8483_v16, 7  ;;  %v19383_v63 = vrot.slane %v17462_v50, 7  ;;  %v9440_v35 = vmul.f32 %v19826_v5, %v20822_v34 }
 0x476   : > { %v8023_v52 = vadd.f32 %v7895_v31, %v7741_v51  ;;  %v8304_v47 = vadd.f32 %v8176_v21, %v8022_v29  ;;  %v8931_v43 = vsel %vm12500_vm9, %v11379_v48, %v8930_v41  ;;  %v8932_v30 = vrot.slane %v8930_v41, 2 }
 0x477   : > { %v8935_v4 = vrot.slane %v8933_v3, 2  ;;  %v8938_v54 = vrot.slane %v8936_v14, 2  ;;  %v9286_v13 = vadd.f32 %v8931_v43, %v8302_v40  ;;  %v9441_v32 = vmul.f32 %v20282_v36, %v20824_v10 }
 0x478   : > { %v8305_v23 = vadd.f32 %v8177_v55, %v8023_v52  ;;  %v8934_v25 = vsel %vm12500_vm9, %v8932_v30, %v8933_v3  ;;  %v9442_v0 = vmul.f32 %v20283_v22, %v20826_v57  ;;  %v9443_v21 = vmul.f32 %v20284_v44, %v20830_v53  ;;  %v20833_v55 = vld [vmem:[#allocation16_spill] sm:$0xff]  ;;  %v20836_v3 = vld [vmem:[#allocation27_spill] sm:$0xff] }
 0x479   : > { %v5075_v29 = vmul.f32 %v20833_v55, %v20706_v59  ;;  %v8937_v48 = vsel %vm12500_vm9, %v8935_v4, %v8936_v14  ;;  %v8940_v9 = vsel %vm12500_vm9, %v8938_v54, %v19383_v63  ;;  %v9287_v19 = vadd.f32 %v8934_v25, %v8303_v60 }
 0x47a   : > { %v9568_v40 = vadd.f32 %v9440_v35, %v9286_v13  ;;  %v9288_v31 = vadd.f32 %v8937_v48, %v8304_v47  ;;  %v9289_v16 = vadd.f32 %v8940_v9, %v8305_v23  ;;  %v5076_v51 = vmul.f32 %v20289_v58, %v20834_v33 }
 0x47b   : > { %v5077_v52 = vmul.f32 %v20291_v56, %v20835_v7  ;;  %v9569_v41 = vadd.f32 %v9441_v32, %v9287_v19  ;;  %v5389_v14 = vmul.f32 %v20836_v3, %v20834_v33  ;;  %v5390_v43 = vmul.f32 %v20293_v20, %v20835_v7  ;;  %v20855_v3 = vld [vmem:[#allocation56_spill] sm:$0xff] }
 0x47c   : > { %v9723_v59 = vadd.f32 %v14371_v15, %v9568_v40  ;;  %v9570_v30 = vadd.f32 %v9442_v0, %v9288_v31  ;;  %v9571_v60 = vadd.f32 %v9443_v21, %v9289_v16  ;;  %v20837_v35 = vrot.slane %v17381_v38, 7  ;;  %v20838_v0 = vld [vmem:[#allocation12_spill] sm:$0xff] }
 0x47d   : > { %v6348_v23 = vmul.f32 %v20713_v39, %v20834_v33  ;;  %v9724_v4 = vadd.f32 %v20144_v61, %v9569_v41  ;;  %v5846_v13 = vrot.slane %v5389_v14, 7  ;;  %v5849_v32 = vrot.slane %v5390_v43, 7  ;;  %v20854_v39 = vld [vmem:[#allocation231_spill] sm:$0xff] }
 0x47e   : > { %v5845_v47 = vrot.slane %v20837_v35, 2  ;;  %v9851_v54 = vmax.f32 %v9723_v59, 0.0  ;;  %v9725_v25 = vadd.f32 %v20145_v49, %v9570_v30  ;;  %v9726_v48 = vadd.f32 %v20360_v12, %v9571_v60  ;;  %v20839_v30 = vld [vmem:[#allocation24_spill] sm:$0xff] }
 0x47f   : > { %v6349_v9 = vmul.f32 %v20114_v1, %v20835_v7  ;;  %v6350_v21 = vmul.f32 %v20115_v26, %v20838_v0  ;;  %v9852_v38 = vmax.f32 %v9724_v4, 0.0  ;;  %v5848_v31 = vrot.slane %v5846_v13, 2 }
 0x480   : > { %v9979_v19 = vmin.f32 %v9851_v54, 6.0  ;;  %v5847_v40 = vsel %vm12500_vm9, %v5845_v47, %v5846_v13  ;;  %v9853_v16 = vmax.f32 %v9725_v25, 0.0  ;;  %v9854_v33 = vmax.f32 %v9726_v48, 0.0  ;;  %v20840_v54 = vld [vmem:[#allocation196_spill] sm:$0xff] }
 0x481   : > { %v5851_v41 = vrot.slane %v5849_v32, 2  ;;  %v6194_v59 = vadd.f32 %v5847_v40, %v5075_v29  ;;  %v9980_v14 = vmin.f32 %v9852_v38, 6.0  ;;  %v5850_v43 = vsel %vm12500_vm9, %v5848_v31, %v5849_v32 }
 0x482   : > { %v6630_v7 = vmul.f32 %v20839_v30, %v20811_v17  ;;  %v6631_v60 = vmul.f32 %v20591_v46, %v20787_v24  ;;  %v9981_v35 = vmin.f32 %v9853_v16, 6.0  ;;  %v9982_v4 = vmin.f32 %v9854_v33, 6.0 }
 0x483   : > { %v20841_v0 = vrot.slane %v20840_v54, 7  ;;  %v6195_v13 = vadd.f32 %v5850_v43, %v5076_v51  ;;  %v10504_v25 = vcombine.low %v9979_v19, %v9980_v14  ;;  %v6476_v48 = vadd.f32 %v6348_v23, %v6194_v59  ;;  %v20842_v19 = vld [vmem:[#allocation151_spill] sm:$0xff]  ;;  %v20844_v43 = vld [vmem:[#allocation166_spill] sm:$0xff] }
 0x484   : > { %v6632_v32 = vmul.f32 %v20593_v2, %v20789_v6  ;;  %v10505_v38 = vcombine.low %v9981_v35, %v9982_v4  ;;  %v6633_v31 = vmul.f32 %v20595_v45, %v20791_v11  ;;  %v6937_v16 = vmul.f32 %v20596_v62, %v20787_v24 }
 0x485   : > { %v5853_v47 = vsel %vm12500_vm9, %v5851_v41, %v20841_v0  ;;  %v6477_v40 = vadd.f32 %v6349_v9, %v6195_v13  ;;  %v10512_v33 = vrot.slane %v10504_v25, %v20361_v28  ;;  %v6758_v63 = vadd.f32 %v6630_v7, %v6476_v48  ;;  %v20843_v9 = vld [vmem:[#allocation49_spill] sm:$0xff] }
 0x486   : > { %v6196_v29 = vadd.f32 %v5853_v47, %v5077_v52  ;;  %v6938_v51 = vmul.f32 %v20597_v18, %v20789_v6  ;;  %v10519_v52 = vrot.slane %v10505_v38, %v20361_v28  ;;  %v6761_v41 = vadd.f32 %v6633_v31, %v20842_v19  ;;  %v20846_v7 = vld [vmem:[#allocation37_spill] sm:$0xff]  ;;  %v20851_v19 = vld [vmem:[#allocation55_spill] sm:$0xff] }
 0x487   : > { %v6759_v23 = vadd.f32 %v6631_v60, %v6477_v40  ;;  %v6939_v59 = vmul.f32 %v20843_v9, %v20791_v11  ;;  %v20845_v35 = vrot.slane %v20844_v43, 7  ;;  %v7394_v0 = vrot.slane %v6937_v16, 7 }
 0x488   : > { %v6478_v54 = vadd.f32 %v6350_v21, %v6196_v29  ;;  %v7397_v47 = vrot.slane %v6938_v51, 7  ;;  %v10520_v13 = vcombine.low %v10512_v33, %v10519_v52  ;;  %v7896_v25 = vmul.f32 %v20846_v7, %v20787_v24  ;;  %v20847_v29 = vld [vmem:[#allocation52_spill] sm:$0xff]  ;;  %v20850_v51 = vld [vmem:[#allocation53_spill] sm:$0xff] }
 0x489   : > { %v7393_v4 = vrot.slane %v20845_v35, 2  ;;  %v7400_v21 = vrot.slane %v6939_v59, 7  ;;  %v7897_v48 = vmul.f32 %v20847_v29, %v20789_v6  ;;  %v7396_v38 = vrot.slane %v7394_v0, 2  ;;  %v20849_v33 = vld [vmem:[#allocation68_spill] sm:$0xff] }
 0x48a   : > { %v6760_v14 = vadd.f32 %v6632_v32, %v6478_v54  ;;  %v7399_v40 = vrot.slane %v7397_v47, 2  ;;  %v20848_v32 = vld [vmem:[#allocation41_spill] sm:$0xff]  ;;  %11657 = vmatprep.mubr.msk.f32.mxu1 %vm10708_vm10, %v10520_v13  ;;  %v7899_v52 = vmul.f32 %v20850_v51, %v20849_v33  ;;  %v8178_v59 = vmul.f32 %v20851_v19, %v20830_v53 }
 0x48b   : > { %v7395_v60 = vsel %vm12500_vm9, %v7393_v4, %v7394_v0  ;;  %v7898_v31 = vmul.f32 %v20848_v32, %v20791_v11  ;;  %v7402_v16 = vrot.slane %v7400_v21, 2  ;;  %v7398_v43 = vsel %vm12500_vm9, %v7396_v38, %v7397_v47  ;;  %v20852_v4 = vld [vmem:[#allocation221_spill] sm:$0xff]  ;;  %v20853_v0 = vld [vmem:[#allocation190_spill] sm:$0xff]  ;;  %v20856_v11 = vld [vmem:[#allocation215_spill] sm:$0xff] }
 0x48c   : > { %v7742_v54 = vadd.f32 %v7395_v60, %v6758_v63  ;;  %v7401_v35 = vsel %vm12500_vm9, %v7399_v40, %v7400_v21  ;;  %v8179_v30 = vmul.f32 %v20853_v0, %v20852_v4  ;;  %v8180_v13 = vmul.f32 %v20855_v3, %v20854_v39  ;;  %v20859_v47 = vld [vmem:[#allocation205_spill] sm:$0xff] }
 0x48d   : > { %v20857_v63 = vrot.slane %v20856_v11, 7  ;;  %v7743_v33 = vadd.f32 %v7398_v43, %v6759_v23  ;;  %v7744_v6 = vadd.f32 %v7401_v35, %v6760_v14  ;;  %v8181_v38 = vmul.f32 %v20859_v47, %v20858_v42  ;;  %v20860_v21 = vld [vmem:[#allocation57_spill] sm:$0xff] }
 0x48e   : > { %v8024_v24 = vadd.f32 %v7896_v25, %v7742_v54  ;;  %v8485_v40 = vmul.f32 %v20860_v21, %v20852_v4  ;;  %v8486_v0 = vmul.f32 %v20796_v37, %v20854_v39  ;;  %v8487_v11 = vmul.f32 %v20797_v27, %v20858_v42 }
 0x48f   : > { %v7404_v60 = vsel %vm12500_vm9, %v7402_v16, %v20857_v63  ;;  %v8025_v19 = vadd.f32 %v7897_v48, %v7743_v33  ;;  %v8026_v3 = vadd.f32 %v7898_v31, %v7744_v6  ;;  %v20861_v23 = vrot.slane %v17462_v50, 7  ;;  %v20864_v33 = vld [vmem:[#allocation116_spill] sm:$0xff] }
 0x490   : > { %v7745_v55 = vadd.f32 %v7404_v60, %v6761_v41  ;;  %v8306_v51 = vadd.f32 %v8178_v59, %v8024_v24  ;;  %v8942_v41 = vrot.slane %v8485_v40, 7  ;;  %v8945_v25 = vrot.slane %v8486_v0, 7  ;;  %v20863_v0 = vld [vmem:[#allocation85_spill] sm:$0xff] }
 0x491   : > { %v8941_v14 = vrot.slane %v20861_v23, 2  ;;  %v8307_v54 = vadd.f32 %v8179_v30, %v8025_v19  ;;  %v8308_v43 = vadd.f32 %v8180_v13, %v8026_v3  ;;  %v8948_v35 = vrot.slane %v8487_v11, 7 }
 0x492   : > { %v8027_v16 = vadd.f32 %v7899_v52, %v7745_v55  ;;  %v9444_v63 = vmul.f32 %v19826_v5, %v20852_v4  ;;  %v8944_v24 = vrot.slane %v8942_v41, 2  ;;  %v8947_v48 = vrot.slane %v8945_v25, 2  ;;  %v20862_v52 = vld [vmem:[#allocation95_spill] sm:$0xff] }
 0x493   : > { %v8943_v6 = vsel %vm12500_vm9, %v8941_v14, %v8942_v41  ;;  %v8950_v31 = vrot.slane %v8948_v35, 2  ;;  %v9445_v50 = vmul.f32 %v20282_v36, %v20854_v39  ;;  %v9446_v55 = vmul.f32 %v20283_v22, %v20858_v42  ;;  %v20866_v14 = vld [vmem:[#allocation209_spill] sm:$0xff] }
 0x494   : > { %v8309_v60 = vadd.f32 %v8181_v38, %v8027_v16  ;;  %v9290_v59 = vadd.f32 %v8943_v6, %v8306_v51  ;;  %v8946_v3 = vsel %vm12500_vm9, %v8944_v24, %v8945_v25  ;;  %v8949_v30 = vsel %vm12500_vm9, %v8947_v48, %v8948_v35  ;;  %v20867_v25 = vld [vmem:[#allocation25_spill] sm:$0xff]  ;;  %v20868_v35 = vld [vmem:[#allocation26_spill] sm:$0xff] }
 0x495   : > { %v9447_v19 = vmul.f32 %v20284_v44, %v20862_v52  ;;  %v5080_v13 = vmul.f32 %v20289_v58, %v20863_v0  ;;  %v20865_v51 = vrot.slane %v20864_v33, 7  ;;  %v9291_v40 = vadd.f32 %v8946_v3, %v8307_v54  ;;  %v20869_v33 = vld [vmem:[#allocation31_spill] sm:$0xff] }
 0x496   : > { %v9292_v11 = vadd.f32 %v8949_v30, %v8308_v43  ;;  %v9572_v16 = vadd.f32 %v9444_v63, %v9290_v59  ;;  %v5081_v41 = vmul.f32 %v20291_v56, %v20866_v14  ;;  %v5082_v6 = vmul.f32 %v20868_v35, %v20867_v25  ;;  %v20870_v43 = vld [vmem:[#allocation34_spill] sm:$0xff] }
 0x497   : > { %v8952_v38 = vsel %vm12500_vm9, %v8950_v31, %v20865_v51  ;;  %v5395_v24 = vmul.f32 %v20293_v20, %v20866_v14  ;;  %v9573_v48 = vadd.f32 %v9445_v50, %v9291_v40  ;;  %v5396_v31 = vmul.f32 %v20869_v33, %v20867_v25 }
 0x498   : > { %v9293_v23 = vadd.f32 %v8952_v38, %v8309_v60  ;;  %v9574_v52 = vadd.f32 %v9446_v55, %v9292_v11  ;;  %v9727_v0 = vadd.f32 %v14371_v15, %v9572_v16  ;;  %v17599_v63 = vmul.f32 %v20870_v43, %v20811_v17  ;;  %v20871_v60 = vld [vmem:[#allocation207_spill] sm:$0xff] }
 0x499   : > { %v20872_v59 = vrot.slane %v20871_v60, 7  ;;  %v5862_v30 = vrot.slane %v5395_v24, 7  ;;  %v9728_v51 = vadd.f32 %v20144_v61, %v9573_v48  ;;  %v5865_v55 = vrot.slane %v5396_v31, 7 }
 0x49a   : > { %v9575_v54 = vadd.f32 %v9447_v19, %v9293_v23  ;;  %v9729_v38 = vadd.f32 %v20145_v49, %v9574_v52  ;;  %v9855_v50 = vmax.f32 %v9727_v0, 0.0  ;;  %v19389_v16 = vrot.slane %v17599_v63, 7 }
 0x49b   : > { %v5861_v3 = vrot.slane %v20872_v59, 2  ;;  %v5864_v19 = vrot.slane %v5862_v30, 2  ;;  %v9856_v23 = vmax.f32 %v9728_v51, 0.0  ;;  %v5867_v60 = vrot.slane %v5865_v55, 2 }
 0x49c   : > { %v9730_v40 = vadd.f32 %v20360_v12, %v9575_v54  ;;  %v9857_v43 = vmax.f32 %v9729_v38, 0.0  ;;  %v9983_v42 = vmin.f32 %v9855_v50, 6.0  ;;  %v6353_v52 = vmul.f32 %v20114_v1, %v20866_v14  ;;  %v20873_v50 = vld [vmem:[#allocation32_spill] sm:$0xff] }
 0x49d   : > { %v5863_v11 = vsel %vm12500_vm9, %v5861_v3, %v5862_v30  ;;  %v5866_v24 = vsel %vm12500_vm9, %v5864_v19, %v5865_v55  ;;  %v9984_v0 = vmin.f32 %v9856_v23, 6.0  ;;  %v5869_v54 = vsel %vm12500_vm9, %v5867_v60, %v19389_v16  ;;  %v20881_v16 = vld [vmem:[#allocation55_spill] sm:$0xff] }
 0x49e   : > { %v9858_v59 = vmax.f32 %v9730_v40, 0.0  ;;  %v6199_v48 = vadd.f32 %v5863_v11, %v5080_v13  ;;  %v9985_v31 = vmin.f32 %v9857_v43, 6.0  ;;  %v6200_v3 = vadd.f32 %v5866_v24, %v5081_v41 }
 0x49f   : > { %v6201_v51 = vadd.f32 %v5869_v54, %v5082_v6  ;;  %v6354_v38 = vmul.f32 %v20115_v26, %v20867_v25  ;;  %v6355_v55 = vmul.f32 %v20873_v50, %v20811_v17  ;;  %v10521_v13 = vcombine.low %v9983_v42, %v9984_v0  ;;  %v20874_v0 = vld [vmem:[#allocation51_spill] sm:$0xff]  ;;  %v20883_v50 = vld [vmem:[#allocation190_spill] sm:$0xff] }
 0x4a0   : > { %v9986_v30 = vmin.f32 %v9858_v59, 6.0  ;;  %v6481_v40 = vadd.f32 %v6353_v52, %v6199_v48  ;;  %v6635_v14 = vmul.f32 %v20591_v46, %v20822_v34  ;;  %v6636_v43 = vmul.f32 %v20593_v2, %v20824_v10 }
 0x4a1   : > { %v6482_v19 = vadd.f32 %v6354_v38, %v6200_v3  ;;  %v6483_v23 = vadd.f32 %v6355_v55, %v6201_v51  ;;  %v6637_v41 = vmul.f32 %v20595_v45, %v20826_v57  ;;  %v10529_v6 = vrot.slane %v10521_v13, %v20361_v28 }
 0x4a2   : > { %v10522_v11 = vcombine.low %v9985_v31, %v9986_v30  ;;  %v6763_v25 = vadd.f32 %v6635_v14, %v6481_v40  ;;  %v6942_v60 = vmul.f32 %v20596_v62, %v20822_v34  ;;  %v6943_v42 = vmul.f32 %v20597_v18, %v20824_v10  ;;  %v20876_v40 = vld [vmem:[#allocation225_spill] sm:$0xff] }
 0x4a3   : > { %v6764_v24 = vadd.f32 %v6636_v43, %v6482_v19  ;;  %v6765_v48 = vadd.f32 %v6637_v41, %v6483_v23  ;;  %v6944_v52 = vmul.f32 %v20843_v9, %v20826_v57  ;;  %v17637_v31 = vmul.f32 %v20874_v0, %v20830_v53 }
 0x4a4   : > { %v10536_v59 = vrot.slane %v10522_v11, %v20361_v28  ;;  %v7407_v54 = vrot.slane %v6942_v60, 7  ;;  %v7410_v3 = vrot.slane %v6943_v42, 7  ;;  %v7900_v30 = vmul.f32 %v20846_v7, %v20822_v34  ;;  %v20879_v42 = vld [vmem:[#allocation53_spill] sm:$0xff] }
 0x4a5   : > { %20875 = vst [vmem:[#allocation81_spill] sm:$0xff] %v17637_v31  ;;  %v7413_v38 = vrot.slane %v6944_v52, 7  ;;  %v7901_v55 = vmul.f32 %v20847_v29, %v20824_v10  ;;  %v7902_v13 = vmul.f32 %v20848_v32, %v20826_v57  ;;  %v20877_v14 = vrot.slane %v20876_v40, 9  ;;  %v20880_v52 = vld [vmem:[#allocation128_spill] sm:$0xff]  ;;  %v20884_v57 = vld [vmem:[#allocation129_spill] sm:$0xff] }
 0x4a6   : > { %v10537_v51 = vcombine.low %v10529_v6, %v10536_v59  ;;  %v7409_v11 = vrot.slane %v7407_v54, 2  ;;  %v7412_v19 = vrot.slane %v7410_v3, 2  ;;  %v20878_v6 = vld [vmem:[#allocation220_spill] sm:$0xff]  ;;  %v7903_v59 = vmul.f32 %v20879_v42, %v20830_v53  ;;  %v20887_v29 = vld [vmem:[#allocation77_spill] sm:$0xff] }
 0x4a7   : > { %v7408_v43 = vsel %vm12500_vm9, %v20877_v14, %v7407_v54  ;;  %v7415_v41 = vrot.slane %v7413_v38, 2  ;;  %v8182_v0 = vmul.f32 %v20881_v16, %v20880_v52  ;;  %v20882_v14 = vld [vmem:[#allocation76_spill] sm:$0xff] }
 0x4a8   : > { %11658 = vmatmul.mubr.msk.f32.gmra.mxu1 %vm10708_vm10, %v10537_v51  ;;  %v7746_v60 = vadd.f32 %v7408_v43, %v20878_v6  ;;  %v7411_v40 = vsel %vm12500_vm9, %v7409_v11, %v7410_v3  ;;  %v7414_v54 = vsel %vm12500_vm9, %v7412_v19, %v7413_v38  ;;  %v8183_v23 = vmul.f32 %v20883_v50, %v20882_v14  ;;  %v20885_v51 = vld [vmem:[#allocation56_spill] sm:$0xff]  ;;  %v20888_v38 = vld [vmem:[#allocation45_spill] sm:$0xff] }
 0x4a9   : > { %v8184_v10 = vmul.f32 %v20885_v51, %v20884_v57  ;;  %v20886_v43 = vrot.slane %v17637_v31, 7  ;;  %v7747_v42 = vadd.f32 %v7411_v40, %v6763_v25  ;;  %v7748_v34 = vadd.f32 %v7414_v54, %v6764_v24  ;;  %v20889_v24 = vld [vmem:[#allocation133_spill] sm:$0xff] }
 0x4aa   : > { %v8028_v16 = vadd.f32 %v7900_v30, %v7746_v60  ;;  %v8185_v3 = vmul.f32 %v20859_v47, %v20887_v29  ;;  %v8489_v11 = vmul.f32 %v20888_v38, %v20880_v52  ;;  %v8490_v19 = vmul.f32 %v20860_v21, %v20882_v14 }
 0x4ab   : > { %v7417_v6 = vsel %vm12500_vm9, %v7415_v41, %v20886_v43  ;;  %v8029_v50 = vadd.f32 %v7901_v55, %v7747_v42  ;;  %v8030_v51 = vadd.f32 %v7902_v13, %v7748_v34  ;;  %v8491_v31 = vmul.f32 %v20796_v37, %v20884_v57 }
 0x4ac   : > { %v7749_v32 = vadd.f32 %v7417_v6, %v6765_v48  ;;  %v8310_v7 = vadd.f32 %v8182_v0, %v8028_v16  ;;  %v8492_v25 = vmul.f32 %v20797_v27, %v20887_v29  ;;  %v20890_v48 = vld [vmem:[#allocation222_spill] sm:$0xff]  ;;  %v11380_v60 = vrot.slane %v8489_v11, 9 }
 0x4ad   : > { %v17680_v30 = vmul.f32 %v20890_v48, %v20889_v24  ;;  %v8311_v40 = vadd.f32 %v8183_v23, %v8029_v50  ;;  %v8312_v52 = vadd.f32 %v8184_v10, %v8030_v51  ;;  %v8955_v54 = vrot.slane %v8490_v19, 7  ;;  %v20892_v19 = vld [vmem:[#allocation212_spill] sm:$0xff]  ;;  %v20893_v48 = vld [vmem:[#allocation30_spill] sm:$0xff] }
 0x4ae   : > { %v8031_v41 = vadd.f32 %v7903_v59, %v7749_v32  ;;  %v8958_v43 = vrot.slane %v8491_v31, 7  ;;  %v8961_v55 = vrot.slane %v8492_v25, 7  ;;  %v9448_v16 = vmul.f32 %v19826_v5, %v20882_v14 }
 0x4af   : > { %v19398_v34 = vrot.slane %v17680_v30, 7  ;;  %v8956_v32 = vsel %vm12500_vm9, %v11380_v60, %v8955_v54  ;;  %v8957_v0 = vrot.slane %v8955_v54, 2  ;;  %v9449_v42 = vmul.f32 %v20282_v36, %v20884_v57 }
 0x4b0   : > { %v8313_v6 = vadd.f32 %v8185_v3, %v8031_v41  ;;  %v8960_v13 = vrot.slane %v8958_v43, 2  ;;  %v8963_v59 = vrot.slane %v8961_v55, 2  ;;  %v9294_v50 = vadd.f32 %v8956_v32, %v8310_v7  ;;  %v20891_v3 = vld [vmem:[#allocation16_spill] sm:$0xff] }
 0x4b1   : > { %v9450_v10 = vmul.f32 %v20283_v22, %v20887_v29  ;;  %v9451_v31 = vmul.f32 %v20284_v44, %v20889_v24  ;;  %v8959_v23 = vsel %vm12500_vm9, %v8957_v0, %v8958_v43  ;;  %v5083_v11 = vmul.f32 %v20891_v3, %v20811_v17  ;;  %v20894_v0 = vld [vmem:[#allocation70_spill] sm:$0xff]  ;;  %v20895_v17 = vld [vmem:[#allocation27_spill] sm:$0xff] }
 0x4b2   : > { %v8962_v51 = vsel %vm12500_vm9, %v8960_v13, %v8961_v55  ;;  %v5084_v41 = vmul.f32 %v20289_v58, %v20892_v19  ;;  %v8965_v7 = vsel %vm12500_vm9, %v8963_v59, %v19398_v34  ;;  %v9295_v25 = vadd.f32 %v8959_v23, %v8311_v40 }
 0x4b3   : > { %v9296_v60 = vadd.f32 %v8962_v51, %v8312_v52  ;;  %v9576_v54 = vadd.f32 %v9448_v16, %v9294_v50  ;;  %v9297_v32 = vadd.f32 %v8965_v7, %v8313_v6  ;;  %v5085_v43 = vmul.f32 %v20291_v56, %v20893_v48 }
 0x4b4   : > { %v5086_v55 = vmul.f32 %v20868_v35, %v20894_v0  ;;  %v5398_v13 = vmul.f32 %v20895_v17, %v20892_v19  ;;  %v9577_v3 = vadd.f32 %v9449_v42, %v9295_v25  ;;  %v5399_v59 = vmul.f32 %v20293_v20, %v20893_v48 }
 0x4b5   : > { %v9578_v38 = vadd.f32 %v9450_v10, %v9296_v60  ;;  %v9731_v29 = vadd.f32 %v14371_v15, %v9576_v54  ;;  %v9579_v40 = vadd.f32 %v9451_v31, %v9297_v32  ;;  %v5400_v52 = vmul.f32 %v20869_v33, %v20894_v0 }
 0x4b6   : > { %v20896_v6 = vrot.slane %v17599_v63, 7  ;;  %v5871_v50 = vrot.slane %v5398_v13, 7  ;;  %v9732_v23 = vadd.f32 %v20144_v61, %v9577_v3  ;;  %v5874_v42 = vrot.slane %v5399_v59, 7 }
 0x4b7   : > { %v9733_v51 = vadd.f32 %v20145_v49, %v9578_v38  ;;  %v9859_v7 = vmax.f32 %v9731_v29, 0.0  ;;  %v9734_v10 = vadd.f32 %v20360_v12, %v9579_v40  ;;  %v5877_v31 = vrot.slane %v5400_v52, 7 }
 0x4b8   : > { %v5870_v16 = vrot.slane %v20896_v6, 2  ;;  %v5873_v60 = vrot.slane %v5871_v50, 2  ;;  %v9860_v54 = vmax.f32 %v9732_v23, 0.0  ;;  %v5876_v17 = vrot.slane %v5874_v42, 2 }
 0x4b9   : > { %v9861_v32 = vmax.f32 %v9733_v51, 0.0  ;;  %v9987_v34 = vmin.f32 %v9859_v7, 6.0  ;;  %v9862_v63 = vmax.f32 %v9734_v10, 0.0  ;;  %v5879_v3 = vrot.slane %v5877_v31, 2  ;;  %v20899_v51 = vld [vmem:[#allocation18_spill] sm:$0xff] }
 0x4ba   : > { %v5872_v25 = vsel %vm12500_vm9, %v5870_v16, %v5871_v50  ;;  %v5875_v13 = vsel %vm12500_vm9, %v5873_v60, %v5874_v42  ;;  %v9988_v38 = vmin.f32 %v9860_v54, 6.0  ;;  %v5878_v59 = vsel %vm12500_vm9, %v5876_v17, %v5877_v31  ;;  %v20897_v16 = vld [vmem:[#allocation72_spill] sm:$0xff] }
 0x4bb   : > { %v6202_v6 = vadd.f32 %v5872_v25, %v5083_v11  ;;  %v9989_v29 = vmin.f32 %v9861_v32, 6.0  ;;  %v6203_v40 = vadd.f32 %v5875_v13, %v5084_v41  ;;  %v9990_v57 = vmin.f32 %v9862_v63, 6.0  ;;  %v20900_v60 = vld [vmem:[#allocation24_spill] sm:$0xff] }
 0x4bc   : > { %v20898_v50 = vrot.slane %v20897_v16, 7  ;;  %v6204_v23 = vadd.f32 %v5878_v59, %v5085_v43  ;;  %v6356_v7 = vmul.f32 %v20899_v51, %v20892_v19  ;;  %v10538_v10 = vcombine.low %v9987_v34, %v9988_v38  ;;  %v20901_v34 = vld [vmem:[#allocation105_spill] sm:$0xff] }
 0x4bd   : > { %v6357_v11 = vmul.f32 %v20114_v1, %v20893_v48  ;;  %v6358_v25 = vmul.f32 %v20115_v26, %v20894_v0  ;;  %v10539_v17 = vcombine.low %v9989_v29, %v9990_v57  ;;  %v6638_v31 = vmul.f32 %v20900_v60, %v20830_v53  ;;  %v20902_v0 = vld [vmem:[#allocation191_spill] sm:$0xff] }
 0x4be   : > { %v5881_v52 = vsel %vm12500_vm9, %v5879_v3, %v20898_v50  ;;  %v6484_v41 = vadd.f32 %v6356_v7, %v6202_v6  ;;  %v6639_v54 = vmul.f32 %v20591_v46, %v20852_v4  ;;  %v10546_v43 = vrot.slane %v10538_v10, %v20361_v28  ;;  %v20903_v50 = vld [vmem:[#allocation81_spill] sm:$0xff] }
 0x4bf   : > { %v6205_v42 = vadd.f32 %v5881_v52, %v5086_v55  ;;  %v6485_v32 = vadd.f32 %v6357_v11, %v6203_v40  ;;  %v6486_v19 = vadd.f32 %v6358_v25, %v6204_v23  ;;  %v10553_v63 = vrot.slane %v10539_v17, %v20361_v28  ;;  %v20905_v11 = vld [vmem:[#allocation37_spill] sm:$0xff]  ;;  %v20906_v17 = vld [vmem:[#allocation52_spill] sm:$0xff] }
 0x4c0   : > { %v6640_v48 = vmul.f32 %v20593_v2, %v20854_v39  ;;  %v6641_v57 = vmul.f32 %v20595_v45, %v20902_v0  ;;  %v6766_v13 = vadd.f32 %v6638_v31, %v6484_v41  ;;  %v6946_v6 = vmul.f32 %v20596_v62, %v20852_v4  ;;  %v20907_v31 = vld [vmem:[#allocation41_spill] sm:$0xff] }
 0x4c1   : > { %v6487_v55 = vadd.f32 %v20901_v34, %v6205_v42  ;;  %v6767_v3 = vadd.f32 %v6639_v54, %v6485_v32  ;;  %v6947_v38 = vmul.f32 %v20597_v18, %v20854_v39  ;;  %v6948_v29 = vmul.f32 %v20843_v9, %v20902_v0  ;;  %v20910_v34 = vld [vmem:[#allocation190_spill] sm:$0xff] }
 0x4c2   : > { %v10554_v59 = vcombine.low %v10546_v43, %v10553_v63  ;;  %v6768_v40 = vadd.f32 %v6640_v48, %v6486_v19  ;;  %v20904_v52 = vrot.slane %v20903_v50, 7  ;;  %v7419_v7 = vrot.slane %v6946_v6, 7  ;;  %v20908_v43 = vld [vmem:[#allocation55_spill] sm:$0xff]  ;;  %v20909_v19 = vld [vmem:[#allocation78_spill] sm:$0xff] }
 0x4c3   : > { %v6769_v16 = vadd.f32 %v6641_v57, %v6487_v55  ;;  %v7422_v10 = vrot.slane %v6947_v38, 7  ;;  %v7425_v42 = vrot.slane %v6948_v29, 7  ;;  %v7904_v25 = vmul.f32 %v20905_v11, %v20852_v4  ;;  %v20911_v29 = vld [vmem:[#allocation80_spill] sm:$0xff] }
 0x4c4   : > { %v7418_v23 = vrot.slane %v20904_v52, 2  ;;  %11660 = vmatprep.mubr.msk.f32.mxu1 %vm10708_vm10, %v10554_v59  ;;  %v7905_v41 = vmul.f32 %v20906_v17, %v20854_v39  ;;  %v7906_v54 = vmul.f32 %v20907_v31, %v20902_v0  ;;  %v8186_v32 = vmul.f32 %v20908_v43, %v20889_v24  ;;  %v20912_v59 = vld [vmem:[#allocation56_spill] sm:$0xff]  ;;  %v20913_v52 = vld [vmem:[#allocation86_spill] sm:$0xff] }
 0x4c5   : > { %v8187_v55 = vmul.f32 %v20910_v34, %v20909_v19  ;;  %v7421_v48 = vrot.slane %v7419_v7, 2  ;;  %v7424_v57 = vrot.slane %v7422_v10, 2  ;;  %v7427_v6 = vrot.slane %v7425_v42, 2  ;;  %v20917_v31 = vld [vmem:[#allocation114_spill] sm:$0xff] }
 0x4c6   : > { %v7420_v63 = vsel %vm12500_vm9, %v7418_v23, %v7419_v7  ;;  %v8188_v50 = vmul.f32 %v20912_v59, %v20911_v29  ;;  %v8189_v60 = vmul.f32 %v20859_v47, %v20913_v52  ;;  %v8494_v51 = vmul.f32 %v20860_v21, %v20909_v19  ;;  %v20914_v23 = vld [vmem:[#allocation113_spill] sm:$0xff] }
 0x4c7   : > { %v7750_v38 = vadd.f32 %v7420_v63, %v6766_v13  ;;  %v7423_v0 = vsel %vm12500_vm9, %v7421_v48, %v7422_v10  ;;  %v7426_v39 = vsel %vm12500_vm9, %v7424_v57, %v7425_v42  ;;  %v20915_v7 = vrot.slane %v20914_v23, 7 }
 0x4c8   : > { %v8495_v63 = vmul.f32 %v20796_v37, %v20911_v29  ;;  %v7751_v4 = vadd.f32 %v7423_v0, %v6767_v3  ;;  %v7752_v59 = vadd.f32 %v7426_v39, %v6768_v40  ;;  %v8496_v21 = vmul.f32 %v20797_v27, %v20913_v52 }
 0x4c9   : > { %v7429_v13 = vsel %vm12500_vm9, %v7427_v6, %v20915_v7  ;;  %v8032_v34 = vadd.f32 %v7904_v25, %v7750_v38  ;;  %v20916_v10 = vrot.slane %v17680_v30, 7  ;;  %v8967_v43 = vrot.slane %v8494_v51, 7 }
 0x4ca   : > { %v7753_v47 = vadd.f32 %v7429_v13, %v6769_v16  ;;  %v8970_v42 = vrot.slane %v8495_v63, 7  ;;  %v8033_v57 = vadd.f32 %v7905_v41, %v7751_v4  ;;  %v8034_v23 = vadd.f32 %v7906_v54, %v7752_v59  ;;  %v20921_v59 = vld [vmem:[#allocation117_spill] sm:$0xff] }
 0x4cb   : > { %v8966_v48 = vrot.slane %v20916_v10, 2  ;;  %v8314_v6 = vadd.f32 %v8186_v32, %v8032_v34  ;;  %v8969_v0 = vrot.slane %v8967_v43, 2  ;;  %v8973_v3 = vrot.slane %v8496_v21, 7  ;;  %v20920_v32 = vld [vmem:[#allocation84_spill] sm:$0xff] }
 0x4cc   : > { %v8035_v17 = vadd.f32 %v20917_v31, %v7753_v47  ;;  %v8972_v39 = vrot.slane %v8970_v42, 2  ;;  %v8315_v40 = vadd.f32 %v8187_v55, %v8033_v57  ;;  %v8316_v16 = vadd.f32 %v8188_v50, %v8034_v23  ;;  %v20923_v23 = vld [vmem:[#allocation218_spill] sm:$0xff] }
 0x4cd   : > { %v8968_v7 = vsel %vm12500_vm9, %v8966_v48, %v8967_v43  ;;  %v8971_v30 = vsel %vm12500_vm9, %v8969_v0, %v8970_v42  ;;  %v8975_v51 = vrot.slane %v8973_v3, 2  ;;  %v9452_v47 = vmul.f32 %v19826_v5, %v20909_v19  ;;  %v20922_v48 = vld [vmem:[#allocation139_spill] sm:$0xff] }
 0x4ce   : > { %v8317_v25 = vadd.f32 %v8189_v60, %v8035_v17  ;;  %v9298_v38 = vadd.f32 %v8968_v7, %v8314_v6  ;;  %v8974_v4 = vsel %vm12500_vm9, %v8972_v39, %v8973_v3  ;;  %v9299_v41 = vadd.f32 %v8971_v30, %v8315_v40  ;;  %v20918_v60 = vld [vmem:[#allocation146_spill] sm:$0xff] }
 0x4cf   : > { %v9300_v31 = vadd.f32 %v8974_v4, %v8316_v16  ;;  %v9453_v54 = vmul.f32 %v20282_v36, %v20911_v29  ;;  %v9454_v21 = vmul.f32 %v20283_v22, %v20913_v52  ;;  %v20919_v17 = vrot.slane %v20918_v60, 7  ;;  %v20924_v16 = vld [vmem:[#allocation34_spill] sm:$0xff] }
 0x4d0   : > { %v9455_v34 = vmul.f32 %v20284_v44, %v20920_v32  ;;  %v9580_v55 = vadd.f32 %v9452_v47, %v9298_v38  ;;  %v5088_v50 = vmul.f32 %v20289_v58, %v20921_v59  ;;  %v5089_v42 = vmul.f32 %v20291_v56, %v20922_v48  ;;  %v20925_v60 = vld [vmem:[#allocation14_spill] sm:$0xff] }
 0x4d1   : > { %v8977_v43 = vsel %vm12500_vm9, %v8975_v51, %v20919_v17  ;;  %v9581_v63 = vadd.f32 %v9453_v54, %v9299_v41  ;;  %v9582_v10 = vadd.f32 %v9454_v21, %v9300_v31  ;;  %v5090_v6 = vmul.f32 %v20868_v35, %v20923_v23 }
 0x4d2   : > { %v9301_v13 = vadd.f32 %v8977_v43, %v8317_v25  ;;  %v9735_v57 = vadd.f32 %v14371_v15, %v9580_v55  ;;  %v5404_v7 = vmul.f32 %v20293_v20, %v20922_v48  ;;  %v5405_v0 = vmul.f32 %v20869_v33, %v20923_v23 }
 0x4d3   : > { %v9736_v3 = vadd.f32 %v20144_v61, %v9581_v63  ;;  %v9737_v40 = vadd.f32 %v20145_v49, %v9582_v10  ;;  %v17823_v25 = vmul.f32 %v20924_v16, %v20830_v53  ;;  %v6361_v51 = vmul.f32 %v20114_v1, %v20922_v48 }
 0x4d4   : > { %v9583_v39 = vadd.f32 %v9455_v34, %v9301_v13  ;;  %v9863_v38 = vmax.f32 %v9735_v57, 0.0  ;;  %v5887_v30 = vrot.slane %v5404_v7, 7  ;;  %v5890_v4 = vrot.slane %v5405_v0, 7  ;;  %v20926_v57 = vld [vmem:[#allocation32_spill] sm:$0xff] }
 0x4d5   : > { %v9864_v41 = vmax.f32 %v9736_v3, 0.0  ;;  %v9865_v31 = vmax.f32 %v9737_v40, 0.0  ;;  %v19405_v54 = vrot.slane %v17823_v25, 7  ;;  %v6362_v48 = vmul.f32 %v20115_v26, %v20923_v23 }
 0x4d6   : > { %v9738_v47 = vadd.f32 %v20360_v12, %v9583_v39  ;;  %v9991_v21 = vmin.f32 %v9863_v38, 6.0  ;;  %v5888_v17 = vsel %vm12500_vm9, %v20925_v60, %v5887_v30  ;;  %v5889_v43 = vrot.slane %v5887_v30, 2  ;;  %v20927_v30 = vld [vmem:[#allocation129_spill] sm:$0xff] }
 0x4d7   : > { %v5892_v32 = vrot.slane %v5890_v4, 2  ;;  %v9992_v55 = vmin.f32 %v9864_v41, 6.0  ;;  %v9993_v59 = vmin.f32 %v9865_v31, 6.0  ;;  %v6207_v13 = vadd.f32 %v5888_v17, %v5088_v50 }
 0x4d8   : > { %v9866_v34 = vmax.f32 %v9738_v47, 0.0  ;;  %v5891_v63 = vsel %vm12500_vm9, %v5889_v43, %v5890_v4  ;;  %v6363_v7 = vmul.f32 %v20926_v57, %v20830_v53  ;;  %v6643_v50 = vmul.f32 %v20591_v46, %v20882_v14  ;;  %v20928_v47 = vld [vmem:[#allocation77_spill] sm:$0xff]  ;;  %v20941_v57 = vld [vmem:[#allocation190_spill] sm:$0xff] }
 0x4d9   : > { %v5894_v10 = vsel %vm12500_vm9, %v5892_v32, %v19405_v54  ;;  %v10555_v39 = vcombine.low %v9991_v21, %v9992_v55  ;;  %v6208_v3 = vadd.f32 %v5891_v63, %v5089_v42  ;;  %v6489_v38 = vadd.f32 %v6361_v51, %v6207_v13  ;;  %v20929_v43 = vld [vmem:[#allocation73_spill] sm:$0xff]  ;;  %v20930_v32 = vld [vmem:[#allocation79_spill] sm:$0xff] }
 0x4da   : > { %v9994_v0 = vmin.f32 %v9866_v34, 6.0  ;;  %v6209_v40 = vadd.f32 %v5894_v10, %v5090_v6  ;;  %v6644_v4 = vmul.f32 %v20593_v2, %v20927_v30  ;;  %v6645_v41 = vmul.f32 %v20595_v45, %v20928_v47  ;;  %v20931_v63 = vld [vmem:[#allocation51_spill] sm:$0xff] }
 0x4db   : > { %v10563_v23 = vrot.slane %v10555_v39, %v20361_v28  ;;  %v6490_v60 = vadd.f32 %v6362_v48, %v6208_v3  ;;  %v6770_v21 = vadd.f32 %v20930_v32, %v20929_v43  ;;  %v6771_v42 = vadd.f32 %v6643_v50, %v6489_v38  ;;  %v20934_v50 = vld [vmem:[#allocation41_spill] sm:$0xff]  ;;  %v20939_v54 = vld [vmem:[#allocation55_spill] sm:$0xff]  ;;  %v20942_v32 = vld [vmem:[#allocation96_spill] sm:$0xff] }
 0x4dc   : > { %v10556_v31 = vcombine.low %v9993_v59, %v9994_v0  ;;  %v6491_v17 = vadd.f32 %v6363_v7, %v6209_v40  ;;  %v6951_v6 = vmul.f32 %v20596_v62, %v20882_v14  ;;  %v6952_v51 = vmul.f32 %v20597_v18, %v20927_v30  ;;  %v20933_v40 = vld [vmem:[#allocation52_spill] sm:$0xff] }
 0x4dd   : > { %v6772_v55 = vadd.f32 %v6644_v4, %v6490_v60  ;;  %v6953_v59 = vmul.f32 %v20843_v9, %v20928_v47  ;;  %v17860_v10 = vmul.f32 %v20931_v63, %v20889_v24  ;;  %v7908_v0 = vmul.f32 %v20905_v11, %v20882_v14 }
 0x4de   : > { %v10570_v34 = vrot.slane %v10556_v31, %v20361_v28  ;;  %v6773_v13 = vadd.f32 %v6645_v41, %v6491_v17  ;;  %v7432_v48 = vrot.slane %v6951_v6, 7  ;;  %v7435_v7 = vrot.slane %v6952_v51, 7  ;;  %v20935_v41 = vld [vmem:[#allocation132_spill] sm:$0xff]  ;;  %v20937_v51 = vld [vmem:[#allocation53_spill] sm:$0xff] }
 0x4df   : > { %20932 = vst [vmem:[#allocation101_spill] sm:$0xff] %v17860_v10  ;;  %v7438_v3 = vrot.slane %v6953_v59, 7  ;;  %v7909_v38 = vmul.f32 %v20933_v40, %v20927_v30  ;;  %v7910_v4 = vmul.f32 %v20934_v50, %v20928_v47  ;;  %v20936_v31 = vrot.slane %v20935_v41, 9  ;;  %v20938_v59 = vld [vmem:[#allocation87_spill] sm:$0xff]  ;;  %v20943_v47 = vld [vmem:[#allocation56_spill] sm:$0xff]  ;;  %v20945_v50 = vld [vmem:[#allocation150_spill] sm:$0xff] }
 0x4e0   : > { %v10571_v39 = vcombine.low %v10563_v23, %v10570_v34  ;;  %v7434_v17 = vrot.slane %v7432_v48, 2  ;;  %v7437_v43 = vrot.slane %v7435_v7, 2  ;;  %v7911_v34 = vmul.f32 %v20937_v51, %v20889_v24 }
 0x4e1   : > { %v7433_v60 = vsel %vm12500_vm9, %v20936_v31, %v7432_v48  ;;  %v7440_v6 = vrot.slane %v7438_v3, 2  ;;  %v8190_v63 = vmul.f32 %v20939_v54, %v20938_v59  ;;  %v20940_v48 = vld [vmem:[#allocation148_spill] sm:$0xff] }
 0x4e2   : > { %11661 = vmatmul.mubr.msk.f32.gmra.mxu1 %vm10708_vm10, %v10571_v39  ;;  %v7754_v23 = vadd.f32 %v7433_v60, %v6770_v21  ;;  %v7436_v41 = vsel %vm12500_vm9, %v7434_v17, %v7435_v7  ;;  %v7439_v31 = vsel %vm12500_vm9, %v7437_v43, %v7438_v3  ;;  %v8191_v16 = vmul.f32 %v20941_v57, %v20940_v48  ;;  %v20946_v7 = vld [vmem:[#allocation205_spill] sm:$0xff] }
 0x4e3   : > { %v8192_v39 = vmul.f32 %v20943_v47, %v20942_v32  ;;  %v20944_v21 = vrot.slane %v17860_v10, 7  ;;  %v7755_v51 = vadd.f32 %v7436_v41, %v6771_v42  ;;  %v7756_v30 = vadd.f32 %v7439_v31, %v6772_v55  ;;  %v20947_v3 = vld [vmem:[#allocation45_spill] sm:$0xff]  ;;  %v20949_v55 = vld [vmem:[#allocation108_spill] sm:$0xff] }
 0x4e4   : > { %v8036_v14 = vadd.f32 %v7908_v0, %v7754_v23  ;;  %v8193_v17 = vmul.f32 %v20946_v7, %v20945_v50  ;;  %v8498_v43 = vmul.f32 %v20947_v3, %v20938_v59  ;;  %v20948_v57 = vld [vmem:[#allocation57_spill] sm:$0xff]  ;;  %v8500_v10 = vmul.f32 %v20796_v37, %v20942_v32 }
 0x4e5   : > { %v7442_v60 = vsel %vm12500_vm9, %v7440_v6, %v20944_v21  ;;  %v8499_v40 = vmul.f32 %v20948_v57, %v20940_v48  ;;  %v8037_v11 = vadd.f32 %v7909_v38, %v7755_v51  ;;  %v8038_v47 = vadd.f32 %v7910_v4, %v7756_v30 }
 0x4e6   : > { %v7757_v54 = vadd.f32 %v7442_v60, %v6773_v13  ;;  %v8318_v9 = vadd.f32 %v8190_v63, %v8036_v14  ;;  %v8501_v42 = vmul.f32 %v20797_v27, %v20945_v50  ;;  %v20950_v13 = vld [vmem:[#allocation222_spill] sm:$0xff]  ;;  %v11381_v23 = vrot.slane %v8498_v43, 9  ;;  %v20952_v43 = vld [vmem:[#allocation221_spill] sm:$0xff] }
 0x4e7   : > { %v17902_v0 = vmul.f32 %v20950_v13, %v20949_v55  ;;  %v8319_v41 = vadd.f32 %v8191_v16, %v8037_v11  ;;  %v8320_v59 = vadd.f32 %v8192_v39, %v8038_v47  ;;  %v8980_v31 = vrot.slane %v8499_v40, 7  ;;  %v20951_v39 = vld [vmem:[#allocation16_spill] sm:$0xff]  ;;  %v20953_v13 = vld [vmem:[#allocation231_spill] sm:$0xff] }
 0x4e8   : > { %v8039_v6 = vadd.f32 %v7911_v34, %v7757_v54  ;;  %v8983_v21 = vrot.slane %v8500_v10, 7  ;;  %v8986_v38 = vrot.slane %v8501_v42, 7  ;;  %v9456_v30 = vmul.f32 %v19826_v5, %v20940_v48 }
 0x4e9   : > { %v19413_v14 = vrot.slane %v17902_v0, 7  ;;  %v8981_v54 = vsel %vm12500_vm9, %v11381_v23, %v8980_v31  ;;  %v8982_v63 = vrot.slane %v8980_v31, 2  ;;  %v9457_v51 = vmul.f32 %v20282_v36, %v20942_v32 }
 0x4ea   : > { %v8321_v60 = vadd.f32 %v8193_v17, %v8039_v6  ;;  %v8985_v4 = vrot.slane %v8983_v21, 2  ;;  %v8988_v34 = vrot.slane %v8986_v38, 2  ;;  %v9302_v11 = vadd.f32 %v8981_v54, %v8318_v9 }
 0x4eb   : > { %v9458_v16 = vmul.f32 %v20283_v22, %v20945_v50  ;;  %v9459_v47 = vmul.f32 %v20284_v44, %v20949_v55  ;;  %v8984_v10 = vsel %vm12500_vm9, %v8982_v63, %v8983_v21  ;;  %v5091_v17 = vmul.f32 %v20951_v39, %v20830_v53  ;;  %v20954_v63 = vld [vmem:[#allocation191_spill] sm:$0xff] }
 0x4ec   : > { %v8987_v40 = vsel %vm12500_vm9, %v8985_v4, %v8986_v38  ;;  %v5092_v6 = vmul.f32 %v20289_v58, %v20952_v43  ;;  %v8990_v9 = vsel %vm12500_vm9, %v8988_v34, %v19413_v14  ;;  %v9303_v42 = vadd.f32 %v8984_v10, %v8319_v41  ;;  %v20955_v53 = vld [vmem:[#allocation27_spill] sm:$0xff] }
 0x4ed   : > { %v9304_v23 = vadd.f32 %v8987_v40, %v8320_v59  ;;  %v9584_v31 = vadd.f32 %v9456_v30, %v9302_v11  ;;  %v9305_v54 = vadd.f32 %v8990_v9, %v8321_v60  ;;  %v5093_v21 = vmul.f32 %v20291_v56, %v20953_v13 }
 0x4ee   : > { %v5094_v38 = vmul.f32 %v20868_v35, %v20954_v63  ;;  %v5407_v4 = vmul.f32 %v20955_v53, %v20952_v43  ;;  %v9585_v39 = vadd.f32 %v9457_v51, %v9303_v42  ;;  %v5408_v34 = vmul.f32 %v20293_v20, %v20953_v13 }
 0x4ef   : > { %v9586_v3 = vadd.f32 %v9458_v16, %v9304_v23  ;;  %v9739_v50 = vadd.f32 %v14371_v15, %v9584_v31  ;;  %v9587_v41 = vadd.f32 %v9459_v47, %v9305_v54  ;;  %v5409_v59 = vmul.f32 %v20869_v33, %v20954_v63 }
 0x4f0   : > { %v20956_v60 = vrot.slane %v17823_v25, 7  ;;  %v5896_v11 = vrot.slane %v5407_v4, 7  ;;  %v9740_v10 = vadd.f32 %v20144_v61, %v9585_v39  ;;  %v5899_v51 = vrot.slane %v5408_v34, 7 }
 0x4f1   : > { %v9741_v40 = vadd.f32 %v20145_v49, %v9586_v3  ;;  %v9867_v9 = vmax.f32 %v9739_v50, 0.0  ;;  %v9742_v16 = vadd.f32 %v20360_v12, %v9587_v41  ;;  %v5902_v47 = vrot.slane %v5409_v59, 7 }
 0x4f2   : > { %v5895_v30 = vrot.slane %v20956_v60, 2  ;;  %v5898_v23 = vrot.slane %v5896_v11, 2  ;;  %v9868_v31 = vmax.f32 %v9740_v10, 0.0  ;;  %v5901_v53 = vrot.slane %v5899_v51, 2 }
 0x4f3   : > { %v9869_v54 = vmax.f32 %v9741_v40, 0.0  ;;  %v9995_v14 = vmin.f32 %v9867_v9, 6.0  ;;  %v9870_v25 = vmax.f32 %v9742_v16, 0.0  ;;  %v5904_v39 = vrot.slane %v5902_v47, 2  ;;  %v20959_v40 = vld [vmem:[#allocation18_spill] sm:$0xff] }
 0x4f4   : > { %v5897_v42 = vsel %vm12500_vm9, %v5895_v30, %v5896_v11  ;;  %v5900_v4 = vsel %vm12500_vm9, %v5898_v23, %v5899_v51  ;;  %v9996_v3 = vmin.f32 %v9868_v31, 6.0  ;;  %v5903_v34 = vsel %vm12500_vm9, %v5901_v53, %v5902_v47  ;;  %v20957_v30 = vld [vmem:[#allocation110_spill] sm:$0xff]  ;;  %v20960_v23 = vld [vmem:[#allocation24_spill] sm:$0xff] }
 0x4f5   : > { %v6210_v60 = vadd.f32 %v5897_v42, %v5091_v17  ;;  %v9997_v50 = vmin.f32 %v9869_v54, 6.0  ;;  %v6211_v41 = vadd.f32 %v5900_v4, %v5092_v6  ;;  %v9998_v32 = vmin.f32 %v9870_v25, 6.0 }
 0x4f6   : > { %v20958_v11 = vrot.slane %v20957_v30, 7  ;;  %v6212_v10 = vadd.f32 %v5903_v34, %v5093_v21  ;;  %v6364_v9 = vmul.f32 %v20959_v40, %v20952_v43  ;;  %v10572_v16 = vcombine.low %v9995_v14, %v9996_v3  ;;  %v20961_v14 = vld [vmem:[#allocation111_spill] sm:$0xff]  ;;  %v20962_v3 = vld [vmem:[#allocation49_spill] sm:$0xff] }
 0x4f7   : > { %v6365_v17 = vmul.f32 %v20114_v1, %v20953_v13  ;;  %v6366_v42 = vmul.f32 %v20115_v26, %v20954_v63  ;;  %v10573_v53 = vcombine.low %v9997_v50, %v9998_v32  ;;  %v6646_v47 = vmul.f32 %v20960_v23, %v20889_v24 }
 0x4f8   : > { %v5906_v59 = vsel %vm12500_vm9, %v5904_v39, %v20958_v11  ;;  %v6492_v6 = vadd.f32 %v6364_v9, %v6210_v60  ;;  %v6647_v31 = vmul.f32 %v20591_v46, %v20909_v19  ;;  %v10580_v21 = vrot.slane %v10572_v16, %v20361_v28  ;;  %v20963_v11 = vld [vmem:[#allocation101_spill] sm:$0xff] }
 0x4f9   : > { %v6213_v51 = vadd.f32 %v5906_v59, %v5094_v38  ;;  %v6493_v54 = vadd.f32 %v6365_v17, %v6211_v41  ;;  %v6494_v43 = vadd.f32 %v6366_v42, %v6212_v10  ;;  %v10587_v25 = vrot.slane %v10573_v53, %v20361_v28  ;;  %v20965_v17 = vld [vmem:[#allocation37_spill] sm:$0xff]  ;;  %v20966_v53 = vld [vmem:[#allocation52_spill] sm:$0xff] }
 0x4fa   : > { %v6648_v13 = vmul.f32 %v20593_v2, %v20911_v29  ;;  %v6649_v32 = vmul.f32 %v20595_v45, %v20913_v52  ;;  %v6774_v63 = vadd.f32 %v6646_v47, %v6492_v6  ;;  %v6955_v39 = vmul.f32 %v20596_v62, %v20909_v19  ;;  %v20967_v47 = vld [vmem:[#allocation41_spill] sm:$0xff] }
 0x4fb   : > { %v6495_v38 = vadd.f32 %v20961_v14, %v6213_v51  ;;  %v6775_v4 = vadd.f32 %v6647_v31, %v6493_v54  ;;  %v6956_v60 = vmul.f32 %v20597_v18, %v20911_v29  ;;  %v6957_v50 = vmul.f32 %v20962_v3, %v20913_v52  ;;  %v20970_v14 = vld [vmem:[#allocation190_spill] sm:$0xff] }
 0x4fc   : > { %v10588_v34 = vcombine.low %v10580_v21, %v10587_v25  ;;  %v6776_v41 = vadd.f32 %v6648_v13, %v6494_v43  ;;  %v20964_v59 = vrot.slane %v20963_v11, 7  ;;  %v7444_v9 = vrot.slane %v6955_v39, 7  ;;  %v20968_v21 = vld [vmem:[#allocation55_spill] sm:$0xff] }
 0x4fd   : > { %v6777_v30 = vadd.f32 %v6649_v32, %v6495_v38  ;;  %v7447_v16 = vrot.slane %v6956_v60, 7  ;;  %v7450_v51 = vrot.slane %v6957_v50, 7  ;;  %v7912_v42 = vmul.f32 %v20965_v17, %v20909_v19  ;;  %v20969_v43 = vld [vmem:[#allocation155_spill] sm:$0xff]  ;;  %v20971_v50 = vld [vmem:[#allocation157_spill] sm:$0xff] }
 0x4fe   : > { %v7443_v10 = vrot.slane %v20964_v59, 2  ;;  %11663 = vmatprep.mubr.msk.f32.mxu1 %vm10708_vm10, %v10588_v34  ;;  %v7913_v6 = vmul.f32 %v20966_v53, %v20911_v29  ;;  %v7914_v31 = vmul.f32 %v20967_v47, %v20913_v52  ;;  %v8194_v54 = vmul.f32 %v20968_v21, %v20949_v55  ;;  %v20972_v34 = vld [vmem:[#allocation56_spill] sm:$0xff]  ;;  %v20977_v53 = vld [vmem:[#allocation147_spill] sm:$0xff] }
 0x4ff   : > { %v8195_v38 = vmul.f32 %v20970_v14, %v20969_v43  ;;  %v7446_v13 = vrot.slane %v7444_v9, 2  ;;  %v7449_v32 = vrot.slane %v7447_v16, 2  ;;  %v7452_v39 = vrot.slane %v7450_v51, 2  ;;  %v20973_v59 = vld [vmem:[#allocation156_spill] sm:$0xff] }
 0x500   : > { %v7445_v25 = vsel %vm12500_vm9, %v7443_v10, %v7444_v9  ;;  %v8196_v11 = vmul.f32 %v20972_v34, %v20971_v50  ;;  %v8197_v23 = vmul.f32 %v20946_v7, %v20973_v59  ;;  %v8503_v52 = vmul.f32 %v20948_v57, %v20969_v43  ;;  %v20974_v10 = vld [vmem:[#allocation4_spill] sm:$0xff] }
 0x501   : > { %v7758_v60 = vadd.f32 %v7445_v25, %v6774_v63  ;;  %v7448_v29 = vsel %vm12500_vm9, %v7446_v13, %v7447_v16  ;;  %v7451_v19 = vsel %vm12500_vm9, %v7449_v32, %v7450_v51  ;;  %v20975_v9 = vrot.slane %v20974_v10, 7 }
 0x502   : > { %v8504_v25 = vmul.f32 %v20796_v37, %v20971_v50  ;;  %v7759_v34 = vadd.f32 %v7448_v29, %v6775_v4  ;;  %v7760_v14 = vadd.f32 %v7451_v19, %v6776_v41  ;;  %v8505_v57 = vmul.f32 %v20797_v27, %v20973_v59 }
 0x503   : > { %v7454_v63 = vsel %vm12500_vm9, %v7452_v39, %v20975_v9  ;;  %v8040_v21 = vadd.f32 %v7912_v42, %v7758_v60  ;;  %v20976_v16 = vrot.slane %v17902_v0, 7  ;;  %v8992_v47 = vrot.slane %v8503_v52, 7 }
 0x504   : > { %v7761_v7 = vadd.f32 %v7454_v63, %v6777_v30  ;;  %v8995_v51 = vrot.slane %v8504_v25, 7  ;;  %v8041_v32 = vadd.f32 %v7913_v6, %v7759_v34  ;;  %v8042_v10 = vadd.f32 %v7914_v31, %v7760_v14  ;;  %v20981_v34 = vld [vmem:[#allocation76_spill] sm:$0xff] }
 0x505   : > { %v8991_v13 = vrot.slane %v20976_v16, 2  ;;  %v8322_v39 = vadd.f32 %v8194_v54, %v8040_v21  ;;  %v8994_v29 = vrot.slane %v8992_v47, 2  ;;  %v8998_v4 = vrot.slane %v8505_v57, 7  ;;  %v20980_v54 = vld [vmem:[#allocation92_spill] sm:$0xff] }
 0x506   : > { %v8043_v17 = vadd.f32 %v20977_v53, %v7761_v7  ;;  %v8997_v19 = vrot.slane %v8995_v51, 2  ;;  %v8323_v41 = vadd.f32 %v8195_v38, %v8041_v32  ;;  %v8324_v30 = vadd.f32 %v8196_v11, %v8042_v10  ;;  %v20983_v10 = vld [vmem:[#allocation77_spill] sm:$0xff] }
 0x507   : > { %v8993_v9 = vsel %vm12500_vm9, %v8991_v13, %v8992_v47  ;;  %v8996_v0 = vsel %vm12500_vm9, %v8994_v29, %v8995_v51  ;;  %v9000_v6 = vrot.slane %v8998_v4, 2  ;;  %v9460_v7 = vmul.f32 %v19826_v5, %v20969_v43  ;;  %v20982_v13 = vld [vmem:[#allocation129_spill] sm:$0xff] }
 0x508   : > { %v8325_v42 = vadd.f32 %v8197_v23, %v8043_v17  ;;  %v9306_v60 = vadd.f32 %v8993_v9, %v8322_v39  ;;  %v8999_v52 = vsel %vm12500_vm9, %v8997_v19, %v8998_v4  ;;  %v9307_v53 = vadd.f32 %v8996_v0, %v8323_v41  ;;  %v20978_v23 = vld [vmem:[#allocation161_spill] sm:$0xff] }
 0x509   : > { %v9308_v31 = vadd.f32 %v8999_v52, %v8324_v30  ;;  %v9461_v47 = vmul.f32 %v20282_v36, %v20971_v50  ;;  %v9462_v57 = vmul.f32 %v20283_v22, %v20973_v59  ;;  %v20979_v17 = vrot.slane %v20978_v23, 7  ;;  %v20984_v30 = vld [vmem:[#allocation34_spill] sm:$0xff]  ;;  %v20985_v23 = vld [vmem:[#allocation71_spill] sm:$0xff] }
 0x50a   : > { %v9463_v14 = vmul.f32 %v20284_v44, %v20980_v54  ;;  %v9588_v38 = vadd.f32 %v9460_v7, %v9306_v60  ;;  %v5096_v11 = vmul.f32 %v20289_v58, %v20981_v34  ;;  %v5097_v51 = vmul.f32 %v20291_v56, %v20982_v13 }
 0x50b   : > { %v9002_v21 = vsel %vm12500_vm9, %v9000_v6, %v20979_v17  ;;  %v9589_v25 = vadd.f32 %v9461_v47, %v9307_v53  ;;  %v9590_v16 = vadd.f32 %v9462_v57, %v9308_v31  ;;  %v5098_v39 = vmul.f32 %v20868_v35, %v20983_v10  ;;  %v21003_v35 = vld [vmem:[#allocation174_spill] sm:$0xff] }
 0x50c   : > { %v9309_v63 = vadd.f32 %v9002_v21, %v8325_v42  ;;  %v9743_v32 = vadd.f32 %v14371_v15, %v9588_v38  ;;  %v5413_v9 = vmul.f32 %v20293_v20, %v20982_v13  ;;  %v5414_v29 = vmul.f32 %v20869_v33, %v20983_v10 }
 0x50d   : > { %v9744_v4 = vadd.f32 %v20144_v61, %v9589_v25  ;;  %v9745_v41 = vadd.f32 %v20145_v49, %v9590_v16  ;;  %v18045_v42 = vmul.f32 %v20984_v30, %v20889_v24  ;;  %v6368_v6 = vmul.f32 %v20959_v40, %v20981_v34  ;;  %v21002_v30 = vld [vmem:[#allocation190_spill] sm:$0xff] }
 0x50e   : > { %v9591_v19 = vadd.f32 %v9463_v14, %v9309_v63  ;;  %v9871_v60 = vmax.f32 %v9743_v32, 0.0  ;;  %v5912_v0 = vrot.slane %v5413_v9, 7  ;;  %v5915_v52 = vrot.slane %v5414_v29, 7 }
 0x50f   : > { %v9872_v53 = vmax.f32 %v9744_v4, 0.0  ;;  %v9873_v31 = vmax.f32 %v9745_v41, 0.0  ;;  %v19420_v47 = vrot.slane %v18045_v42, 7  ;;  %v6369_v32 = vmul.f32 %v20114_v1, %v20982_v13 }
 0x510   : > { %v9746_v7 = vadd.f32 %v20360_v12, %v9591_v19  ;;  %v9999_v57 = vmin.f32 %v9871_v60, 6.0  ;;  %v5913_v17 = vsel %vm12500_vm9, %v20985_v23, %v5912_v0  ;;  %v5914_v21 = vrot.slane %v5912_v0, 2  ;;  %v20987_v0 = vld [vmem:[#allocation91_spill] sm:$0xff] }
 0x511   : > { %v5917_v54 = vrot.slane %v5915_v52, 2  ;;  %v10000_v38 = vmin.f32 %v9872_v53, 6.0  ;;  %v10001_v63 = vmin.f32 %v9873_v31, 6.0  ;;  %v6215_v25 = vadd.f32 %v5913_v17, %v5096_v11  ;;  %v20986_v11 = vld [vmem:[#allocation32_spill] sm:$0xff] }
 0x512   : > { %v9874_v14 = vmax.f32 %v9746_v7, 0.0  ;;  %v5916_v34 = vsel %vm12500_vm9, %v5914_v21, %v5915_v52  ;;  %v6370_v9 = vmul.f32 %v20115_v26, %v20983_v10  ;;  %v6371_v60 = vmul.f32 %v20986_v11, %v20889_v24  ;;  %v20988_v17 = vld [vmem:[#allocation96_spill] sm:$0xff]  ;;  %v21001_v11 = vld [vmem:[#allocation173_spill] sm:$0xff] }
 0x513   : > { %v5919_v16 = vsel %vm12500_vm9, %v5917_v54, %v19420_v47  ;;  %v10589_v19 = vcombine.low %v9999_v57, %v10000_v38  ;;  %v6216_v4 = vadd.f32 %v5916_v34, %v5097_v51  ;;  %v6496_v52 = vadd.f32 %v6368_v6, %v20987_v0  ;;  %v20989_v57 = vld [vmem:[#allocation150_spill] sm:$0xff]  ;;  %v20994_v0 = vld [vmem:[#allocation52_spill] sm:$0xff]  ;;  %v21000_v47 = vld [vmem:[#allocation55_spill] sm:$0xff] }
 0x514   : > { %v10002_v29 = vmin.f32 %v9874_v14, 6.0  ;;  %v6217_v41 = vadd.f32 %v5919_v16, %v5098_v39  ;;  %v6497_v7 = vadd.f32 %v6369_v32, %v6215_v25  ;;  %v6651_v53 = vmul.f32 %v20591_v46, %v20940_v48  ;;  %v20990_v39 = vld [vmem:[#allocation152_spill] sm:$0xff]  ;;  %v20991_v32 = vld [vmem:[#allocation51_spill] sm:$0xff] }
 0x515   : > { %v10597_v23 = vrot.slane %v10589_v19, %v20361_v28  ;;  %v6498_v13 = vadd.f32 %v6370_v9, %v6216_v4  ;;  %v6652_v10 = vmul.f32 %v20593_v2, %v20988_v17  ;;  %v6653_v51 = vmul.f32 %v20595_v45, %v20989_v57 }
 0x516   : > { %v10590_v31 = vcombine.low %v10001_v63, %v10002_v29  ;;  %v6499_v21 = vadd.f32 %v6371_v60, %v6217_v41  ;;  %v6778_v54 = vadd.f32 %v20990_v39, %v6496_v52  ;;  %v6779_v14 = vadd.f32 %v6651_v53, %v6497_v7  ;;  %v20993_v29 = vld [vmem:[#allocation37_spill] sm:$0xff] }
 0x517   : > { %v6780_v38 = vadd.f32 %v6652_v10, %v6498_v13  ;;  %v6960_v25 = vmul.f32 %v20596_v62, %v20940_v48  ;;  %v6961_v63 = vmul.f32 %v20597_v18, %v20988_v17  ;;  %v6962_v16 = vmul.f32 %v20962_v3, %v20989_v57  ;;  %v20996_v10 = vld [vmem:[#allocation53_spill] sm:$0xff] }
 0x518   : > { %v10604_v6 = vrot.slane %v10590_v31, %v20361_v28  ;;  %v6781_v34 = vadd.f32 %v6653_v51, %v6499_v21  ;;  %v18084_v9 = vmul.f32 %v20991_v32, %v20949_v55  ;;  %v7916_v19 = vmul.f32 %v20993_v29, %v20940_v48  ;;  %v20995_v31 = vld [vmem:[#allocation41_spill] sm:$0xff] }
 0x519   : > { %v7457_v41 = vrot.slane %v6960_v25, 7  ;;  %v7460_v60 = vrot.slane %v6961_v63, 7  ;;  %v7917_v52 = vmul.f32 %v20994_v0, %v20988_v17  ;;  %v7463_v7 = vrot.slane %v6962_v16, 7  ;;  %v20997_v51 = vld [vmem:[#allocation153_spill] sm:$0xff]  ;;  %v20999_v63 = vld [vmem:[#allocation167_spill] sm:$0xff] }
 0x51a   : > { %20992 = vst [vmem:[#allocation233_spill] sm:$0xff] %v18084_v9  ;;  %v10605_v4 = vcombine.low %v10597_v23, %v10604_v6  ;;  %v7918_v13 = vmul.f32 %v20995_v31, %v20989_v57  ;;  %v7919_v21 = vmul.f32 %v20996_v10, %v20949_v55  ;;  %v20998_v39 = vrot.slane %v20997_v51, 9  ;;  %v21004_v57 = vld [vmem:[#allocation56_spill] sm:$0xff]  ;;  %v21007_v48 = vld [vmem:[#allocation45_spill] sm:$0xff] }
 0x51b   : > { %v7459_v6 = vrot.slane %v7457_v41, 2  ;;  %v7462_v25 = vrot.slane %v7460_v60, 2  ;;  %v8198_v16 = vmul.f32 %v21000_v47, %v20999_v63  ;;  %v7465_v32 = vrot.slane %v7463_v7, 2  ;;  %v21010_v29 = vld [vmem:[#allocation177_spill] sm:$0xff] }
 0x51c   : > { %11664 = vmatmul.mubr.msk.f32.gmra.mxu1 %vm10708_vm10, %v10605_v4  ;;  %v7458_v23 = vsel %vm12500_vm9, %v20998_v39, %v7457_v41  ;;  %v8199_v33 = vmul.f32 %v21002_v30, %v21001_v11  ;;  %v8200_v10 = vmul.f32 %v21004_v57, %v21003_v35  ;;  %v21005_v39 = vld [vmem:[#allocation176_spill] sm:$0xff]  ;;  %v21006_v41 = vld [vmem:[#allocation205_spill] sm:$0xff]  ;;  %v8507_v47 = vmul.f32 %v21007_v48, %v20999_v63 }
 0x51d   : > { %v7762_v53 = vadd.f32 %v7458_v23, %v6778_v54  ;;  %v7461_v4 = vsel %vm12500_vm9, %v7459_v6, %v7460_v60  ;;  %v7464_v51 = vsel %vm12500_vm9, %v7462_v25, %v7463_v7  ;;  %v8201_v17 = vmul.f32 %v21006_v41, %v21005_v39  ;;  %v21009_v60 = vld [vmem:[#allocation57_spill] sm:$0xff] }
 0x51e   : > { %v21008_v54 = vrot.slane %v18084_v9, 7  ;;  %v7763_v30 = vadd.f32 %v7461_v4, %v6779_v14  ;;  %v7764_v31 = vadd.f32 %v7464_v51, %v6780_v38  ;;  %v8508_v6 = vmul.f32 %v21009_v60, %v21001_v11  ;;  %v21011_v9 = vld [vmem:[#allocation222_spill] sm:$0xff] }
 0x51f   : > { %v8044_v57 = vadd.f32 %v7916_v19, %v7762_v53  ;;  %v8509_v7 = vmul.f32 %v20796_v37, %v21003_v35  ;;  %v8510_v25 = vmul.f32 %v20797_v27, %v21005_v39  ;;  %v18126_v3 = vmul.f32 %v21011_v9, %v21010_v29 }
 0x520   : > { %v7467_v23 = vsel %vm12500_vm9, %v7465_v32, %v21008_v54  ;;  %v8045_v41 = vadd.f32 %v7917_v52, %v7763_v30  ;;  %v8046_v48 = vadd.f32 %v7918_v13, %v7764_v31  ;;  %v11382_v38 = vrot.slane %v8507_v47, 9 }
 0x521   : > { %v7765_v0 = vadd.f32 %v7467_v23, %v6781_v34  ;;  %v8326_v63 = vadd.f32 %v8198_v16, %v8044_v57  ;;  %v9005_v32 = vrot.slane %v8508_v6, 7  ;;  %v9008_v34 = vrot.slane %v8509_v7, 7 }
 0x522   : > { %v8327_v19 = vadd.f32 %v8199_v33, %v8045_v41  ;;  %v8328_v53 = vadd.f32 %v8200_v10, %v8046_v48  ;;  %v9011_v4 = vrot.slane %v8510_v25, 7  ;;  %v19428_v51 = vrot.slane %v18126_v3, 7  ;;  %v21012_v25 = vld [vmem:[#allocation16_spill] sm:$0xff] }
 0x523   : > { %v8047_v14 = vadd.f32 %v7919_v21, %v7765_v0  ;;  %v9006_v23 = vsel %vm12500_vm9, %v11382_v38, %v9005_v32  ;;  %v9007_v30 = vrot.slane %v9005_v32, 2  ;;  %v9010_v52 = vrot.slane %v9008_v34, 2  ;;  %v21014_v38 = vld [vmem:[#allocation80_spill] sm:$0xff] }
 0x524   : > { %v9013_v57 = vrot.slane %v9011_v4, 2  ;;  %v9310_v31 = vadd.f32 %v9006_v23, %v8326_v63  ;;  %v9464_v13 = vmul.f32 %v19826_v5, %v21001_v11  ;;  %v9465_v47 = vmul.f32 %v20282_v36, %v21003_v35  ;;  %v21013_v63 = vld [vmem:[#allocation78_spill] sm:$0xff] }
 0x525   : > { %v8329_v54 = vadd.f32 %v8201_v17, %v8047_v14  ;;  %v9009_v33 = vsel %vm12500_vm9, %v9007_v30, %v9008_v34  ;;  %v9012_v0 = vsel %vm12500_vm9, %v9010_v52, %v9011_v4  ;;  %v9466_v17 = vmul.f32 %v20283_v22, %v21005_v39  ;;  %v21015_v30 = vld [vmem:[#allocation27_spill] sm:$0xff] }
 0x526   : > { %v9467_v10 = vmul.f32 %v20284_v44, %v21010_v29  ;;  %v9015_v21 = vsel %vm12500_vm9, %v9013_v57, %v19428_v51  ;;  %v9311_v16 = vadd.f32 %v9009_v33, %v8327_v19  ;;  %v9312_v41 = vadd.f32 %v9012_v0, %v8328_v53 }
 0x527   : > { %v9592_v6 = vadd.f32 %v9464_v13, %v9310_v31  ;;  %v9313_v7 = vadd.f32 %v9015_v21, %v8329_v54  ;;  %v5099_v48 = vmul.f32 %v21012_v25, %v20889_v24  ;;  %v5100_v14 = vmul.f32 %v20289_v58, %v21013_v63  ;;  %v21017_v21 = vld [vmem:[#allocation86_spill] sm:$0xff] }
 0x528   : > { %v5101_v32 = vmul.f32 %v20291_v56, %v21014_v38  ;;  %v9593_v34 = vadd.f32 %v9465_v47, %v9311_v16  ;;  %v9594_v4 = vadd.f32 %v9466_v17, %v9312_v41  ;;  %v5416_v52 = vmul.f32 %v21015_v30, %v21013_v63 }
 0x529   : > { %v9747_v23 = vadd.f32 %v14371_v15, %v9592_v6  ;;  %v9595_v19 = vadd.f32 %v9467_v10, %v9313_v7  ;;  %v5417_v53 = vmul.f32 %v20293_v20, %v21014_v38  ;;  %v21016_v54 = vrot.slane %v18045_v42, 7 }
 0x52a   : > { %v6372_v57 = vmul.f32 %v20959_v40, %v21013_v63  ;;  %v9748_v31 = vadd.f32 %v20144_v61, %v9593_v34  ;;  %v9749_v13 = vadd.f32 %v20145_v49, %v9594_v4  ;;  %v5921_v33 = vrot.slane %v5416_v52, 7  ;;  %v21035_v40 = vld [vmem:[#allocation160_spill] sm:$0xff] }
 0x52b   : > { %v5920_v24 = vrot.slane %v21016_v54, 2  ;;  %v9875_v47 = vmax.f32 %v9747_v23, 0.0  ;;  %v9750_v0 = vadd.f32 %v20360_v12, %v9595_v19  ;;  %v5924_v17 = vrot.slane %v5417_v53, 7  ;;  %v21018_v19 = vld [vmem:[#allocation24_spill] sm:$0xff] }
 0x52c   : > { %v6373_v10 = vmul.f32 %v20114_v1, %v21014_v38  ;;  %v6374_v16 = vmul.f32 %v20115_v26, %v21017_v21  ;;  %v9876_v42 = vmax.f32 %v9748_v31, 0.0  ;;  %v9877_v41 = vmax.f32 %v9749_v13, 0.0  ;;  %v21019_v13 = vld [vmem:[#allocation134_spill] sm:$0xff] }
 0x52d   : > { %v10003_v6 = vmin.f32 %v9875_v47, 6.0  ;;  %v5922_v7 = vsel %vm12500_vm9, %v5920_v24, %v5921_v33  ;;  %v9878_v63 = vmax.f32 %v9750_v0, 0.0  ;;  %v5923_v34 = vrot.slane %v5921_v33, 2 }
 0x52e   : > { %v5926_v4 = vrot.slane %v5924_v17, 2  ;;  %v6218_v23 = vadd.f32 %v5922_v7, %v5099_v48  ;;  %v10004_v52 = vmin.f32 %v9876_v42, 6.0  ;;  %v10005_v54 = vmin.f32 %v9877_v41, 6.0 }
 0x52f   : > { %v6654_v53 = vmul.f32 %v21018_v19, %v20949_v55  ;;  %v6655_v38 = vmul.f32 %v20591_v46, %v20969_v43  ;;  %v10006_v51 = vmin.f32 %v9878_v63, 6.0  ;;  %v5925_v31 = vsel %vm12500_vm9, %v5923_v34, %v5924_v17 }
 0x530   : > { %v21020_v47 = vrot.slane %v21019_v13, 7  ;;  %v6500_v33 = vadd.f32 %v6372_v57, %v6218_v23  ;;  %v10606_v0 = vcombine.low %v10003_v6, %v10004_v52  ;;  %v6219_v48 = vadd.f32 %v5925_v31, %v5100_v14  ;;  %v21023_v23 = vld [vmem:[#allocation233_spill] sm:$0xff] }
 0x531   : > { %v6656_v42 = vmul.f32 %v20593_v2, %v20971_v50  ;;  %v10607_v41 = vcombine.low %v10005_v54, %v10006_v51  ;;  %v6657_v7 = vmul.f32 %v20595_v45, %v20973_v59  ;;  %v6964_v17 = vmul.f32 %v20596_v62, %v20969_v43  ;;  %v21022_v51 = vld [vmem:[#allocation49_spill] sm:$0xff]  ;;  %v21033_v62 = vld [vmem:[#allocation94_spill] sm:$0xff] }
 0x532   : > { %v5928_v24 = vsel %vm12500_vm9, %v5926_v4, %v21020_v47  ;;  %v6782_v63 = vadd.f32 %v6654_v53, %v6500_v33  ;;  %v10614_v34 = vrot.slane %v10606_v0, %v20361_v28  ;;  %v6501_v13 = vadd.f32 %v6373_v10, %v6219_v48  ;;  %v21026_v48 = vld [vmem:[#allocation52_spill] sm:$0xff] }
 0x533   : > { %v6220_v21 = vadd.f32 %v5928_v24, %v5101_v32  ;;  %v6965_v57 = vmul.f32 %v20597_v18, %v20971_v50  ;;  %v10621_v14 = vrot.slane %v10607_v41, %v20361_v28  ;;  %v21021_v32 = vld [vmem:[#allocation149_spill] sm:$0xff]  ;;  %v6966_v4 = vmul.f32 %v21022_v51, %v20973_v59 }
 0x534   : > { %v6785_v6 = vadd.f32 %v6657_v7, %v21021_v32  ;;  %v21024_v52 = vrot.slane %v21023_v23, 7  ;;  %v6783_v53 = vadd.f32 %v6655_v38, %v6501_v13  ;;  %v7469_v47 = vrot.slane %v6964_v17, 7  ;;  %v21027_v23 = vld [vmem:[#allocation41_spill] sm:$0xff]  ;;  %v21030_v13 = vld [vmem:[#allocation190_spill] sm:$0xff] }
 0x535   : > { %v6502_v19 = vadd.f32 %v6374_v16, %v6220_v21  ;;  %v7472_v24 = vrot.slane %v6965_v57, 7  ;;  %v10622_v33 = vcombine.low %v10614_v34, %v10621_v14  ;;  %v7475_v10 = vrot.slane %v6966_v4, 7  ;;  %v21025_v16 = vld [vmem:[#allocation37_spill] sm:$0xff]  ;;  %v21029_v34 = vld [vmem:[#allocation178_spill] sm:$0xff] }
 0x536   : > { %v7468_v54 = vrot.slane %v21024_v52, 2  ;;  %v7920_v0 = vmul.f32 %v21025_v16, %v20969_v43  ;;  %v7921_v21 = vmul.f32 %v21026_v48, %v20971_v50  ;;  %v7471_v7 = vrot.slane %v7469_v47, 2 }
 0x537   : > { %v6784_v31 = vadd.f32 %v6656_v42, %v6502_v19  ;;  %v7474_v32 = vrot.slane %v7472_v24, 2  ;;  %v7922_v52 = vmul.f32 %v21027_v23, %v20973_v59  ;;  %11666 = vmatprep.mubr.msk.f32.mxu1 %vm10708_vm10, %v10622_v33  ;;  %v7477_v19 = vrot.slane %v7475_v10, 2  ;;  %v21028_v42 = vld [vmem:[#allocation55_spill] sm:$0xff]  ;;  %v21034_v59 = vld [vmem:[#allocation205_spill] sm:$0xff] }
 0x538   : > { %v7470_v41 = vsel %vm12500_vm9, %v7468_v54, %v7469_v47  ;;  %v8202_v17 = vmul.f32 %v21028_v42, %v21010_v29  ;;  %v8203_v57 = vmul.f32 %v21030_v13, %v21029_v34  ;;  %v7473_v14 = vsel %vm12500_vm9, %v7471_v7, %v7472_v24  ;;  %v21031_v54 = vld [vmem:[#allocation179_spill] sm:$0xff]  ;;  %v21032_v47 = vld [vmem:[#allocation56_spill] sm:$0xff] }
 0x539   : > { %v7766_v38 = vadd.f32 %v7470_v41, %v6782_v63  ;;  %v7476_v4 = vsel %vm12500_vm9, %v7474_v32, %v7475_v10  ;;  %v8204_v16 = vmul.f32 %v21032_v47, %v21031_v54  ;;  %v8205_v33 = vmul.f32 %v21034_v59, %v21033_v62 }
 0x53a   : > { %v21036_v63 = vrot.slane %v21035_v40, 7  ;;  %v7767_v42 = vadd.f32 %v7473_v14, %v6783_v53  ;;  %v7768_v30 = vadd.f32 %v7476_v4, %v6784_v31  ;;  %v8512_v24 = vmul.f32 %v21009_v60, %v21029_v34 }
 0x53b   : > { %v8048_v50 = vadd.f32 %v7920_v0, %v7766_v38  ;;  %v8513_v10 = vmul.f32 %v20796_v37, %v21031_v54  ;;  %v8514_v7 = vmul.f32 %v20797_v27, %v21033_v62  ;;  %v21037_v40 = vrot.slane %v18126_v3, 7 }
 0x53c   : > { %v7479_v41 = vsel %vm12500_vm9, %v7477_v19, %v21036_v63  ;;  %v8049_v32 = vadd.f32 %v7921_v21, %v7767_v42  ;;  %v8050_v25 = vadd.f32 %v7922_v52, %v7768_v30  ;;  %v21038_v19 = vld [vmem:[#allocation162_spill] sm:$0xff]  ;;  %v9017_v31 = vrot.slane %v8512_v24, 7  ;;  %v21039_v42 = vld [vmem:[#allocation97_spill] sm:$0xff] }
 0x53d   : > { %v7769_v43 = vadd.f32 %v7479_v41, %v6785_v6  ;;  %v8330_v9 = vadd.f32 %v8202_v17, %v8048_v50  ;;  %v9016_v59 = vrot.slane %v21037_v40, 2  ;;  %v9020_v0 = vrot.slane %v8513_v10, 7  ;;  %v21042_v10 = vld [vmem:[#allocation182_spill] sm:$0xff] }
 0x53e   : > { %v9023_v6 = vrot.slane %v8514_v7, 7  ;;  %v8331_v38 = vadd.f32 %v8203_v57, %v8049_v32  ;;  %v8332_v14 = vadd.f32 %v8204_v16, %v8050_v25  ;;  %v9468_v4 = vmul.f32 %v19826_v5, %v21029_v34  ;;  %v21040_v57 = vld [vmem:[#allocation148_spill] sm:$0xff] }
 0x53f   : > { %v8051_v53 = vadd.f32 %v21038_v19, %v7769_v43  ;;  %v9469_v63 = vmul.f32 %v20282_v36, %v21031_v54  ;;  %v9018_v50 = vsel %vm12500_vm9, %v9016_v59, %v9017_v31  ;;  %v9019_v30 = vrot.slane %v9017_v31, 2  ;;  %v21041_v59 = vld [vmem:[#allocation96_spill] sm:$0xff]  ;;  %v21044_v31 = vld [vmem:[#allocation150_spill] sm:$0xff] }
 0x540   : > { %v9022_v3 = vrot.slane %v9020_v0, 2  ;;  %v9025_v21 = vrot.slane %v9023_v6, 2  ;;  %v9314_v52 = vadd.f32 %v9018_v50, %v8330_v9  ;;  %v9470_v43 = vmul.f32 %v20283_v22, %v21033_v62  ;;  %v21047_v62 = vld [vmem:[#allocation34_spill] sm:$0xff] }
 0x541   : > { %v8333_v41 = vadd.f32 %v8205_v33, %v8051_v53  ;;  %v9471_v25 = vmul.f32 %v20284_v44, %v21039_v42  ;;  %v9021_v16 = vsel %vm12500_vm9, %v9019_v30, %v9020_v0  ;;  %v5104_v33 = vmul.f32 %v20289_v58, %v21040_v57  ;;  %v21045_v0 = vld [vmem:[#allocation26_spill] sm:$0xff]  ;;  %v21046_v30 = vld [vmem:[#allocation31_spill] sm:$0xff] }
 0x542   : > { %v9024_v17 = vsel %vm12500_vm9, %v9022_v3, %v9023_v6  ;;  %v5105_v24 = vmul.f32 %v20291_v56, %v21041_v59  ;;  %v21043_v9 = vrot.slane %v21042_v10, 7  ;;  %v9315_v32 = vadd.f32 %v9021_v16, %v8331_v38 }
 0x543   : > { %v9316_v40 = vadd.f32 %v9024_v17, %v8332_v14  ;;  %v9596_v19 = vadd.f32 %v9468_v4, %v9314_v52  ;;  %v5106_v50 = vmul.f32 %v21045_v0, %v21044_v31  ;;  %v5422_v6 = vmul.f32 %v20293_v20, %v21041_v59 }
 0x544   : > { %v9027_v7 = vsel %vm12500_vm9, %v9025_v21, %v21043_v9  ;;  %v5423_v3 = vmul.f32 %v21046_v30, %v21044_v31  ;;  %v9597_v42 = vadd.f32 %v9469_v63, %v9315_v32  ;;  %v18261_v21 = vmul.f32 %v21047_v62, %v20949_v55  ;;  %v21048_v9 = vld [vmem:[#allocation192_spill] sm:$0xff] }
 0x545   : > { %v9317_v53 = vadd.f32 %v9027_v7, %v8333_v41  ;;  %v9598_v57 = vadd.f32 %v9470_v43, %v9316_v40  ;;  %v9751_v10 = vadd.f32 %v14371_v15, %v9596_v19  ;;  %v5937_v14 = vrot.slane %v5422_v6, 7 }
 0x546   : > { %v5940_v4 = vrot.slane %v5423_v3, 7  ;;  %v6377_v41 = vmul.f32 %v20114_v1, %v21041_v59  ;;  %v9752_v52 = vadd.f32 %v20144_v61, %v9597_v42  ;;  %v19435_v63 = vrot.slane %v18261_v21, 7 }
 0x547   : > { %v9599_v38 = vadd.f32 %v9471_v25, %v9317_v53  ;;  %v9753_v16 = vadd.f32 %v20145_v49, %v9598_v57  ;;  %v9879_v17 = vmax.f32 %v9751_v10, 0.0  ;;  %v5938_v62 = vsel %vm12500_vm9, %v21048_v9, %v5937_v14 }
 0x548   : > { %v5939_v7 = vrot.slane %v5937_v14, 2  ;;  %v5942_v25 = vrot.slane %v5940_v4, 2  ;;  %v9880_v32 = vmax.f32 %v9752_v52, 0.0  ;;  %v6223_v53 = vadd.f32 %v5938_v62, %v5104_v33  ;;  %v21049_v14 = vld [vmem:[#allocation32_spill] sm:$0xff] }
 0x549   : > { %v9754_v43 = vadd.f32 %v20360_v12, %v9599_v38  ;;  %v9881_v40 = vmax.f32 %v9753_v16, 0.0  ;;  %v10007_v19 = vmin.f32 %v9879_v17, 6.0  ;;  %v6378_v30 = vmul.f32 %v20115_v26, %v21044_v31 }
 0x54a   : > { %v5941_v0 = vsel %vm12500_vm9, %v5939_v7, %v5940_v4  ;;  %v5944_v6 = vsel %vm12500_vm9, %v5942_v25, %v19435_v63  ;;  %v10008_v3 = vmin.f32 %v9880_v32, 6.0  ;;  %v6379_v33 = vmul.f32 %v21049_v14, %v20949_v55  ;;  %v21050_v25 = vld [vmem:[#allocation51_spill] sm:$0xff] }
 0x54b   : > { %v9882_v59 = vmax.f32 %v9754_v43, 0.0  ;;  %v10009_v42 = vmin.f32 %v9881_v40, 6.0  ;;  %v6224_v57 = vadd.f32 %v5941_v0, %v5105_v24  ;;  %v6225_v10 = vadd.f32 %v5944_v6, %v5106_v50 }
 0x54c   : > { %v6505_v52 = vadd.f32 %v6377_v41, %v6223_v53  ;;  %v6659_v4 = vmul.f32 %v20591_v46, %v21001_v11  ;;  %v10623_v16 = vcombine.low %v10007_v19, %v10008_v3  ;;  %v6660_v43 = vmul.f32 %v20593_v2, %v21003_v35 }
 0x54d   : > { %v10010_v38 = vmin.f32 %v9882_v59, 6.0  ;;  %v6506_v17 = vadd.f32 %v6378_v30, %v6224_v57  ;;  %v6661_v31 = vmul.f32 %v20595_v45, %v21005_v39  ;;  %v6507_v62 = vadd.f32 %v6379_v33, %v6225_v10  ;;  %v21051_v30 = vld [vmem:[#allocation53_spill] sm:$0xff]  ;;  %v18310_v33 = vpop.f32.mrf.mxu1 }
 0x54e   : > { %v6787_v24 = vadd.f32 %v6659_v4, %v6505_v52  ;;  %v6970_v50 = vmul.f32 %v20597_v18, %v21003_v35  ;;  %v10631_v7 = vrot.slane %v10623_v16, %v20361_v28  ;;  %v6971_v11 = vmul.f32 %v21022_v51, %v21005_v39  ;;  %v21054_v4 = vld [vmem:[#allocation186_spill] sm:$0xff] }
 0x54f   : > { %v10624_v9 = vcombine.low %v10009_v42, %v10010_v38  ;;  %v6788_v41 = vadd.f32 %v6660_v43, %v6506_v17  ;;  %v18295_v32 = vmul.f32 %v21050_v25, %v21010_v29  ;;  %v6789_v19 = vadd.f32 %v6661_v31, %v6507_v62  ;;  %v21052_v42 = vld [vmem:[#allocation197_spill] sm:$0xff]  ;;  %v21053_v38 = vld [vmem:[#allocation180_spill] sm:$0xff]  ;;  %v21057_v25 = vld [vmem:[#allocation198_spill] sm:$0xff] }
 0x550   : > { %v7485_v45 = vrot.slane %v6970_v50, 7  ;;  %v7925_v53 = vmul.f32 %v21026_v48, %v21003_v35  ;;  %v7488_v59 = vrot.slane %v6971_v11, 7  ;;  %v7926_v6 = vmul.f32 %v21027_v23, %v21005_v39  ;;  %v21055_v39 = vld [vmem:[#allocation187_spill] sm:$0xff]  ;;  %v21056_v17 = vld [vmem:[#allocation205_spill] sm:$0xff] }
 0x551   : > { %v10638_v40 = vrot.slane %v10624_v9, %v20361_v28  ;;  %v7491_v0 = vrot.slane %v18295_v32, 7  ;;  %v7927_v51 = vmul.f32 %v21051_v30, %v21010_v29  ;;  %v8207_v14 = vmul.f32 %v21030_v13, %v21053_v38 }
 0x552   : > { %v7486_v57 = vsel %vm12500_vm9, %v21052_v42, %v7485_v45  ;;  %v7487_v10 = vrot.slane %v7485_v45, 2  ;;  %v7490_v35 = vrot.slane %v7488_v59, 2  ;;  %v8208_v16 = vmul.f32 %v21032_v47, %v21054_v4 }
 0x553   : > { %v10639_v3 = vcombine.low %v10631_v7, %v10638_v40  ;;  %v7771_v52 = vadd.f32 %v7486_v57, %v6787_v24  ;;  %v8209_v43 = vmul.f32 %v21056_v17, %v21055_v39  ;;  %v8517_v9 = vmul.f32 %v21009_v60, %v21053_v38  ;;  %v21058_v40 = vld [vmem:[#allocation222_spill] sm:$0xff]  ;;  %v18333_v57 = vpop.f32.mrf.mxu1 }
 0x554   : > { %v7489_v31 = vsel %vm12500_vm9, %v7487_v10, %v7488_v59  ;;  %v8518_v62 = vmul.f32 %v20796_v37, %v21054_v4  ;;  %v8519_v24 = vmul.f32 %v20797_v27, %v21055_v39  ;;  %v7492_v50 = vsel %vm12500_vm9, %v7490_v35, %v7491_v0 }
 0x555   : > { %11667 = vmatmul.mubr.msk.f32.gmra.mxu1 %vm10708_vm10, %v10639_v3  ;;  %v7772_v7 = vadd.f32 %v7489_v31, %v6788_v41  ;;  %v8053_v11 = vadd.f32 %v7925_v53, %v7771_v52  ;;  %v18331_v45 = vmul.f32 %v21058_v40, %v21057_v25  ;;  %v7773_v59 = vadd.f32 %v7492_v50, %v6789_v19  ;;  %v21059_v41 = vld [vmem:[#allocation194_spill] sm:$0xff]  ;;  %v21061_v50 = vld [vmem:[#allocation203_spill] sm:$0xff] }
 0x556   : > { %v9030_v30 = vrot.slane %v8517_v9, 7  ;;  %v9033_v3 = vrot.slane %v8518_v62, 7  ;;  %v9036_v42 = vrot.slane %v8519_v24, 7  ;;  %v9472_v63 = vmul.f32 %v19826_v5, %v21053_v38  ;;  %v18342_v9 = vpop.f32.mrf.mxu1 }
 0x557   : > { %v8054_v10 = vadd.f32 %v7926_v6, %v7772_v7  ;;  %v8335_v17 = vadd.f32 %v8207_v14, %v8053_v11  ;;  %v9039_v27 = vrot.slane %v18331_v45, 7  ;;  %v8055_v35 = vadd.f32 %v7927_v51, %v7773_v59 }
 0x558   : > { %v21060_v53 = vrot.slane %v21059_v41, 9  ;;  %v9032_v31 = vrot.slane %v9030_v30, 2  ;;  %v9035_v19 = vrot.slane %v9033_v3, 2  ;;  %v9038_v24 = vrot.slane %v9036_v42, 2  ;;  %v18363_v41 = vpop.f32.mrf.mxu1 }
 0x559   : > { %v8336_v62 = vadd.f32 %v8208_v16, %v8054_v10  ;;  %v9473_v14 = vmul.f32 %v20282_v36, %v21054_v4  ;;  %v8337_v7 = vadd.f32 %v8209_v43, %v8055_v35  ;;  %v9474_v11 = vmul.f32 %v20283_v22, %v21055_v39  ;;  %v21063_v35 = vld [vmem:[#allocation155_spill] sm:$0xff] }
 0x55a   : > { %v9031_v52 = vsel %vm12500_vm9, %v21060_v53, %v9030_v30  ;;  %v9034_v51 = vsel %vm12500_vm9, %v9032_v31, %v9033_v3  ;;  %v9037_v38 = vsel %vm12500_vm9, %v9035_v19, %v9036_v42  ;;  %v9040_v16 = vsel %vm12500_vm9, %v9038_v24, %v9039_v27  ;;  %v21062_v3 = vld [vmem:[#allocation16_spill] sm:$0xff] }
 0x55b   : > { %v9318_v6 = vadd.f32 %v9031_v52, %v21061_v50  ;;  %v9319_v40 = vadd.f32 %v9034_v51, %v8335_v17  ;;  %v9320_v59 = vadd.f32 %v9037_v38, %v8336_v62  ;;  %v9475_v4 = vmul.f32 %v20284_v44, %v21057_v25  ;;  %v21064_v52 = vld [vmem:[#allocation157_spill] sm:$0xff]  ;;  %v21065_v17 = vld [vmem:[#allocation27_spill] sm:$0xff] }
 0x55c   : > { %v9321_v43 = vadd.f32 %v9040_v16, %v8337_v7  ;;  %v5107_v10 = vmul.f32 %v21062_v3, %v20949_v55  ;;  %v5108_v42 = vmul.f32 %v20289_v58, %v21063_v35  ;;  %v5109_v31 = vmul.f32 %v20291_v56, %v21064_v52  ;;  %v18374_v58 = vpop.f32.mrf.mxu1  ;;  %v21067_v56 = vld [vmem:[#allocation18_spill] sm:$0xff] }
 0x55d   : > { %v9600_v30 = vadd.f32 %v9472_v63, %v9318_v6  ;;  %v9601_v39 = vadd.f32 %v9473_v14, %v9319_v40  ;;  %v9602_v53 = vadd.f32 %v9474_v11, %v9320_v59  ;;  %v5425_v19 = vmul.f32 %v21065_v17, %v21063_v35 }
 0x55e   : > { %v9603_v62 = vadd.f32 %v9475_v4, %v9321_v43  ;;  %v5426_v63 = vmul.f32 %v20293_v20, %v21064_v52  ;;  %v21066_v55 = vrot.slane %v18261_v21, 7  ;;  %v6380_v7 = vmul.f32 %v21067_v56, %v21063_v35 }
 0x55f   : > { %v9755_v44 = vadd.f32 %v14371_v15, %v9600_v30  ;;  %v9756_v50 = vadd.f32 %v20144_v61, %v9601_v39  ;;  %v9757_v6 = vadd.f32 %v20145_v49, %v9602_v53  ;;  %v5946_v14 = vrot.slane %v5425_v19, 7  ;;  %v18385_v39 = vpop.f32.mrf.mxu1  ;;  %v21068_v19 = vld [vmem:[#allocation156_spill] sm:$0xff] }
 0x560   : > { %v5945_v24 = vrot.slane %v21066_v55, 2  ;;  %v9758_v51 = vadd.f32 %v20360_v12, %v9603_v62  ;;  %v5949_v11 = vrot.slane %v5426_v63, 7  ;;  %v6381_v20 = vmul.f32 %v20114_v1, %v21064_v52  ;;  %v21069_v62 = vld [vmem:[#allocation158_spill] sm:$0xff] }
 0x561   : > { %v9883_v38 = vmax.f32 %v9755_v44, 0.0  ;;  %v9884_v16 = vmax.f32 %v9756_v50, 0.0  ;;  %v9885_v21 = vmax.f32 %v9757_v6, 0.0  ;;  %v5948_v59 = vrot.slane %v5946_v14, 2  ;;  %v18395_v50 = vpop.f32.mrf.mxu1 }
 0x562   : > { %v5947_v40 = vsel %vm12500_vm9, %v5945_v24, %v5946_v14  ;;  %v9886_v4 = vmax.f32 %v9758_v51, 0.0  ;;  %v5951_v30 = vrot.slane %v5949_v11, 2  ;;  %v6382_v1 = vmul.f32 %v20115_v26, %v21068_v19  ;;  %v21071_v14 = vld [vmem:[#allocation24_spill] sm:$0xff]  ;;  %v21074_v19 = vld [vmem:[#allocation94_spill] sm:$0xff] }
 0x563   : > { %v10011_v43 = vmin.f32 %v9883_v38, 6.0  ;;  %v6226_v3 = vadd.f32 %v5947_v40, %v5107_v10  ;;  %v10012_v35 = vmin.f32 %v9884_v16, 6.0  ;;  %v10013_v53 = vmin.f32 %v9885_v21, 6.0  ;;  %v21072_v16 = vld [vmem:[#allocation39_spill] sm:$0xff] }
 0x564   : > { %v5950_v17 = vsel %vm12500_vm9, %v5948_v59, %v5949_v11  ;;  %v10014_v52 = vmin.f32 %v9886_v4, 6.0  ;;  %v21070_v44 = vrot.slane %v21069_v62, 7  ;;  %v6662_v56 = vmul.f32 %v21071_v14, %v21010_v29  ;;  %v18411_v4 = vpop.f32.mrf.mxu1  ;;  %v21075_v62 = vld [vmem:[#allocation55_spill] sm:$0xff] }
 0x565   : > { %v6227_v55 = vadd.f32 %v5950_v17, %v5108_v42  ;;  %v6508_v24 = vadd.f32 %v6380_v7, %v6226_v3  ;;  %v10640_v10 = vcombine.low %v10011_v43, %v10012_v35  ;;  %v6663_v51 = vmul.f32 %v20591_v46, %v21029_v34 }
 0x566   : > { %v5953_v63 = vsel %vm12500_vm9, %v5951_v30, %v21070_v44  ;;  %v10641_v38 = vcombine.low %v10013_v53, %v10014_v52  ;;  %v6664_v11 = vmul.f32 %v20593_v2, %v21031_v54  ;;  %v6973_v21 = vmul.f32 %v21072_v16, %v21029_v34  ;;  %v21073_v30 = vld [vmem:[#allocation37_spill] sm:$0xff] }
 0x567   : > { %v6228_v6 = vadd.f32 %v5953_v63, %v5109_v31  ;;  %v6509_v26 = vadd.f32 %v6381_v20, %v6227_v55  ;;  %v10648_v42 = vrot.slane %v10640_v10, %v20361_v28  ;;  %v6790_v40 = vadd.f32 %v6662_v56, %v6508_v24  ;;  %v21076_v63 = vld [vmem:[#allocation199_spill] sm:$0xff]  ;;  %v21078_v10 = vld [vmem:[#allocation202_spill] sm:$0xff] }
 0x568   : > { %v6974_v31 = vmul.f32 %v20597_v18, %v21031_v54  ;;  %v10655_v29 = vrot.slane %v10641_v38, %v20361_v28  ;;  %v7493_v46 = vrot.slane %v7491_v0, 2  ;;  %v7494_v20 = vrot.slane %v6973_v21, 7  ;;  %v18421_v0 = vpop.f32.mrf.mxu1  ;;  %v21080_v21 = vld [vmem:[#allocation201_spill] sm:$0xff] }
 0x569   : > { %v6510_v7 = vadd.f32 %v6382_v1, %v6228_v6  ;;  %v6791_v59 = vadd.f32 %v6663_v51, %v6509_v26  ;;  %v7928_v3 = vmul.f32 %v21073_v30, %v21029_v34  ;;  %v7929_v35 = vmul.f32 %v21026_v48, %v21031_v54  ;;  %v21077_v54 = vld [vmem:[#allocation200_spill] sm:$0xff] }
 0x56a   : > { %v7497_v43 = vrot.slane %v6974_v31, 7  ;;  %v10656_v53 = vcombine.low %v10648_v42, %v10655_v29  ;;  %v7495_v18 = vsel %vm12500_vm9, %v7493_v46, %v7494_v20  ;;  %v7496_v17 = vrot.slane %v7494_v20, 2  ;;  %v21082_v20 = vld [vmem:[#allocation60_spill] sm:$0xff] }
 0x56b   : > { %v6792_v2 = vadd.f32 %v6664_v11, %v6510_v7  ;;  %v7930_v32 = vmul.f32 %v21027_v23, %v21074_v19  ;;  %v7774_v52 = vadd.f32 %v7495_v18, %v6790_v40  ;;  %v8210_v44 = vmul.f32 %v21075_v62, %v21057_v25 }
 0x56c   : > { %v7499_v1 = vrot.slane %v7497_v43, 2  ;;  %v8211_v34 = vmul.f32 %v21030_v13, %v21076_v63  ;;  %11669 = vmatprep.mubr.msk.f32.mxu1 %vm10708_vm10, %v10656_v53  ;;  %v7498_v48 = vsel %vm12500_vm9, %v7496_v17, %v7497_v43  ;;  %v8212_v55 = vmul.f32 %v21032_v47, %v21077_v54  ;;  %v21083_v43 = vld [vmem:[#allocation208_spill] sm:$0xff] }
 0x56d   : > { %v8521_v23 = vmul.f32 %v21009_v60, %v21076_v63  ;;  %v8522_v24 = vmul.f32 %v20796_v37, %v21077_v54  ;;  %v21079_v6 = vrot.slane %v21078_v10, 7  ;;  %v7775_v13 = vadd.f32 %v7498_v48, %v6791_v59  ;;  %v18444_v60 = vpop.f32.mrf.mxu1  ;;  %v21081_v59 = vld [vmem:[#allocation216_spill] sm:$0xff] }
 0x56e   : > { %v8056_v14 = vadd.f32 %v7928_v3, %v7774_v52  ;;  %v9041_v56 = vrot.slane %v9039_v27, 2  ;;  %v9476_v47 = vmul.f32 %v19826_v5, %v21076_v63  ;;  %v9477_v16 = vmul.f32 %v20282_v36, %v21077_v54 }
 0x56f   : > { %v7501_v25 = vsel %vm12500_vm9, %v7499_v1, %v21079_v6  ;;  %v9042_v38 = vrot.slane %v8521_v23, 7  ;;  %v9045_v26 = vrot.slane %v8522_v24, 7  ;;  %v8057_v11 = vadd.f32 %v7929_v35, %v7775_v13  ;;  %v18452_v31 = vpop.f32.mrf.mxu1  ;;  %v21085_v35 = vld [vmem:[#allocation127_spill] sm:$0xff] }
 0x570   : > { %v7776_v51 = vadd.f32 %v7501_v25, %v6792_v2  ;;  %v8338_v37 = vadd.f32 %v8210_v44, %v8056_v14  ;;  %v9478_v42 = vmul.f32 %v20283_v22, %v21080_v21  ;;  %v9762_v46 = vadd.f32 %v20360_v12, %v21081_v59  ;;  %v21087_v44 = vld [vmem:[#allocation141_spill] sm:$0xff]  ;;  %v18482_v21 = vld [vmem:[%s18723_s7] ss:$0 sm:$0xff] }
 0x571   : > { %v9043_v45 = vsel %vm12500_vm9, %v9041_v56, %v9042_v38  ;;  %v9044_v27 = vrot.slane %v9042_v38, 2  ;;  %v9047_v40 = vrot.slane %v9045_v26, 2  ;;  %v8339_v29 = vadd.f32 %v8211_v34, %v8057_v11  ;;  %v18469_v34 = vpop.f32.mrf.mxu1  ;;  %v21089_v11 = vld [vmem:[#allocation89_spill] sm:$0xff] }
 0x572   : > { %v8058_v7 = vadd.f32 %v7930_v32, %v7776_v51  ;;  %v9322_v5 = vadd.f32 %v9043_v45, %v8338_v37  ;;  %v9763_v2 = vadd.f32 %v14371_v15, %v21082_v20  ;;  %v21084_v30 = vrot.slane %v21083_v43, 7  ;;  %v21086_v32 = vld [vmem:[#allocation217_spill] sm:$0xff] }
 0x573   : > { %v9046_v22 = vsel %vm12500_vm9, %v9044_v27, %v9045_v26  ;;  %v9764_v53 = vadd.f32 %v20144_v61, %v21085_v35  ;;  %v9890_v19 = vmax.f32 %v9762_v46, 0.0  ;;  %v9765_v12 = vadd.f32 %v20145_v49, %v21086_v32  ;;  %v18472_v25 = vpop.f32.mrf.mxu1  ;;  %v21088_v51 = vld [vmem:[#allocation181_spill] sm:$0xff] }
 0x574   : > { %v8340_v36 = vadd.f32 %v8212_v55, %v8058_v7  ;;  %v9049_v3 = vsel %vm12500_vm9, %v9047_v40, %v21084_v30  ;;  %v9323_v18 = vadd.f32 %v9046_v22, %v8339_v29  ;;  %v9604_v17 = vadd.f32 %v9476_v47, %v9322_v5  ;;  %v21091_v22 = vld [vmem:[#allocation232_spill] sm:$0xff]  ;;  %v11752_v30 = vld [vmem:[%s11934_s18 + $0x20] sm:$0xff] }
 0x575   : > { %v9891_v52 = vmax.f32 %v9763_v2, 0.0  ;;  %v9892_v62 = vmax.f32 %v9764_v53, 0.0  ;;  %v9894_v63 = vmax.f32 %v21087_v44, 0.0  ;;  %v10018_v54 = vmin.f32 %v9890_v19, 6.0  ;;  %v18485_v5 = vpop.f32.mrf.mxu1 }
 0x576   : > { %v9324_v1 = vadd.f32 %v9049_v3, %v8340_v36  ;;  %v9605_v48 = vadd.f32 %v9477_v16, %v9323_v18  ;;  %v9759_v8 = vadd.f32 %v14371_v15, %v9604_v17  ;;  %v9893_v55 = vmax.f32 %v9765_v12, 0.0  ;;  %v21090_v15 = vld [vmem:[#allocation226_spill] sm:$0xff]  ;;  %v11753_v17 = vld [vmem:[%s11934_s18 + $0x28] sm:$0x3] }
 0x577   : > { %v10019_v24 = vmin.f32 %v9891_v52, 6.0  ;;  %v10020_v10 = vmin.f32 %v9892_v62, 6.0  ;;  %v10022_v6 = vmin.f32 %v9894_v63, 6.0  ;;  %v9895_v38 = vmax.f32 %v21088_v51, 0.0  ;;  %v18493_v35 = vpop.f32.mrf.mxu1  ;;  %v11754_v52 = vld [vmem:[%s11934_s18 + $0x18] sm:$0xff] }
 0x578   : > { %v9606_v23 = vadd.f32 %v9478_v42, %v9324_v1  ;;  %v9760_v13 = vadd.f32 %v20144_v61, %v9605_v48  ;;  %v9887_v14 = vmax.f32 %v9759_v8, 0.0  ;;  %v10021_v56 = vmin.f32 %v9893_v55, 6.0  ;;  %v11755_v48 = vld [vmem:[%s11934_s18 + $0x38] sm:$0xff] }
 0x579   : > { %v10674_v47 = vcombine.low %v10019_v24, %v10020_v10  ;;  %v9896_v37 = vmax.f32 %v21089_v11, 0.0  ;;  %v9897_v16 = vmax.f32 %v21090_v15, 0.0  ;;  %v10023_v45 = vmin.f32 %v9895_v38, 6.0  ;;  %v18516_v10 = vpop.f32.mrf.mxu1  ;;  %v11759_v11 = vld [vmem:[%s11934_s18 + $0x58] sm:$0x3] }
 0x57a   : > { %v9761_v26 = vadd.f32 %v20145_v49, %v9606_v23  ;;  %v9888_v42 = vmax.f32 %v9760_v13, 0.0  ;;  %v10015_v7 = vmin.f32 %v9887_v14, 6.0  ;;  %v10675_v61 = vcombine.low %v10021_v56, %v10022_v6  ;;  %v11756_v13 = vld [vmem:[%s11934_s18 + $0x40] sm:$0x3]  ;;  %v11757_v56 = vld [vmem:[%s11934_s18 + $0x30] sm:$0xff] }
 0x57b   : > { %v10682_v40 = vrot.slane %v10674_v47, %v20361_v28  ;;  %v10024_v49 = vmin.f32 %v9896_v37, 6.0  ;;  %v10025_v29 = vmin.f32 %v9897_v16, 6.0  ;;  %v10845_v20 = vadd.f32 %v18310_v33, %v18482_v21  ;;  %v18528_v15 = vpop.f32.mrf.mxu1 }
 0x57c   : > { %v9889_v27 = vmax.f32 %v9761_v26, 0.0  ;;  %v10016_v59 = vmin.f32 %v9888_v42, 6.0  ;;  %v10689_v46 = vrot.slane %v10675_v61, %v20361_v28  ;;  %v11000_v3 = vrot.slane %v11752_v30, 1  ;;  %v11758_v26 = vld [vmem:[%s11934_s18 + $0x50] sm:$0xff] }
 0x57d   : > { %v10691_v36 = vcombine.low %v10023_v45, %v10024_v49  ;;  %v10692_v43 = vcombine.low %v10025_v29, %v21091_v22  ;;  %v11002_v19 = vrot.slane %v11753_v17, 1  ;;  %v10840_v32 = vadd.f32 %v18482_v21, %v18333_v57  ;;  %v11761_v29 = vld [vmem:[%s11934_s18 + $0x68] sm:$0xff]  ;;  %v18554_v30 = vpop.f32.mrf.mxu1 }
 0x57e   : > { %v10017_v2 = vmin.f32 %v9889_v27, 6.0  ;;  %v10657_v53 = vcombine.low %v10015_v7, %v10016_v59  ;;  %v10690_v18 = vcombine.low %v10682_v40, %v10689_v46  ;;  %v10999_v62 = vrot.slane %v11754_v52, 1  ;;  %v11762_v46 = vld [vmem:[%s11934_s18 + $0x70] sm:$0x3]  ;;  %v11765_v17 = vld [vmem:[%s11934_s18 + $0x88] sm:$0x3] }
 0x57f   : > { %v18499_v12 = vrot.slane %v10691_v36, %v20361_v28  ;;  %v10706_v1 = vrot.slane %v10692_v43, %v20361_v28  ;;  %v11003_v63 = vsel %vm10998_vm11, %v11000_v3, %v11002_v19  ;;  %v10855_v57 = vadd.f32 %v18342_v9, %v18482_v21  ;;  %v11763_v36 = vld [vmem:[%s11934_s18 + $0x60] sm:$0xff]  ;;  %v11656_v52 = vpop.f32.mrf.mxu1 }
 0x580   : > { %v10658_v33 = vcombine.low %v10017_v2, %v10018_v54  ;;  %v10665_v44 = vrot.slane %v10657_v53, %v20361_v28  ;;  %v11005_v8 = vrot.slane %v11755_v48, 1  ;;  %v11112_v23 = vadd.f32 %v11003_v63, %v10845_v20  ;;  %v11764_v53 = vld [vmem:[%s11934_s18 + $0x80] sm:$0xff] }
 0x581   : > { %v10707_v55 = vcombine.low %v18499_v12, %v10706_v1  ;;  %v11001_v24 = vsel %vm10998_vm11, %v10999_v62, %v11000_v3  ;;  %v11007_v14 = vrot.slane %v11756_v13, 1  ;;  %v10850_v9 = vadd.f32 %v18482_v21, %v18363_v41 }
 0x582   : > { %v10672_v54 = vrot.slane %v10658_v33, %v20361_v28  ;;  %v11111_v6 = vadd.f32 %v11001_v24, %v10840_v32  ;;  %v11004_v51 = vrot.slane %v11757_v56, 1  ;;  %11144 = vst.msk [vmem:[%s18507_s12 + $0x8] sm:$0xff] %vm1904_vm2, %v11112_v23  ;;  %v10865_v28 = vadd.f32 %v18374_v58, %v18482_v21  ;;  %v11760_v58 = vld [vmem:[%s11934_s18 + $0x48] sm:$0xff]  ;;  %v11766_v33 = vld [vmem:[%s11934_s18 + $0x78] sm:$0xff] }
 0x583   : > { %v11010_v47 = vrot.slane %v11758_v26, 1  ;;  %v11012_v37 = vrot.slane %v11759_v11, 1  ;;  %v11008_v41 = vsel %vm10998_vm11, %v11005_v8, %v11007_v14  ;;  %v10860_v42 = vadd.f32 %v18482_v21, %v18385_v39  ;;  %v11770_v14 = vld [vmem:[%s11934_s18 + $0xb0] sm:$0xff]  ;;  %v10929_v26 = vpop.f32.mrf.mxu1 }
 0x584   : > { %v10673_v38 = vcombine.low %v10665_v44, %v10672_v54  ;;  %11143 = vst.msk [vmem:[%s18507_s12] sm:$0xff] %vm1904_vm2, %v11111_v6  ;;  %v11006_v16 = vsel %vm10998_vm11, %v11004_v51, %v11005_v8  ;;  %v11009_v7 = vrot.slane %v11760_v58, 1  ;;  %v11114_v61 = vadd.f32 %v11008_v41, %v10855_v57  ;;  %v11768_v57 = vld [vmem:[%s11934_s18 + $0xa0] sm:$0x3]  ;;  %v11771_v51 = vld [vmem:[%s11934_s18 + $0xb8] sm:$0x3] }
 0x585   : > { %v11113_v45 = vadd.f32 %v11006_v16, %v10850_v9  ;;  %v11013_v27 = vsel %vm10998_vm11, %v11010_v47, %v11012_v37  ;;  %v10875_v40 = vadd.f32 %v18395_v50, %v18482_v21  ;;  %v11015_v59 = vrot.slane %v11761_v29, 1  ;;  %v11773_v41 = vld [vmem:[%s11934_s18 + $0xc8] sm:$0xff]  ;;  %v11774_v58 = vld [vmem:[%s11934_s18 + $0xd0] sm:$0x3] }
 0x586   : > { %11670 = vmatmul.mubr.msk.f32.gmra.mxu1 %vm10708_vm10, %v10673_v38  ;;  %v11116_v49 = vadd.f32 %v11013_v27, %v10865_v28  ;;  %v11011_v39 = vsel %vm10998_vm11, %v11009_v7, %v11010_v47  ;;  %v11017_v20 = vrot.slane %v11762_v46, 1  ;;  %11146 = vst.msk [vmem:[%s18507_s12 + $0x18] sm:$0xff] %vm1904_vm2, %v11114_v61  ;;  %v10870_v50 = vadd.f32 %v18482_v21, %v18411_v4  ;;  %v11772_v47 = vld [vmem:[%s11934_s18 + $0xa8] sm:$0xff]  ;;  %v11775_v61 = vld [vmem:[%s11934_s18 + $0xc0] sm:$0xff]  ;;  %v11659_v27 = vpop.f32.mrf.mxu1 }
 0x587   : > { %11672 = vmatprep.mubr.msk.f32.mxu1 %vm10708_vm10, %v10690_v18  ;;  %11145 = vst.msk [vmem:[%s18507_s12 + $0x10] sm:$0xff] %vm1904_vm2, %v11113_v45  ;;  %v11115_v2 = vadd.f32 %v11011_v39, %v10860_v42  ;;  %v11014_v22 = vrot.slane %v11763_v36, 1  ;;  %v10885_v43 = vadd.f32 %v18421_v0, %v18482_v21  ;;  %v11020_v18 = vrot.slane %v11764_v53, 1  ;;  %v11776_v39 = vld [vmem:[%s11934_s18 + $0xe0] sm:$0xff] }
 0x588   : > { %11148 = vst.msk [vmem:[%s18507_s12 + $0x28] sm:$0xff] %vm1904_vm2, %v11116_v49  ;;  %v11018_v3 = vsel %vm10998_vm11, %v11015_v59, %v11017_v20  ;;  %v11022_v19 = vrot.slane %v11765_v17, 1  ;;  %v10880_v4 = vadd.f32 %v18482_v21, %v18444_v60  ;;  %v11019_v12 = vrot.slane %v11766_v33, 1  ;;  %v11767_v60 = vld [vmem:[%s11934_s18 + $0x98] sm:$0xff]  ;;  %v11777_v20 = vld [vmem:[%s11934_s18 + $0xe8] sm:$0x3] }
 0x589   : > { %11147 = vst.msk [vmem:[%s18507_s12 + $0x20] sm:$0xff] %vm1904_vm2, %v11115_v2  ;;  %v11118_v0 = vadd.f32 %v11018_v3, %v10875_v40  ;;  %v11016_v32 = vsel %vm10998_vm11, %v11014_v22, %v11015_v59  ;;  %v10895_v1 = vadd.f32 %v18452_v31, %v18482_v21  ;;  %v11025_v63 = vrot.slane %v11767_v60, 1  ;;  %v11769_v31 = vld [vmem:[%s11934_s18 + $0x90] sm:$0xff]  ;;  %v11778_v22 = vld [vmem:[%s11934_s18 + $0xd8] sm:$0xff] }
 0x58a   : > { %11673 = vmatmul.mubr.msk.f32.gmra.mxu1 %vm10708_vm10, %v10707_v55  ;;  %v11117_v62 = vadd.f32 %v11016_v32, %v10870_v50  ;;  %v11023_v44 = vsel %vm10998_vm11, %v11020_v18, %v11022_v19  ;;  %v11027_v48 = vrot.slane %v11768_v57, 1  ;;  %v11021_v54 = vsel %vm10998_vm11, %v11019_v12, %v11020_v18  ;;  %v11779_v18 = vld [vmem:[%s11934_s18 + $0xf8] sm:$0xff]  ;;  %v11780_v19 = vld [vmem:[%s11934_s18 + $0x100] sm:$0x3]  ;;  %v11781_v12 = vld [vmem:[%s11934_s18 + $0xf0] sm:$0xff] }
 0x58b   : > { %11150 = vst.msk [vmem:[%s18507_s12 + $0x38] sm:$0xff] %vm1904_vm2, %v11118_v0  ;;  %v11120_v8 = vadd.f32 %v11023_v44, %v10885_v43  ;;  %v10890_v55 = vadd.f32 %v18482_v21, %v18469_v34  ;;  %v11024_v23 = vrot.slane %v11769_v31, 1  ;;  %v11119_v24 = vadd.f32 %v11021_v54, %v10880_v4  ;;  %v10939_v0 = vpop.f32.mrf.mxu1  ;;  %v11782_v60 = vld [vmem:[%s11934_s18 + $0x110] sm:$0xff] }
 0x58c   : > { %11149 = vst.msk [vmem:[%s18507_s12 + $0x30] sm:$0xff] %vm1904_vm2, %v11117_v62  ;;  %v11028_v6 = vsel %vm10998_vm11, %v11025_v63, %v11027_v48  ;;  %v10905_v13 = vadd.f32 %v18472_v25, %v18482_v21  ;;  %v11030_v9 = vrot.slane %v11770_v14, 1  ;;  %v11032_v38 = vrot.slane %v11771_v51, 1  ;;  %v11786_v51 = vld [vmem:[%s11934_s18 + $0x130] sm:$0x3] }
 0x58d   : > { %11152 = vst.msk [vmem:[%s18507_s12 + $0x48] sm:$0xff] %vm1904_vm2, %v11120_v8  ;;  %v11122_v34 = vadd.f32 %v11028_v6, %v10895_v1  ;;  %v11026_v56 = vsel %vm10998_vm11, %v11024_v23, %v11025_v63  ;;  %v10900_v28 = vadd.f32 %v18482_v21, %v18485_v5  ;;  %11151 = vst.msk [vmem:[%s18507_s12 + $0x40] sm:$0xff] %vm1904_vm2, %v11119_v24  ;;  %v11029_v11 = vrot.slane %v11772_v47, 1  ;;  %v11783_v8 = vld [vmem:[%s11934_s18 + $0x118] sm:$0x3]  ;;  %v11784_v23 = vld [vmem:[%s11934_s18 + $0x108] sm:$0xff] }
 0x58e   : > { %v11121_v25 = vadd.f32 %v11026_v56, %v10890_v55  ;;  %v10915_v37 = vadd.f32 %v18493_v35, %v18482_v21  ;;  %v11035_v16 = vrot.slane %v11773_v41, 1  ;;  %v11033_v42 = vsel %vm10998_vm11, %v11030_v9, %v11032_v38 }
 0x58f   : > { %11154 = vst.msk [vmem:[%s18507_s12 + $0x58] sm:$0xff] %vm1904_vm2, %v11122_v34  ;;  %v11037_v5 = vrot.slane %v11774_v58, 1  ;;  %v10910_v7 = vadd.f32 %v18482_v21, %v18516_v10  ;;  %v11034_v45 = vrot.slane %v11775_v61, 1  ;;  %v11124_v35 = vadd.f32 %v11033_v42, %v10905_v13  ;;  %v11785_v34 = vld [vmem:[%s11934_s18 + $0x128] sm:$0xff] }
 0x590   : > { %11153 = vst.msk [vmem:[%s18507_s12 + $0x50] sm:$0xff] %vm1904_vm2, %v11121_v25  ;;  %v11031_v40 = vsel %vm10998_vm11, %v11029_v11, %v11030_v9  ;;  %v10925_v49 = vadd.f32 %v18528_v15, %v18482_v21  ;;  %v11040_v29 = vrot.slane %v11776_v39, 1  ;;  %v11042_v2 = vrot.slane %v11777_v20, 1  ;;  %v11789_v61 = vld [vmem:[%s11934_s18 + $0x148] sm:$0x3] }
 0x591   : > { %v11123_v59 = vadd.f32 %v11031_v40, %v10900_v28  ;;  %v11038_v10 = vsel %vm10998_vm11, %v11035_v16, %v11037_v5  ;;  %v11036_v46 = vsel %vm10998_vm11, %v11034_v45, %v11035_v16  ;;  %11156 = vst.msk [vmem:[%s18507_s12 + $0x68] sm:$0xff] %vm1904_vm2, %v11124_v35  ;;  %v10920_v15 = vadd.f32 %v18482_v21, %v18554_v30  ;;  %v11787_v28 = vld [vmem:[%s11934_s18 + $0x120] sm:$0xff] }
 0x592   : > { %v11126_v50 = vadd.f32 %v11038_v10, %v10915_v37  ;;  %v11125_v36 = vadd.f32 %v11036_v46, %v10910_v7  ;;  %v11039_v43 = vrot.slane %v11778_v22, 1  ;;  %v11043_v3 = vsel %vm10998_vm11, %v11040_v29, %v11042_v2  ;;  %v11788_v5 = vld [vmem:[%s11934_s18 + $0x140] sm:$0xff]  ;;  %v11791_v2 = vld [vmem:[%s11934_s18 + $0x158] sm:$0xff]  ;;  %v11793_v22 = vld [vmem:[%s11934_s18 + $0x150] sm:$0xff] }
 0x593   : > { %11155 = vst.msk [vmem:[%s18507_s12 + $0x60] sm:$0xff] %vm1904_vm2, %v11123_v59  ;;  %v10935_v53 = vadd.f32 %v11656_v52, %v18482_v21  ;;  %v11045_v17 = vrot.slane %v11779_v18, 1  ;;  %v11047_v4 = vrot.slane %v11780_v19, 1  ;;  %v11128_v30 = vadd.f32 %v11043_v3, %v10925_v49 }
 0x594   : > { %11158 = vst.msk [vmem:[%s18507_s12 + $0x78] sm:$0xff] %vm1904_vm2, %v11126_v50  ;;  %11157 = vst.msk [vmem:[%s18507_s12 + $0x70] sm:$0xff] %vm1904_vm2, %v11125_v36  ;;  %v11041_v32 = vsel %vm10998_vm11, %v11039_v43, %v11040_v29  ;;  %v10930_v33 = vadd.f32 %v18482_v21, %v10929_v26  ;;  %v11044_v1 = vrot.slane %v11781_v12, 1  ;;  %v10945_v44 = vadd.f32 %v11659_v27, %v18482_v21  ;;  %v11790_v27 = vld [vmem:[%s11934_s18 + $0x138] sm:$0xff]  ;;  %v11792_v36 = vld [vmem:[%s11934_s18 + $0x160] sm:$0x3] }
 0x595   : > { %v11127_v52 = vadd.f32 %v11041_v32, %v10920_v15  ;;  %v11048_v62 = vsel %vm10998_vm11, %v11045_v17, %v11047_v4  ;;  %v11050_v63 = vrot.slane %v11782_v60, 1  ;;  %11160 = vst.msk [vmem:[%s18507_s12 + $0x88] sm:$0xff] %vm1904_vm2, %v11128_v30  ;;  %v11052_v54 = vrot.slane %v11783_v8, 1  ;;  %v11794_v32 = vld [vmem:[%s11934_s18 + $0x170] sm:$0xff]  ;;  %v11795_v12 = vld [vmem:[%s11934_s18 + $0x178] sm:$0x3] }
 0x596   : > { %v11130_v57 = vadd.f32 %v11048_v62, %v10935_v53  ;;  %v11046_v48 = vsel %vm10998_vm11, %v11044_v1, %v11045_v17  ;;  %v10940_v55 = vadd.f32 %v18482_v21, %v10939_v0  ;;  %v11049_v24 = vrot.slane %v11784_v23, 1  ;;  %v11799_v23 = vld [vmem:[%s11934_s18 + $0x180] sm:$0xff] }
 0x597   : > { %11159 = vst.msk [vmem:[%s18507_s12 + $0x80] sm:$0xff] %vm1904_vm2, %v11127_v52  ;;  %v11129_v31 = vadd.f32 %v11046_v48, %v10930_v33  ;;  %v11053_v6 = vsel %vm10998_vm11, %v11050_v63, %v11052_v54  ;;  %v11055_v56 = vrot.slane %v11785_v34, 1  ;;  %v11057_v38 = vrot.slane %v11786_v51, 1  ;;  %v11796_v52 = vld [vmem:[%s11934_s18 + $0x168] sm:$0xff]  ;;  %v11798_v48 = vld [vmem:[%s11934_s18 + $0x190] sm:$0x3] }
 0x598   : > { %11162 = vst.msk [vmem:[%s18507_s12 + $0x98] sm:$0xff] %vm1904_vm2, %v11130_v57  ;;  %v11132_v13 = vadd.f32 %v11053_v6, %v10945_v44  ;;  %v11051_v14 = vsel %vm10998_vm11, %v11049_v24, %v11050_v63  ;;  %v11054_v26 = vrot.slane %v11787_v28, 1  ;;  %v11060_v7 = vrot.slane %v11788_v5, 1  ;;  %v11797_v63 = vld [vmem:[%s11934_s18 + $0x188] sm:$0xff] }
 0x599   : > { %11161 = vst.msk [vmem:[%s18507_s12 + $0x90] sm:$0xff] %vm1904_vm2, %v11129_v31  ;;  %v11131_v9 = vadd.f32 %v11051_v14, %v10940_v55  ;;  %v11058_v47 = vsel %vm10998_vm11, %v11055_v56, %v11057_v38  ;;  %v11062_v45 = vrot.slane %v11789_v61, 1  ;;  %v11059_v35 = vrot.slane %v11790_v27, 1 }
 0x59a   : > { %11164 = vst.msk [vmem:[%s18507_s12 + $0xa8] sm:$0xff] %vm1904_vm2, %v11132_v13  ;;  %v11056_v41 = vsel %vm10998_vm11, %v11054_v26, %v11055_v56  ;;  %v11065_v50 = vrot.slane %v11791_v2, 1  ;;  %v11067_v15 = vrot.slane %v11792_v36, 1  ;;  %v11064_v43 = vrot.slane %v11793_v22, 1 }
 0x59b   : > { %11163 = vst.msk [vmem:[%s18507_s12 + $0xa0] sm:$0xff] %vm1904_vm2, %v11131_v9  ;;  %v11063_v49 = vsel %vm10998_vm11, %v11060_v7, %v11062_v45  ;;  %v11061_v59 = vsel %vm10998_vm11, %v11059_v35, %v11060_v7  ;;  %v11070_v33 = vrot.slane %v11794_v32, 1  ;;  %v11072_v1 = vrot.slane %v11795_v12, 1 }
 0x59c   : > { %v11068_v53 = vsel %vm10998_vm11, %v11065_v50, %v11067_v15  ;;  %v11066_v19 = vsel %vm10998_vm11, %v11064_v43, %v11065_v50  ;;  %v11069_v62 = vrot.slane %v11796_v52, 1  ;;  %v11075_v57 = vrot.slane %v11797_v63, 1 }
 0x59d   : > { %v11073_v60 = vsel %vm10998_vm11, %v11070_v33, %v11072_v1  ;;  %v11077_v8 = vrot.slane %v11798_v48, 1  ;;  %v11074_v24 = vrot.slane %v11799_v23, 1 }
 0x59e   : > { %v11071_v31 = vsel %vm10998_vm11, %v11069_v62, %v11070_v33 }
 0x59f   : > { %v11078_v9 = vsel %vm10998_vm11, %v11075_v57, %v11077_v8  ;;  %v11076_v38 = vsel %vm10998_vm11, %v11074_v24, %v11075_v57 }
 0x5a2   : > { %v11662_v25 = vpop.f32.mrf.mxu1 }
 0x5a3   : > { %v10955_v11 = vadd.f32 %v11662_v25, %v18482_v21 }
 0x5a4   : > { %v10949_v37 = vpop.f32.mrf.mxu1 }
 0x5a5   : > { %v11134_v16 = vadd.f32 %v11058_v47, %v10955_v11  ;;  %v10950_v42 = vadd.f32 %v18482_v21, %v10949_v37 }
 0x5a7   : > { %11166 = vst.msk [vmem:[%s18507_s12 + $0xb8] sm:$0xff] %vm1904_vm2, %v11134_v16  ;;  %v11133_v58 = vadd.f32 %v11056_v41, %v10950_v42 }
 0x5a9   : > { %11165 = vst.msk [vmem:[%s18507_s12 + $0xb0] sm:$0xff] %vm1904_vm2, %v11133_v58 }
 0x5dc   : > { %v11665_v40 = vpop.f32.mrf.mxu1 }
 0x5dd   : > { %v10965_v39 = vadd.f32 %v11665_v40, %v18482_v21 }
 0x5de   : > { %v10959_v29 = vpop.f32.mrf.mxu1 }
 0x5df   : > { %v11136_v10 = vadd.f32 %v11063_v49, %v10965_v39  ;;  %v10960_v46 = vadd.f32 %v18482_v21, %v10959_v29 }
 0x5e1   : > { %11168 = vst.msk [vmem:[%s18507_s12 + $0xc8] sm:$0xff] %vm1904_vm2, %v11136_v10  ;;  %v11135_v20 = vadd.f32 %v11061_v59, %v10960_v46 }
 0x5e3   : > { %11167 = vst.msk [vmem:[%s18507_s12 + $0xc0] sm:$0xff] %vm1904_vm2, %v11135_v20 }
 0x615   : > { %v11668_v3 = vpop.f32.mrf.mxu1 }
 0x616   : > { %v10975_v18 = vadd.f32 %v11668_v3, %v18482_v21 }
 0x617   : > { %v10969_v17 = vpop.f32.mrf.mxu1 }
 0x618   : > { %v11138_v4 = vadd.f32 %v11068_v53, %v10975_v18  ;;  %v10970_v0 = vadd.f32 %v18482_v21, %v10969_v17 }
 0x61a   : > { %11170 = vst.msk [vmem:[%s18507_s12 + $0xd8] sm:$0xff] %vm1904_vm2, %v11138_v4  ;;  %v11137_v30 = vadd.f32 %v11066_v19, %v10970_v0 }
 0x61c   : > { %11169 = vst.msk [vmem:[%s18507_s12 + $0xd0] sm:$0xff] %vm1904_vm2, %v11137_v30 }
 0x646   : > { %v11671_v44 = vpop.f32.mrf.mxu1 }
 0x647   : > { %v10985_v54 = vadd.f32 %v11671_v44, %v18482_v21 }
 0x648   : > { %v10979_v55 = vpop.f32.mrf.mxu1 }
 0x649   : > { %v11140_v6 = vadd.f32 %v11073_v60, %v10985_v54  ;;  %v10980_v13 = vadd.f32 %v18482_v21, %v10979_v55 }
 0x64a   : > { %v11674_v14 = vpop.f32.mrf.mxu1 }
 0x64b   : > { %11172 = vst.msk [vmem:[%s18507_s12 + $0xe8] sm:$0xff] %vm1904_vm2, %v11140_v6  ;;  %v11139_v34 = vadd.f32 %v11071_v31, %v10980_v13  ;;  %v10995_v56 = vadd.f32 %v11674_v14, %v18482_v21 }
 0x64c   : > { %v10989_v51 = vpop.f32.mrf.mxu1 }
 0x64d   : > { %11171 = vst.msk [vmem:[%s18507_s12 + $0xe0] sm:$0xff] %vm1904_vm2, %v11139_v34  ;;  %v11142_v28 = vadd.f32 %v11078_v9, %v10995_v56  ;;  %v10990_v26 = vadd.f32 %v18482_v21, %v10989_v51 }
 0x64f   : > { %11174 = vst.msk [vmem:[%s18507_s12 + $0xf8] sm:$0xff] %vm1904_vm2, %v11142_v28  ;;  %v11141_v25 = vadd.f32 %v11076_v38, %v10990_v26 }
 0x651   : > { %11173 = vst.msk [vmem:[%s18507_s12 + $0xf0] sm:$0xff] %vm1904_vm2, %v11141_v25 }
 0x652 PF: > { %s18_s29 = sadd.s32 1, %s11838_s29   ;;  %s21092_s27 = smov %s11834_s28 }
 0x653   : > { %p15_p5 = scmp.ge.s32.totalorder %s18_s29, 4   ;;  %s21093_s28 = smov %s21095_s30 }
 0x655   :  { %17 = sbr.rel (!%p15_p5) target bundleno = 2 (0x2), region = 85 }

</bundles_post_ra>
